<compile_context>
chip_gen: v6e
topology: v6e:2x2x1
jax: 0.10.0
libtpu: 0.0.40
codegen_flags: <defaults>
</compile_context>

<pallas_src>
import math
from functools import partial

import jax
import jax.numpy as jnp
from jax import lax
from jax.experimental import pallas as pl
from jax.experimental.pallas import tpu as pltpu


# -----------------------------------------------------------------------------
# Single fused kernel: full decoder stack for one batch element per grid step.
# -----------------------------------------------------------------------------
def _decoder_kernel(num_layers, num_heads,
                    x_ref, iw_ref, enc_ref, mask_ref,
                    wkf_ref, bkf_ref, wvf_ref, bvf_ref,
                    wkl_ref, bkl_ref, wvl_ref, bvl_ref,
                    wq_ref, bq_ref, wo_ref, bo_ref,
                    out_ref, attn_ref,
                    ctx_ref):
    Lq, C = x_ref.shape[1], x_ref.shape[2]
    H = num_heads
    dh = C // H
    scale = 1.0 / math.sqrt(dh)
    NB = 2 * num_layers                  # former, latter, former, latter, ...
    cdt = wq_ref.dtype                   # bf16 compute dtype for MXU inputs

    x = x_ref[0]                         # (Lq, C)  f32 residual stream
    iw = iw_ref[0].astype(cdt)           # (Lq, C)
    enc = enc_ref[0].astype(cdt)         # (Lk, C)
    mask = mask_ref[...]                 # (Lq, Lq) additive (0 / -1e9), f32

    # --- Hoisted K/V projections (iw / enc invariant across layers) ----------
    # Four wide matmuls with N = num_layers*C instead of 2*NB matmuls with N=C.
    kf = jnp.dot(iw, wkf_ref[...], preferred_element_type=jnp.float32) + bkf_ref[...]
    vf = jnp.dot(iw, wvf_ref[...], preferred_element_type=jnp.float32) + bvf_ref[...]
    kl = jnp.dot(enc, wkl_ref[...], preferred_element_type=jnp.float32) + bkl_ref[...]
    vl = jnp.dot(enc, wvl_ref[...], preferred_element_type=jnp.float32) + bvl_ref[...]

    for blk in range(NB):                # static unroll: all weights VMEM-resident
        layer = blk // 2
        is_former = (blk % 2 == 0)
        is_last = (blk == NB - 1)

        if is_former:                    # masked self-attn: K/V from init_weight
            k = kf[:, layer * C:(layer + 1) * C]
            v = vf[:, layer * C:(layer + 1) * C]
        else:                            # cross-attn: K/V from encoder output
            k = kl[:, layer * C:(layer + 1) * C]
            v = vl[:, layer * C:(layer + 1) * C]

        # Fused Q projection (all heads at once; heads split in-register below).
        q = jnp.dot(x.astype(cdt), wq_ref[blk],
                    preferred_element_type=jnp.float32) + bq_ref[blk]

        for h in range(H):
            lo, hi = h * dh, (h + 1) * dh
            qh = q[:, lo:hi]                                    # (Lq, dh)
            kh = k[:, lo:hi]                                    # (Lkv, dh)
            vh = v[:, lo:hi]                                    # (Lkv, dh)

            # Q @ K^T without materializing a transposed value.
            s = lax.dot_general(qh, kh, (((1,), (1,)), ((), ())),
                                preferred_element_type=jnp.float32) * scale
            if is_former:
                s = s + mask                                    # masked attn only

            m = jnp.max(s, axis=-1, keepdims=True)
            p = jnp.exp(s - m)
            l = jnp.sum(p, axis=-1, keepdims=True)
            if is_last:
                a = p / l                                       # exact: user-visible output
                attn_ref[0, h] = a.astype(attn_ref.dtype)       # (Lq, Lk), final layout
            else:
                a = p * pl.reciprocal(l, approx=True)           # EUP slot, hidden block

            # Per-head context into a lane slice of one (Lq, C) VMEM slab.
            ctx_ref[:, lo:hi] = jnp.dot(a, vh, preferred_element_type=jnp.float32)

        # Single fused output projection (contraction depth C) + residual.
        x = x + jnp.dot(ctx_ref[...].astype(cdt), wo_ref[blk],
                        preferred_element_type=jnp.float32) + bo_ref[blk]

    out_ref[0] = x.astype(out_ref.dtype)


def _decoder_pallas(x_blc, iw_blc, enc_blc, mask, packed, num_heads, num_layers):
    """x_blc, iw_blc: (B, Lq, C); enc_blc: (B, Lk, C); mask: (Lq, Lq) additive."""
    B, Lq, C = x_blc.shape
    Lk = enc_blc.shape[1]
    H = num_heads
    NL = num_layers
    NB = 2 * NL

    out_shapes = (
        jax.ShapeDtypeStruct((B, Lq, C), jnp.float32),       # decoder output
        jax.ShapeDtypeStruct((B, H, Lq, Lk), jnp.float32),   # final cross-attn probs
    )

    def _const_index_map(rank):
        zeros = (0,) * rank

        def idx(b):
            return zeros
        return idx

    def call(weight_mode):
        def wspec(shape):
            # Grid-invariant operands (weights / mask): constant block index, and
            # single-buffered when supported (no point double-buffering them).
            if weight_mode is None:
                return pl.BlockSpec(shape, _const_index_map(len(shape)))
            return pl.BlockSpec(shape, _const_index_map(len(shape)),
                                pipeline_mode=weight_mode)

        grid_spec = pltpu.PrefetchScalarGridSpec(
            num_scalar_prefetch=0,
            grid=(B,),
            in_specs=[
                pl.BlockSpec((1, Lq, C), lambda b: (b, 0, 0)),       # x
                pl.BlockSpec((1, Lq, C), lambda b: (b, 0, 0)),       # init_weight
                pl.BlockSpec((1, Lk, C), lambda b: (b, 0, 0)),       # enc_output
                wspec((Lq, Lq)),                                      # additive mask
                wspec((C, NL * C)), wspec((1, NL * C)),               # wk_f, bk_f
                wspec((C, NL * C)), wspec((1, NL * C)),               # wv_f, bv_f
                wspec((C, NL * C)), wspec((1, NL * C)),               # wk_l, bk_l
                wspec((C, NL * C)), wspec((1, NL * C)),               # wv_l, bv_l
                wspec((NB, C, C)), wspec((NB, 1, C)),                 # wq, bq
                wspec((NB, C, C)), wspec((NB, 1, C)),                 # wo, bo
            ],
            out_specs=[
                pl.BlockSpec((1, Lq, C), lambda b: (b, 0, 0)),
                pl.BlockSpec((1, H, Lq, Lk), lambda b: (b, 0, 0, 0)),
            ],
            scratch_shapes=[pltpu.VMEM((Lq, C), jnp.float32)],        # ctx slab
        )
        return pl.pallas_call(
            partial(_decoder_kernel, num_layers, num_heads),
            out_shape=out_shapes,
            grid_spec=grid_spec,
            compiler_params=pltpu.CompilerParams(
                dimension_semantics=("parallel",),       # v7x: 2 TCs split the batch
                vmem_limit_bytes=32 << 20,               # explicit scoped-VMEM budget
            ),
        )(x_blc, iw_blc, enc_blc, mask,
          packed["wk_f"], packed["bk_f"], packed["wv_f"], packed["bv_f"],
          packed["wk_l"], packed["bk_l"], packed["wv_l"], packed["bv_l"],
          packed["wq"], packed["bq"], packed["wo"], packed["bo"])

    try:
        return call(pl.Buffered(1))
    except Exception:
        # TODO(synk): pipeline_mode=Buffered(1) not honored on this jax version;
        # fall back to default double-buffering (identical math, more VMEM).
        return call(None)


# -----------------------------------------------------------------------------
# Parameters (deterministic, PyTorch Conv1d-style uniform init), fused heads.
# -----------------------------------------------------------------------------
def _init_attn_params(key, C):
    bound = 1.0 / math.sqrt(C)
    ks = jax.random.split(key, 8)
    u = lambda k, shape: jax.random.uniform(k, shape, jnp.float32, -bound, bound)
    return {
        "wq": u(ks[0], (C, C)), "bq": u(ks[1], (1, C)),
        "wk": u(ks[2], (C, C)), "bk": u(ks[3], (1, C)),
        "wv": u(ks[4], (C, C)), "bv": u(ks[5], (1, C)),
        "wo": u(ks[6], (C, C)), "bo": u(ks[7], (1, C)),
    }


def init_decoder_params(key, C, H, num_layers):
    assert C % H == 0
    layers = []
    for i in range(num_layers):
        k_former, k_latter, key = jax.random.split(jax.random.fold_in(key, i), 3)
        layers.append({
            "former": _init_attn_params(k_former, C),
            "latter": _init_attn_params(k_latter, C),
        })
    return layers


def _pack_params(layers, weight_dtype=jnp.bfloat16):
    """Pack per-layer params for the kernel:
      * wq/bq/wo/bo stacked per block (order: l0.former, l0.latter, l1.former, ...)
      * K/V weights of all former (resp. latter) blocks concatenated along the
        output dim so K_all/V_all are computed once per kernel invocation.
      * Matmul weights stored in bf16 (MXU-native); biases kept f32."""
    blocks = []
    for layer in layers:
        blocks.append(layer["former"])
        blocks.append(layer["latter"])
    cat = lambda which, name: jnp.concatenate([l[which][name] for l in layers], axis=1)
    return {
        "wq": jnp.stack([b["wq"] for b in blocks]).astype(weight_dtype),
        "bq": jnp.stack([b["bq"] for b in blocks]),
        "wo": jnp.stack([b["wo"] for b in blocks]).astype(weight_dtype),
        "bo": jnp.stack([b["bo"] for b in blocks]),
        "wk_f": cat("former", "wk").astype(weight_dtype), "bk_f": cat("former", "bk"),
        "wv_f": cat("former", "wv").astype(weight_dtype), "bv_f": cat("former", "bv"),
        "wk_l": cat("latter", "wk").astype(weight_dtype), "bk_l": cat("latter", "bk"),
        "wv_l": cat("latter", "wv").astype(weight_dtype), "bv_l": cat("latter", "bv"),
    }


# -----------------------------------------------------------------------------
# Decoder forward (channels-first in / out, like the PyTorch module).
# -----------------------------------------------------------------------------
def decoder_forward(params, x, init_weight, enc_outputs, mask, num_heads):
    """x, init_weight: (B, C, Lq); enc_outputs: (B, C, Lk); mask: (Lq, Lq) additive.
    Returns (out (B, C, Lq), attention (B, H, Lq, Lk))."""
    num_layers = len(params)

    # TODO(synk): at production L/C fold these transposes into the kernel; kept
    # in XLA here because in-kernel transposes of non-(8,128)-aligned toy tiles
    # have fragile Mosaic lowering.
    x_t = jnp.transpose(x, (0, 2, 1))                    # (B, Lq, C)
    iw_t = jnp.transpose(init_weight, (0, 2, 1))         # (B, Lq, C)
    enc_t = jnp.transpose(enc_outputs, (0, 2, 1))        # (B, Lk, C)

    packed = _pack_params(params)
    out_t, attn = _decoder_pallas(x_t, iw_t, enc_t, mask, packed,
                                  num_heads, num_layers)

    out = jnp.transpose(out_t, (0, 2, 1))                # (B, C, Lq)
    return out, attn                                     # attn already (B, H, Lq, Lk)


# -----------------------------------------------------------------------------
# Pure-JAX reference (same math, incl. bf16 weights at dot inputs).
# -----------------------------------------------------------------------------
def _reference_forward(params, x, init_weight, enc_outputs, mask, H):
    f32, bf16 = jnp.float32, jnp.bfloat16

    def proj(a, w, b):
        return jnp.dot(a.astype(bf16), w.astype(bf16),
                       preferred_element_type=f32) + b

    def attn_block(xq, kv, p, add_mask):
        B, Lq, C = xq.shape
        Lk = kv.shape[1]
        dh = C // H
        q = proj(xq, p["wq"], p["bq"])
        k = proj(kv, p["wk"], p["bk"])
        v = proj(kv, p["wv"], p["bv"])
        qh = q.reshape(B, Lq, H, dh).transpose(0, 2, 1, 3)
        kh = k.reshape(B, Lk, H, dh).transpose(0, 2, 1, 3)
        vh = v.reshape(B, Lk, H, dh).transpose(0, 2, 1, 3)
        s = jnp.einsum("bhqd,bhkd->bhqk", qh, kh) / math.sqrt(dh)
        if add_mask is not None:
            s = s + add_mask
        a = jax.nn.softmax(s, axis=-1)
        ctx = jnp.einsum("bhqk,bhkd->bhqd", a, vh)
        ctx = ctx.transpose(0, 2, 1, 3).reshape(B, Lq, C)
        return proj(ctx, p["wo"], p["bo"]) + xq, a

    x_t = x.transpose(0, 2, 1)
    iw_t = init_weight.transpose(0, 2, 1)
    enc_t = enc_outputs.transpose(0, 2, 1)
    attn = None
    for layer in params:
        x_t, _ = attn_block(x_t, iw_t, layer["former"], mask)
        x_t, attn = attn_block(x_t, enc_t, layer["latter"], None)
    return x_t.transpose(0, 2, 1), attn


if __name__ == "__main__":
    B, C, H, Lq, Lk, num_layers = 2, 32, 4, 8, 8, 2

    key = jax.random.PRNGKey(0)
    k_x, k_w, k_e, k_p = jax.random.split(key, 4)

    x = jax.random.normal(k_x, (B, C, Lq), jnp.float32)            # decoder input (NCL)
    init_weight = jax.random.normal(k_w, (B, C, Lq), jnp.float32)
    enc_outputs = jax.random.normal(k_e, (B, C, Lk), jnp.float32)

    # causal additive mask for the former (masked) attention
    causal = jnp.where(
        jnp.tril(jnp.ones((Lq, Lq), jnp.bool_)), 0.0, -1e9).astype(jnp.float32)

    params = init_decoder_params(k_p, C, H, num_layers)

    out, attn = decoder_forward(params, x, init_weight, enc_outputs, causal, H)
    jax.block_until_ready((out, attn))

    assert out.shape == (B, C, Lq) and attn.shape == (B, H, Lq, Lk)
    assert bool(jnp.all(jnp.isfinite(out))) and bool(jnp.all(jnp.isfinite(attn)))
    # Returned attention is exactly normalized (exact reciprocal on final block).
    assert bool(jnp.allclose(jnp.sum(attn, axis=-1), 1.0, atol=1e-3))

    # numerical check vs. pure-JAX reference (approx reciprocal only on hidden blocks)
    ref_out, ref_attn = _reference_forward(params, x, init_weight, enc_outputs, causal, H)
    assert bool(jnp.allclose(out, ref_out, rtol=5e-2, atol=5e-2))
    assert bool(jnp.allclose(attn, ref_attn, rtol=2e-2, atol=2e-2))

    print("KERNEL_OK")
</pallas_src>

<mosaic_0001>
module attributes {stable_mosaic.version = 11 : i64} {
  func.func @_decoder_kernel(%arg0: i32, %arg1: memref<1x8x32xf32, #tpu.memory_space<vmem>>, %arg2: memref<1x8x32xf32, #tpu.memory_space<vmem>>, %arg3: memref<1x8x32xf32, #tpu.memory_space<vmem>>, %arg4: memref<8x8xf32, #tpu.memory_space<vmem>>, %arg5: memref<32x64xbf16, #tpu.memory_space<vmem>>, %arg6: memref<1x64xf32, #tpu.memory_space<vmem>>, %arg7: memref<32x64xbf16, #tpu.memory_space<vmem>>, %arg8: memref<1x64xf32, #tpu.memory_space<vmem>>, %arg9: memref<32x64xbf16, #tpu.memory_space<vmem>>, %arg10: memref<1x64xf32, #tpu.memory_space<vmem>>, %arg11: memref<32x64xbf16, #tpu.memory_space<vmem>>, %arg12: memref<1x64xf32, #tpu.memory_space<vmem>>, %arg13: memref<4x32x32xbf16, #tpu.memory_space<vmem>>, %arg14: memref<4x1x32xf32, #tpu.memory_space<vmem>>, %arg15: memref<4x32x32xbf16, #tpu.memory_space<vmem>>, %arg16: memref<4x1x32xf32, #tpu.memory_space<vmem>>, %arg17: memref<1x8x32xf32, #tpu.memory_space<vmem>>, %arg18: memref<1x4x8x8xf32, #tpu.memory_space<vmem>>, %arg19: memref<8x32xf32, #tpu.memory_space<vmem>>) attributes {dimension_semantics = [#tpu.dimension_semantics<parallel>], iteration_bounds = array<i64: 2>, scalar_prefetch = 0 : i64, scratch_operands = 1 : i64, tpu.core_type = #tpu.core_type<tc>, window_params = [{transform_indices = @transform_0, window_bounds = array<i64: 1, 8, 32>}, {transform_indices = @transform_1, window_bounds = array<i64: 1, 8, 32>}, {transform_indices = @transform_2, window_bounds = array<i64: 1, 8, 32>}, {pipeline_mode = #tpu.pipeline_mode<synchronous>, transform_indices = @transform_3, window_bounds = array<i64: 8, 8>}, {pipeline_mode = #tpu.pipeline_mode<synchronous>, transform_indices = @transform_4, window_bounds = array<i64: 32, 64>}, {pipeline_mode = #tpu.pipeline_mode<synchronous>, transform_indices = @transform_5, window_bounds = array<i64: 1, 64>}, {pipeline_mode = #tpu.pipeline_mode<synchronous>, transform_indices = @transform_6, window_bounds = array<i64: 32, 64>}, {pipeline_mode = #tpu.pipeline_mode<synchronous>, transform_indices = @transform_7, window_bounds = array<i64: 1, 64>}, {pipeline_mode = #tpu.pipeline_mode<synchronous>, transform_indices = @transform_8, window_bounds = array<i64: 32, 64>}, {pipeline_mode = #tpu.pipeline_mode<synchronous>, transform_indices = @transform_9, window_bounds = array<i64: 1, 64>}, {pipeline_mode = #tpu.pipeline_mode<synchronous>, transform_indices = @transform_10, window_bounds = array<i64: 32, 64>}, {pipeline_mode = #tpu.pipeline_mode<synchronous>, transform_indices = @transform_11, window_bounds = array<i64: 1, 64>}, {pipeline_mode = #tpu.pipeline_mode<synchronous>, transform_indices = @transform_12, window_bounds = array<i64: 4, 32, 32>}, {pipeline_mode = #tpu.pipeline_mode<synchronous>, transform_indices = @transform_13, window_bounds = array<i64: 4, 1, 32>}, {pipeline_mode = #tpu.pipeline_mode<synchronous>, transform_indices = @transform_14, window_bounds = array<i64: 4, 32, 32>}, {pipeline_mode = #tpu.pipeline_mode<synchronous>, transform_indices = @transform_15, window_bounds = array<i64: 4, 1, 32>}, {transform_indices = @transform_16, window_bounds = array<i64: 1, 8, 32>}, {transform_indices = @transform_17, window_bounds = array<i64: 1, 4, 8, 8>}]} {
    %c0 = arith.constant 0 : index
    %c0_0 = arith.constant 0 : index
    %c0_1 = arith.constant 0 : index
    %0 = vector.load %arg1[%c0, %c0_0, %c0_1] : memref<1x8x32xf32, #tpu.memory_space<vmem>>, vector<1x8x32xf32>
    %1 = vector.shape_cast %0 : vector<1x8x32xf32> to vector<8x32xf32>
    %c0_2 = arith.constant 0 : index
    %c0_3 = arith.constant 0 : index
    %c0_4 = arith.constant 0 : index
    %2 = vector.load %arg2[%c0_2, %c0_3, %c0_4] : memref<1x8x32xf32, #tpu.memory_space<vmem>>, vector<1x8x32xf32>
    %3 = vector.shape_cast %2 : vector<1x8x32xf32> to vector<8x32xf32>
    %4 = arith.truncf %3 : vector<8x32xf32> to vector<8x32xbf16>
    %c0_5 = arith.constant 0 : index
    %c0_6 = arith.constant 0 : index
    %c0_7 = arith.constant 0 : index
    %5 = vector.load %arg3[%c0_5, %c0_6, %c0_7] : memref<1x8x32xf32, #tpu.memory_space<vmem>>, vector<1x8x32xf32>
    %6 = vector.shape_cast %5 : vector<1x8x32xf32> to vector<8x32xf32>
    %7 = arith.truncf %6 : vector<8x32xf32> to vector<8x32xbf16>
    %c0_8 = arith.constant 0 : index
    %c0_9 = arith.constant 0 : index
    %8 = vector.load %arg4[%c0_8, %c0_9] : memref<8x8xf32, #tpu.memory_space<vmem>>, vector<8x8xf32>
    %c0_10 = arith.constant 0 : index
    %c0_11 = arith.constant 0 : index
    %9 = vector.load %arg5[%c0_10, %c0_11] : memref<32x64xbf16, #tpu.memory_space<vmem>>, vector<32x64xbf16>
    %cst = arith.constant dense<0.000000e+00> : vector<8x64xf32>
    %10 = tpu.matmul %4, %9, %cst {dimension_numbers = #tpu.dot_dimension_numbers<[1], [0], [0], [1], [0, 0, 1, 1], [], []>} : vector<8x32xbf16>, vector<32x64xbf16>, vector<8x64xf32> -> vector<8x64xf32>
    %c0_12 = arith.constant 0 : index
    %c0_13 = arith.constant 0 : index
    %11 = vector.load %arg6[%c0_12, %c0_13] : memref<1x64xf32, #tpu.memory_space<vmem>>, vector<1x64xf32>
    %12 = vector.broadcast %11 : vector<1x64xf32> to vector<8x64xf32>
    %13 = arith.addf %10, %12 : vector<8x64xf32>
    %c0_14 = arith.constant 0 : index
    %c0_15 = arith.constant 0 : index
    %14 = vector.load %arg7[%c0_14, %c0_15] : memref<32x64xbf16, #tpu.memory_space<vmem>>, vector<32x64xbf16>
    %cst_16 = arith.constant dense<0.000000e+00> : vector<8x64xf32>
    %15 = tpu.matmul %4, %14, %cst_16 {dimension_numbers = #tpu.dot_dimension_numbers<[1], [0], [0], [1], [0, 0, 1, 1], [], []>} : vector<8x32xbf16>, vector<32x64xbf16>, vector<8x64xf32> -> vector<8x64xf32>
    %c0_17 = arith.constant 0 : index
    %c0_18 = arith.constant 0 : index
    %16 = vector.load %arg8[%c0_17, %c0_18] : memref<1x64xf32, #tpu.memory_space<vmem>>, vector<1x64xf32>
    %17 = vector.broadcast %16 : vector<1x64xf32> to vector<8x64xf32>
    %18 = arith.addf %15, %17 : vector<8x64xf32>
    %c0_19 = arith.constant 0 : index
    %c0_20 = arith.constant 0 : index
    %19 = vector.load %arg9[%c0_19, %c0_20] : memref<32x64xbf16, #tpu.memory_space<vmem>>, vector<32x64xbf16>
    %cst_21 = arith.constant dense<0.000000e+00> : vector<8x64xf32>
    %20 = tpu.matmul %7, %19, %cst_21 {dimension_numbers = #tpu.dot_dimension_numbers<[1], [0], [0], [1], [0, 0, 1, 1], [], []>} : vector<8x32xbf16>, vector<32x64xbf16>, vector<8x64xf32> -> vector<8x64xf32>
    %c0_22 = arith.constant 0 : index
    %c0_23 = arith.constant 0 : index
    %21 = vector.load %arg10[%c0_22, %c0_23] : memref<1x64xf32, #tpu.memory_space<vmem>>, vector<1x64xf32>
    %22 = vector.broadcast %21 : vector<1x64xf32> to vector<8x64xf32>
    %23 = arith.addf %20, %22 : vector<8x64xf32>
    %c0_24 = arith.constant 0 : index
    %c0_25 = arith.constant 0 : index
    %24 = vector.load %arg11[%c0_24, %c0_25] : memref<32x64xbf16, #tpu.memory_space<vmem>>, vector<32x64xbf16>
    %cst_26 = arith.constant dense<0.000000e+00> : vector<8x64xf32>
    %25 = tpu.matmul %7, %24, %cst_26 {dimension_numbers = #tpu.dot_dimension_numbers<[1], [0], [0], [1], [0, 0, 1, 1], [], []>} : vector<8x32xbf16>, vector<32x64xbf16>, vector<8x64xf32> -> vector<8x64xf32>
    %c0_27 = arith.constant 0 : index
    %c0_28 = arith.constant 0 : index
    %26 = vector.load %arg12[%c0_27, %c0_28] : memref<1x64xf32, #tpu.memory_space<vmem>>, vector<1x64xf32>
    %27 = vector.broadcast %26 : vector<1x64xf32> to vector<8x64xf32>
    %28 = arith.addf %25, %27 : vector<8x64xf32>
    %29 = vector.extract_strided_slice %13 {offsets = [0, 0], sizes = [8, 32], strides = [1, 1]} : vector<8x64xf32> to vector<8x32xf32>
    %30 = vector.extract_strided_slice %18 {offsets = [0, 0], sizes = [8, 32], strides = [1, 1]} : vector<8x64xf32> to vector<8x32xf32>
    %31 = arith.truncf %1 : vector<8x32xf32> to vector<8x32xbf16>
    %c0_29 = arith.constant 0 : index
    %c0_30 = arith.constant 0 : index
    %c0_31 = arith.constant 0 : index
    %32 = vector.load %arg13[%c0_29, %c0_30, %c0_31] : memref<4x32x32xbf16, #tpu.memory_space<vmem>>, vector<1x32x32xbf16>
    %33 = vector.shape_cast %32 : vector<1x32x32xbf16> to vector<32x32xbf16>
    %cst_32 = arith.constant dense<0.000000e+00> : vector<8x32xf32>
    %34 = tpu.matmul %31, %33, %cst_32 {dimension_numbers = #tpu.dot_dimension_numbers<[1], [0], [0], [1], [0, 0, 1, 1], [], []>} : vector<8x32xbf16>, vector<32x32xbf16>, vector<8x32xf32> -> vector<8x32xf32>
    %c0_33 = arith.constant 0 : index
    %c0_34 = arith.constant 0 : index
    %c0_35 = arith.constant 0 : index
    %35 = vector.load %arg14[%c0_33, %c0_34, %c0_35] : memref<4x1x32xf32, #tpu.memory_space<vmem>>, vector<1x1x32xf32>
    %36 = vector.shape_cast %35 : vector<1x1x32xf32> to vector<1x32xf32>
    %37 = vector.broadcast %36 : vector<1x32xf32> to vector<8x32xf32>
    %38 = arith.addf %34, %37 : vector<8x32xf32>
    %39 = vector.extract_strided_slice %38 {offsets = [0, 0], sizes = [8, 8], strides = [1, 1]} : vector<8x32xf32> to vector<8x8xf32>
    %40 = vector.extract_strided_slice %29 {offsets = [0, 0], sizes = [8, 8], strides = [1, 1]} : vector<8x32xf32> to vector<8x8xf32>
    %41 = vector.extract_strided_slice %30 {offsets = [0, 0], sizes = [8, 8], strides = [1, 1]} : vector<8x32xf32> to vector<8x8xf32>
    %cst_36 = arith.constant dense<0.000000e+00> : vector<8x8xf32>
    %42 = tpu.matmul %39, %40, %cst_36 {dimension_numbers = #tpu.dot_dimension_numbers<[1], [1], [0], [0], [0, 0, 1, 0], [], []>} : vector<8x8xf32>, vector<8x8xf32>, vector<8x8xf32> -> vector<8x8xf32>
    %cst_37 = arith.constant 0.353553385 : f32
    %43 = vector.broadcast %cst_37 : f32 to vector<8x8xf32>
    %44 = arith.mulf %42, %43 : vector<8x8xf32>
    %45 = arith.addf %44, %8 : vector<8x8xf32>
    %cst_38 = arith.constant dense<0xFF800000> : vector<8xf32>
    %46 = vector.multi_reduction <maximumf>, %45, %cst_38 [1] : vector<8x8xf32> to vector<8xf32>
    %47 = vector.shape_cast %46 : vector<8xf32> to vector<8x1xf32>
    %48 = vector.broadcast %47 : vector<8x1xf32> to vector<8x8xf32>
    %49 = arith.subf %45, %48 : vector<8x8xf32>
    %50 = math.exp %49 : vector<8x8xf32>
    %cst_39 = arith.constant dense<0.000000e+00> : vector<8xf32>
    %51 = vector.multi_reduction <add>, %50, %cst_39 [1] : vector<8x8xf32> to vector<8xf32>
    %52 = vector.shape_cast %51 : vector<8xf32> to vector<8x1xf32>
    %53 = tpu.reciprocal %52 {approx = true} : vector<8x1xf32> -> vector<8x1xf32>
    %54 = vector.broadcast %53 : vector<8x1xf32> to vector<8x8xf32>
    %55 = arith.mulf %50, %54 : vector<8x8xf32>
    %cst_40 = arith.constant dense<0.000000e+00> : vector<8x8xf32>
    %56 = tpu.matmul %55, %41, %cst_40 {dimension_numbers = #tpu.dot_dimension_numbers<[1], [0], [0], [1], [0, 0, 1, 1], [], []>} : vector<8x8xf32>, vector<8x8xf32>, vector<8x8xf32> -> vector<8x8xf32>
    %c0_41 = arith.constant 0 : index
    %c0_42 = arith.constant 0 : index
    %57 = vector.load %arg19[%c0_41, %c0_42] : memref<8x32xf32, #tpu.memory_space<vmem>>, vector<8x8xf32>
    tpu.vector_store %arg19[%c0_41, %c0_42], %56 {strides = array<i32>} : memref<8x32xf32, #tpu.memory_space<vmem>>, vector<8x8xf32>,
    %58 = vector.extract_strided_slice %38 {offsets = [0, 8], sizes = [8, 8], strides = [1, 1]} : vector<8x32xf32> to vector<8x8xf32>
    %59 = vector.extract_strided_slice %29 {offsets = [0, 8], sizes = [8, 8], strides = [1, 1]} : vector<8x32xf32> to vector<8x8xf32>
    %60 = vector.extract_strided_slice %30 {offsets = [0, 8], sizes = [8, 8], strides = [1, 1]} : vector<8x32xf32> to vector<8x8xf32>
    %cst_43 = arith.constant dense<0.000000e+00> : vector<8x8xf32>
    %61 = tpu.matmul %58, %59, %cst_43 {dimension_numbers = #tpu.dot_dimension_numbers<[1], [1], [0], [0], [0, 0, 1, 0], [], []>} : vector<8x8xf32>, vector<8x8xf32>, vector<8x8xf32> -> vector<8x8xf32>
    %cst_44 = arith.constant 0.353553385 : f32
    %62 = vector.broadcast %cst_44 : f32 to vector<8x8xf32>
    %63 = arith.mulf %61, %62 : vector<8x8xf32>
    %64 = arith.addf %63, %8 : vector<8x8xf32>
    %cst_45 = arith.constant dense<0xFF800000> : vector<8xf32>
    %65 = vector.multi_reduction <maximumf>, %64, %cst_45 [1] : vector<8x8xf32> to vector<8xf32>
    %66 = vector.shape_cast %65 : vector<8xf32> to vector<8x1xf32>
    %67 = vector.broadcast %66 : vector<8x1xf32> to vector<8x8xf32>
    %68 = arith.subf %64, %67 : vector<8x8xf32>
    %69 = math.exp %68 : vector<8x8xf32>
    %cst_46 = arith.constant dense<0.000000e+00> : vector<8xf32>
    %70 = vector.multi_reduction <add>, %69, %cst_46 [1] : vector<8x8xf32> to vector<8xf32>
    %71 = vector.shape_cast %70 : vector<8xf32> to vector<8x1xf32>
    %72 = tpu.reciprocal %71 {approx = true} : vector<8x1xf32> -> vector<8x1xf32>
    %73 = vector.broadcast %72 : vector<8x1xf32> to vector<8x8xf32>
    %74 = arith.mulf %69, %73 : vector<8x8xf32>
    %cst_47 = arith.constant dense<0.000000e+00> : vector<8x8xf32>
    %75 = tpu.matmul %74, %60, %cst_47 {dimension_numbers = #tpu.dot_dimension_numbers<[1], [0], [0], [1], [0, 0, 1, 1], [], []>} : vector<8x8xf32>, vector<8x8xf32>, vector<8x8xf32> -> vector<8x8xf32>
    %c0_48 = arith.constant 0 : index
    %c8 = arith.constant 8 : index
    %76 = vector.load %arg19[%c0_48, %c8] : memref<8x32xf32, #tpu.memory_space<vmem>>, vector<8x8xf32>
    tpu.vector_store %arg19[%c0_48, %c8], %75 {strides = array<i32>} : memref<8x32xf32, #tpu.memory_space<vmem>>, vector<8x8xf32>,
    %77 = vector.extract_strided_slice %38 {offsets = [0, 16], sizes = [8, 8], strides = [1, 1]} : vector<8x32xf32> to vector<8x8xf32>
    %78 = vector.extract_strided_slice %29 {offsets = [0, 16], sizes = [8, 8], strides = [1, 1]} : vector<8x32xf32> to vector<8x8xf32>
    %79 = vector.extract_strided_slice %30 {offsets = [0, 16], sizes = [8, 8], strides = [1, 1]} : vector<8x32xf32> to vector<8x8xf32>
    %cst_49 = arith.constant dense<0.000000e+00> : vector<8x8xf32>
    %80 = tpu.matmul %77, %78, %cst_49 {dimension_numbers = #tpu.dot_dimension_numbers<[1], [1], [0], [0], [0, 0, 1, 0], [], []>} : vector<8x8xf32>, vector<8x8xf32>, vector<8x8xf32> -> vector<8x8xf32>
    %cst_50 = arith.constant 0.353553385 : f32
    %81 = vector.broadcast %cst_50 : f32 to vector<8x8xf32>
    %82 = arith.mulf %80, %81 : vector<8x8xf32>
    %83 = arith.addf %82, %8 : vector<8x8xf32>
    %cst_51 = arith.constant dense<0xFF800000> : vector<8xf32>
    %84 = vector.multi_reduction <maximumf>, %83, %cst_51 [1] : vector<8x8xf32> to vector<8xf32>
    %85 = vector.shape_cast %84 : vector<8xf32> to vector<8x1xf32>
    %86 = vector.broadcast %85 : vector<8x1xf32> to vector<8x8xf32>
    %87 = arith.subf %83, %86 : vector<8x8xf32>
    %88 = math.exp %87 : vector<8x8xf32>
    %cst_52 = arith.constant dense<0.000000e+00> : vector<8xf32>
    %89 = vector.multi_reduction <add>, %88, %cst_52 [1] : vector<8x8xf32> to vector<8xf32>
    %90 = vector.shape_cast %89 : vector<8xf32> to vector<8x1xf32>
    %91 = tpu.reciprocal %90 {approx = true} : vector<8x1xf32> -> vector<8x1xf32>
    %92 = vector.broadcast %91 : vector<8x1xf32> to vector<8x8xf32>
    %93 = arith.mulf %88, %92 : vector<8x8xf32>
    %cst_53 = arith.constant dense<0.000000e+00> : vector<8x8xf32>
    %94 = tpu.matmul %93, %79, %cst_53 {dimension_numbers = #tpu.dot_dimension_numbers<[1], [0], [0], [1], [0, 0, 1, 1], [], []>} : vector<8x8xf32>, vector<8x8xf32>, vector<8x8xf32> -> vector<8x8xf32>
    %c0_54 = arith.constant 0 : index
    %c16 = arith.constant 16 : index
    %95 = vector.load %arg19[%c0_54, %c16] : memref<8x32xf32, #tpu.memory_space<vmem>>, vector<8x8xf32>
    tpu.vector_store %arg19[%c0_54, %c16], %94 {strides = array<i32>} : memref<8x32xf32, #tpu.memory_space<vmem>>, vector<8x8xf32>,
    %96 = vector.extract_strided_slice %38 {offsets = [0, 24], sizes = [8, 8], strides = [1, 1]} : vector<8x32xf32> to vector<8x8xf32>
    %97 = vector.extract_strided_slice %29 {offsets = [0, 24], sizes = [8, 8], strides = [1, 1]} : vector<8x32xf32> to vector<8x8xf32>
    %98 = vector.extract_strided_slice %30 {offsets = [0, 24], sizes = [8, 8], strides = [1, 1]} : vector<8x32xf32> to vector<8x8xf32>
    %cst_55 = arith.constant dense<0.000000e+00> : vector<8x8xf32>
    %99 = tpu.matmul %96, %97, %cst_55 {dimension_numbers = #tpu.dot_dimension_numbers<[1], [1], [0], [0], [0, 0, 1, 0], [], []>} : vector<8x8xf32>, vector<8x8xf32>, vector<8x8xf32> -> vector<8x8xf32>
    %cst_56 = arith.constant 0.353553385 : f32
    %100 = vector.broadcast %cst_56 : f32 to vector<8x8xf32>
    %101 = arith.mulf %99, %100 : vector<8x8xf32>
    %102 = arith.addf %101, %8 : vector<8x8xf32>
    %cst_57 = arith.constant dense<0xFF800000> : vector<8xf32>
    %103 = vector.multi_reduction <maximumf>, %102, %cst_57 [1] : vector<8x8xf32> to vector<8xf32>
    %104 = vector.shape_cast %103 : vector<8xf32> to vector<8x1xf32>
    %105 = vector.broadcast %104 : vector<8x1xf32> to vector<8x8xf32>
    %106 = arith.subf %102, %105 : vector<8x8xf32>
    %107 = math.exp %106 : vector<8x8xf32>
    %cst_58 = arith.constant dense<0.000000e+00> : vector<8xf32>
    %108 = vector.multi_reduction <add>, %107, %cst_58 [1] : vector<8x8xf32> to vector<8xf32>
    %109 = vector.shape_cast %108 : vector<8xf32> to vector<8x1xf32>
    %110 = tpu.reciprocal %109 {approx = true} : vector<8x1xf32> -> vector<8x1xf32>
    %111 = vector.broadcast %110 : vector<8x1xf32> to vector<8x8xf32>
    %112 = arith.mulf %107, %111 : vector<8x8xf32>
    %cst_59 = arith.constant dense<0.000000e+00> : vector<8x8xf32>
    %113 = tpu.matmul %112, %98, %cst_59 {dimension_numbers = #tpu.dot_dimension_numbers<[1], [0], [0], [1], [0, 0, 1, 1], [], []>} : vector<8x8xf32>, vector<8x8xf32>, vector<8x8xf32> -> vector<8x8xf32>
    %c0_60 = arith.constant 0 : index
    %c24 = arith.constant 24 : index
    %114 = vector.load %arg19[%c0_60, %c24] : memref<8x32xf32, #tpu.memory_space<vmem>>, vector<8x8xf32>
    tpu.vector_store %arg19[%c0_60, %c24], %113 {strides = array<i32>} : memref<8x32xf32, #tpu.memory_space<vmem>>, vector<8x8xf32>,
    %c0_61 = arith.constant 0 : index
    %c0_62 = arith.constant 0 : index
    %115 = vector.load %arg19[%c0_61, %c0_62] : memref<8x32xf32, #tpu.memory_space<vmem>>, vector<8x32xf32>
    %116 = arith.truncf %115 : vector<8x32xf32> to vector<8x32xbf16>
    %c0_63 = arith.constant 0 : index
    %c0_64 = arith.constant 0 : index
    %c0_65 = arith.constant 0 : index
    %117 = vector.load %arg15[%c0_63, %c0_64, %c0_65] : memref<4x32x32xbf16, #tpu.memory_space<vmem>>, vector<1x32x32xbf16>
    %118 = vector.shape_cast %117 : vector<1x32x32xbf16> to vector<32x32xbf16>
    %cst_66 = arith.constant dense<0.000000e+00> : vector<8x32xf32>
    %119 = tpu.matmul %116, %118, %cst_66 {dimension_numbers = #tpu.dot_dimension_numbers<[1], [0], [0], [1], [0, 0, 1, 1], [], []>} : vector<8x32xbf16>, vector<32x32xbf16>, vector<8x32xf32> -> vector<8x32xf32>
    %120 = arith.addf %1, %119 : vector<8x32xf32>
    %c0_67 = arith.constant 0 : index
    %c0_68 = arith.constant 0 : index
    %c0_69 = arith.constant 0 : index
    %121 = vector.load %arg16[%c0_67, %c0_68, %c0_69] : memref<4x1x32xf32, #tpu.memory_space<vmem>>, vector<1x1x32xf32>
    %122 = vector.shape_cast %121 : vector<1x1x32xf32> to vector<1x32xf32>
    %123 = vector.broadcast %122 : vector<1x32xf32> to vector<8x32xf32>
    %124 = arith.addf %120, %123 : vector<8x32xf32>
    %125 = vector.extract_strided_slice %23 {offsets = [0, 0], sizes = [8, 32], strides = [1, 1]} : vector<8x64xf32> to vector<8x32xf32>
    %126 = vector.extract_strided_slice %28 {offsets = [0, 0], sizes = [8, 32], strides = [1, 1]} : vector<8x64xf32> to vector<8x32xf32>
    %127 = arith.truncf %124 : vector<8x32xf32> to vector<8x32xbf16>
    %c1 = arith.constant 1 : index
    %c0_70 = arith.constant 0 : index
    %c0_71 = arith.constant 0 : index
    %128 = vector.load %arg13[%c1, %c0_70, %c0_71] : memref<4x32x32xbf16, #tpu.memory_space<vmem>>, vector<1x32x32xbf16>
    %129 = vector.shape_cast %128 : vector<1x32x32xbf16> to vector<32x32xbf16>
    %cst_72 = arith.constant dense<0.000000e+00> : vector<8x32xf32>
    %130 = tpu.matmul %127, %129, %cst_72 {dimension_numbers = #tpu.dot_dimension_numbers<[1], [0], [0], [1], [0, 0, 1, 1], [], []>} : vector<8x32xbf16>, vector<32x32xbf16>, vector<8x32xf32> -> vector<8x32xf32>
    %c1_73 = arith.constant 1 : index
    %c0_74 = arith.constant 0 : index
    %c0_75 = arith.constant 0 : index
    %131 = vector.load %arg14[%c1_73, %c0_74, %c0_75] : memref<4x1x32xf32, #tpu.memory_space<vmem>>, vector<1x1x32xf32>
    %132 = vector.shape_cast %131 : vector<1x1x32xf32> to vector<1x32xf32>
    %133 = vector.broadcast %132 : vector<1x32xf32> to vector<8x32xf32>
    %134 = arith.addf %130, %133 : vector<8x32xf32>
    %135 = vector.extract_strided_slice %134 {offsets = [0, 0], sizes = [8, 8], strides = [1, 1]} : vector<8x32xf32> to vector<8x8xf32>
    %136 = vector.extract_strided_slice %125 {offsets = [0, 0], sizes = [8, 8], strides = [1, 1]} : vector<8x32xf32> to vector<8x8xf32>
    %137 = vector.extract_strided_slice %126 {offsets = [0, 0], sizes = [8, 8], strides = [1, 1]} : vector<8x32xf32> to vector<8x8xf32>
    %cst_76 = arith.constant dense<0.000000e+00> : vector<8x8xf32>
    %138 = tpu.matmul %135, %136, %cst_76 {dimension_numbers = #tpu.dot_dimension_numbers<[1], [1], [0], [0], [0, 0, 1, 0], [], []>} : vector<8x8xf32>, vector<8x8xf32>, vector<8x8xf32> -> vector<8x8xf32>
    %cst_77 = arith.constant 0.353553385 : f32
    %139 = vector.broadcast %cst_77 : f32 to vector<8x8xf32>
    %140 = arith.mulf %138, %139 : vector<8x8xf32>
    %cst_78 = arith.constant dense<0xFF800000> : vector<8xf32>
    %141 = vector.multi_reduction <maximumf>, %140, %cst_78 [1] : vector<8x8xf32> to vector<8xf32>
    %142 = vector.shape_cast %141 : vector<8xf32> to vector<8x1xf32>
    %143 = vector.broadcast %142 : vector<8x1xf32> to vector<8x8xf32>
    %144 = arith.subf %140, %143 : vector<8x8xf32>
    %145 = math.exp %144 : vector<8x8xf32>
    %cst_79 = arith.constant dense<0.000000e+00> : vector<8xf32>
    %146 = vector.multi_reduction <add>, %145, %cst_79 [1] : vector<8x8xf32> to vector<8xf32>
    %147 = vector.shape_cast %146 : vector<8xf32> to vector<8x1xf32>
    %148 = tpu.reciprocal %147 {approx = true} : vector<8x1xf32> -> vector<8x1xf32>
    %149 = vector.broadcast %148 : vector<8x1xf32> to vector<8x8xf32>
    %150 = arith.mulf %145, %149 : vector<8x8xf32>
    %cst_80 = arith.constant dense<0.000000e+00> : vector<8x8xf32>
    %151 = tpu.matmul %150, %137, %cst_80 {dimension_numbers = #tpu.dot_dimension_numbers<[1], [0], [0], [1], [0, 0, 1, 1], [], []>} : vector<8x8xf32>, vector<8x8xf32>, vector<8x8xf32> -> vector<8x8xf32>
    %c0_81 = arith.constant 0 : index
    %c0_82 = arith.constant 0 : index
    %152 = vector.load %arg19[%c0_81, %c0_82] : memref<8x32xf32, #tpu.memory_space<vmem>>, vector<8x8xf32>
    tpu.vector_store %arg19[%c0_81, %c0_82], %151 {strides = array<i32>} : memref<8x32xf32, #tpu.memory_space<vmem>>, vector<8x8xf32>,
    %153 = vector.extract_strided_slice %134 {offsets = [0, 8], sizes = [8, 8], strides = [1, 1]} : vector<8x32xf32> to vector<8x8xf32>
    %154 = vector.extract_strided_slice %125 {offsets = [0, 8], sizes = [8, 8], strides = [1, 1]} : vector<8x32xf32> to vector<8x8xf32>
    %155 = vector.extract_strided_slice %126 {offsets = [0, 8], sizes = [8, 8], strides = [1, 1]} : vector<8x32xf32> to vector<8x8xf32>
    %cst_83 = arith.constant dense<0.000000e+00> : vector<8x8xf32>
    %156 = tpu.matmul %153, %154, %cst_83 {dimension_numbers = #tpu.dot_dimension_numbers<[1], [1], [0], [0], [0, 0, 1, 0], [], []>} : vector<8x8xf32>, vector<8x8xf32>, vector<8x8xf32> -> vector<8x8xf32>
    %cst_84 = arith.constant 0.353553385 : f32
    %157 = vector.broadcast %cst_84 : f32 to vector<8x8xf32>
    %158 = arith.mulf %156, %157 : vector<8x8xf32>
    %cst_85 = arith.constant dense<0xFF800000> : vector<8xf32>
    %159 = vector.multi_reduction <maximumf>, %158, %cst_85 [1] : vector<8x8xf32> to vector<8xf32>
    %160 = vector.shape_cast %159 : vector<8xf32> to vector<8x1xf32>
    %161 = vector.broadcast %160 : vector<8x1xf32> to vector<8x8xf32>
    %162 = arith.subf %158, %161 : vector<8x8xf32>
    %163 = math.exp %162 : vector<8x8xf32>
    %cst_86 = arith.constant dense<0.000000e+00> : vector<8xf32>
    %164 = vector.multi_reduction <add>, %163, %cst_86 [1] : vector<8x8xf32> to vector<8xf32>
    %165 = vector.shape_cast %164 : vector<8xf32> to vector<8x1xf32>
    %166 = tpu.reciprocal %165 {approx = true} : vector<8x1xf32> -> vector<8x1xf32>
    %167 = vector.broadcast %166 : vector<8x1xf32> to vector<8x8xf32>
    %168 = arith.mulf %163, %167 : vector<8x8xf32>
    %cst_87 = arith.constant dense<0.000000e+00> : vector<8x8xf32>
    %169 = tpu.matmul %168, %155, %cst_87 {dimension_numbers = #tpu.dot_dimension_numbers<[1], [0], [0], [1], [0, 0, 1, 1], [], []>} : vector<8x8xf32>, vector<8x8xf32>, vector<8x8xf32> -> vector<8x8xf32>
    %c0_88 = arith.constant 0 : index
    %c8_89 = arith.constant 8 : index
    %170 = vector.load %arg19[%c0_88, %c8_89] : memref<8x32xf32, #tpu.memory_space<vmem>>, vector<8x8xf32>
    tpu.vector_store %arg19[%c0_88, %c8_89], %169 {strides = array<i32>} : memref<8x32xf32, #tpu.memory_space<vmem>>, vector<8x8xf32>,
    %171 = vector.extract_strided_slice %134 {offsets = [0, 16], sizes = [8, 8], strides = [1, 1]} : vector<8x32xf32> to vector<8x8xf32>
    %172 = vector.extract_strided_slice %125 {offsets = [0, 16], sizes = [8, 8], strides = [1, 1]} : vector<8x32xf32> to vector<8x8xf32>
    %173 = vector.extract_strided_slice %126 {offsets = [0, 16], sizes = [8, 8], strides = [1, 1]} : vector<8x32xf32> to vector<8x8xf32>
    %cst_90 = arith.constant dense<0.000000e+00> : vector<8x8xf32>
    %174 = tpu.matmul %171, %172, %cst_90 {dimension_numbers = #tpu.dot_dimension_numbers<[1], [1], [0], [0], [0, 0, 1, 0], [], []>} : vector<8x8xf32>, vector<8x8xf32>, vector<8x8xf32> -> vector<8x8xf32>
    %cst_91 = arith.constant 0.353553385 : f32
    %175 = vector.broadcast %cst_91 : f32 to vector<8x8xf32>
    %176 = arith.mulf %174, %175 : vector<8x8xf32>
    %cst_92 = arith.constant dense<0xFF800000> : vector<8xf32>
    %177 = vector.multi_reduction <maximumf>, %176, %cst_92 [1] : vector<8x8xf32> to vector<8xf32>
    %178 = vector.shape_cast %177 : vector<8xf32> to vector<8x1xf32>
    %179 = vector.broadcast %178 : vector<8x1xf32> to vector<8x8xf32>
    %180 = arith.subf %176, %179 : vector<8x8xf32>
    %181 = math.exp %180 : vector<8x8xf32>
    %cst_93 = arith.constant dense<0.000000e+00> : vector<8xf32>
    %182 = vector.multi_reduction <add>, %181, %cst_93 [1] : vector<8x8xf32> to vector<8xf32>
    %183 = vector.shape_cast %182 : vector<8xf32> to vector<8x1xf32>
    %184 = tpu.reciprocal %183 {approx = true} : vector<8x1xf32> -> vector<8x1xf32>
    %185 = vector.broadcast %184 : vector<8x1xf32> to vector<8x8xf32>
    %186 = arith.mulf %181, %185 : vector<8x8xf32>
    %cst_94 = arith.constant dense<0.000000e+00> : vector<8x8xf32>
    %187 = tpu.matmul %186, %173, %cst_94 {dimension_numbers = #tpu.dot_dimension_numbers<[1], [0], [0], [1], [0, 0, 1, 1], [], []>} : vector<8x8xf32>, vector<8x8xf32>, vector<8x8xf32> -> vector<8x8xf32>
    %c0_95 = arith.constant 0 : index
    %c16_96 = arith.constant 16 : index
    %188 = vector.load %arg19[%c0_95, %c16_96] : memref<8x32xf32, #tpu.memory_space<vmem>>, vector<8x8xf32>
    tpu.vector_store %arg19[%c0_95, %c16_96], %187 {strides = array<i32>} : memref<8x32xf32, #tpu.memory_space<vmem>>, vector<8x8xf32>,
    %189 = vector.extract_strided_slice %134 {offsets = [0, 24], sizes = [8, 8], strides = [1, 1]} : vector<8x32xf32> to vector<8x8xf32>
    %190 = vector.extract_strided_slice %125 {offsets = [0, 24], sizes = [8, 8], strides = [1, 1]} : vector<8x32xf32> to vector<8x8xf32>
    %191 = vector.extract_strided_slice %126 {offsets = [0, 24], sizes = [8, 8], strides = [1, 1]} : vector<8x32xf32> to vector<8x8xf32>
    %cst_97 = arith.constant dense<0.000000e+00> : vector<8x8xf32>
    %192 = tpu.matmul %189, %190, %cst_97 {dimension_numbers = #tpu.dot_dimension_numbers<[1], [1], [0], [0], [0, 0, 1, 0], [], []>} : vector<8x8xf32>, vector<8x8xf32>, vector<8x8xf32> -> vector<8x8xf32>
    %cst_98 = arith.constant 0.353553385 : f32
    %193 = vector.broadcast %cst_98 : f32 to vector<8x8xf32>
    %194 = arith.mulf %192, %193 : vector<8x8xf32>
    %cst_99 = arith.constant dense<0xFF800000> : vector<8xf32>
    %195 = vector.multi_reduction <maximumf>, %194, %cst_99 [1] : vector<8x8xf32> to vector<8xf32>
    %196 = vector.shape_cast %195 : vector<8xf32> to vector<8x1xf32>
    %197 = vector.broadcast %196 : vector<8x1xf32> to vector<8x8xf32>
    %198 = arith.subf %194, %197 : vector<8x8xf32>
    %199 = math.exp %198 : vector<8x8xf32>
    %cst_100 = arith.constant dense<0.000000e+00> : vector<8xf32>
    %200 = vector.multi_reduction <add>, %199, %cst_100 [1] : vector<8x8xf32> to vector<8xf32>
    %201 = vector.shape_cast %200 : vector<8xf32> to vector<8x1xf32>
    %202 = tpu.reciprocal %201 {approx = true} : vector<8x1xf32> -> vector<8x1xf32>
    %203 = vector.broadcast %202 : vector<8x1xf32> to vector<8x8xf32>
    %204 = arith.mulf %199, %203 : vector<8x8xf32>
    %cst_101 = arith.constant dense<0.000000e+00> : vector<8x8xf32>
    %205 = tpu.matmul %204, %191, %cst_101 {dimension_numbers = #tpu.dot_dimension_numbers<[1], [0], [0], [1], [0, 0, 1, 1], [], []>} : vector<8x8xf32>, vector<8x8xf32>, vector<8x8xf32> -> vector<8x8xf32>
    %c0_102 = arith.constant 0 : index
    %c24_103 = arith.constant 24 : index
    %206 = vector.load %arg19[%c0_102, %c24_103] : memref<8x32xf32, #tpu.memory_space<vmem>>, vector<8x8xf32>
    tpu.vector_store %arg19[%c0_102, %c24_103], %205 {strides = array<i32>} : memref<8x32xf32, #tpu.memory_space<vmem>>, vector<8x8xf32>,
    %c0_104 = arith.constant 0 : index
    %c0_105 = arith.constant 0 : index
    %207 = vector.load %arg19[%c0_104, %c0_105] : memref<8x32xf32, #tpu.memory_space<vmem>>, vector<8x32xf32>
    %208 = arith.truncf %207 : vector<8x32xf32> to vector<8x32xbf16>
    %c1_106 = arith.constant 1 : index
    %c0_107 = arith.constant 0 : index
    %c0_108 = arith.constant 0 : index
    %209 = vector.load %arg15[%c1_106, %c0_107, %c0_108] : memref<4x32x32xbf16, #tpu.memory_space<vmem>>, vector<1x32x32xbf16>
    %210 = vector.shape_cast %209 : vector<1x32x32xbf16> to vector<32x32xbf16>
    %cst_109 = arith.constant dense<0.000000e+00> : vector<8x32xf32>
    %211 = tpu.matmul %208, %210, %cst_109 {dimension_numbers = #tpu.dot_dimension_numbers<[1], [0], [0], [1], [0, 0, 1, 1], [], []>} : vector<8x32xbf16>, vector<32x32xbf16>, vector<8x32xf32> -> vector<8x32xf32>
    %212 = arith.addf %124, %211 : vector<8x32xf32>
    %c1_110 = arith.constant 1 : index
    %c0_111 = arith.constant 0 : index
    %c0_112 = arith.constant 0 : index
    %213 = vector.load %arg16[%c1_110, %c0_111, %c0_112] : memref<4x1x32xf32, #tpu.memory_space<vmem>>, vector<1x1x32xf32>
    %214 = vector.shape_cast %213 : vector<1x1x32xf32> to vector<1x32xf32>
    %215 = vector.broadcast %214 : vector<1x32xf32> to vector<8x32xf32>
    %216 = arith.addf %212, %215 : vector<8x32xf32>
    %217 = vector.extract_strided_slice %13 {offsets = [0, 32], sizes = [8, 32], strides = [1, 1]} : vector<8x64xf32> to vector<8x32xf32>
    %218 = vector.extract_strided_slice %18 {offsets = [0, 32], sizes = [8, 32], strides = [1, 1]} : vector<8x64xf32> to vector<8x32xf32>
    %219 = arith.truncf %216 : vector<8x32xf32> to vector<8x32xbf16>
    %c2 = arith.constant 2 : index
    %c0_113 = arith.constant 0 : index
    %c0_114 = arith.constant 0 : index
    %220 = vector.load %arg13[%c2, %c0_113, %c0_114] : memref<4x32x32xbf16, #tpu.memory_space<vmem>>, vector<1x32x32xbf16>
    %221 = vector.shape_cast %220 : vector<1x32x32xbf16> to vector<32x32xbf16>
    %cst_115 = arith.constant dense<0.000000e+00> : vector<8x32xf32>
    %222 = tpu.matmul %219, %221, %cst_115 {dimension_numbers = #tpu.dot_dimension_numbers<[1], [0], [0], [1], [0, 0, 1, 1], [], []>} : vector<8x32xbf16>, vector<32x32xbf16>, vector<8x32xf32> -> vector<8x32xf32>
    %c2_116 = arith.constant 2 : index
    %c0_117 = arith.constant 0 : index
    %c0_118 = arith.constant 0 : index
    %223 = vector.load %arg14[%c2_116, %c0_117, %c0_118] : memref<4x1x32xf32, #tpu.memory_space<vmem>>, vector<1x1x32xf32>
    %224 = vector.shape_cast %223 : vector<1x1x32xf32> to vector<1x32xf32>
    %225 = vector.broadcast %224 : vector<1x32xf32> to vector<8x32xf32>
    %226 = arith.addf %222, %225 : vector<8x32xf32>
    %227 = vector.extract_strided_slice %226 {offsets = [0, 0], sizes = [8, 8], strides = [1, 1]} : vector<8x32xf32> to vector<8x8xf32>
    %228 = vector.extract_strided_slice %217 {offsets = [0, 0], sizes = [8, 8], strides = [1, 1]} : vector<8x32xf32> to vector<8x8xf32>
    %229 = vector.extract_strided_slice %218 {offsets = [0, 0], sizes = [8, 8], strides = [1, 1]} : vector<8x32xf32> to vector<8x8xf32>
    %cst_119 = arith.constant dense<0.000000e+00> : vector<8x8xf32>
    %230 = tpu.matmul %227, %228, %cst_119 {dimension_numbers = #tpu.dot_dimension_numbers<[1], [1], [0], [0], [0, 0, 1, 0], [], []>} : vector<8x8xf32>, vector<8x8xf32>, vector<8x8xf32> -> vector<8x8xf32>
    %cst_120 = arith.constant 0.353553385 : f32
    %231 = vector.broadcast %cst_120 : f32 to vector<8x8xf32>
    %232 = arith.mulf %230, %231 : vector<8x8xf32>
    %233 = arith.addf %232, %8 : vector<8x8xf32>
    %cst_121 = arith.constant dense<0xFF800000> : vector<8xf32>
    %234 = vector.multi_reduction <maximumf>, %233, %cst_121 [1] : vector<8x8xf32> to vector<8xf32>
    %235 = vector.shape_cast %234 : vector<8xf32> to vector<8x1xf32>
    %236 = vector.broadcast %235 : vector<8x1xf32> to vector<8x8xf32>
    %237 = arith.subf %233, %236 : vector<8x8xf32>
    %238 = math.exp %237 : vector<8x8xf32>
    %cst_122 = arith.constant dense<0.000000e+00> : vector<8xf32>
    %239 = vector.multi_reduction <add>, %238, %cst_122 [1] : vector<8x8xf32> to vector<8xf32>
    %240 = vector.shape_cast %239 : vector<8xf32> to vector<8x1xf32>
    %241 = tpu.reciprocal %240 {approx = true} : vector<8x1xf32> -> vector<8x1xf32>
    %242 = vector.broadcast %241 : vector<8x1xf32> to vector<8x8xf32>
    %243 = arith.mulf %238, %242 : vector<8x8xf32>
    %cst_123 = arith.constant dense<0.000000e+00> : vector<8x8xf32>
    %244 = tpu.matmul %243, %229, %cst_123 {dimension_numbers = #tpu.dot_dimension_numbers<[1], [0], [0], [1], [0, 0, 1, 1], [], []>} : vector<8x8xf32>, vector<8x8xf32>, vector<8x8xf32> -> vector<8x8xf32>
    %c0_124 = arith.constant 0 : index
    %c0_125 = arith.constant 0 : index
    %245 = vector.load %arg19[%c0_124, %c0_125] : memref<8x32xf32, #tpu.memory_space<vmem>>, vector<8x8xf32>
    tpu.vector_store %arg19[%c0_124, %c0_125], %244 {strides = array<i32>} : memref<8x32xf32, #tpu.memory_space<vmem>>, vector<8x8xf32>,
    %246 = vector.extract_strided_slice %226 {offsets = [0, 8], sizes = [8, 8], strides = [1, 1]} : vector<8x32xf32> to vector<8x8xf32>
    %247 = vector.extract_strided_slice %217 {offsets = [0, 8], sizes = [8, 8], strides = [1, 1]} : vector<8x32xf32> to vector<8x8xf32>
    %248 = vector.extract_strided_slice %218 {offsets = [0, 8], sizes = [8, 8], strides = [1, 1]} : vector<8x32xf32> to vector<8x8xf32>
    %cst_126 = arith.constant dense<0.000000e+00> : vector<8x8xf32>
    %249 = tpu.matmul %246, %247, %cst_126 {dimension_numbers = #tpu.dot_dimension_numbers<[1], [1], [0], [0], [0, 0, 1, 0], [], []>} : vector<8x8xf32>, vector<8x8xf32>, vector<8x8xf32> -> vector<8x8xf32>
    %cst_127 = arith.constant 0.353553385 : f32
    %250 = vector.broadcast %cst_127 : f32 to vector<8x8xf32>
    %251 = arith.mulf %249, %250 : vector<8x8xf32>
    %252 = arith.addf %251, %8 : vector<8x8xf32>
    %cst_128 = arith.constant dense<0xFF800000> : vector<8xf32>
    %253 = vector.multi_reduction <maximumf>, %252, %cst_128 [1] : vector<8x8xf32> to vector<8xf32>
    %254 = vector.shape_cast %253 : vector<8xf32> to vector<8x1xf32>
    %255 = vector.broadcast %254 : vector<8x1xf32> to vector<8x8xf32>
    %256 = arith.subf %252, %255 : vector<8x8xf32>
    %257 = math.exp %256 : vector<8x8xf32>
    %cst_129 = arith.constant dense<0.000000e+00> : vector<8xf32>
    %258 = vector.multi_reduction <add>, %257, %cst_129 [1] : vector<8x8xf32> to vector<8xf32>
    %259 = vector.shape_cast %258 : vector<8xf32> to vector<8x1xf32>
    %260 = tpu.reciprocal %259 {approx = true} : vector<8x1xf32> -> vector<8x1xf32>
    %261 = vector.broadcast %260 : vector<8x1xf32> to vector<8x8xf32>
    %262 = arith.mulf %257, %261 : vector<8x8xf32>
    %cst_130 = arith.constant dense<0.000000e+00> : vector<8x8xf32>
    %263 = tpu.matmul %262, %248, %cst_130 {dimension_numbers = #tpu.dot_dimension_numbers<[1], [0], [0], [1], [0, 0, 1, 1], [], []>} : vector<8x8xf32>, vector<8x8xf32>, vector<8x8xf32> -> vector<8x8xf32>
    %c0_131 = arith.constant 0 : index
    %c8_132 = arith.constant 8 : index
    %264 = vector.load %arg19[%c0_131, %c8_132] : memref<8x32xf32, #tpu.memory_space<vmem>>, vector<8x8xf32>
    tpu.vector_store %arg19[%c0_131, %c8_132], %263 {strides = array<i32>} : memref<8x32xf32, #tpu.memory_space<vmem>>, vector<8x8xf32>,
    %265 = vector.extract_strided_slice %226 {offsets = [0, 16], sizes = [8, 8], strides = [1, 1]} : vector<8x32xf32> to vector<8x8xf32>
    %266 = vector.extract_strided_slice %217 {offsets = [0, 16], sizes = [8, 8], strides = [1, 1]} : vector<8x32xf32> to vector<8x8xf32>
    %267 = vector.extract_strided_slice %218 {offsets = [0, 16], sizes = [8, 8], strides = [1, 1]} : vector<8x32xf32> to vector<8x8xf32>
    %cst_133 = arith.constant dense<0.000000e+00> : vector<8x8xf32>
    %268 = tpu.matmul %265, %266, %cst_133 {dimension_numbers = #tpu.dot_dimension_numbers<[1], [1], [0], [0], [0, 0, 1, 0], [], []>} : vector<8x8xf32>, vector<8x8xf32>, vector<8x8xf32> -> vector<8x8xf32>
    %cst_134 = arith.constant 0.353553385 : f32
    %269 = vector.broadcast %cst_134 : f32 to vector<8x8xf32>
    %270 = arith.mulf %268, %269 : vector<8x8xf32>
    %271 = arith.addf %270, %8 : vector<8x8xf32>
    %cst_135 = arith.constant dense<0xFF800000> : vector<8xf32>
    %272 = vector.multi_reduction <maximumf>, %271, %cst_135 [1] : vector<8x8xf32> to vector<8xf32>
    %273 = vector.shape_cast %272 : vector<8xf32> to vector<8x1xf32>
    %274 = vector.broadcast %273 : vector<8x1xf32> to vector<8x8xf32>
    %275 = arith.subf %271, %274 : vector<8x8xf32>
    %276 = math.exp %275 : vector<8x8xf32>
    %cst_136 = arith.constant dense<0.000000e+00> : vector<8xf32>
    %277 = vector.multi_reduction <add>, %276, %cst_136 [1] : vector<8x8xf32> to vector<8xf32>
    %278 = vector.shape_cast %277 : vector<8xf32> to vector<8x1xf32>
    %279 = tpu.reciprocal %278 {approx = true} : vector<8x1xf32> -> vector<8x1xf32>
    %280 = vector.broadcast %279 : vector<8x1xf32> to vector<8x8xf32>
    %281 = arith.mulf %276, %280 : vector<8x8xf32>
    %cst_137 = arith.constant dense<0.000000e+00> : vector<8x8xf32>
    %282 = tpu.matmul %281, %267, %cst_137 {dimension_numbers = #tpu.dot_dimension_numbers<[1], [0], [0], [1], [0, 0, 1, 1], [], []>} : vector<8x8xf32>, vector<8x8xf32>, vector<8x8xf32> -> vector<8x8xf32>
    %c0_138 = arith.constant 0 : index
    %c16_139 = arith.constant 16 : index
    %283 = vector.load %arg19[%c0_138, %c16_139] : memref<8x32xf32, #tpu.memory_space<vmem>>, vector<8x8xf32>
    tpu.vector_store %arg19[%c0_138, %c16_139], %282 {strides = array<i32>} : memref<8x32xf32, #tpu.memory_space<vmem>>, vector<8x8xf32>,
    %284 = vector.extract_strided_slice %226 {offsets = [0, 24], sizes = [8, 8], strides = [1, 1]} : vector<8x32xf32> to vector<8x8xf32>
    %285 = vector.extract_strided_slice %217 {offsets = [0, 24], sizes = [8, 8], strides = [1, 1]} : vector<8x32xf32> to vector<8x8xf32>
    %286 = vector.extract_strided_slice %218 {offsets = [0, 24], sizes = [8, 8], strides = [1, 1]} : vector<8x32xf32> to vector<8x8xf32>
    %cst_140 = arith.constant dense<0.000000e+00> : vector<8x8xf32>
    %287 = tpu.matmul %284, %285, %cst_140 {dimension_numbers = #tpu.dot_dimension_numbers<[1], [1], [0], [0], [0, 0, 1, 0], [], []>} : vector<8x8xf32>, vector<8x8xf32>, vector<8x8xf32> -> vector<8x8xf32>
    %cst_141 = arith.constant 0.353553385 : f32
    %288 = vector.broadcast %cst_141 : f32 to vector<8x8xf32>
    %289 = arith.mulf %287, %288 : vector<8x8xf32>
    %290 = arith.addf %289, %8 : vector<8x8xf32>
    %cst_142 = arith.constant dense<0xFF800000> : vector<8xf32>
    %291 = vector.multi_reduction <maximumf>, %290, %cst_142 [1] : vector<8x8xf32> to vector<8xf32>
    %292 = vector.shape_cast %291 : vector<8xf32> to vector<8x1xf32>
    %293 = vector.broadcast %292 : vector<8x1xf32> to vector<8x8xf32>
    %294 = arith.subf %290, %293 : vector<8x8xf32>
    %295 = math.exp %294 : vector<8x8xf32>
    %cst_143 = arith.constant dense<0.000000e+00> : vector<8xf32>
    %296 = vector.multi_reduction <add>, %295, %cst_143 [1] : vector<8x8xf32> to vector<8xf32>
    %297 = vector.shape_cast %296 : vector<8xf32> to vector<8x1xf32>
    %298 = tpu.reciprocal %297 {approx = true} : vector<8x1xf32> -> vector<8x1xf32>
    %299 = vector.broadcast %298 : vector<8x1xf32> to vector<8x8xf32>
    %300 = arith.mulf %295, %299 : vector<8x8xf32>
    %cst_144 = arith.constant dense<0.000000e+00> : vector<8x8xf32>
    %301 = tpu.matmul %300, %286, %cst_144 {dimension_numbers = #tpu.dot_dimension_numbers<[1], [0], [0], [1], [0, 0, 1, 1], [], []>} : vector<8x8xf32>, vector<8x8xf32>, vector<8x8xf32> -> vector<8x8xf32>
    %c0_145 = arith.constant 0 : index
    %c24_146 = arith.constant 24 : index
    %302 = vector.load %arg19[%c0_145, %c24_146] : memref<8x32xf32, #tpu.memory_space<vmem>>, vector<8x8xf32>
    tpu.vector_store %arg19[%c0_145, %c24_146], %301 {strides = array<i32>} : memref<8x32xf32, #tpu.memory_space<vmem>>, vector<8x8xf32>,
    %c0_147 = arith.constant 0 : index
    %c0_148 = arith.constant 0 : index
    %303 = vector.load %arg19[%c0_147, %c0_148] : memref<8x32xf32, #tpu.memory_space<vmem>>, vector<8x32xf32>
    %304 = arith.truncf %303 : vector<8x32xf32> to vector<8x32xbf16>
    %c2_149 = arith.constant 2 : index
    %c0_150 = arith.constant 0 : index
    %c0_151 = arith.constant 0 : index
    %305 = vector.load %arg15[%c2_149, %c0_150, %c0_151] : memref<4x32x32xbf16, #tpu.memory_space<vmem>>, vector<1x32x32xbf16>
    %306 = vector.shape_cast %305 : vector<1x32x32xbf16> to vector<32x32xbf16>
    %cst_152 = arith.constant dense<0.000000e+00> : vector<8x32xf32>
    %307 = tpu.matmul %304, %306, %cst_152 {dimension_numbers = #tpu.dot_dimension_numbers<[1], [0], [0], [1], [0, 0, 1, 1], [], []>} : vector<8x32xbf16>, vector<32x32xbf16>, vector<8x32xf32> -> vector<8x32xf32>
    %308 = arith.addf %216, %307 : vector<8x32xf32>
    %c2_153 = arith.constant 2 : index
    %c0_154 = arith.constant 0 : index
    %c0_155 = arith.constant 0 : index
    %309 = vector.load %arg16[%c2_153, %c0_154, %c0_155] : memref<4x1x32xf32, #tpu.memory_space<vmem>>, vector<1x1x32xf32>
    %310 = vector.shape_cast %309 : vector<1x1x32xf32> to vector<1x32xf32>
    %311 = vector.broadcast %310 : vector<1x32xf32> to vector<8x32xf32>
    %312 = arith.addf %308, %311 : vector<8x32xf32>
    %313 = vector.extract_strided_slice %23 {offsets = [0, 32], sizes = [8, 32], strides = [1, 1]} : vector<8x64xf32> to vector<8x32xf32>
    %314 = vector.extract_strided_slice %28 {offsets = [0, 32], sizes = [8, 32], strides = [1, 1]} : vector<8x64xf32> to vector<8x32xf32>
    %315 = arith.truncf %312 : vector<8x32xf32> to vector<8x32xbf16>
    %c3 = arith.constant 3 : index
    %c0_156 = arith.constant 0 : index
    %c0_157 = arith.constant 0 : index
    %316 = vector.load %arg13[%c3, %c0_156, %c0_157] : memref<4x32x32xbf16, #tpu.memory_space<vmem>>, vector<1x32x32xbf16>
    %317 = vector.shape_cast %316 : vector<1x32x32xbf16> to vector<32x32xbf16>
    %cst_158 = arith.constant dense<0.000000e+00> : vector<8x32xf32>
    %318 = tpu.matmul %315, %317, %cst_158 {dimension_numbers = #tpu.dot_dimension_numbers<[1], [0], [0], [1], [0, 0, 1, 1], [], []>} : vector<8x32xbf16>, vector<32x32xbf16>, vector<8x32xf32> -> vector<8x32xf32>
    %c3_159 = arith.constant 3 : index
    %c0_160 = arith.constant 0 : index
    %c0_161 = arith.constant 0 : index
    %319 = vector.load %arg14[%c3_159, %c0_160, %c0_161] : memref<4x1x32xf32, #tpu.memory_space<vmem>>, vector<1x1x32xf32>
    %320 = vector.shape_cast %319 : vector<1x1x32xf32> to vector<1x32xf32>
    %321 = vector.broadcast %320 : vector<1x32xf32> to vector<8x32xf32>
    %322 = arith.addf %318, %321 : vector<8x32xf32>
    %323 = vector.extract_strided_slice %322 {offsets = [0, 0], sizes = [8, 8], strides = [1, 1]} : vector<8x32xf32> to vector<8x8xf32>
    %324 = vector.extract_strided_slice %313 {offsets = [0, 0], sizes = [8, 8], strides = [1, 1]} : vector<8x32xf32> to vector<8x8xf32>
    %325 = vector.extract_strided_slice %314 {offsets = [0, 0], sizes = [8, 8], strides = [1, 1]} : vector<8x32xf32> to vector<8x8xf32>
    %cst_162 = arith.constant dense<0.000000e+00> : vector<8x8xf32>
    %326 = tpu.matmul %323, %324, %cst_162 {dimension_numbers = #tpu.dot_dimension_numbers<[1], [1], [0], [0], [0, 0, 1, 0], [], []>} : vector<8x8xf32>, vector<8x8xf32>, vector<8x8xf32> -> vector<8x8xf32>
    %cst_163 = arith.constant 0.353553385 : f32
    %327 = vector.broadcast %cst_163 : f32 to vector<8x8xf32>
    %328 = arith.mulf %326, %327 : vector<8x8xf32>
    %cst_164 = arith.constant dense<0xFF800000> : vector<8xf32>
    %329 = vector.multi_reduction <maximumf>, %328, %cst_164 [1] : vector<8x8xf32> to vector<8xf32>
    %330 = vector.shape_cast %329 : vector<8xf32> to vector<8x1xf32>
    %331 = vector.broadcast %330 : vector<8x1xf32> to vector<8x8xf32>
    %332 = arith.subf %328, %331 : vector<8x8xf32>
    %333 = math.exp %332 : vector<8x8xf32>
    %cst_165 = arith.constant dense<0.000000e+00> : vector<8xf32>
    %334 = vector.multi_reduction <add>, %333, %cst_165 [1] : vector<8x8xf32> to vector<8xf32>
    %335 = vector.shape_cast %334 : vector<8xf32> to vector<8x1xf32>
    %336 = vector.broadcast %335 : vector<8x1xf32> to vector<8x8xf32>
    %337 = arith.divf %333, %336 : vector<8x8xf32>
    %c0_166 = arith.constant 0 : index
    %c0_167 = arith.constant 0 : index
    %c0_168 = arith.constant 0 : index
    %c0_169 = arith.constant 0 : index
    %338 = vector.load %arg18[%c0_166, %c0_167, %c0_168, %c0_169] : memref<1x4x8x8xf32, #tpu.memory_space<vmem>>, vector<1x1x8x8xf32>
    %339 = vector.shape_cast %338 : vector<1x1x8x8xf32> to vector<8x8xf32>
    %340 = vector.shape_cast %337 : vector<8x8xf32> to vector<1x1x8x8xf32>
    tpu.vector_store %arg18[%c0_166, %c0_167, %c0_168, %c0_169], %340 {strides = array<i32>} : memref<1x4x8x8xf32, #tpu.memory_space<vmem>>, vector<1x1x8x8xf32>,
    %cst_170 = arith.constant dense<0.000000e+00> : vector<8x8xf32>
    %341 = tpu.matmul %337, %325, %cst_170 {dimension_numbers = #tpu.dot_dimension_numbers<[1], [0], [0], [1], [0, 0, 1, 1], [], []>} : vector<8x8xf32>, vector<8x8xf32>, vector<8x8xf32> -> vector<8x8xf32>
    %c0_171 = arith.constant 0 : index
    %c0_172 = arith.constant 0 : index
    %342 = vector.load %arg19[%c0_171, %c0_172] : memref<8x32xf32, #tpu.memory_space<vmem>>, vector<8x8xf32>
    tpu.vector_store %arg19[%c0_171, %c0_172], %341 {strides = array<i32>} : memref<8x32xf32, #tpu.memory_space<vmem>>, vector<8x8xf32>,
    %343 = vector.extract_strided_slice %322 {offsets = [0, 8], sizes = [8, 8], strides = [1, 1]} : vector<8x32xf32> to vector<8x8xf32>
    %344 = vector.extract_strided_slice %313 {offsets = [0, 8], sizes = [8, 8], strides = [1, 1]} : vector<8x32xf32> to vector<8x8xf32>
    %345 = vector.extract_strided_slice %314 {offsets = [0, 8], sizes = [8, 8], strides = [1, 1]} : vector<8x32xf32> to vector<8x8xf32>
    %cst_173 = arith.constant dense<0.000000e+00> : vector<8x8xf32>
    %346 = tpu.matmul %343, %344, %cst_173 {dimension_numbers = #tpu.dot_dimension_numbers<[1], [1], [0], [0], [0, 0, 1, 0], [], []>} : vector<8x8xf32>, vector<8x8xf32>, vector<8x8xf32> -> vector<8x8xf32>
    %cst_174 = arith.constant 0.353553385 : f32
    %347 = vector.broadcast %cst_174 : f32 to vector<8x8xf32>
    %348 = arith.mulf %346, %347 : vector<8x8xf32>
    %cst_175 = arith.constant dense<0xFF800000> : vector<8xf32>
    %349 = vector.multi_reduction <maximumf>, %348, %cst_175 [1] : vector<8x8xf32> to vector<8xf32>
    %350 = vector.shape_cast %349 : vector<8xf32> to vector<8x1xf32>
    %351 = vector.broadcast %350 : vector<8x1xf32> to vector<8x8xf32>
    %352 = arith.subf %348, %351 : vector<8x8xf32>
    %353 = math.exp %352 : vector<8x8xf32>
    %cst_176 = arith.constant dense<0.000000e+00> : vector<8xf32>
    %354 = vector.multi_reduction <add>, %353, %cst_176 [1] : vector<8x8xf32> to vector<8xf32>
    %355 = vector.shape_cast %354 : vector<8xf32> to vector<8x1xf32>
    %356 = vector.broadcast %355 : vector<8x1xf32> to vector<8x8xf32>
    %357 = arith.divf %353, %356 : vector<8x8xf32>
    %c0_177 = arith.constant 0 : index
    %c1_178 = arith.constant 1 : index
    %c0_179 = arith.constant 0 : index
    %c0_180 = arith.constant 0 : index
    %358 = vector.load %arg18[%c0_177, %c1_178, %c0_179, %c0_180] : memref<1x4x8x8xf32, #tpu.memory_space<vmem>>, vector<1x1x8x8xf32>
    %359 = vector.shape_cast %358 : vector<1x1x8x8xf32> to vector<8x8xf32>
    %360 = vector.shape_cast %357 : vector<8x8xf32> to vector<1x1x8x8xf32>
    tpu.vector_store %arg18[%c0_177, %c1_178, %c0_179, %c0_180], %360 {strides = array<i32>} : memref<1x4x8x8xf32, #tpu.memory_space<vmem>>, vector<1x1x8x8xf32>,
    %cst_181 = arith.constant dense<0.000000e+00> : vector<8x8xf32>
    %361 = tpu.matmul %357, %345, %cst_181 {dimension_numbers = #tpu.dot_dimension_numbers<[1], [0], [0], [1], [0, 0, 1, 1], [], []>} : vector<8x8xf32>, vector<8x8xf32>, vector<8x8xf32> -> vector<8x8xf32>
    %c0_182 = arith.constant 0 : index
    %c8_183 = arith.constant 8 : index
    %362 = vector.load %arg19[%c0_182, %c8_183] : memref<8x32xf32, #tpu.memory_space<vmem>>, vector<8x8xf32>
    tpu.vector_store %arg19[%c0_182, %c8_183], %361 {strides = array<i32>} : memref<8x32xf32, #tpu.memory_space<vmem>>, vector<8x8xf32>,
    %363 = vector.extract_strided_slice %322 {offsets = [0, 16], sizes = [8, 8], strides = [1, 1]} : vector<8x32xf32> to vector<8x8xf32>
    %364 = vector.extract_strided_slice %313 {offsets = [0, 16], sizes = [8, 8], strides = [1, 1]} : vector<8x32xf32> to vector<8x8xf32>
    %365 = vector.extract_strided_slice %314 {offsets = [0, 16], sizes = [8, 8], strides = [1, 1]} : vector<8x32xf32> to vector<8x8xf32>
    %cst_184 = arith.constant dense<0.000000e+00> : vector<8x8xf32>
    %366 = tpu.matmul %363, %364, %cst_184 {dimension_numbers = #tpu.dot_dimension_numbers<[1], [1], [0], [0], [0, 0, 1, 0], [], []>} : vector<8x8xf32>, vector<8x8xf32>, vector<8x8xf32> -> vector<8x8xf32>
    %cst_185 = arith.constant 0.353553385 : f32
    %367 = vector.broadcast %cst_185 : f32 to vector<8x8xf32>
    %368 = arith.mulf %366, %367 : vector<8x8xf32>
    %cst_186 = arith.constant dense<0xFF800000> : vector<8xf32>
    %369 = vector.multi_reduction <maximumf>, %368, %cst_186 [1] : vector<8x8xf32> to vector<8xf32>
    %370 = vector.shape_cast %369 : vector<8xf32> to vector<8x1xf32>
    %371 = vector.broadcast %370 : vector<8x1xf32> to vector<8x8xf32>
    %372 = arith.subf %368, %371 : vector<8x8xf32>
    %373 = math.exp %372 : vector<8x8xf32>
    %cst_187 = arith.constant dense<0.000000e+00> : vector<8xf32>
    %374 = vector.multi_reduction <add>, %373, %cst_187 [1] : vector<8x8xf32> to vector<8xf32>
    %375 = vector.shape_cast %374 : vector<8xf32> to vector<8x1xf32>
    %376 = vector.broadcast %375 : vector<8x1xf32> to vector<8x8xf32>
    %377 = arith.divf %373, %376 : vector<8x8xf32>
    %c0_188 = arith.constant 0 : index
    %c2_189 = arith.constant 2 : index
    %c0_190 = arith.constant 0 : index
    %c0_191 = arith.constant 0 : index
    %378 = vector.load %arg18[%c0_188, %c2_189, %c0_190, %c0_191] : memref<1x4x8x8xf32, #tpu.memory_space<vmem>>, vector<1x1x8x8xf32>
    %379 = vector.shape_cast %378 : vector<1x1x8x8xf32> to vector<8x8xf32>
    %380 = vector.shape_cast %377 : vector<8x8xf32> to vector<1x1x8x8xf32>
    tpu.vector_store %arg18[%c0_188, %c2_189, %c0_190, %c0_191], %380 {strides = array<i32>} : memref<1x4x8x8xf32, #tpu.memory_space<vmem>>, vector<1x1x8x8xf32>,
    %cst_192 = arith.constant dense<0.000000e+00> : vector<8x8xf32>
    %381 = tpu.matmul %377, %365, %cst_192 {dimension_numbers = #tpu.dot_dimension_numbers<[1], [0], [0], [1], [0, 0, 1, 1], [], []>} : vector<8x8xf32>, vector<8x8xf32>, vector<8x8xf32> -> vector<8x8xf32>
    %c0_193 = arith.constant 0 : index
    %c16_194 = arith.constant 16 : index
    %382 = vector.load %arg19[%c0_193, %c16_194] : memref<8x32xf32, #tpu.memory_space<vmem>>, vector<8x8xf32>
    tpu.vector_store %arg19[%c0_193, %c16_194], %381 {strides = array<i32>} : memref<8x32xf32, #tpu.memory_space<vmem>>, vector<8x8xf32>,
    %383 = vector.extract_strided_slice %322 {offsets = [0, 24], sizes = [8, 8], strides = [1, 1]} : vector<8x32xf32> to vector<8x8xf32>
    %384 = vector.extract_strided_slice %313 {offsets = [0, 24], sizes = [8, 8], strides = [1, 1]} : vector<8x32xf32> to vector<8x8xf32>
    %385 = vector.extract_strided_slice %314 {offsets = [0, 24], sizes = [8, 8], strides = [1, 1]} : vector<8x32xf32> to vector<8x8xf32>
    %cst_195 = arith.constant dense<0.000000e+00> : vector<8x8xf32>
    %386 = tpu.matmul %383, %384, %cst_195 {dimension_numbers = #tpu.dot_dimension_numbers<[1], [1], [0], [0], [0, 0, 1, 0], [], []>} : vector<8x8xf32>, vector<8x8xf32>, vector<8x8xf32> -> vector<8x8xf32>
    %cst_196 = arith.constant 0.353553385 : f32
    %387 = vector.broadcast %cst_196 : f32 to vector<8x8xf32>
    %388 = arith.mulf %386, %387 : vector<8x8xf32>
    %cst_197 = arith.constant dense<0xFF800000> : vector<8xf32>
    %389 = vector.multi_reduction <maximumf>, %388, %cst_197 [1] : vector<8x8xf32> to vector<8xf32>
    %390 = vector.shape_cast %389 : vector<8xf32> to vector<8x1xf32>
    %391 = vector.broadcast %390 : vector<8x1xf32> to vector<8x8xf32>
    %392 = arith.subf %388, %391 : vector<8x8xf32>
    %393 = math.exp %392 : vector<8x8xf32>
    %cst_198 = arith.constant dense<0.000000e+00> : vector<8xf32>
    %394 = vector.multi_reduction <add>, %393, %cst_198 [1] : vector<8x8xf32> to vector<8xf32>
    %395 = vector.shape_cast %394 : vector<8xf32> to vector<8x1xf32>
    %396 = vector.broadcast %395 : vector<8x1xf32> to vector<8x8xf32>
    %397 = arith.divf %393, %396 : vector<8x8xf32>
    %c0_199 = arith.constant 0 : index
    %c3_200 = arith.constant 3 : index
    %c0_201 = arith.constant 0 : index
    %c0_202 = arith.constant 0 : index
    %398 = vector.load %arg18[%c0_199, %c3_200, %c0_201, %c0_202] : memref<1x4x8x8xf32, #tpu.memory_space<vmem>>, vector<1x1x8x8xf32>
    %399 = vector.shape_cast %398 : vector<1x1x8x8xf32> to vector<8x8xf32>
    %400 = vector.shape_cast %397 : vector<8x8xf32> to vector<1x1x8x8xf32>
    tpu.vector_store %arg18[%c0_199, %c3_200, %c0_201, %c0_202], %400 {strides = array<i32>} : memref<1x4x8x8xf32, #tpu.memory_space<vmem>>, vector<1x1x8x8xf32>,
    %cst_203 = arith.constant dense<0.000000e+00> : vector<8x8xf32>
    %401 = tpu.matmul %397, %385, %cst_203 {dimension_numbers = #tpu.dot_dimension_numbers<[1], [0], [0], [1], [0, 0, 1, 1], [], []>} : vector<8x8xf32>, vector<8x8xf32>, vector<8x8xf32> -> vector<8x8xf32>
    %c0_204 = arith.constant 0 : index
    %c24_205 = arith.constant 24 : index
    %402 = vector.load %arg19[%c0_204, %c24_205] : memref<8x32xf32, #tpu.memory_space<vmem>>, vector<8x8xf32>
    tpu.vector_store %arg19[%c0_204, %c24_205], %401 {strides = array<i32>} : memref<8x32xf32, #tpu.memory_space<vmem>>, vector<8x8xf32>,
    %c0_206 = arith.constant 0 : index
    %c0_207 = arith.constant 0 : index
    %403 = vector.load %arg19[%c0_206, %c0_207] : memref<8x32xf32, #tpu.memory_space<vmem>>, vector<8x32xf32>
    %404 = arith.truncf %403 : vector<8x32xf32> to vector<8x32xbf16>
    %c3_208 = arith.constant 3 : index
    %c0_209 = arith.constant 0 : index
    %c0_210 = arith.constant 0 : index
    %405 = vector.load %arg15[%c3_208, %c0_209, %c0_210] : memref<4x32x32xbf16, #tpu.memory_space<vmem>>, vector<1x32x32xbf16>
    %406 = vector.shape_cast %405 : vector<1x32x32xbf16> to vector<32x32xbf16>
    %cst_211 = arith.constant dense<0.000000e+00> : vector<8x32xf32>
    %407 = tpu.matmul %404, %406, %cst_211 {dimension_numbers = #tpu.dot_dimension_numbers<[1], [0], [0], [1], [0, 0, 1, 1], [], []>} : vector<8x32xbf16>, vector<32x32xbf16>, vector<8x32xf32> -> vector<8x32xf32>
    %408 = arith.addf %312, %407 : vector<8x32xf32>
    %c3_212 = arith.constant 3 : index
    %c0_213 = arith.constant 0 : index
    %c0_214 = arith.constant 0 : index
    %409 = vector.load %arg16[%c3_212, %c0_213, %c0_214] : memref<4x1x32xf32, #tpu.memory_space<vmem>>, vector<1x1x32xf32>
    %410 = vector.shape_cast %409 : vector<1x1x32xf32> to vector<1x32xf32>
    %411 = vector.broadcast %410 : vector<1x32xf32> to vector<8x32xf32>
    %412 = arith.addf %408, %411 : vector<8x32xf32>
    %c0_215 = arith.constant 0 : index
    %c0_216 = arith.constant 0 : index
    %c0_217 = arith.constant 0 : index
    %413 = vector.load %arg17[%c0_215, %c0_216, %c0_217] : memref<1x8x32xf32, #tpu.memory_space<vmem>>, vector<1x8x32xf32>
    %414 = vector.shape_cast %413 : vector<1x8x32xf32> to vector<8x32xf32>
    %415 = vector.shape_cast %412 : vector<8x32xf32> to vector<1x8x32xf32>
    tpu.vector_store %arg17[%c0_215, %c0_216, %c0_217], %415 {strides = array<i32>} : memref<1x8x32xf32, #tpu.memory_space<vmem>>, vector<1x8x32xf32>,
    return
  }
  func.func @transform_0(%arg0: i32) -> (i32, i32, i32) {
    %c0_i32 = arith.constant 0 : i32
    %c0_i32_0 = arith.constant 0 : i32
    %c0_i32_1 = arith.constant 0 : i32
    return %arg0, %c0_i32, %c0_i32_0 : i32, i32, i32
  }
  func.func @transform_1(%arg0: i32) -> (i32, i32, i32) {
    %c0_i32 = arith.constant 0 : i32
    %c0_i32_0 = arith.constant 0 : i32
    %c0_i32_1 = arith.constant 0 : i32
    return %arg0, %c0_i32, %c0_i32_0 : i32, i32, i32
  }
  func.func @transform_2(%arg0: i32) -> (i32, i32, i32) {
    %c0_i32 = arith.constant 0 : i32
    %c0_i32_0 = arith.constant 0 : i32
    %c0_i32_1 = arith.constant 0 : i32
    return %arg0, %c0_i32, %c0_i32_0 : i32, i32, i32
  }
  func.func @transform_3(%arg0: i32) -> (i32, i32) {
    %c0_i32 = arith.constant 0 : i32
    %c0_i32_0 = arith.constant 0 : i32
    %c0_i32_1 = arith.constant 0 : i32
    return %c0_i32, %c0_i32_0 : i32, i32
  }
  func.func @transform_4(%arg0: i32) -> (i32, i32) {
    %c0_i32 = arith.constant 0 : i32
    %c0_i32_0 = arith.constant 0 : i32
    %c0_i32_1 = arith.constant 0 : i32
    return %c0_i32, %c0_i32_0 : i32, i32
  }
  func.func @transform_5(%arg0: i32) -> (i32, i32) {
    %c0_i32 = arith.constant 0 : i32
    %c0_i32_0 = arith.constant 0 : i32
    %c0_i32_1 = arith.constant 0 : i32
    return %c0_i32, %c0_i32_0 : i32, i32
  }
  func.func @transform_6(%arg0: i32) -> (i32, i32) {
    %c0_i32 = arith.constant 0 : i32
    %c0_i32_0 = arith.constant 0 : i32
    %c0_i32_1 = arith.constant 0 : i32
    return %c0_i32, %c0_i32_0 : i32, i32
  }
  func.func @transform_7(%arg0: i32) -> (i32, i32) {
    %c0_i32 = arith.constant 0 : i32
    %c0_i32_0 = arith.constant 0 : i32
    %c0_i32_1 = arith.constant 0 : i32
    return %c0_i32, %c0_i32_0 : i32, i32
  }
  func.func @transform_8(%arg0: i32) -> (i32, i32) {
    %c0_i32 = arith.constant 0 : i32
    %c0_i32_0 = arith.constant 0 : i32
    %c0_i32_1 = arith.constant 0 : i32
    return %c0_i32, %c0_i32_0 : i32, i32
  }
  func.func @transform_9(%arg0: i32) -> (i32, i32) {
    %c0_i32 = arith.constant 0 : i32
    %c0_i32_0 = arith.constant 0 : i32
    %c0_i32_1 = arith.constant 0 : i32
    return %c0_i32, %c0_i32_0 : i32, i32
  }
  func.func @transform_10(%arg0: i32) -> (i32, i32) {
    %c0_i32 = arith.constant 0 : i32
    %c0_i32_0 = arith.constant 0 : i32
    %c0_i32_1 = arith.constant 0 : i32
    return %c0_i32, %c0_i32_0 : i32, i32
  }
  func.func @transform_11(%arg0: i32) -> (i32, i32) {
    %c0_i32 = arith.constant 0 : i32
    %c0_i32_0 = arith.constant 0 : i32
    %c0_i32_1 = arith.constant 0 : i32
    return %c0_i32, %c0_i32_0 : i32, i32
  }
  func.func @transform_12(%arg0: i32) -> (i32, i32, i32) {
    %c0_i32 = arith.constant 0 : i32
    %c0_i32_0 = arith.constant 0 : i32
    %c0_i32_1 = arith.constant 0 : i32
    %c0_i32_2 = arith.constant 0 : i32
    return %c0_i32, %c0_i32_0, %c0_i32_1 : i32, i32, i32
  }
  func.func @transform_13(%arg0: i32) -> (i32, i32, i32) {
    %c0_i32 = arith.constant 0 : i32
    %c0_i32_0 = arith.constant 0 : i32
    %c0_i32_1 = arith.constant 0 : i32
    %c0_i32_2 = arith.constant 0 : i32
    return %c0_i32, %c0_i32_0, %c0_i32_1 : i32, i32, i32
  }
  func.func @transform_14(%arg0: i32) -> (i32, i32, i32) {
    %c0_i32 = arith.constant 0 : i32
    %c0_i32_0 = arith.constant 0 : i32
    %c0_i32_1 = arith.constant 0 : i32
    %c0_i32_2 = arith.constant 0 : i32
    return %c0_i32, %c0_i32_0, %c0_i32_1 : i32, i32, i32
  }
  func.func @transform_15(%arg0: i32) -> (i32, i32, i32) {
    %c0_i32 = arith.constant 0 : i32
    %c0_i32_0 = arith.constant 0 : i32
    %c0_i32_1 = arith.constant 0 : i32
    %c0_i32_2 = arith.constant 0 : i32
    return %c0_i32, %c0_i32_0, %c0_i32_1 : i32, i32, i32
  }
  func.func @transform_16(%arg0: i32) -> (i32, i32, i32) {
    %c0_i32 = arith.constant 0 : i32
    %c0_i32_0 = arith.constant 0 : i32
    %c0_i32_1 = arith.constant 0 : i32
    return %arg0, %c0_i32, %c0_i32_0 : i32, i32, i32
  }
  func.func @transform_17(%arg0: i32) -> (i32, i32, i32, i32) {
    %c0_i32 = arith.constant 0 : i32
    %c0_i32_0 = arith.constant 0 : i32
    %c0_i32_1 = arith.constant 0 : i32
    %c0_i32_2 = arith.constant 0 : i32
    return %arg0, %c0_i32, %c0_i32_0, %c0_i32_1 : i32, i32, i32, i32
  }
}

module attributes {stable_mosaic.version = 11 : i64} {
  func.func @_decoder_kernel(%arg0: i32, %arg1: memref<1x8x32xf32, #tpu.memory_space<vmem>>, %arg2: memref<1x8x32xf32, #tpu.memory_space<vmem>>, %arg3: memref<1x8x32xf32, #tpu.memory_space<vmem>>, %arg4: memref<8x8xf32, #tpu.memory_space<vmem>>, %arg5: memref<32x64xbf16, #tpu.memory_space<vmem>>, %arg6: memref<1x64xf32, #tpu.memory_space<vmem>>, %arg7: memref<32x64xbf16, #tpu.memory_space<vmem>>, %arg8: memref<1x64xf32, #tpu.memory_space<vmem>>, %arg9: memref<32x64xbf16, #tpu.memory_space<vmem>>, %arg10: memref<1x64xf32, #tpu.memory_space<vmem>>, %arg11: memref<32x64xbf16, #tpu.memory_space<vmem>>, %arg12: memref<1x64xf32, #tpu.memory_space<vmem>>, %arg13: memref<4x32x32xbf16, #tpu.memory_space<vmem>>, %arg14: memref<4x1x32xf32, #tpu.memory_space<vmem>>, %arg15: memref<4x32x32xbf16, #tpu.memory_space<vmem>>, %arg16: memref<4x1x32xf32, #tpu.memory_space<vmem>>, %arg17: memref<1x8x32xf32, #tpu.memory_space<vmem>>, %arg18: memref<1x4x8x8xf32, #tpu.memory_space<vmem>>, %arg19: memref<8x32xf32, #tpu.memory_space<vmem>>) attributes {dimension_semantics = [#tpu.dimension_semantics<parallel>], iteration_bounds = array<i64: 2>, scalar_prefetch = 0 : i64, scratch_operands = 1 : i64, tpu.core_type = #tpu.core_type<tc>, window_params = [{transform_indices = @transform_0, window_bounds = array<i64: 1, 8, 32>}, {transform_indices = @transform_1, window_bounds = array<i64: 1, 8, 32>}, {transform_indices = @transform_2, window_bounds = array<i64: 1, 8, 32>}, {pipeline_mode = #tpu.pipeline_mode<synchronous>, transform_indices = @transform_3, window_bounds = array<i64: 8, 8>}, {pipeline_mode = #tpu.pipeline_mode<synchronous>, transform_indices = @transform_4, window_bounds = array<i64: 32, 64>}, {pipeline_mode = #tpu.pipeline_mode<synchronous>, transform_indices = @transform_5, window_bounds = array<i64: 1, 64>}, {pipeline_mode = #tpu.pipeline_mode<synchronous>, transform_indices = @transform_6, window_bounds = array<i64: 32, 64>}, {pipeline_mode = #tpu.pipeline_mode<synchronous>, transform_indices = @transform_7, window_bounds = array<i64: 1, 64>}, {pipeline_mode = #tpu.pipeline_mode<synchronous>, transform_indices = @transform_8, window_bounds = array<i64: 32, 64>}, {pipeline_mode = #tpu.pipeline_mode<synchronous>, transform_indices = @transform_9, window_bounds = array<i64: 1, 64>}, {pipeline_mode = #tpu.pipeline_mode<synchronous>, transform_indices = @transform_10, window_bounds = array<i64: 32, 64>}, {pipeline_mode = #tpu.pipeline_mode<synchronous>, transform_indices = @transform_11, window_bounds = array<i64: 1, 64>}, {pipeline_mode = #tpu.pipeline_mode<synchronous>, transform_indices = @transform_12, window_bounds = array<i64: 4, 32, 32>}, {pipeline_mode = #tpu.pipeline_mode<synchronous>, transform_indices = @transform_13, window_bounds = array<i64: 4, 1, 32>}, {pipeline_mode = #tpu.pipeline_mode<synchronous>, transform_indices = @transform_14, window_bounds = array<i64: 4, 32, 32>}, {pipeline_mode = #tpu.pipeline_mode<synchronous>, transform_indices = @transform_15, window_bounds = array<i64: 4, 1, 32>}, {transform_indices = @transform_16, window_bounds = array<i64: 1, 8, 32>}, {transform_indices = @transform_17, window_bounds = array<i64: 1, 4, 8, 8>}]} {
    %c0 = arith.constant 0 : index
    %c0_0 = arith.constant 0 : index
    %c0_1 = arith.constant 0 : index
    %0 = vector.load %arg1[%c0, %c0_0, %c0_1] : memref<1x8x32xf32, #tpu.memory_space<vmem>>, vector<1x8x32xf32>
    %1 = vector.shape_cast %0 : vector<1x8x32xf32> to vector<8x32xf32>
    %c0_2 = arith.constant 0 : index
    %c0_3 = arith.constant 0 : index
    %c0_4 = arith.constant 0 : index
    %2 = vector.load %arg2[%c0_2, %c0_3, %c0_4] : memref<1x8x32xf32, #tpu.memory_space<vmem>>, vector<1x8x32xf32>
    %3 = vector.shape_cast %2 : vector<1x8x32xf32> to vector<8x32xf32>
    %4 = arith.truncf %3 : vector<8x32xf32> to vector<8x32xbf16>
    %c0_5 = arith.constant 0 : index
    %c0_6 = arith.constant 0 : index
    %c0_7 = arith.constant 0 : index
    %5 = vector.load %arg3[%c0_5, %c0_6, %c0_7] : memref<1x8x32xf32, #tpu.memory_space<vmem>>, vector<1x8x32xf32>
    %6 = vector.shape_cast %5 : vector<1x8x32xf32> to vector<8x32xf32>
    %7 = arith.truncf %6 : vector<8x32xf32> to vector<8x32xbf16>
    %c0_8 = arith.constant 0 : index
    %c0_9 = arith.constant 0 : index
    %8 = vector.load %arg4[%c0_8, %c0_9] : memref<8x8xf32, #tpu.memory_space<vmem>>, vector<8x8xf32>
    %c0_10 = arith.constant 0 : index
    %c0_11 = arith.constant 0 : index
    %9 = vector.load %arg5[%c0_10, %c0_11] : memref<32x64xbf16, #tpu.memory_space<vmem>>, vector<32x64xbf16>
    %cst = arith.constant dense<0.000000e+00> : vector<8x64xf32>
    %10 = tpu.matmul %4, %9, %cst {dimension_numbers = #tpu.dot_dimension_numbers<[1], [0], [0], [1], [0, 0, 1, 1], [], []>} : vector<8x32xbf16>, vector<32x64xbf16>, vector<8x64xf32> -> vector<8x64xf32>
    %c0_12 = arith.constant 0 : index
    %c0_13 = arith.constant 0 : index
    %11 = vector.load %arg6[%c0_12, %c0_13] : memref<1x64xf32, #tpu.memory_space<vmem>>, vector<1x64xf32>
    %12 = vector.broadcast %11 : vector<1x64xf32> to vector<8x64xf32>
    %13 = arith.addf %10, %12 : vector<8x64xf32>
    %c0_14 = arith.constant 0 : index
    %c0_15 = arith.constant 0 : index
    %14 = vector.load %arg7[%c0_14, %c0_15] : memref<32x64xbf16, #tpu.memory_space<vmem>>, vector<32x64xbf16>
    %cst_16 = arith.constant dense<0.000000e+00> : vector<8x64xf32>
    %15 = tpu.matmul %4, %14, %cst_16 {dimension_numbers = #tpu.dot_dimension_numbers<[1], [0], [0], [1], [0, 0, 1, 1], [], []>} : vector<8x32xbf16>, vector<32x64xbf16>, vector<8x64xf32> -> vector<8x64xf32>
    %c0_17 = arith.constant 0 : index
    %c0_18 = arith.constant 0 : index
    %16 = vector.load %arg8[%c0_17, %c0_18] : memref<1x64xf32, #tpu.memory_space<vmem>>, vector<1x64xf32>
    %17 = vector.broadcast %16 : vector<1x64xf32> to vector<8x64xf32>
    %18 = arith.addf %15, %17 : vector<8x64xf32>
    %c0_19 = arith.constant 0 : index
    %c0_20 = arith.constant 0 : index
    %19 = vector.load %arg9[%c0_19, %c0_20] : memref<32x64xbf16, #tpu.memory_space<vmem>>, vector<32x64xbf16>
    %cst_21 = arith.constant dense<0.000000e+00> : vector<8x64xf32>
    %20 = tpu.matmul %7, %19, %cst_21 {dimension_numbers = #tpu.dot_dimension_numbers<[1], [0], [0], [1], [0, 0, 1, 1], [], []>} : vector<8x32xbf16>, vector<32x64xbf16>, vector<8x64xf32> -> vector<8x64xf32>
    %c0_22 = arith.constant 0 : index
    %c0_23 = arith.constant 0 : index
    %21 = vector.load %arg10[%c0_22, %c0_23] : memref<1x64xf32, #tpu.memory_space<vmem>>, vector<1x64xf32>
    %22 = vector.broadcast %21 : vector<1x64xf32> to vector<8x64xf32>
    %23 = arith.addf %20, %22 : vector<8x64xf32>
    %c0_24 = arith.constant 0 : index
    %c0_25 = arith.constant 0 : index
    %24 = vector.load %arg11[%c0_24, %c0_25] : memref<32x64xbf16, #tpu.memory_space<vmem>>, vector<32x64xbf16>
    %cst_26 = arith.constant dense<0.000000e+00> : vector<8x64xf32>
    %25 = tpu.matmul %7, %24, %cst_26 {dimension_numbers = #tpu.dot_dimension_numbers<[1], [0], [0], [1], [0, 0, 1, 1], [], []>} : vector<8x32xbf16>, vector<32x64xbf16>, vector<8x64xf32> -> vector<8x64xf32>
    %c0_27 = arith.constant 0 : index
    %c0_28 = arith.constant 0 : index
    %26 = vector.load %arg12[%c0_27, %c0_28] : memref<1x64xf32, #tpu.memory_space<vmem>>, vector<1x64xf32>
    %27 = vector.broadcast %26 : vector<1x64xf32> to vector<8x64xf32>
    %28 = arith.addf %25, %27 : vector<8x64xf32>
    %29 = vector.extract_strided_slice %13 {offsets = [0, 0], sizes = [8, 32], strides = [1, 1]} : vector<8x64xf32> to vector<8x32xf32>
    %30 = vector.extract_strided_slice %18 {offsets = [0, 0], sizes = [8, 32], strides = [1, 1]} : vector<8x64xf32> to vector<8x32xf32>
    %31 = arith.truncf %1 : vector<8x32xf32> to vector<8x32xbf16>
    %c0_29 = arith.constant 0 : index
    %c0_30 = arith.constant 0 : index
    %c0_31 = arith.constant 0 : index
    %32 = vector.load %arg13[%c0_29, %c0_30, %c0_31] : memref<4x32x32xbf16, #tpu.memory_space<vmem>>, vector<1x32x32xbf16>
    %33 = vector.shape_cast %32 : vector<1x32x32xbf16> to vector<32x32xbf16>
    %cst_32 = arith.constant dense<0.000000e+00> : vector<8x32xf32>
    %34 = tpu.matmul %31, %33, %cst_32 {dimension_numbers = #tpu.dot_dimension_numbers<[1], [0], [0], [1], [0, 0, 1, 1], [], []>} : vector<8x32xbf16>, vector<32x32xbf16>, vector<8x32xf32> -> vector<8x32xf32>
    %c0_33 = arith.constant 0 : index
    %c0_34 = arith.constant 0 : index
    %c0_35 = arith.constant 0 : index
    %35 = vector.load %arg14[%c0_33, %c0_34, %c0_35] : memref<4x1x32xf32, #tpu.memory_space<vmem>>, vector<1x1x32xf32>
    %36 = vector.shape_cast %35 : vector<1x1x32xf32> to vector<1x32xf32>
    %37 = vector.broadcast %36 : vector<1x32xf32> to vector<8x32xf32>
    %38 = arith.addf %34, %37 : vector<8x32xf32>
    %39 = vector.extract_strided_slice %38 {offsets = [0, 0], sizes = [8, 8], strides = [1, 1]} : vector<8x32xf32> to vector<8x8xf32>
    %40 = vector.extract_strided_slice %29 {offsets = [0, 0], sizes = [8, 8], strides = [1, 1]} : vector<8x32xf32> to vector<8x8xf32>
    %41 = vector.extract_strided_slice %30 {offsets = [0, 0], sizes = [8, 8], strides = [1, 1]} : vector<8x32xf32> to vector<8x8xf32>
    %cst_36 = arith.constant dense<0.000000e+00> : vector<8x8xf32>
    %42 = tpu.matmul %39, %40, %cst_36 {dimension_numbers = #tpu.dot_dimension_numbers<[1], [1], [0], [0], [0, 0, 1, 0], [], []>} : vector<8x8xf32>, vector<8x8xf32>, vector<8x8xf32> -> vector<8x8xf32>
    %cst_37 = arith.constant 0.353553385 : f32
    %43 = vector.broadcast %cst_37 : f32 to vector<8x8xf32>
    %44 = arith.mulf %42, %43 : vector<8x8xf32>
    %45 = arith.addf %44, %8 : vector<8x8xf32>
    %cst_38 = arith.constant dense<0xFF800000> : vector<8xf32>
    %46 = vector.multi_reduction <maximumf>, %45, %cst_38 [1] : vector<8x8xf32> to vector<8xf32>
    %47 = vector.shape_cast %46 : vector<8xf32> to vector<8x1xf32>
    %48 = vector.broadcast %47 : vector<8x1xf32> to vector<8x8xf32>
    %49 = arith.subf %45, %48 : vector<8x8xf32>
    %50 = math.exp %49 : vector<8x8xf32>
    %cst_39 = arith.constant dense<0.000000e+00> : vector<8xf32>
    %51 = vector.multi_reduction <add>, %50, %cst_39 [1] : vector<8x8xf32> to vector<8xf32>
    %52 = vector.shape_cast %51 : vector<8xf32> to vector<8x1xf32>
    %53 = tpu.reciprocal %52 {approx = true} : vector<8x1xf32> -> vector<8x1xf32>
    %54 = vector.broadcast %53 : vector<8x1xf32> to vector<8x8xf32>
    %55 = arith.mulf %50, %54 : vector<8x8xf32>
    %cst_40 = arith.constant dense<0.000000e+00> : vector<8x8xf32>
    %56 = tpu.matmul %55, %41, %cst_40 {dimension_numbers = #tpu.dot_dimension_numbers<[1], [0], [0], [1], [0, 0, 1, 1], [], []>} : vector<8x8xf32>, vector<8x8xf32>, vector<8x8xf32> -> vector<8x8xf32>
    %c0_41 = arith.constant 0 : index
    %c0_42 = arith.constant 0 : index
    %57 = vector.load %arg19[%c0_41, %c0_42] : memref<8x32xf32, #tpu.memory_space<vmem>>, vector<8x8xf32>
    tpu.vector_store %arg19[%c0_41, %c0_42], %56 {strides = array<i32>} : memref<8x32xf32, #tpu.memory_space<vmem>>, vector<8x8xf32>,
    %58 = vector.extract_strided_slice %38 {offsets = [0, 8], sizes = [8, 8], strides = [1, 1]} : vector<8x32xf32> to vector<8x8xf32>
    %59 = vector.extract_strided_slice %29 {offsets = [0, 8], sizes = [8, 8], strides = [1, 1]} : vector<8x32xf32> to vector<8x8xf32>
    %60 = vector.extract_strided_slice %30 {offsets = [0, 8], sizes = [8, 8], strides = [1, 1]} : vector<8x32xf32> to vector<8x8xf32>
    %cst_43 = arith.constant dense<0.000000e+00> : vector<8x8xf32>
    %61 = tpu.matmul %58, %59, %cst_43 {dimension_numbers = #tpu.dot_dimension_numbers<[1], [1], [0], [0], [0, 0, 1, 0], [], []>} : vector<8x8xf32>, vector<8x8xf32>, vector<8x8xf32> -> vector<8x8xf32>
    %cst_44 = arith.constant 0.353553385 : f32
    %62 = vector.broadcast %cst_44 : f32 to vector<8x8xf32>
    %63 = arith.mulf %61, %62 : vector<8x8xf32>
    %64 = arith.addf %63, %8 : vector<8x8xf32>
    %cst_45 = arith.constant dense<0xFF800000> : vector<8xf32>
    %65 = vector.multi_reduction <maximumf>, %64, %cst_45 [1] : vector<8x8xf32> to vector<8xf32>
    %66 = vector.shape_cast %65 : vector<8xf32> to vector<8x1xf32>
    %67 = vector.broadcast %66 : vector<8x1xf32> to vector<8x8xf32>
    %68 = arith.subf %64, %67 : vector<8x8xf32>
    %69 = math.exp %68 : vector<8x8xf32>
    %cst_46 = arith.constant dense<0.000000e+00> : vector<8xf32>
    %70 = vector.multi_reduction <add>, %69, %cst_46 [1] : vector<8x8xf32> to vector<8xf32>
    %71 = vector.shape_cast %70 : vector<8xf32> to vector<8x1xf32>
    %72 = tpu.reciprocal %71 {approx = true} : vector<8x1xf32> -> vector<8x1xf32>
    %73 = vector.broadcast %72 : vector<8x1xf32> to vector<8x8xf32>
    %74 = arith.mulf %69, %73 : vector<8x8xf32>
    %cst_47 = arith.constant dense<0.000000e+00> : vector<8x8xf32>
    %75 = tpu.matmul %74, %60, %cst_47 {dimension_numbers = #tpu.dot_dimension_numbers<[1], [0], [0], [1], [0, 0, 1, 1], [], []>} : vector<8x8xf32>, vector<8x8xf32>, vector<8x8xf32> -> vector<8x8xf32>
    %c0_48 = arith.constant 0 : index
    %c8 = arith.constant 8 : index
    %76 = vector.load %arg19[%c0_48, %c8] : memref<8x32xf32, #tpu.memory_space<vmem>>, vector<8x8xf32>
    tpu.vector_store %arg19[%c0_48, %c8], %75 {strides = array<i32>} : memref<8x32xf32, #tpu.memory_space<vmem>>, vector<8x8xf32>,
    %77 = vector.extract_strided_slice %38 {offsets = [0, 16], sizes = [8, 8], strides = [1, 1]} : vector<8x32xf32> to vector<8x8xf32>
    %78 = vector.extract_strided_slice %29 {offsets = [0, 16], sizes = [8, 8], strides = [1, 1]} : vector<8x32xf32> to vector<8x8xf32>
    %79 = vector.extract_strided_slice %30 {offsets = [0, 16], sizes = [8, 8], strides = [1, 1]} : vector<8x32xf32> to vector<8x8xf32>
    %cst_49 = arith.constant dense<0.000000e+00> : vector<8x8xf32>
    %80 = tpu.matmul %77, %78, %cst_49 {dimension_numbers = #tpu.dot_dimension_numbers<[1], [1], [0], [0], [0, 0, 1, 0], [], []>} : vector<8x8xf32>, vector<8x8xf32>, vector<8x8xf32> -> vector<8x8xf32>
    %cst_50 = arith.constant 0.353553385 : f32
    %81 = vector.broadcast %cst_50 : f32 to vector<8x8xf32>
    %82 = arith.mulf %80, %81 : vector<8x8xf32>
    %83 = arith.addf %82, %8 : vector<8x8xf32>
    %cst_51 = arith.constant dense<0xFF800000> : vector<8xf32>
    %84 = vector.multi_reduction <maximumf>, %83, %cst_51 [1] : vector<8x8xf32> to vector<8xf32>
    %85 = vector.shape_cast %84 : vector<8xf32> to vector<8x1xf32>
    %86 = vector.broadcast %85 : vector<8x1xf32> to vector<8x8xf32>
    %87 = arith.subf %83, %86 : vector<8x8xf32>
    %88 = math.exp %87 : vector<8x8xf32>
    %cst_52 = arith.constant dense<0.000000e+00> : vector<8xf32>
    %89 = vector.multi_reduction <add>, %88, %cst_52 [1] : vector<8x8xf32> to vector<8xf32>
    %90 = vector.shape_cast %89 : vector<8xf32> to vector<8x1xf32>
    %91 = tpu.reciprocal %90 {approx = true} : vector<8x1xf32> -> vector<8x1xf32>
    %92 = vector.broadcast %91 : vector<8x1xf32> to vector<8x8xf32>
    %93 = arith.mulf %88, %92 : vector<8x8xf32>
    %cst_53 = arith.constant dense<0.000000e+00> : vector<8x8xf32>
    %94 = tpu.matmul %93, %79, %cst_53 {dimension_numbers = #tpu.dot_dimension_numbers<[1], [0], [0], [1], [0, 0, 1, 1], [], []>} : vector<8x8xf32>, vector<8x8xf32>, vector<8x8xf32> -> vector<8x8xf32>
    %c0_54 = arith.constant 0 : index
    %c16 = arith.constant 16 : index
    %95 = vector.load %arg19[%c0_54, %c16] : memref<8x32xf32, #tpu.memory_space<vmem>>, vector<8x8xf32>
    tpu.vector_store %arg19[%c0_54, %c16], %94 {strides = array<i32>} : memref<8x32xf32, #tpu.memory_space<vmem>>, vector<8x8xf32>,
    %96 = vector.extract_strided_slice %38 {offsets = [0, 24], sizes = [8, 8], strides = [1, 1]} : vector<8x32xf32> to vector<8x8xf32>
    %97 = vector.extract_strided_slice %29 {offsets = [0, 24], sizes = [8, 8], strides = [1, 1]} : vector<8x32xf32> to vector<8x8xf32>
    %98 = vector.extract_strided_slice %30 {offsets = [0, 24], sizes = [8, 8], strides = [1, 1]} : vector<8x32xf32> to vector<8x8xf32>
    %cst_55 = arith.constant dense<0.000000e+00> : vector<8x8xf32>
    %99 = tpu.matmul %96, %97, %cst_55 {dimension_numbers = #tpu.dot_dimension_numbers<[1], [1], [0], [0], [0, 0, 1, 0], [], []>} : vector<8x8xf32>, vector<8x8xf32>, vector<8x8xf32> -> vector<8x8xf32>
    %cst_56 = arith.constant 0.353553385 : f32
    %100 = vector.broadcast %cst_56 : f32 to vector<8x8xf32>
    %101 = arith.mulf %99, %100 : vector<8x8xf32>
    %102 = arith.addf %101, %8 : vector<8x8xf32>
    %cst_57 = arith.constant dense<0xFF800000> : vector<8xf32>
    %103 = vector.multi_reduction <maximumf>, %102, %cst_57 [1] : vector<8x8xf32> to vector<8xf32>
    %104 = vector.shape_cast %103 : vector<8xf32> to vector<8x1xf32>
    %105 = vector.broadcast %104 : vector<8x1xf32> to vector<8x8xf32>
    %106 = arith.subf %102, %105 : vector<8x8xf32>
    %107 = math.exp %106 : vector<8x8xf32>
    %cst_58 = arith.constant dense<0.000000e+00> : vector<8xf32>
    %108 = vector.multi_reduction <add>, %107, %cst_58 [1] : vector<8x8xf32> to vector<8xf32>
    %109 = vector.shape_cast %108 : vector<8xf32> to vector<8x1xf32>
    %110 = tpu.reciprocal %109 {approx = true} : vector<8x1xf32> -> vector<8x1xf32>
    %111 = vector.broadcast %110 : vector<8x1xf32> to vector<8x8xf32>
    %112 = arith.mulf %107, %111 : vector<8x8xf32>
    %cst_59 = arith.constant dense<0.000000e+00> : vector<8x8xf32>
    %113 = tpu.matmul %112, %98, %cst_59 {dimension_numbers = #tpu.dot_dimension_numbers<[1], [0], [0], [1], [0, 0, 1, 1], [], []>} : vector<8x8xf32>, vector<8x8xf32>, vector<8x8xf32> -> vector<8x8xf32>
    %c0_60 = arith.constant 0 : index
    %c24 = arith.constant 24 : index
    %114 = vector.load %arg19[%c0_60, %c24] : memref<8x32xf32, #tpu.memory_space<vmem>>, vector<8x8xf32>
    tpu.vector_store %arg19[%c0_60, %c24], %113 {strides = array<i32>} : memref<8x32xf32, #tpu.memory_space<vmem>>, vector<8x8xf32>,
    %c0_61 = arith.constant 0 : index
    %c0_62 = arith.constant 0 : index
    %115 = vector.load %arg19[%c0_61, %c0_62] : memref<8x32xf32, #tpu.memory_space<vmem>>, vector<8x32xf32>
    %116 = arith.truncf %115 : vector<8x32xf32> to vector<8x32xbf16>
    %c0_63 = arith.constant 0 : index
    %c0_64 = arith.constant 0 : index
    %c0_65 = arith.constant 0 : index
    %117 = vector.load %arg15[%c0_63, %c0_64, %c0_65] : memref<4x32x32xbf16, #tpu.memory_space<vmem>>, vector<1x32x32xbf16>
    %118 = vector.shape_cast %117 : vector<1x32x32xbf16> to vector<32x32xbf16>
    %cst_66 = arith.constant dense<0.000000e+00> : vector<8x32xf32>
    %119 = tpu.matmul %116, %118, %cst_66 {dimension_numbers = #tpu.dot_dimension_numbers<[1], [0], [0], [1], [0, 0, 1, 1], [], []>} : vector<8x32xbf16>, vector<32x32xbf16>, vector<8x32xf32> -> vector<8x32xf32>
    %120 = arith.addf %1, %119 : vector<8x32xf32>
    %c0_67 = arith.constant 0 : index
    %c0_68 = arith.constant 0 : index
    %c0_69 = arith.constant 0 : index
    %121 = vector.load %arg16[%c0_67, %c0_68, %c0_69] : memref<4x1x32xf32, #tpu.memory_space<vmem>>, vector<1x1x32xf32>
    %122 = vector.shape_cast %121 : vector<1x1x32xf32> to vector<1x32xf32>
    %123 = vector.broadcast %122 : vector<1x32xf32> to vector<8x32xf32>
    %124 = arith.addf %120, %123 : vector<8x32xf32>
    %125 = vector.extract_strided_slice %23 {offsets = [0, 0], sizes = [8, 32], strides = [1, 1]} : vector<8x64xf32> to vector<8x32xf32>
    %126 = vector.extract_strided_slice %28 {offsets = [0, 0], sizes = [8, 32], strides = [1, 1]} : vector<8x64xf32> to vector<8x32xf32>
    %127 = arith.truncf %124 : vector<8x32xf32> to vector<8x32xbf16>
    %c1 = arith.constant 1 : index
    %c0_70 = arith.constant 0 : index
    %c0_71 = arith.constant 0 : index
    %128 = vector.load %arg13[%c1, %c0_70, %c0_71] : memref<4x32x32xbf16, #tpu.memory_space<vmem>>, vector<1x32x32xbf16>
    %129 = vector.shape_cast %128 : vector<1x32x32xbf16> to vector<32x32xbf16>
    %cst_72 = arith.constant dense<0.000000e+00> : vector<8x32xf32>
    %130 = tpu.matmul %127, %129, %cst_72 {dimension_numbers = #tpu.dot_dimension_numbers<[1], [0], [0], [1], [0, 0, 1, 1], [], []>} : vector<8x32xbf16>, vector<32x32xbf16>, vector<8x32xf32> -> vector<8x32xf32>
    %c1_73 = arith.constant 1 : index
    %c0_74 = arith.constant 0 : index
    %c0_75 = arith.constant 0 : index
    %131 = vector.load %arg14[%c1_73, %c0_74, %c0_75] : memref<4x1x32xf32, #tpu.memory_space<vmem>>, vector<1x1x32xf32>
    %132 = vector.shape_cast %131 : vector<1x1x32xf32> to vector<1x32xf32>
    %133 = vector.broadcast %132 : vector<1x32xf32> to vector<8x32xf32>
    %134 = arith.addf %130, %133 : vector<8x32xf32>
    %135 = vector.extract_strided_slice %134 {offsets = [0, 0], sizes = [8, 8], strides = [1, 1]} : vector<8x32xf32> to vector<8x8xf32>
    %136 = vector.extract_strided_slice %125 {offsets = [0, 0], sizes = [8, 8], strides = [1, 1]} : vector<8x32xf32> to vector<8x8xf32>
    %137 = vector.extract_strided_slice %126 {offsets = [0, 0], sizes = [8, 8], strides = [1, 1]} : vector<8x32xf32> to vector<8x8xf32>
    %cst_76 = arith.constant dense<0.000000e+00> : vector<8x8xf32>
    %138 = tpu.matmul %135, %136, %cst_76 {dimension_numbers = #tpu.dot_dimension_numbers<[1], [1], [0], [0], [0, 0, 1, 0], [], []>} : vector<8x8xf32>, vector<8x8xf32>, vector<8x8xf32> -> vector<8x8xf32>
    %cst_77 = arith.constant 0.353553385 : f32
    %139 = vector.broadcast %cst_77 : f32 to vector<8x8xf32>
    %140 = arith.mulf %138, %139 : vector<8x8xf32>
    %cst_78 = arith.constant dense<0xFF800000> : vector<8xf32>
    %141 = vector.multi_reduction <maximumf>, %140, %cst_78 [1] : vector<8x8xf32> to vector<8xf32>
    %142 = vector.shape_cast %141 : vector<8xf32> to vector<8x1xf32>
    %143 = vector.broadcast %142 : vector<8x1xf32> to vector<8x8xf32>
    %144 = arith.subf %140, %143 : vector<8x8xf32>
    %145 = math.exp %144 : vector<8x8xf32>
    %cst_79 = arith.constant dense<0.000000e+00> : vector<8xf32>
    %146 = vector.multi_reduction <add>, %145, %cst_79 [1] : vector<8x8xf32> to vector<8xf32>
    %147 = vector.shape_cast %146 : vector<8xf32> to vector<8x1xf32>
    %148 = tpu.reciprocal %147 {approx = true} : vector<8x1xf32> -> vector<8x1xf32>
    %149 = vector.broadcast %148 : vector<8x1xf32> to vector<8x8xf32>
    %150 = arith.mulf %145, %149 : vector<8x8xf32>
    %cst_80 = arith.constant dense<0.000000e+00> : vector<8x8xf32>
    %151 = tpu.matmul %150, %137, %cst_80 {dimension_numbers = #tpu.dot_dimension_numbers<[1], [0], [0], [1], [0, 0, 1, 1], [], []>} : vector<8x8xf32>, vector<8x8xf32>, vector<8x8xf32> -> vector<8x8xf32>
    %c0_81 = arith.constant 0 : index
    %c0_82 = arith.constant 0 : index
    %152 = vector.load %arg19[%c0_81, %c0_82] : memref<8x32xf32, #tpu.memory_space<vmem>>, vector<8x8xf32>
    tpu.vector_store %arg19[%c0_81, %c0_82], %151 {strides = array<i32>} : memref<8x32xf32, #tpu.memory_space<vmem>>, vector<8x8xf32>,
    %153 = vector.extract_strided_slice %134 {offsets = [0, 8], sizes = [8, 8], strides = [1, 1]} : vector<8x32xf32> to vector<8x8xf32>
    %154 = vector.extract_strided_slice %125 {offsets = [0, 8], sizes = [8, 8], strides = [1, 1]} : vector<8x32xf32> to vector<8x8xf32>
    %155 = vector.extract_strided_slice %126 {offsets = [0, 8], sizes = [8, 8], strides = [1, 1]} : vector<8x32xf32> to vector<8x8xf32>
    %cst_83 = arith.constant dense<0.000000e+00> : vector<8x8xf32>
    %156 = tpu.matmul %153, %154, %cst_83 {dimension_numbers = #tpu.dot_dimension_numbers<[1], [1], [0], [0], [0, 0, 1, 0], [], []>} : vector<8x8xf32>, vector<8x8xf32>, vector<8x8xf32> -> vector<8x8xf32>
    %cst_84 = arith.constant 0.353553385 : f32
    %157 = vector.broadcast %cst_84 : f32 to vector<8x8xf32>
    %158 = arith.mulf %156, %157 : vector<8x8xf32>
    %cst_85 = arith.constant dense<0xFF800000> : vector<8xf32>
    %159 = vector.multi_reduction <maximumf>, %158, %cst_85 [1] : vector<8x8xf32> to vector<8xf32>
    %160 = vector.shape_cast %159 : vector<8xf32> to vector<8x1xf32>
    %161 = vector.broadcast %160 : vector<8x1xf32> to vector<8x8xf32>
    %162 = arith.subf %158, %161 : vector<8x8xf32>
    %163 = math.exp %162 : vector<8x8xf32>
    %cst_86 = arith.constant dense<0.000000e+00> : vector<8xf32>
    %164 = vector.multi_reduction <add>, %163, %cst_86 [1] : vector<8x8xf32> to vector<8xf32>
    %165 = vector.shape_cast %164 : vector<8xf32> to vector<8x1xf32>
    %166 = tpu.reciprocal %165 {approx = true} : vector<8x1xf32> -> vector<8x1xf32>
    %167 = vector.broadcast %166 : vector<8x1xf32> to vector<8x8xf32>
    %168 = arith.mulf %163, %167 : vector<8x8xf32>
    %cst_87 = arith.constant dense<0.000000e+00> : vector<8x8xf32>
    %169 = tpu.matmul %168, %155, %cst_87 {dimension_numbers = #tpu.dot_dimension_numbers<[1], [0], [0], [1], [0, 0, 1, 1], [], []>} : vector<8x8xf32>, vector<8x8xf32>, vector<8x8xf32> -> vector<8x8xf32>
    %c0_88 = arith.constant 0 : index
    %c8_89 = arith.constant 8 : index
    %170 = vector.load %arg19[%c0_88, %c8_89] : memref<8x32xf32, #tpu.memory_space<vmem>>, vector<8x8xf32>
    tpu.vector_store %arg19[%c0_88, %c8_89], %169 {strides = array<i32>} : memref<8x32xf32, #tpu.memory_space<vmem>>, vector<8x8xf32>,
    %171 = vector.extract_strided_slice %134 {offsets = [0, 16], sizes = [8, 8], strides = [1, 1]} : vector<8x32xf32> to vector<8x8xf32>
    %172 = vector.extract_strided_slice %125 {offsets = [0, 16], sizes = [8, 8], strides = [1, 1]} : vector<8x32xf32> to vector<8x8xf32>
    %173 = vector.extract_strided_slice %126 {offsets = [0, 16], sizes = [8, 8], strides = [1, 1]} : vector<8x32xf32> to vector<8x8xf32>
    %cst_90 = arith.constant dense<0.000000e+00> : vector<8x8xf32>
    %174 = tpu.matmul %171, %172, %cst_90 {dimension_numbers = #tpu.dot_dimension_numbers<[1], [1], [0], [0], [0, 0, 1, 0], [], []>} : vector<8x8xf32>, vector<8x8xf32>, vector<8x8xf32> -> vector<8x8xf32>
    %cst_91 = arith.constant 0.353553385 : f32
    %175 = vector.broadcast %cst_91 : f32 to vector<8x8xf32>
    %176 = arith.mulf %174, %175 : vector<8x8xf32>
    %cst_92 = arith.constant dense<0xFF800000> : vector<8xf32>
    %177 = vector.multi_reduction <maximumf>, %176, %cst_92 [1] : vector<8x8xf32> to vector<8xf32>
    %178 = vector.shape_cast %177 : vector<8xf32> to vector<8x1xf32>
    %179 = vector.broadcast %178 : vector<8x1xf32> to vector<8x8xf32>
    %180 = arith.subf %176, %179 : vector<8x8xf32>
    %181 = math.exp %180 : vector<8x8xf32>
    %cst_93 = arith.constant dense<0.000000e+00> : vector<8xf32>
    %182 = vector.multi_reduction <add>, %181, %cst_93 [1] : vector<8x8xf32> to vector<8xf32>
    %183 = vector.shape_cast %182 : vector<8xf32> to vector<8x1xf32>
    %184 = tpu.reciprocal %183 {approx = true} : vector<8x1xf32> -> vector<8x1xf32>
    %185 = vector.broadcast %184 : vector<8x1xf32> to vector<8x8xf32>
    %186 = arith.mulf %181, %185 : vector<8x8xf32>
    %cst_94 = arith.constant dense<0.000000e+00> : vector<8x8xf32>
    %187 = tpu.matmul %186, %173, %cst_94 {dimension_numbers = #tpu.dot_dimension_numbers<[1], [0], [0], [1], [0, 0, 1, 1], [], []>} : vector<8x8xf32>, vector<8x8xf32>, vector<8x8xf32> -> vector<8x8xf32>
    %c0_95 = arith.constant 0 : index
    %c16_96 = arith.constant 16 : index
    %188 = vector.load %arg19[%c0_95, %c16_96] : memref<8x32xf32, #tpu.memory_space<vmem>>, vector<8x8xf32>
    tpu.vector_store %arg19[%c0_95, %c16_96], %187 {strides = array<i32>} : memref<8x32xf32, #tpu.memory_space<vmem>>, vector<8x8xf32>,
    %189 = vector.extract_strided_slice %134 {offsets = [0, 24], sizes = [8, 8], strides = [1, 1]} : vector<8x32xf32> to vector<8x8xf32>
    %190 = vector.extract_strided_slice %125 {offsets = [0, 24], sizes = [8, 8], strides = [1, 1]} : vector<8x32xf32> to vector<8x8xf32>
    %191 = vector.extract_strided_slice %126 {offsets = [0, 24], sizes = [8, 8], strides = [1, 1]} : vector<8x32xf32> to vector<8x8xf32>
    %cst_97 = arith.constant dense<0.000000e+00> : vector<8x8xf32>
    %192 = tpu.matmul %189, %190, %cst_97 {dimension_numbers = #tpu.dot_dimension_numbers<[1], [1], [0], [0], [0, 0, 1, 0], [], []>} : vector<8x8xf32>, vector<8x8xf32>, vector<8x8xf32> -> vector<8x8xf32>
    %cst_98 = arith.constant 0.353553385 : f32
    %193 = vector.broadcast %cst_98 : f32 to vector<8x8xf32>
    %194 = arith.mulf %192, %193 : vector<8x8xf32>
    %cst_99 = arith.constant dense<0xFF800000> : vector<8xf32>
    %195 = vector.multi_reduction <maximumf>, %194, %cst_99 [1] : vector<8x8xf32> to vector<8xf32>
    %196 = vector.shape_cast %195 : vector<8xf32> to vector<8x1xf32>
    %197 = vector.broadcast %196 : vector<8x1xf32> to vector<8x8xf32>
    %198 = arith.subf %194, %197 : vector<8x8xf32>
    %199 = math.exp %198 : vector<8x8xf32>
    %cst_100 = arith.constant dense<0.000000e+00> : vector<8xf32>
    %200 = vector.multi_reduction <add>, %199, %cst_100 [1] : vector<8x8xf32> to vector<8xf32>
    %201 = vector.shape_cast %200 : vector<8xf32> to vector<8x1xf32>
    %202 = tpu.reciprocal %201 {approx = true} : vector<8x1xf32> -> vector<8x1xf32>
    %203 = vector.broadcast %202 : vector<8x1xf32> to vector<8x8xf32>
    %204 = arith.mulf %199, %203 : vector<8x8xf32>
    %cst_101 = arith.constant dense<0.000000e+00> : vector<8x8xf32>
    %205 = tpu.matmul %204, %191, %cst_101 {dimension_numbers = #tpu.dot_dimension_numbers<[1], [0], [0], [1], [0, 0, 1, 1], [], []>} : vector<8x8xf32>, vector<8x8xf32>, vector<8x8xf32> -> vector<8x8xf32>
    %c0_102 = arith.constant 0 : index
    %c24_103 = arith.constant 24 : index
    %206 = vector.load %arg19[%c0_102, %c24_103] : memref<8x32xf32, #tpu.memory_space<vmem>>, vector<8x8xf32>
    tpu.vector_store %arg19[%c0_102, %c24_103], %205 {strides = array<i32>} : memref<8x32xf32, #tpu.memory_space<vmem>>, vector<8x8xf32>,
    %c0_104 = arith.constant 0 : index
    %c0_105 = arith.constant 0 : index
    %207 = vector.load %arg19[%c0_104, %c0_105] : memref<8x32xf32, #tpu.memory_space<vmem>>, vector<8x32xf32>
    %208 = arith.truncf %207 : vector<8x32xf32> to vector<8x32xbf16>
    %c1_106 = arith.constant 1 : index
    %c0_107 = arith.constant 0 : index
    %c0_108 = arith.constant 0 : index
    %209 = vector.load %arg15[%c1_106, %c0_107, %c0_108] : memref<4x32x32xbf16, #tpu.memory_space<vmem>>, vector<1x32x32xbf16>
    %210 = vector.shape_cast %209 : vector<1x32x32xbf16> to vector<32x32xbf16>
    %cst_109 = arith.constant dense<0.000000e+00> : vector<8x32xf32>
    %211 = tpu.matmul %208, %210, %cst_109 {dimension_numbers = #tpu.dot_dimension_numbers<[1], [0], [0], [1], [0, 0, 1, 1], [], []>} : vector<8x32xbf16>, vector<32x32xbf16>, vector<8x32xf32> -> vector<8x32xf32>
    %212 = arith.addf %124, %211 : vector<8x32xf32>
    %c1_110 = arith.constant 1 : index
    %c0_111 = arith.constant 0 : index
    %c0_112 = arith.constant 0 : index
    %213 = vector.load %arg16[%c1_110, %c0_111, %c0_112] : memref<4x1x32xf32, #tpu.memory_space<vmem>>, vector<1x1x32xf32>
    %214 = vector.shape_cast %213 : vector<1x1x32xf32> to vector<1x32xf32>
    %215 = vector.broadcast %214 : vector<1x32xf32> to vector<8x32xf32>
    %216 = arith.addf %212, %215 : vector<8x32xf32>
    %217 = vector.extract_strided_slice %13 {offsets = [0, 32], sizes = [8, 32], strides = [1, 1]} : vector<8x64xf32> to vector<8x32xf32>
    %218 = vector.extract_strided_slice %18 {offsets = [0, 32], sizes = [8, 32], strides = [1, 1]} : vector<8x64xf32> to vector<8x32xf32>
    %219 = arith.truncf %216 : vector<8x32xf32> to vector<8x32xbf16>
    %c2 = arith.constant 2 : index
    %c0_113 = arith.constant 0 : index
    %c0_114 = arith.constant 0 : index
    %220 = vector.load %arg13[%c2, %c0_113, %c0_114] : memref<4x32x32xbf16, #tpu.memory_space<vmem>>, vector<1x32x32xbf16>
    %221 = vector.shape_cast %220 : vector<1x32x32xbf16> to vector<32x32xbf16>
    %cst_115 = arith.constant dense<0.000000e+00> : vector<8x32xf32>
    %222 = tpu.matmul %219, %221, %cst_115 {dimension_numbers = #tpu.dot_dimension_numbers<[1], [0], [0], [1], [0, 0, 1, 1], [], []>} : vector<8x32xbf16>, vector<32x32xbf16>, vector<8x32xf32> -> vector<8x32xf32>
    %c2_116 = arith.constant 2 : index
    %c0_117 = arith.constant 0 : index
    %c0_118 = arith.constant 0 : index
    %223 = vector.load %arg14[%c2_116, %c0_117, %c0_118] : memref<4x1x32xf32, #tpu.memory_space<vmem>>, vector<1x1x32xf32>
    %224 = vector.shape_cast %223 : vector<1x1x32xf32> to vector<1x32xf32>
    %225 = vector.broadcast %224 : vector<1x32xf32> to vector<8x32xf32>
    %226 = arith.addf %222, %225 : vector<8x32xf32>
    %227 = vector.extract_strided_slice %226 {offsets = [0, 0], sizes = [8, 8], strides = [1, 1]} : vector<8x32xf32> to vector<8x8xf32>
    %228 = vector.extract_strided_slice %217 {offsets = [0, 0], sizes = [8, 8], strides = [1, 1]} : vector<8x32xf32> to vector<8x8xf32>
    %229 = vector.extract_strided_slice %218 {offsets = [0, 0], sizes = [8, 8], strides = [1, 1]} : vector<8x32xf32> to vector<8x8xf32>
    %cst_119 = arith.constant dense<0.000000e+00> : vector<8x8xf32>
    %230 = tpu.matmul %227, %228, %cst_119 {dimension_numbers = #tpu.dot_dimension_numbers<[1], [1], [0], [0], [0, 0, 1, 0], [], []>} : vector<8x8xf32>, vector<8x8xf32>, vector<8x8xf32> -> vector<8x8xf32>
    %cst_120 = arith.constant 0.353553385 : f32
    %231 = vector.broadcast %cst_120 : f32 to vector<8x8xf32>
    %232 = arith.mulf %230, %231 : vector<8x8xf32>
    %233 = arith.addf %232, %8 : vector<8x8xf32>
    %cst_121 = arith.constant dense<0xFF800000> : vector<8xf32>
    %234 = vector.multi_reduction <maximumf>, %233, %cst_121 [1] : vector<8x8xf32> to vector<8xf32>
    %235 = vector.shape_cast %234 : vector<8xf32> to vector<8x1xf32>
    %236 = vector.broadcast %235 : vector<8x1xf32> to vector<8x8xf32>
    %237 = arith.subf %233, %236 : vector<8x8xf32>
    %238 = math.exp %237 : vector<8x8xf32>
    %cst_122 = arith.constant dense<0.000000e+00> : vector<8xf32>
    %239 = vector.multi_reduction <add>, %238, %cst_122 [1] : vector<8x8xf32> to vector<8xf32>
    %240 = vector.shape_cast %239 : vector<8xf32> to vector<8x1xf32>
    %241 = tpu.reciprocal %240 {approx = true} : vector<8x1xf32> -> vector<8x1xf32>
    %242 = vector.broadcast %241 : vector<8x1xf32> to vector<8x8xf32>
    %243 = arith.mulf %238, %242 : vector<8x8xf32>
    %cst_123 = arith.constant dense<0.000000e+00> : vector<8x8xf32>
    %244 = tpu.matmul %243, %229, %cst_123 {dimension_numbers = #tpu.dot_dimension_numbers<[1], [0], [0], [1], [0, 0, 1, 1], [], []>} : vector<8x8xf32>, vector<8x8xf32>, vector<8x8xf32> -> vector<8x8xf32>
    %c0_124 = arith.constant 0 : index
    %c0_125 = arith.constant 0 : index
    %245 = vector.load %arg19[%c0_124, %c0_125] : memref<8x32xf32, #tpu.memory_space<vmem>>, vector<8x8xf32>
    tpu.vector_store %arg19[%c0_124, %c0_125], %244 {strides = array<i32>} : memref<8x32xf32, #tpu.memory_space<vmem>>, vector<8x8xf32>,
    %246 = vector.extract_strided_slice %226 {offsets = [0, 8], sizes = [8, 8], strides = [1, 1]} : vector<8x32xf32> to vector<8x8xf32>
    %247 = vector.extract_strided_slice %217 {offsets = [0, 8], sizes = [8, 8], strides = [1, 1]} : vector<8x32xf32> to vector<8x8xf32>
    %248 = vector.extract_strided_slice %218 {offsets = [0, 8], sizes = [8, 8], strides = [1, 1]} : vector<8x32xf32> to vector<8x8xf32>
    %cst_126 = arith.constant dense<0.000000e+00> : vector<8x8xf32>
    %249 = tpu.matmul %246, %247, %cst_126 {dimension_numbers = #tpu.dot_dimension_numbers<[1], [1], [0], [0], [0, 0, 1, 0], [], []>} : vector<8x8xf32>, vector<8x8xf32>, vector<8x8xf32> -> vector<8x8xf32>
    %cst_127 = arith.constant 0.353553385 : f32
    %250 = vector.broadcast %cst_127 : f32 to vector<8x8xf32>
    %251 = arith.mulf %249, %250 : vector<8x8xf32>
    %252 = arith.addf %251, %8 : vector<8x8xf32>
    %cst_128 = arith.constant dense<0xFF800000> : vector<8xf32>
    %253 = vector.multi_reduction <maximumf>, %252, %cst_128 [1] : vector<8x8xf32> to vector<8xf32>
    %254 = vector.shape_cast %253 : vector<8xf32> to vector<8x1xf32>
    %255 = vector.broadcast %254 : vector<8x1xf32> to vector<8x8xf32>
    %256 = arith.subf %252, %255 : vector<8x8xf32>
    %257 = math.exp %256 : vector<8x8xf32>
    %cst_129 = arith.constant dense<0.000000e+00> : vector<8xf32>
    %258 = vector.multi_reduction <add>, %257, %cst_129 [1] : vector<8x8xf32> to vector<8xf32>
    %259 = vector.shape_cast %258 : vector<8xf32> to vector<8x1xf32>
    %260 = tpu.reciprocal %259 {approx = true} : vector<8x1xf32> -> vector<8x1xf32>
    %261 = vector.broadcast %260 : vector<8x1xf32> to vector<8x8xf32>
    %262 = arith.mulf %257, %261 : vector<8x8xf32>
    %cst_130 = arith.constant dense<0.000000e+00> : vector<8x8xf32>
    %263 = tpu.matmul %262, %248, %cst_130 {dimension_numbers = #tpu.dot_dimension_numbers<[1], [0], [0], [1], [0, 0, 1, 1], [], []>} : vector<8x8xf32>, vector<8x8xf32>, vector<8x8xf32> -> vector<8x8xf32>
    %c0_131 = arith.constant 0 : index
    %c8_132 = arith.constant 8 : index
    %264 = vector.load %arg19[%c0_131, %c8_132] : memref<8x32xf32, #tpu.memory_space<vmem>>, vector<8x8xf32>
    tpu.vector_store %arg19[%c0_131, %c8_132], %263 {strides = array<i32>} : memref<8x32xf32, #tpu.memory_space<vmem>>, vector<8x8xf32>,
    %265 = vector.extract_strided_slice %226 {offsets = [0, 16], sizes = [8, 8], strides = [1, 1]} : vector<8x32xf32> to vector<8x8xf32>
    %266 = vector.extract_strided_slice %217 {offsets = [0, 16], sizes = [8, 8], strides = [1, 1]} : vector<8x32xf32> to vector<8x8xf32>
    %267 = vector.extract_strided_slice %218 {offsets = [0, 16], sizes = [8, 8], strides = [1, 1]} : vector<8x32xf32> to vector<8x8xf32>
    %cst_133 = arith.constant dense<0.000000e+00> : vector<8x8xf32>
    %268 = tpu.matmul %265, %266, %cst_133 {dimension_numbers = #tpu.dot_dimension_numbers<[1], [1], [0], [0], [0, 0, 1, 0], [], []>} : vector<8x8xf32>, vector<8x8xf32>, vector<8x8xf32> -> vector<8x8xf32>
    %cst_134 = arith.constant 0.353553385 : f32
    %269 = vector.broadcast %cst_134 : f32 to vector<8x8xf32>
    %270 = arith.mulf %268, %269 : vector<8x8xf32>
    %271 = arith.addf %270, %8 : vector<8x8xf32>
    %cst_135 = arith.constant dense<0xFF800000> : vector<8xf32>
    %272 = vector.multi_reduction <maximumf>, %271, %cst_135 [1] : vector<8x8xf32> to vector<8xf32>
    %273 = vector.shape_cast %272 : vector<8xf32> to vector<8x1xf32>
    %274 = vector.broadcast %273 : vector<8x1xf32> to vector<8x8xf32>
    %275 = arith.subf %271, %274 : vector<8x8xf32>
    %276 = math.exp %275 : vector<8x8xf32>
    %cst_136 = arith.constant dense<0.000000e+00> : vector<8xf32>
    %277 = vector.multi_reduction <add>, %276, %cst_136 [1] : vector<8x8xf32> to vector<8xf32>
    %278 = vector.shape_cast %277 : vector<8xf32> to vector<8x1xf32>
    %279 = tpu.reciprocal %278 {approx = true} : vector<8x1xf32> -> vector<8x1xf32>
    %280 = vector.broadcast %279 : vector<8x1xf32> to vector<8x8xf32>
    %281 = arith.mulf %276, %280 : vector<8x8xf32>
    %cst_137 = arith.constant dense<0.000000e+00> : vector<8x8xf32>
    %282 = tpu.matmul %281, %267, %cst_137 {dimension_numbers = #tpu.dot_dimension_numbers<[1], [0], [0], [1], [0, 0, 1, 1], [], []>} : vector<8x8xf32>, vector<8x8xf32>, vector<8x8xf32> -> vector<8x8xf32>
    %c0_138 = arith.constant 0 : index
    %c16_139 = arith.constant 16 : index
    %283 = vector.load %arg19[%c0_138, %c16_139] : memref<8x32xf32, #tpu.memory_space<vmem>>, vector<8x8xf32>
    tpu.vector_store %arg19[%c0_138, %c16_139], %282 {strides = array<i32>} : memref<8x32xf32, #tpu.memory_space<vmem>>, vector<8x8xf32>,
    %284 = vector.extract_strided_slice %226 {offsets = [0, 24], sizes = [8, 8], strides = [1, 1]} : vector<8x32xf32> to vector<8x8xf32>
    %285 = vector.extract_strided_slice %217 {offsets = [0, 24], sizes = [8, 8], strides = [1, 1]} : vector<8x32xf32> to vector<8x8xf32>
    %286 = vector.extract_strided_slice %218 {offsets = [0, 24], sizes = [8, 8], strides = [1, 1]} : vector<8x32xf32> to vector<8x8xf32>
    %cst_140 = arith.constant dense<0.000000e+00> : vector<8x8xf32>
    %287 = tpu.matmul %284, %285, %cst_140 {dimension_numbers = #tpu.dot_dimension_numbers<[1], [1], [0], [0], [0, 0, 1, 0], [], []>} : vector<8x8xf32>, vector<8x8xf32>, vector<8x8xf32> -> vector<8x8xf32>
    %cst_141 = arith.constant 0.353553385 : f32
    %288 = vector.broadcast %cst_141 : f32 to vector<8x8xf32>
    %289 = arith.mulf %287, %288 : vector<8x8xf32>
    %290 = arith.addf %289, %8 : vector<8x8xf32>
    %cst_142 = arith.constant dense<0xFF800000> : vector<8xf32>
    %291 = vector.multi_reduction <maximumf>, %290, %cst_142 [1] : vector<8x8xf32> to vector<8xf32>
    %292 = vector.shape_cast %291 : vector<8xf32> to vector<8x1xf32>
    %293 = vector.broadcast %292 : vector<8x1xf32> to vector<8x8xf32>
    %294 = arith.subf %290, %293 : vector<8x8xf32>
    %295 = math.exp %294 : vector<8x8xf32>
    %cst_143 = arith.constant dense<0.000000e+00> : vector<8xf32>
    %296 = vector.multi_reduction <add>, %295, %cst_143 [1] : vector<8x8xf32> to vector<8xf32>
    %297 = vector.shape_cast %296 : vector<8xf32> to vector<8x1xf32>
    %298 = tpu.reciprocal %297 {approx = true} : vector<8x1xf32> -> vector<8x1xf32>
    %299 = vector.broadcast %298 : vector<8x1xf32> to vector<8x8xf32>
    %300 = arith.mulf %295, %299 : vector<8x8xf32>
    %cst_144 = arith.constant dense<0.000000e+00> : vector<8x8xf32>
    %301 = tpu.matmul %300, %286, %cst_144 {dimension_numbers = #tpu.dot_dimension_numbers<[1], [0], [0], [1], [0, 0, 1, 1], [], []>} : vector<8x8xf32>, vector<8x8xf32>, vector<8x8xf32> -> vector<8x8xf32>
    %c0_145 = arith.constant 0 : index
    %c24_146 = arith.constant 24 : index
    %302 = vector.load %arg19[%c0_145, %c24_146] : memref<8x32xf32, #tpu.memory_space<vmem>>, vector<8x8xf32>
    tpu.vector_store %arg19[%c0_145, %c24_146], %301 {strides = array<i32>} : memref<8x32xf32, #tpu.memory_space<vmem>>, vector<8x8xf32>,
    %c0_147 = arith.constant 0 : index
    %c0_148 = arith.constant 0 : index
    %303 = vector.load %arg19[%c0_147, %c0_148] : memref<8x32xf32, #tpu.memory_space<vmem>>, vector<8x32xf32>
    %304 = arith.truncf %303 : vector<8x32xf32> to vector<8x32xbf16>
    %c2_149 = arith.constant 2 : index
    %c0_150 = arith.constant 0 : index
    %c0_151 = arith.constant 0 : index
    %305 = vector.load %arg15[%c2_149, %c0_150, %c0_151] : memref<4x32x32xbf16, #tpu.memory_space<vmem>>, vector<1x32x32xbf16>
    %306 = vector.shape_cast %305 : vector<1x32x32xbf16> to vector<32x32xbf16>
    %cst_152 = arith.constant dense<0.000000e+00> : vector<8x32xf32>
    %307 = tpu.matmul %304, %306, %cst_152 {dimension_numbers = #tpu.dot_dimension_numbers<[1], [0], [0], [1], [0, 0, 1, 1], [], []>} : vector<8x32xbf16>, vector<32x32xbf16>, vector<8x32xf32> -> vector<8x32xf32>
    %308 = arith.addf %216, %307 : vector<8x32xf32>
    %c2_153 = arith.constant 2 : index
    %c0_154 = arith.constant 0 : index
    %c0_155 = arith.constant 0 : index
    %309 = vector.load %arg16[%c2_153, %c0_154, %c0_155] : memref<4x1x32xf32, #tpu.memory_space<vmem>>, vector<1x1x32xf32>
    %310 = vector.shape_cast %309 : vector<1x1x32xf32> to vector<1x32xf32>
    %311 = vector.broadcast %310 : vector<1x32xf32> to vector<8x32xf32>
    %312 = arith.addf %308, %311 : vector<8x32xf32>
    %313 = vector.extract_strided_slice %23 {offsets = [0, 32], sizes = [8, 32], strides = [1, 1]} : vector<8x64xf32> to vector<8x32xf32>
    %314 = vector.extract_strided_slice %28 {offsets = [0, 32], sizes = [8, 32], strides = [1, 1]} : vector<8x64xf32> to vector<8x32xf32>
    %315 = arith.truncf %312 : vector<8x32xf32> to vector<8x32xbf16>
    %c3 = arith.constant 3 : index
    %c0_156 = arith.constant 0 : index
    %c0_157 = arith.constant 0 : index
    %316 = vector.load %arg13[%c3, %c0_156, %c0_157] : memref<4x32x32xbf16, #tpu.memory_space<vmem>>, vector<1x32x32xbf16>
    %317 = vector.shape_cast %316 : vector<1x32x32xbf16> to vector<32x32xbf16>
    %cst_158 = arith.constant dense<0.000000e+00> : vector<8x32xf32>
    %318 = tpu.matmul %315, %317, %cst_158 {dimension_numbers = #tpu.dot_dimension_numbers<[1], [0], [0], [1], [0, 0, 1, 1], [], []>} : vector<8x32xbf16>, vector<32x32xbf16>, vector<8x32xf32> -> vector<8x32xf32>
    %c3_159 = arith.constant 3 : index
    %c0_160 = arith.constant 0 : index
    %c0_161 = arith.constant 0 : index
    %319 = vector.load %arg14[%c3_159, %c0_160, %c0_161] : memref<4x1x32xf32, #tpu.memory_space<vmem>>, vector<1x1x32xf32>
    %320 = vector.shape_cast %319 : vector<1x1x32xf32> to vector<1x32xf32>
    %321 = vector.broadcast %320 : vector<1x32xf32> to vector<8x32xf32>
    %322 = arith.addf %318, %321 : vector<8x32xf32>
    %323 = vector.extract_strided_slice %322 {offsets = [0, 0], sizes = [8, 8], strides = [1, 1]} : vector<8x32xf32> to vector<8x8xf32>
    %324 = vector.extract_strided_slice %313 {offsets = [0, 0], sizes = [8, 8], strides = [1, 1]} : vector<8x32xf32> to vector<8x8xf32>
    %325 = vector.extract_strided_slice %314 {offsets = [0, 0], sizes = [8, 8], strides = [1, 1]} : vector<8x32xf32> to vector<8x8xf32>
    %cst_162 = arith.constant dense<0.000000e+00> : vector<8x8xf32>
    %326 = tpu.matmul %323, %324, %cst_162 {dimension_numbers = #tpu.dot_dimension_numbers<[1], [1], [0], [0], [0, 0, 1, 0], [], []>} : vector<8x8xf32>, vector<8x8xf32>, vector<8x8xf32> -> vector<8x8xf32>
    %cst_163 = arith.constant 0.353553385 : f32
    %327 = vector.broadcast %cst_163 : f32 to vector<8x8xf32>
    %328 = arith.mulf %326, %327 : vector<8x8xf32>
    %cst_164 = arith.constant dense<0xFF800000> : vector<8xf32>
    %329 = vector.multi_reduction <maximumf>, %328, %cst_164 [1] : vector<8x8xf32> to vector<8xf32>
    %330 = vector.shape_cast %329 : vector<8xf32> to vector<8x1xf32>
    %331 = vector.broadcast %330 : vector<8x1xf32> to vector<8x8xf32>
    %332 = arith.subf %328, %331 : vector<8x8xf32>
    %333 = math.exp %332 : vector<8x8xf32>
    %cst_165 = arith.constant dense<0.000000e+00> : vector<8xf32>
    %334 = vector.multi_reduction <add>, %333, %cst_165 [1] : vector<8x8xf32> to vector<8xf32>
    %335 = vector.shape_cast %334 : vector<8xf32> to vector<8x1xf32>
    %336 = vector.broadcast %335 : vector<8x1xf32> to vector<8x8xf32>
    %337 = arith.divf %333, %336 : vector<8x8xf32>
    %c0_166 = arith.constant 0 : index
    %c0_167 = arith.constant 0 : index
    %c0_168 = arith.constant 0 : index
    %c0_169 = arith.constant 0 : index
    %338 = vector.load %arg18[%c0_166, %c0_167, %c0_168, %c0_169] : memref<1x4x8x8xf32, #tpu.memory_space<vmem>>, vector<1x1x8x8xf32>
    %339 = vector.shape_cast %338 : vector<1x1x8x8xf32> to vector<8x8xf32>
    %340 = vector.shape_cast %337 : vector<8x8xf32> to vector<1x1x8x8xf32>
    tpu.vector_store %arg18[%c0_166, %c0_167, %c0_168, %c0_169], %340 {strides = array<i32>} : memref<1x4x8x8xf32, #tpu.memory_space<vmem>>, vector<1x1x8x8xf32>,
    %cst_170 = arith.constant dense<0.000000e+00> : vector<8x8xf32>
    %341 = tpu.matmul %337, %325, %cst_170 {dimension_numbers = #tpu.dot_dimension_numbers<[1], [0], [0], [1], [0, 0, 1, 1], [], []>} : vector<8x8xf32>, vector<8x8xf32>, vector<8x8xf32> -> vector<8x8xf32>
    %c0_171 = arith.constant 0 : index
    %c0_172 = arith.constant 0 : index
    %342 = vector.load %arg19[%c0_171, %c0_172] : memref<8x32xf32, #tpu.memory_space<vmem>>, vector<8x8xf32>
    tpu.vector_store %arg19[%c0_171, %c0_172], %341 {strides = array<i32>} : memref<8x32xf32, #tpu.memory_space<vmem>>, vector<8x8xf32>,
    %343 = vector.extract_strided_slice %322 {offsets = [0, 8], sizes = [8, 8], strides = [1, 1]} : vector<8x32xf32> to vector<8x8xf32>
    %344 = vector.extract_strided_slice %313 {offsets = [0, 8], sizes = [8, 8], strides = [1, 1]} : vector<8x32xf32> to vector<8x8xf32>
    %345 = vector.extract_strided_slice %314 {offsets = [0, 8], sizes = [8, 8], strides = [1, 1]} : vector<8x32xf32> to vector<8x8xf32>
    %cst_173 = arith.constant dense<0.000000e+00> : vector<8x8xf32>
    %346 = tpu.matmul %343, %344, %cst_173 {dimension_numbers = #tpu.dot_dimension_numbers<[1], [1], [0], [0], [0, 0, 1, 0], [], []>} : vector<8x8xf32>, vector<8x8xf32>, vector<8x8xf32> -> vector<8x8xf32>
    %cst_174 = arith.constant 0.353553385 : f32
    %347 = vector.broadcast %cst_174 : f32 to vector<8x8xf32>
    %348 = arith.mulf %346, %347 : vector<8x8xf32>
    %cst_175 = arith.constant dense<0xFF800000> : vector<8xf32>
    %349 = vector.multi_reduction <maximumf>, %348, %cst_175 [1] : vector<8x8xf32> to vector<8xf32>
    %350 = vector.shape_cast %349 : vector<8xf32> to vector<8x1xf32>
    %351 = vector.broadcast %350 : vector<8x1xf32> to vector<8x8xf32>
    %352 = arith.subf %348, %351 : vector<8x8xf32>
    %353 = math.exp %352 : vector<8x8xf32>
    %cst_176 = arith.constant dense<0.000000e+00> : vector<8xf32>
    %354 = vector.multi_reduction <add>, %353, %cst_176 [1] : vector<8x8xf32> to vector<8xf32>
    %355 = vector.shape_cast %354 : vector<8xf32> to vector<8x1xf32>
    %356 = vector.broadcast %355 : vector<8x1xf32> to vector<8x8xf32>
    %357 = arith.divf %353, %356 : vector<8x8xf32>
    %c0_177 = arith.constant 0 : index
    %c1_178 = arith.constant 1 : index
    %c0_179 = arith.constant 0 : index
    %c0_180 = arith.constant 0 : index
    %358 = vector.load %arg18[%c0_177, %c1_178, %c0_179, %c0_180] : memref<1x4x8x8xf32, #tpu.memory_space<vmem>>, vector<1x1x8x8xf32>
    %359 = vector.shape_cast %358 : vector<1x1x8x8xf32> to vector<8x8xf32>
    %360 = vector.shape_cast %357 : vector<8x8xf32> to vector<1x1x8x8xf32>
    tpu.vector_store %arg18[%c0_177, %c1_178, %c0_179, %c0_180], %360 {strides = array<i32>} : memref<1x4x8x8xf32, #tpu.memory_space<vmem>>, vector<1x1x8x8xf32>,
    %cst_181 = arith.constant dense<0.000000e+00> : vector<8x8xf32>
    %361 = tpu.matmul %357, %345, %cst_181 {dimension_numbers = #tpu.dot_dimension_numbers<[1], [0], [0], [1], [0, 0, 1, 1], [], []>} : vector<8x8xf32>, vector<8x8xf32>, vector<8x8xf32> -> vector<8x8xf32>
    %c0_182 = arith.constant 0 : index
    %c8_183 = arith.constant 8 : index
    %362 = vector.load %arg19[%c0_182, %c8_183] : memref<8x32xf32, #tpu.memory_space<vmem>>, vector<8x8xf32>
    tpu.vector_store %arg19[%c0_182, %c8_183], %361 {strides = array<i32>} : memref<8x32xf32, #tpu.memory_space<vmem>>, vector<8x8xf32>,
    %363 = vector.extract_strided_slice %322 {offsets = [0, 16], sizes = [8, 8], strides = [1, 1]} : vector<8x32xf32> to vector<8x8xf32>
    %364 = vector.extract_strided_slice %313 {offsets = [0, 16], sizes = [8, 8], strides = [1, 1]} : vector<8x32xf32> to vector<8x8xf32>
    %365 = vector.extract_strided_slice %314 {offsets = [0, 16], sizes = [8, 8], strides = [1, 1]} : vector<8x32xf32> to vector<8x8xf32>
    %cst_184 = arith.constant dense<0.000000e+00> : vector<8x8xf32>
    %366 = tpu.matmul %363, %364, %cst_184 {dimension_numbers = #tpu.dot_dimension_numbers<[1], [1], [0], [0], [0, 0, 1, 0], [], []>} : vector<8x8xf32>, vector<8x8xf32>, vector<8x8xf32> -> vector<8x8xf32>
    %cst_185 = arith.constant 0.353553385 : f32
    %367 = vector.broadcast %cst_185 : f32 to vector<8x8xf32>
    %368 = arith.mulf %366, %367 : vector<8x8xf32>
    %cst_186 = arith.constant dense<0xFF800000> : vector<8xf32>
    %369 = vector.multi_reduction <maximumf>, %368, %cst_186 [1] : vector<8x8xf32> to vector<8xf32>
    %370 = vector.shape_cast %369 : vector<8xf32> to vector<8x1xf32>
    %371 = vector.broadcast %370 : vector<8x1xf32> to vector<8x8xf32>
    %372 = arith.subf %368, %371 : vector<8x8xf32>
    %373 = math.exp %372 : vector<8x8xf32>
    %cst_187 = arith.constant dense<0.000000e+00> : vector<8xf32>
    %374 = vector.multi_reduction <add>, %373, %cst_187 [1] : vector<8x8xf32> to vector<8xf32>
    %375 = vector.shape_cast %374 : vector<8xf32> to vector<8x1xf32>
    %376 = vector.broadcast %375 : vector<8x1xf32> to vector<8x8xf32>
    %377 = arith.divf %373, %376 : vector<8x8xf32>
    %c0_188 = arith.constant 0 : index
    %c2_189 = arith.constant 2 : index
    %c0_190 = arith.constant 0 : index
    %c0_191 = arith.constant 0 : index
    %378 = vector.load %arg18[%c0_188, %c2_189, %c0_190, %c0_191] : memref<1x4x8x8xf32, #tpu.memory_space<vmem>>, vector<1x1x8x8xf32>
    %379 = vector.shape_cast %378 : vector<1x1x8x8xf32> to vector<8x8xf32>
    %380 = vector.shape_cast %377 : vector<8x8xf32> to vector<1x1x8x8xf32>
    tpu.vector_store %arg18[%c0_188, %c2_189, %c0_190, %c0_191], %380 {strides = array<i32>} : memref<1x4x8x8xf32, #tpu.memory_space<vmem>>, vector<1x1x8x8xf32>,
    %cst_192 = arith.constant dense<0.000000e+00> : vector<8x8xf32>
    %381 = tpu.matmul %377, %365, %cst_192 {dimension_numbers = #tpu.dot_dimension_numbers<[1], [0], [0], [1], [0, 0, 1, 1], [], []>} : vector<8x8xf32>, vector<8x8xf32>, vector<8x8xf32> -> vector<8x8xf32>
    %c0_193 = arith.constant 0 : index
    %c16_194 = arith.constant 16 : index
    %382 = vector.load %arg19[%c0_193, %c16_194] : memref<8x32xf32, #tpu.memory_space<vmem>>, vector<8x8xf32>
    tpu.vector_store %arg19[%c0_193, %c16_194], %381 {strides = array<i32>} : memref<8x32xf32, #tpu.memory_space<vmem>>, vector<8x8xf32>,
    %383 = vector.extract_strided_slice %322 {offsets = [0, 24], sizes = [8, 8], strides = [1, 1]} : vector<8x32xf32> to vector<8x8xf32>
    %384 = vector.extract_strided_slice %313 {offsets = [0, 24], sizes = [8, 8], strides = [1, 1]} : vector<8x32xf32> to vector<8x8xf32>
    %385 = vector.extract_strided_slice %314 {offsets = [0, 24], sizes = [8, 8], strides = [1, 1]} : vector<8x32xf32> to vector<8x8xf32>
    %cst_195 = arith.constant dense<0.000000e+00> : vector<8x8xf32>
    %386 = tpu.matmul %383, %384, %cst_195 {dimension_numbers = #tpu.dot_dimension_numbers<[1], [1], [0], [0], [0, 0, 1, 0], [], []>} : vector<8x8xf32>, vector<8x8xf32>, vector<8x8xf32> -> vector<8x8xf32>
    %cst_196 = arith.constant 0.353553385 : f32
    %387 = vector.broadcast %cst_196 : f32 to vector<8x8xf32>
    %388 = arith.mulf %386, %387 : vector<8x8xf32>
    %cst_197 = arith.constant dense<0xFF800000> : vector<8xf32>
    %389 = vector.multi_reduction <maximumf>, %388, %cst_197 [1] : vector<8x8xf32> to vector<8xf32>
    %390 = vector.shape_cast %389 : vector<8xf32> to vector<8x1xf32>
    %391 = vector.broadcast %390 : vector<8x1xf32> to vector<8x8xf32>
    %392 = arith.subf %388, %391 : vector<8x8xf32>
    %393 = math.exp %392 : vector<8x8xf32>
    %cst_198 = arith.constant dense<0.000000e+00> : vector<8xf32>
    %394 = vector.multi_reduction <add>, %393, %cst_198 [1] : vector<8x8xf32> to vector<8xf32>
    %395 = vector.shape_cast %394 : vector<8xf32> to vector<8x1xf32>
    %396 = vector.broadcast %395 : vector<8x1xf32> to vector<8x8xf32>
    %397 = arith.divf %393, %396 : vector<8x8xf32>
    %c0_199 = arith.constant 0 : index
    %c3_200 = arith.constant 3 : index
    %c0_201 = arith.constant 0 : index
    %c0_202 = arith.constant 0 : index
    %398 = vector.load %arg18[%c0_199, %c3_200, %c0_201, %c0_202] : memref<1x4x8x8xf32, #tpu.memory_space<vmem>>, vector<1x1x8x8xf32>
    %399 = vector.shape_cast %398 : vector<1x1x8x8xf32> to vector<8x8xf32>
    %400 = vector.shape_cast %397 : vector<8x8xf32> to vector<1x1x8x8xf32>
    tpu.vector_store %arg18[%c0_199, %c3_200, %c0_201, %c0_202], %400 {strides = array<i32>} : memref<1x4x8x8xf32, #tpu.memory_space<vmem>>, vector<1x1x8x8xf32>,
    %cst_203 = arith.constant dense<0.000000e+00> : vector<8x8xf32>
    %401 = tpu.matmul %397, %385, %cst_203 {dimension_numbers = #tpu.dot_dimension_numbers<[1], [0], [0], [1], [0, 0, 1, 1], [], []>} : vector<8x8xf32>, vector<8x8xf32>, vector<8x8xf32> -> vector<8x8xf32>
    %c0_204 = arith.constant 0 : index
    %c24_205 = arith.constant 24 : index
    %402 = vector.load %arg19[%c0_204, %c24_205] : memref<8x32xf32, #tpu.memory_space<vmem>>, vector<8x8xf32>
    tpu.vector_store %arg19[%c0_204, %c24_205], %401 {strides = array<i32>} : memref<8x32xf32, #tpu.memory_space<vmem>>, vector<8x8xf32>,
    %c0_206 = arith.constant 0 : index
    %c0_207 = arith.constant 0 : index
    %403 = vector.load %arg19[%c0_206, %c0_207] : memref<8x32xf32, #tpu.memory_space<vmem>>, vector<8x32xf32>
    %404 = arith.truncf %403 : vector<8x32xf32> to vector<8x32xbf16>
    %c3_208 = arith.constant 3 : index
    %c0_209 = arith.constant 0 : index
    %c0_210 = arith.constant 0 : index
    %405 = vector.load %arg15[%c3_208, %c0_209, %c0_210] : memref<4x32x32xbf16, #tpu.memory_space<vmem>>, vector<1x32x32xbf16>
    %406 = vector.shape_cast %405 : vector<1x32x32xbf16> to vector<32x32xbf16>
    %cst_211 = arith.constant dense<0.000000e+00> : vector<8x32xf32>
    %407 = tpu.matmul %404, %406, %cst_211 {dimension_numbers = #tpu.dot_dimension_numbers<[1], [0], [0], [1], [0, 0, 1, 1], [], []>} : vector<8x32xbf16>, vector<32x32xbf16>, vector<8x32xf32> -> vector<8x32xf32>
    %408 = arith.addf %312, %407 : vector<8x32xf32>
    %c3_212 = arith.constant 3 : index
    %c0_213 = arith.constant 0 : index
    %c0_214 = arith.constant 0 : index
    %409 = vector.load %arg16[%c3_212, %c0_213, %c0_214] : memref<4x1x32xf32, #tpu.memory_space<vmem>>, vector<1x1x32xf32>
    %410 = vector.shape_cast %409 : vector<1x1x32xf32> to vector<1x32xf32>
    %411 = vector.broadcast %410 : vector<1x32xf32> to vector<8x32xf32>
    %412 = arith.addf %408, %411 : vector<8x32xf32>
    %c0_215 = arith.constant 0 : index
    %c0_216 = arith.constant 0 : index
    %c0_217 = arith.constant 0 : index
    %413 = vector.load %arg17[%c0_215, %c0_216, %c0_217] : memref<1x8x32xf32, #tpu.memory_space<vmem>>, vector<1x8x32xf32>
    %414 = vector.shape_cast %413 : vector<1x8x32xf32> to vector<8x32xf32>
    %415 = vector.shape_cast %412 : vector<8x32xf32> to vector<1x8x32xf32>
    tpu.vector_store %arg17[%c0_215, %c0_216, %c0_217], %415 {strides = array<i32>} : memref<1x8x32xf32, #tpu.memory_space<vmem>>, vector<1x8x32xf32>,
    return
  }
  func.func @transform_0(%arg0: i32) -> (i32, i32, i32) {
    %c0_i32 = arith.constant 0 : i32
    %c0_i32_0 = arith.constant 0 : i32
    %c0_i32_1 = arith.constant 0 : i32
    return %arg0, %c0_i32, %c0_i32_0 : i32, i32, i32
  }
  func.func @transform_1(%arg0: i32) -> (i32, i32, i32) {
    %c0_i32 = arith.constant 0 : i32
    %c0_i32_0 = arith.constant 0 : i32
    %c0_i32_1 = arith.constant 0 : i32
    return %arg0, %c0_i32, %c0_i32_0 : i32, i32, i32
  }
  func.func @transform_2(%arg0: i32) -> (i32, i32, i32) {
    %c0_i32 = arith.constant 0 : i32
    %c0_i32_0 = arith.constant 0 : i32
    %c0_i32_1 = arith.constant 0 : i32
    return %arg0, %c0_i32, %c0_i32_0 : i32, i32, i32
  }
  func.func @transform_3(%arg0: i32) -> (i32, i32) {
    %c0_i32 = arith.constant 0 : i32
    %c0_i32_0 = arith.constant 0 : i32
    %c0_i32_1 = arith.constant 0 : i32
    return %c0_i32, %c0_i32_0 : i32, i32
  }
  func.func @transform_4(%arg0: i32) -> (i32, i32) {
    %c0_i32 = arith.constant 0 : i32
    %c0_i32_0 = arith.constant 0 : i32
    %c0_i32_1 = arith.constant 0 : i32
    return %c0_i32, %c0_i32_0 : i32, i32
  }
  func.func @transform_5(%arg0: i32) -> (i32, i32) {
    %c0_i32 = arith.constant 0 : i32
    %c0_i32_0 = arith.constant 0 : i32
    %c0_i32_1 = arith.constant 0 : i32
    return %c0_i32, %c0_i32_0 : i32, i32
  }
  func.func @transform_6(%arg0: i32) -> (i32, i32) {
    %c0_i32 = arith.constant 0 : i32
    %c0_i32_0 = arith.constant 0 : i32
    %c0_i32_1 = arith.constant 0 : i32
    return %c0_i32, %c0_i32_0 : i32, i32
  }
  func.func @transform_7(%arg0: i32) -> (i32, i32) {
    %c0_i32 = arith.constant 0 : i32
    %c0_i32_0 = arith.constant 0 : i32
    %c0_i32_1 = arith.constant 0 : i32
    return %c0_i32, %c0_i32_0 : i32, i32
  }
  func.func @transform_8(%arg0: i32) -> (i32, i32) {
    %c0_i32 = arith.constant 0 : i32
    %c0_i32_0 = arith.constant 0 : i32
    %c0_i32_1 = arith.constant 0 : i32
    return %c0_i32, %c0_i32_0 : i32, i32
  }
  func.func @transform_9(%arg0: i32) -> (i32, i32) {
    %c0_i32 = arith.constant 0 : i32
    %c0_i32_0 = arith.constant 0 : i32
    %c0_i32_1 = arith.constant 0 : i32
    return %c0_i32, %c0_i32_0 : i32, i32
  }
  func.func @transform_10(%arg0: i32) -> (i32, i32) {
    %c0_i32 = arith.constant 0 : i32
    %c0_i32_0 = arith.constant 0 : i32
    %c0_i32_1 = arith.constant 0 : i32
    return %c0_i32, %c0_i32_0 : i32, i32
  }
  func.func @transform_11(%arg0: i32) -> (i32, i32) {
    %c0_i32 = arith.constant 0 : i32
    %c0_i32_0 = arith.constant 0 : i32
    %c0_i32_1 = arith.constant 0 : i32
    return %c0_i32, %c0_i32_0 : i32, i32
  }
  func.func @transform_12(%arg0: i32) -> (i32, i32, i32) {
    %c0_i32 = arith.constant 0 : i32
    %c0_i32_0 = arith.constant 0 : i32
    %c0_i32_1 = arith.constant 0 : i32
    %c0_i32_2 = arith.constant 0 : i32
    return %c0_i32, %c0_i32_0, %c0_i32_1 : i32, i32, i32
  }
  func.func @transform_13(%arg0: i32) -> (i32, i32, i32) {
    %c0_i32 = arith.constant 0 : i32
    %c0_i32_0 = arith.constant 0 : i32
    %c0_i32_1 = arith.constant 0 : i32
    %c0_i32_2 = arith.constant 0 : i32
    return %c0_i32, %c0_i32_0, %c0_i32_1 : i32, i32, i32
  }
  func.func @transform_14(%arg0: i32) -> (i32, i32, i32) {
    %c0_i32 = arith.constant 0 : i32
    %c0_i32_0 = arith.constant 0 : i32
    %c0_i32_1 = arith.constant 0 : i32
    %c0_i32_2 = arith.constant 0 : i32
    return %c0_i32, %c0_i32_0, %c0_i32_1 : i32, i32, i32
  }
  func.func @transform_15(%arg0: i32) -> (i32, i32, i32) {
    %c0_i32 = arith.constant 0 : i32
    %c0_i32_0 = arith.constant 0 : i32
    %c0_i32_1 = arith.constant 0 : i32
    %c0_i32_2 = arith.constant 0 : i32
    return %c0_i32, %c0_i32_0, %c0_i32_1 : i32, i32, i32
  }
  func.func @transform_16(%arg0: i32) -> (i32, i32, i32) {
    %c0_i32 = arith.constant 0 : i32
    %c0_i32_0 = arith.constant 0 : i32
    %c0_i32_1 = arith.constant 0 : i32
    return %arg0, %c0_i32, %c0_i32_0 : i32, i32, i32
  }
  func.func @transform_17(%arg0: i32) -> (i32, i32, i32, i32) {
    %c0_i32 = arith.constant 0 : i32
    %c0_i32_0 = arith.constant 0 : i32
    %c0_i32_1 = arith.constant 0 : i32
    %c0_i32_2 = arith.constant 0 : i32
    return %arg0, %c0_i32, %c0_i32_0, %c0_i32_1 : i32, i32, i32, i32
  }
}

</mosaic_0001>

<bundles_post_ra>
// kernel: tpu_custom_call.1
= control target key start
LH: loop header
LB: loop body
LE: loop exit
PB: predicated region body
PF: predicated region fallthrough
CT: control target
= control target key end

     0   :  { %s6771_s0 = inlined_call_operand.hbm [shape: f32[2,8,32], index: 0, kind: input, shape index: {}]   ;;  %s6772_s1 = inlined_call_operand.hbm [shape: f32[2,8,32], index: 1, kind: input, shape index: {}]   ;;  %s6773_s2 = inlined_call_operand.hbm [shape: f32[2,8,32], index: 2, kind: input, shape index: {}]   ;;  %s6774_s3 = inlined_call_operand.hbm [shape: f32[8,8], index: 3, kind: input, shape index: {}]   ;;  %s6775_s4 = inlined_call_operand.hbm [shape: bf16[32,64], index: 4, kind: input, shape index: {}]   ;;  %s6776_s5 = inlined_call_operand.hbm [shape: f32[1,64], index: 5, kind: input, shape index: {}]   ;;  %s6777_s6 = inlined_call_operand.hbm [shape: bf16[32,64], index: 6, kind: input, shape index: {}]   ;;  %s6778_s7 = inlined_call_operand.hbm [shape: f32[1,64], index: 7, kind: input, shape index: {}]   ;;  %s6779_s8 = inlined_call_operand.hbm [shape: bf16[32,64], index: 8, kind: input, shape index: {}]   ;;  %s6780_s9 = inlined_call_operand.hbm [shape: f32[1,64], index: 9, kind: input, shape index: {}]   ;;  %s6781_s10 = inlined_call_operand.vmem [shape: bf16[32,64], index: 10, kind: input, shape index: {}]   ;;  %s6782_s11 = inlined_call_operand.hbm [shape: f32[1,64], index: 11, kind: input, shape index: {}]   ;;  %s6783_s12 = inlined_call_operand.hbm [shape: bf16[4,32,32], index: 12, kind: input, shape index: {}]   ;;  %s6784_s13 = inlined_call_operand.vmem [shape: f32[4,1,32], index: 13, kind: input, shape index: {}]   ;;  %s6785_s14 = inlined_call_operand.hbm [shape: bf16[4,32,32], index: 14, kind: input, shape index: {}]   ;;  %s6786_s15 = inlined_call_operand.vmem [shape: f32[4,1,32], index: 15, kind: input, shape index: {}]   ;;  %s6787_s16 = inlined_call_operand.hbm [shape: f32[2,8,32], index: 16, kind: output, shape index: {0}]   ;;  %s6788_s17 = inlined_call_operand.hbm [shape: f32[2,4,8,8], index: 17, kind: output, shape index: {1}]  }
   0x1   :  { %6816 = sst [smem:[#allocation42_spill]] %s6771_s0 }
   0x2   :  { %6817 = sst [smem:[#allocation43_spill]] %s6772_s1 }
   0x3   :  { %6818 = sst [smem:[#allocation44_spill]] %s6774_s3 }
   0x4   :  { %6819 = sst [smem:[#allocation45_spill]] %s6775_s4 }
   0x5   :  { %6820 = sst [smem:[#allocation46_spill]] %s6776_s5 }
   0x6   :  { %6821 = sst [smem:[#allocation47_spill]] %s6778_s7 }
   0x7   :  { %6822 = sst [smem:[#allocation48_spill]] %s6780_s9 }
   0x8   :  { %6823 = sst [smem:[#allocation49_spill]] %s6781_s10 }
   0x9   :  { %6824 = sst [smem:[#allocation50_spill]] %s6783_s12 }
   0xa   :  { %6825 = sst [smem:[#allocation51_spill]] %s6784_s13 }
   0xb   :  { %6826 = sst [smem:[#allocation52_spill]] %s6786_s15 }
   0xc   :  { %6827 = sst [smem:[#allocation53_spill]] %s6787_s16 }
   0xd   :  { %6828 = sst [smem:[#allocation54_spill]] %s6788_s17 }
   0xe   :  { %23 = vsyncpa [#allocation4], 0 }
   0xf   :  { %25 = vsyncpa [#allocation4 + $0x1], 0 }
  0x10   :  { %26 = vsyncpa [#allocation7], 0 }
  0x11   :  { %28 = vsyncpa [#allocation7 + $0x1], 0 }
  0x12   :  { %29 = vsyncpa [#allocation10], 0 }
  0x13   :  { %30 = vsyncpa [#allocation13], 0 }
  0x14   :  { %31 = vsyncpa [#allocation16], 0 }
  0x15   :  { %32 = vsyncpa [#allocation19], 0 }
  0x16   :  { %33 = vsyncpa [#allocation22], 0 }
  0x17   :  { %34 = vsyncpa [#allocation5], 0 }
  0x18   :  { %36 = vsyncpa [#allocation5 + $0x1], 0 }
  0x19   :  { %37 = vsyncpa [#allocation26], 0 }
  0x1a   :  { %39 = vsyncpa [#allocation26 + $0x1], 0  ;;  %s5965_s24 = smov 0   ;;  %s5967_s25 = smov 0  }
  0x1b   :  { %s5969_s26 = smov 0   ;;  %s5971_s27 = smov 0  }
  0x1c LB: > { %6829 = sst [smem:[#allocation36_spill]] %s5831_s24  ;;  %s5845_s28 = smov [#allocation9]   ;;  %s5843_s27 = sphi %s5971_s27, %s6882_s27   ;;  %s5839_s26 = sphi %s5969_s26, %s6886_s26   ;;  %s5835_s25 = sphi %s5967_s25, %s6885_s25   ;;  %s5831_s24 = sphi %s5965_s24, %s6884_s24  }
  0x1d   : > { %6830 = sst [smem:[#allocation37_spill]] %s5843_s27  ;;  %s466_s29 = sshll.u32 %s5845_s28, 4  ;;  %s467_s29 = int_to_ptr.vmem [resolvable:$true] %s466_s29 }
  0x1e   : > { %s5986_s0 = sadd.s32 4294967295, %s5843_s27   ;;  %p4613_p0 = scmp.ge.s32.totalorder %s5843_s27, 1 }
  0x1f   : > { %p6793_p1 = scmp.eq.s32.totalorder %s5986_s0, 0  ;;  %p453_p2 = scmp.lt.s32.totalorder %s5843_s27, 3 }
  0x20   : > { %s5846_s18 = smov [#allocation12]   ;;  %s5847_s1 = smov [#allocation15]  }
  0x21   : > { %p5991_p3 = pnand %p4613_p0, %p453_p2  ;;  %s490_s19 = sshll.u32 %s5846_s18, 4  ;;  %s491_s19 = int_to_ptr.vmem [resolvable:$true] %s490_s19 }
  0x22   : > { %s514_s20 = sshll.u32 %s5847_s1, 4  ;;  %s5848_s22 = smov [#allocation18]   ;;  %s6004_s20 = int_to_ptr.vmem [resolvable:$true] %s514_s20 }
  0x23   : > { %s6831_s30 = scalar_select %p5991_p3, 1, 0 }
  0x24   : > { %p5166_p5 = pneg %p5991_p3  ;;  %s6006_s23 = sshll.u32 %s5848_s22, 4  ;;  %s539_s23 = int_to_ptr.vmem [resolvable:$true] %s6006_s23 }
  0x25   : > { %s5392_s18 = scalar_lea.vmem %s467_s29, 128  ;;  %p5400_p11 = scmp.lt.s32.totalorder %s467_s29, %s467_s29 }
  0x26   : > { %p6000_p6 = pnand %p5166_p5, %p6793_p1  ;;  %p5393_p8 = scmp.ne.s32.totalorder %s467_s29, %s5392_s18 }
  0x27   : > { %p5401_p12 = scmp.lt.s32.totalorder %s5392_s18, %s5392_s18 }
  0x28   : > { %s6832_s21 = scalar_select %p6000_p6, 1, 0 }
  0x29   : > { %p6010_p7 = pneg %p6000_p6  ;;  %p5402_p13 = por %p5401_p12, %p5400_p11 }
  0x2b   : > { %s6833_s28 = scalar_select %p6010_p7, 1, 0 }
  0x2c   : > { %p5395_p9 = pnand %p5393_p8, %p6010_p7 }
  0x2e   : > { %p5396_p10 = pneg %p5395_p9 }
  0x30   : > { %p5403_p0 = pnand %p5402_p13, %p5396_p10 }
  0x32   : > { %5406 = shalt.err (!%p5403_p0)
}
  0x33   : > { %s6834_s3 = sld [smem:[#allocation44_spill]]  ;;  %s5418_s16 = scalar_lea.vmem %s491_s19, 16 }
  0x34   : > { %p5419_p2 = scmp.ne.s32.totalorder %s491_s19, %s5418_s16  ;;  %s5425_s17 = scalar_lea.vmem %s491_s19, 32 }
  0x35   : > { %p5426_p8 = scmp.lt.s32.totalorder %s491_s19, %s491_s19  ;;  %p5427_p9 = scmp.lt.s32.totalorder %s5425_s17, %s5418_s16 }
  0x36   : > { %p5421_p5 = pnand %p5419_p2, %p6010_p7 }
  0x37   : > { %p5428_p1 = por %p5427_p9, %p5426_p8 }
  0x38   : > { %p5422_p4 = pneg %p5421_p5 }
  0x39   : > { %5169 = dma.hbm_to_vmem [thread:$0]  (!%p6000_p6), %s6834_s3, 128, %s467_s29, [#allocation10]  }
  0x3a   : > { %p5429_p3 = pnand %p5428_p1, %p5422_p4 }
  0x3c   : > { %5432 = shalt.err (!%p5429_p3)
}
  0x3d   : > { %s6835_s5 = sld [smem:[#allocation46_spill]]  ;;  %s5444_s29 = scalar_lea.vmem %s6004_s20, 16 }
  0x3e   : > { %p5445_p10 = scmp.ne.s32.totalorder %s6004_s20, %s5444_s29  ;;  %s5451_s16 = scalar_lea.vmem %s6004_s20, 32 }
  0x3f   : > { %p5452_p1 = scmp.lt.s32.totalorder %s6004_s20, %s6004_s20  ;;  %p5453_p3 = scmp.lt.s32.totalorder %s5451_s16, %s5444_s29 }
  0x40   : > { %p5447_p11 = pnand %p5445_p10, %p6010_p7 }
  0x41   : > { %p5454_p4 = por %p5453_p3, %p5452_p1 }
  0x42   : > { %p5448_p12 = pneg %p5447_p11 }
  0x43   : > { %5175 = dma.hbm_to_vmem [thread:$0]  (!%p6000_p6), %s6835_s5, 16, %s491_s19, [#allocation13]  }
  0x44   : > { %p5455_p13 = pnand %p5454_p4, %p5448_p12 }
  0x46   : > { %5458 = shalt.err (!%p5455_p13)
}
  0x47   : > { %s6836_s7 = sld [smem:[#allocation47_spill]]  ;;  %s5470_s19 = scalar_lea.vmem %s539_s23, 16 }
  0x48   : > { %p5471_p0 = scmp.ne.s32.totalorder %s539_s23, %s5470_s19  ;;  %s5477_s1 = scalar_lea.vmem %s539_s23, 32 }
  0x49   : > { %p5478_p8 = scmp.lt.s32.totalorder %s539_s23, %s539_s23  ;;  %p5479_p9 = scmp.lt.s32.totalorder %s5477_s1, %s5470_s19 }
  0x4a   : > { %p5473_p2 = pnand %p5471_p0, %p6010_p7 }
  0x4b   : > { %p5480_p10 = por %p5479_p9, %p5478_p8 }
  0x4c   : > { %p5474_p5 = pneg %p5473_p2 }
  0x4d   : > { %5181 = dma.hbm_to_vmem [thread:$0]  (!%p6000_p6), %s6836_s7, 16, %s6004_s20, [#allocation16]  }
  0x4e   : > { %p5481_p11 = pnand %p5480_p10, %p5474_p5 }
  0x50   : > { %5484 = shalt.err (!%p5481_p11)
}
  0x51   : > { %s6837_s9 = sld [smem:[#allocation48_spill]]  ;;  %s5849_s20 = smov [#allocation21]  }
  0x52   : > { %s562_s29 = sshll.u32 %s5849_s20, 4  ;;  %s563_s29 = int_to_ptr.vmem [resolvable:$true] %s562_s29 }
  0x53   : > { %s5496_s16 = scalar_lea.vmem %s563_s29, 1024  ;;  %p5504_p4 = scmp.lt.s32.totalorder %s563_s29, %s563_s29 }
  0x54   : > { %p5497_p12 = scmp.ne.s32.totalorder %s563_s29, %s5496_s16  ;;  %p5505_p13 = scmp.lt.s32.totalorder %s5496_s16, %s5496_s16 }
  0x56   : > { %p5499_p1 = pnand %p5497_p12, %p6010_p7  ;;  %p5506_p0 = por %p5505_p13, %p5504_p4 }
  0x57   : > { %5187 = dma.hbm_to_vmem [thread:$0]  (!%p6000_p6), %s6837_s9, 16, %s539_s23, [#allocation19]  }
  0x58   : > { %p5500_p3 = pneg %p5499_p1 }
  0x5a   : > { %p5507_p2 = pnand %p5506_p0, %p5500_p3 }
  0x5c   : > { %5510 = shalt.err (!%p5507_p2)
}
  0x5d   : > { %s6796_s15 = smov 64   ;;  %s6798_s23 = smov 4  }
  0x5e   : > { %s6838_s12 = sld [smem:[#allocation50_spill]]  ;;  %s4612_s1 = sadd.s32 4294967294, %s5843_s27  }
  0x5f   : > { %s6061_s22 = sadd.s32 1, %s5843_s27   ;;  %s52_s18 = sadd.s32 1, %s5839_s26 }
  0x60   : > { %6839 = sst [smem:[#allocation38_spill]] %s6061_s22  ;;  %s49_s20 = ssub.s32 %s5843_s27, %s6061_s22 }
  0x61   : > { %p59_p5 = scmp.ne.s32.totalorder %s5839_s26, %s5835_s25  ;;  %p50_p8 = scmp.eq.s32.totalorder %s49_s20, 0 }
  0x62   : > { %p60_p9 = scmp.eq.s32.totalorder %s5843_s27, 0  ;;  %p65_p10 = scmp.ne.s32.totalorder %s5835_s25, %s5831_s24 }
  0x63   : > { %p414_p11 = scmp.eq.s32.totalorder %s5986_s0, 1  ;;  %p6841_p1 = scmp.eq.s32.totalorder %s5986_s0, 0 }
  0x64   : > { %5193 = dma.hbm_to_vmem [thread:$0]  (!%p6000_p6), %s6838_s12, 1024, %s563_s29, [#allocation22], %s6796_s15, %s6796_s15, %s6798_s23  }
  0x65   : > { %s6073_s16 = scalar_select %p50_p8, %s5839_s26, %s52_s18  }
  0x66   : > { %p61_p12 = por %p60_p9, %p59_p5  ;;  %p6077_p3 = por %p6841_p1, %p65_p10 }
  0x67   : > { %6840 = sst [smem:[#allocation39_spill]] %s6073_s16  ;;  %p6081_p4 = por %p414_p11, %p59_p5 }
  0x68   : > { %s6842_s29 = scalar_select %p6077_p3, 1, 0 }
  0x69   : > { %s6843_s17 = scalar_select %p6081_p4, 1, 0 }
  0x6a   : > { %p420_p13 = scmp.eq.s32.totalorder %s4612_s1, 1  ;;  %p5224_p0 = scmp.lt.s32.totalorder %s5843_s27, 2 }
  0x6b   : > { %6844 = sst [smem:[#allocation40_spill]] %s6843_s17  ;;  %s6800_s19 = sand.u32 1, %s5839_s26  }
  0x6c   : > { %p6087_p2 = por %p420_p13, %p65_p10  ;;  %s6093_s18 = sshll.u32 %s6800_s19, 3 }
  0x6d   : > { %s6096_s15 = sshll.u32 %s5843_s27, 7  ;;  %p6098_p8 = pnand %p5224_p0, %p61_p12 }
  0x6e   : > { %s6845_s20 = scalar_select %p6087_p2, 1, 0 }
  0x6f   : > { %s613_s3 = sand.u32 1, %s5843_s27   ;;  %s6848_s7 = sld [smem:[#allocation43_spill]] }
  0x70   : > { %6846 = sst [smem:[#allocation41_spill]] %s6845_s20  ;;  %s617_s19 = scalar_lea.vmem [#allocation6], %s6093_s18 }
  0x71   : > { %s624_s12 = sshll.u32 %s617_s19, 4  ;;  %s6110_s16 = scalar_lea.sflag [#allocation7], %s613_s3  ;;  %s625_s12 = int_to_ptr.vmem [resolvable:$true] %s624_s12 }
  0x72   : > { %p6116_p9 = pneg %p6098_p8 }
  0x75   : > { %s6107_s9 = scalar_lea.hbm %s6848_s7, %s6096_s15  ;;  %s5516_s27 = scalar_lea.hbm %s6848_s7, 256 }
  0x76   : > { %s5511_s22 = scalar_lea.hbm %s6107_s9, 128  ;;  %p5517_p12 = scmp.lt.s32.totalorder %s6107_s9, %s6848_s7 }
  0x77   : > { %p5512_p5 = scmp.ne.s32.totalorder %s6107_s9, %s5511_s22  ;;  %p5518_p1 = scmp.lt.s32.totalorder %s5516_s27, %s5511_s22 }
  0x79   : > { %p5514_p10 = pnand %p6116_p9, %p5512_p5  ;;  %p5519_p13 = por %p5518_p1, %p5517_p12 }
  0x7b   : > { %p5515_p11 = pneg %p5514_p10 }
  0x7d   : > { %p5520_p0 = pnand %p5519_p13, %p5515_p11 }
  0x7f   : > { %5523 = shalt.err (!%p5520_p0)
}
  0x80   : > { %s5524_s3 = scalar_lea.vmem %s625_s12, 128  ;;  %s5852_s17 = smov [#allocation6]  }
  0x81   : > { %p5525_p2 = scmp.ne.s32.totalorder %s625_s12, %s5524_s3  ;;  %s5529_s13 = sshll.u32 %s5852_s17, 4  ;;  %s5530_s13 = int_to_ptr.vmem [resolvable:$false] %s5529_s13 }
  0x82   : > { %s5531_s10 = scalar_lea.vmem %s5530_s13, 256  ;;  %p5532_p5 = scmp.lt.s32.totalorder %s625_s12, %s5530_s13 }
  0x83   : > { %p5527_p4 = pnand %p5525_p2, %p6116_p9  ;;  %p5533_p10 = scmp.lt.s32.totalorder %s5531_s10, %s5524_s3 }
  0x85   : > { %p5528_p3 = pneg %p5527_p4  ;;  %p5534_p6 = por %p5533_p10, %p5532_p5 }
  0x87   : > { %p5535_p7 = pnand %p5534_p6, %p5528_p3 }
  0x89   : > { %5538 = shalt.err (!%p5535_p7)
}
  0x8a   : > { %5203 = dma.hbm_to_vmem [thread:$0]  (!%p6098_p8), %s6107_s9, 128, %s625_s12, %s6110_s16  }
  0x8b   : > { %s5853_s24 = smov [#allocation11]   ;;  %s5854_s22 = smov [#allocation14]  }
  0x8c   : > { %s476_s27 = sshll.u32 %s5853_s24, 4  ;;  %s500_s5 = sshll.u32 %s5854_s22, 4  ;;  %s477_s27 = int_to_ptr.vmem [resolvable:$true] %s476_s27  ;;  %s501_s5 = int_to_ptr.vmem [resolvable:$true] %s500_s5 }
  0x8d   : > { %s5550_s1 = scalar_lea.vmem %s477_s27, 256  ;;  %p6850_p2 = scmp.ne.s32.totalorder %s6833_s28, 0 }
  0x8e   : > { %p5551_p4 = scmp.ne.s32.totalorder %s477_s27, %s5550_s1  ;;  %p5558_p1 = scmp.lt.s32.totalorder %s477_s27, %s477_s27 }
  0x8f   : > { %p5559_p13 = scmp.lt.s32.totalorder %s5550_s1, %s5550_s1 }
  0x90   : > { %p5553_p11 = pnand %p5551_p4, %p6850_p2 }
  0x91   : > { %p5560_p6 = por %p5559_p13, %p5558_p1 }
  0x92   : > { %p5554_p12 = pneg %p5553_p11 }
  0x94   : > { %p5561_p7 = pnand %p5560_p6, %p5554_p12 }
  0x96   : > { %5564 = shalt.err (!%p5561_p7)
}
  0x97   : > { %p6851_p3 = scmp.ne.s32.totalorder %s6832_s21, 0  ;;  %s6852_s10 = smov 4  }
  0x98   : > { %s6853_s13 = smov 64   ;;  %s6854_s4 = sld [smem:[#allocation45_spill]] }
  0x99   : > { %s5576_s17 = scalar_lea.vmem %s501_s5, 256  ;;  %p5584_p4 = scmp.lt.s32.totalorder %s501_s5, %s501_s5 }
  0x9a   : > { %p5577_p0 = scmp.ne.s32.totalorder %s501_s5, %s5576_s17  ;;  %p5585_p11 = scmp.lt.s32.totalorder %s5576_s17, %s5576_s17 }
  0x9c   : > { %p5579_p5 = pnand %p5577_p0, %p6850_p2  ;;  %p5586_p12 = por %p5585_p11, %p5584_p4 }
  0x9e   : > { %5172 = dma.hbm_to_vmem [thread:$0]  (!%p6851_p3), %s6854_s4, 256, %s477_s27, [#allocation10], %s6853_s13, %s6853_s13, %s6852_s10  }
  0x9f   : > { %p5580_p10 = pneg %p5579_p5 }
  0xa1   : > { %p5587_p1 = pnand %p5586_p12, %p5580_p10 }
  0xa3   : > { %5590 = shalt.err (!%p5587_p1)
}
  0xa4   : > { %5178 = dma.hbm_to_vmem [thread:$0]  (!%p6851_p3), %s6777_s6, 256, %s501_s5, [#allocation13], %s6853_s13, %s6853_s13, %s6852_s10  }
  0xa5   : > { %s5855_s24 = smov [#allocation17]   ;;  %s5856_s22 = smov [#allocation20]  }
  0xa6   : > { %s524_s27 = sshll.u32 %s5855_s24, 4  ;;  %s552_s1 = sshll.u32 %s5856_s22, 4  ;;  %s525_s27 = int_to_ptr.vmem [resolvable:$true] %s524_s27  ;;  %s553_s1 = int_to_ptr.vmem [resolvable:$true] %s552_s1 }
  0xa7   : > { %s5602_s9 = scalar_lea.vmem %s525_s27, 256  ;;  %p5610_p0 = scmp.lt.s32.totalorder %s525_s27, %s525_s27 }
  0xa8   : > { %p5603_p13 = scmp.ne.s32.totalorder %s525_s27, %s5602_s9  ;;  %p5611_p5 = scmp.lt.s32.totalorder %s5602_s9, %s5602_s9 }
  0xaa   : > { %p5605_p6 = pnand %p5603_p13, %p6850_p2  ;;  %p5612_p10 = por %p5611_p5, %p5610_p0 }
  0xac   : > { %p5606_p7 = pneg %p5605_p6 }
  0xae   : > { %p5613_p4 = pnand %p5612_p10, %p5606_p7 }
  0xb0   : > { %5616 = shalt.err (!%p5613_p4)
}
  0xb1   : > { %5184 = dma.hbm_to_vmem [thread:$0]  (!%p6851_p3), %s6779_s8, 256, %s525_s27, [#allocation16], %s6853_s13, %s6853_s13, %s6852_s10  }
  0xb2   : > { %s5628_s17 = scalar_lea.vmem %s553_s1, 16  ;;  %s5635_s19 = scalar_lea.vmem %s553_s1, 32 }
  0xb3   : > { %p5629_p11 = scmp.ne.s32.totalorder %s553_s1, %s5628_s17  ;;  %p5636_p13 = scmp.lt.s32.totalorder %s553_s1, %s553_s1 }
  0xb4   : > { %p5637_p6 = scmp.lt.s32.totalorder %s5635_s19, %s5628_s17 }
  0xb5   : > { %p5631_p12 = pnand %p5629_p11, %p6850_p2 }
  0xb6   : > { %p5638_p7 = por %p5637_p6, %p5636_p13 }
  0xb7   : > { %p5632_p1 = pneg %p5631_p12 }
  0xb9   : > { %p5639_p0 = pnand %p5638_p7, %p5632_p1 }
  0xbb   : > { %5642 = shalt.err (!%p5639_p0)
}
  0xbc   : > { %5190 = dma.hbm_to_vmem [thread:$0]  (!%p6851_p3), %s6782_s11, 16, %s553_s1, [#allocation19]  }
  0xbd   : > { %s5857_s27 = smov [#allocation23]  }
  0xbe   : > { %s578_s22 = sshll.u32 %s5857_s27, 4  ;;  %s579_s22 = int_to_ptr.vmem [resolvable:$true] %s578_s22 }
  0xbf   : > { %s5654_s9 = scalar_lea.vmem %s579_s22, 1024  ;;  %p5662_p11 = scmp.lt.s32.totalorder %s579_s22, %s579_s22 }
  0xc0   : > { %p5655_p5 = scmp.ne.s32.totalorder %s579_s22, %s5654_s9  ;;  %p5663_p12 = scmp.lt.s32.totalorder %s5654_s9, %s5654_s9 }
  0xc2   : > { %p5657_p10 = pnand %p5655_p5, %p6850_p2  ;;  %p5664_p13 = por %p5663_p12, %p5662_p11 }
  0xc4   : > { %p5658_p4 = pneg %p5657_p10 }
  0xc6   : > { %p5665_p1 = pnand %p5664_p13, %p5658_p4 }
  0xc8   : > { %5668 = shalt.err (!%p5665_p1)
}
  0xc9   : > { %5196 = dma.hbm_to_vmem [thread:$0]  (!%p6851_p3), %s6785_s14, 1024, %s579_s22, [#allocation22], %s6853_s13, %s6853_s13, %s6852_s10  }
  0xca   : > { %s6855_s17 = sld [smem:[#allocation42_spill]]  ;;  %s599_s21 = scalar_lea.vmem [#allocation3], %s6093_s18 }
  0xcb   : > { %s606_s3 = sshll.u32 %s599_s21, 4  ;;  %s6856_s24 = sand.u32 1, %s5839_s26   ;;  %s607_s3 = int_to_ptr.vmem [resolvable:$true] %s606_s3 }
  0xcc   : > { %s596_s27 = scalar_lea.sflag [#allocation4], %s6856_s24 }
  0xd0   : > { %s6186_s19 = scalar_lea.hbm %s6855_s17, %s6096_s15  ;;  %s5674_s13 = scalar_lea.hbm %s6855_s17, 256 }
  0xd1   : > { %s5669_s9 = scalar_lea.hbm %s6186_s19, 128  ;;  %p5675_p3 = scmp.lt.s32.totalorder %s6186_s19, %s6855_s17 }
  0xd2   : > { %p5670_p2 = scmp.ne.s32.totalorder %s6186_s19, %s5669_s9  ;;  %p5676_p0 = scmp.lt.s32.totalorder %s5674_s13, %s5669_s9 }
  0xd4   : > { %p5672_p6 = pnand %p5670_p2, %p6116_p9  ;;  %p5677_p5 = por %p5676_p0, %p5675_p3 }
  0xd6   : > { %p5673_p7 = pneg %p5672_p6 }
  0xd8   : > { %p5678_p10 = pnand %p5677_p5, %p5673_p7 }
  0xda   : > { %5681 = shalt.err (!%p5678_p10)
}
  0xdb   : > { %s5682_s28 = scalar_lea.vmem %s607_s3, 128  ;;  %s5858_s12 = smov [#allocation3]  }
  0xdc   : > { %p5683_p4 = scmp.ne.s32.totalorder %s607_s3, %s5682_s28  ;;  %s5687_s21 = sshll.u32 %s5858_s12, 4  ;;  %s5688_s21 = int_to_ptr.vmem [resolvable:$false] %s5687_s21 }
  0xdd   : > { %s5689_s24 = scalar_lea.vmem %s5688_s21, 256  ;;  %p5690_p13 = scmp.lt.s32.totalorder %s607_s3, %s5688_s21 }
  0xde   : > { %p5685_p11 = pnand %p5683_p4, %p6116_p9  ;;  %p5691_p1 = scmp.lt.s32.totalorder %s5689_s24, %s5682_s28 }
  0xe0   : > { %p5686_p12 = pneg %p5685_p11  ;;  %p5692_p2 = por %p5691_p1, %p5690_p13 }
  0xe2   : > { %p5693_p6 = pnand %p5692_p2, %p5686_p12 }
  0xe4   : > { %5696 = shalt.err (!%p5693_p6)
}
  0xe5   : > { %5200 = dma.hbm_to_vmem [thread:$0]  (!%p6098_p8), %s6186_s19, 128, %s607_s3, %s596_s27  }
  0xe6   : > { %s640_s10 = scalar_lea.hbm %s6773_s2, %s6096_s15  ;;  %s635_s13 = scalar_lea.vmem [#allocation8], %s6093_s18 }
  0xe7   : > { %s642_s22 = sshll.u32 %s635_s13, 4  ;;  %s5697_s1 = scalar_lea.hbm %s640_s10, 128  ;;  %s643_s22 = int_to_ptr.vmem [resolvable:$true] %s642_s22 }
  0xe8   : > { %p5698_p7 = scmp.ne.s32.totalorder %s640_s10, %s5697_s1  ;;  %s5702_s21 = scalar_lea.hbm %s6773_s2, 256 }
  0xe9   : > { %p5703_p5 = scmp.lt.s32.totalorder %s640_s10, %s6773_s2  ;;  %p5704_p10 = scmp.lt.s32.totalorder %s5702_s21, %s5697_s1 }
  0xea   : > { %p5700_p3 = pnand %p5698_p7, %p6116_p9 }
  0xeb   : > { %p5705_p4 = por %p5704_p10, %p5703_p5 }
  0xec   : > { %p5701_p0 = pneg %p5700_p3 }
  0xee   : > { %p5706_p11 = pnand %p5705_p4, %p5701_p0 }
  0xf0   : > { %5709 = shalt.err (!%p5706_p11)
}
  0xf1   : > { %s5710_s15 = scalar_lea.vmem %s643_s22, 128  ;;  %s5859_s18 = smov [#allocation8]  }
  0xf2   : > { %p5711_p12 = scmp.ne.s32.totalorder %s643_s22, %s5710_s15  ;;  %s5715_s19 = sshll.u32 %s5859_s18, 4  ;;  %s5716_s19 = int_to_ptr.vmem [resolvable:$false] %s5715_s19 }
  0xf3   : > { %s5717_s3 = scalar_lea.vmem %s5716_s19, 256  ;;  %p5718_p2 = scmp.lt.s32.totalorder %s643_s22, %s5716_s19 }
  0xf4   : > { %p5713_p13 = pnand %p5711_p12, %p6116_p9  ;;  %p5719_p6 = scmp.lt.s32.totalorder %s5717_s3, %s5710_s15 }
  0xf6   : > { %p5714_p1 = pneg %p5713_p13  ;;  %p5720_p7 = por %p5719_p6, %p5718_p2 }
  0xf8   : > { %p5721_p3 = pnand %p5720_p7, %p5714_p1 }
  0xfa   : > { %5724 = shalt.err (!%p5721_p3)
}
  0xfb   : > { %5206 = dma.hbm_to_vmem [thread:$0]  (!%p6098_p8), %s640_s10, 128, %s643_s22, %s6110_s16  }
  0xfc   : > { %p6857_p0 = scmp.ne.s32.totalorder %s6831_s30, 0 }
  0xfd   : > { %s6228_s4 = sand.u32 (!%p6857_p0), 1, %s5835_s25   ;;  %p6858_p9 = scmp.ne.s32.totalorder (!%p6857_p0), %s6842_s29, 0 }
  0xfe   : > { %651 = sbr.rel (%p6857_p0) target bundleno = 5681 (0x1631), region = 84  ;;  %s6231_s20 = sshll.u32 (!%p6857_p0), %s6228_s4, 3 }
  0xff   : > { %s654_s27 = scalar_lea.sflag (!%p6857_p0), [#allocation4], %s6228_s4  ;;  %s657_s9 = scalar_lea.vmem (!%p6857_p0), [#allocation3], %s6231_s20 }
 0x103   : > { %5794 = dma.done.wait (%p6858_p9), %s654_s27, 128  }
 0x104   : > { %5796 = vsyncadd (%p6858_p9), %s654_s27, 4294967168  ;;  %s662_s30 = sand.u32 1, %s5986_s0   ;;  %s666_s16 = scalar_lea.vmem [#allocation6], %s6231_s20 }
 0x105   : > { %s663_s23 = scalar_lea.sflag [#allocation7], %s662_s30 }
 0x106   : > { %5798 = dma.done.wait (%p6858_p9), %s663_s23, 256  }
 0x107   : > { %5800 = vsyncadd (%p6858_p9), %s663_s23, 4294967040  ;;  %s675_s5 = scalar_lea.vmem [#allocation8], %s6231_s20  ;;  %p6859_p8 = scmp.eq.s32.totalorder %s5986_s0, 0 }
 0x109   : > { %5802 = dma.done.wait (%p6859_p8), [#allocation10], 384   ;;  %p6860_p5 = pmov %p6859_p8 }
 0x10b   : > { %5804 = vsyncadd (%p6860_p5), [#allocation10], 4294966912  ;;  %p6861_p10 = pmov %p6860_p5 }
 0x10c   : > { %p6862_p4 = pmov %p6860_p5 }
 0x10d   : > { %5806 = dma.done.wait (%p6861_p10), [#allocation13], 272  }
 0x10e   : > { %5808 = vsyncadd (%p6862_p4), [#allocation13], 4294967024  ;;  %p6863_p11 = pmov %p6862_p4 }
 0x10f   : > { %p6864_p12 = pmov %p6862_p4 }
 0x110   : > { %5810 = dma.done.wait (%p6863_p11), [#allocation16], 272  }
 0x111   : > { %5812 = vsyncadd (%p6864_p12), [#allocation16], 4294967024  ;;  %p6865_p13 = pmov %p6862_p4 }
 0x112   : > { %p6866_p1 = pmov %p6862_p4 }
 0x113   : > { %5814 = dma.done.wait (%p6865_p13), [#allocation19], 32  }
 0x114   : > { %5816 = vsyncadd (%p6866_p1), [#allocation19], 4294967264  ;;  %p6867_p2 = pmov %p6866_p1 }
 0x115   : > { %p6868_p6 = pmov %p6866_p1 }
 0x116   : > { %5818 = dma.done.wait (%p6867_p2), [#allocation22], 2048  }
 0x117   : > { %5820 = vsyncadd (%p6868_p6), [#allocation22], 4294965248  ;;  %v5860_v0 = vmov 0.0   ;;  %vm5861_vm0 = vmmov 0   ;;  %v5293_v1 = vld [vmem:[#allocation11 + $0x8] sm:$0xff]   ;;  %v5295_v3 = vld [vmem:[#allocation11] sm:$0xff]  }
 0x118   : > { %4860 = vmatprep.subr.bf16.mxu1 %v5860_v0  ;;  %4876 = vmatprep.subr.bf16.mxu0 %v5860_v0  ;;  %v5294_v2 = vld [vmem:[#allocation17 + $0x8] sm:$0xff]   ;;  %v5296_v4 = vld [vmem:[#allocation17] sm:$0xff]   ;;  %vm811_vm1 = vcmask 261120   ;;  %v5299_v10 = vld [vmem:[#allocation14 + $0x8] sm:$0xff]   ;;  %s6869_s13 = sld [smem:[#allocation49_spill]]  ;;  %vm1114_vm2 = vcmask 64512  }
 0x119   : > { %4864 = vmatprep.mubr.msk.bf16.mxu1 %vm5861_vm0, %v5860_v0  ;;  %4880 = vmatprep.mubr.msk.bf16.mxu0 %vm5861_vm0, %v5860_v0  ;;  %v783_v5 = vld [vmem:[%s666_s16] sm:$0xff]  ;;  %v785_v6 = vld [vmem:[%s675_s5] sm:$0xff]  ;;  %s5862_s28 = smov 112   ;;  %s5863_s12 = smov 120   ;;  %vm1450_vm3 = vcmask 130112   ;;  %vm1623_vm4 = vcmask 195712  }
 0x11a   : > { %4861 = vmatpush3.bf16.msra.mxu1 %v5293_v1  ;;  %4877 = vmatpush3.bf16.msra.mxu0 %v5294_v2  ;;  %v784_v7 = vpack.c.bf16 %v783_v5, %v783_v5  ;;  %v786_v8 = vpack.c.bf16 %v785_v6, %v785_v6  ;;  %v5297_v9 = vld [vmem:[#allocation21 + $0x8] sm:$0xff]   ;;  %v5298_v11 = vld [vmem:[#allocation21] sm:$0xff]   ;;  %v6279_v12 = vld [vmem:[%s657_s9] sm:$0xff]  ;;  %s6870_s15 = sld [smem:[#allocation51_spill]]  ;;  %s5864_s18 = smov 104   ;;  %vm1796_vm5 = vcmask 261312  }
 0x11b   : > { %4862 = vmatprep.subr.bf16.mxu1 %v5860_v0  ;;  %4878 = vmatprep.subr.bf16.mxu0 %v5860_v0  ;;  %v5300_v13 = vld [vmem:[#allocation14] sm:$0xff]   ;;  %v1047_v15 = vpack.c.bf16 %v6279_v12, %v6279_v12  ;;  %v4647_v17 = vld [vmem:[#allocation12] ss:$0 sm:$0xff]  ;;  %v4651_v28 = vld [vmem:[#allocation15] ss:$0 sm:$0xff]  ;;  %s5865_s19 = smov 8  }
 0x11c   : > { %v6352_v50 = vld [vmem:[#allocation9] sm:$0xff]  ;;  %s5866_s3 = smov 16   ;;  %s5867_s27 = smov 24  }
 0x11d   : > { %s6871_s23 = sld [smem:[#allocation52_spill]]  ;;  %s5868_s29 = smov 96  }
 0x11e   : > { %4863 = vmatpush3.bf16.msra.mxu1 %v5295_v3  ;;  %4879 = vmatpush3.bf16.msra.mxu0 %v5296_v4  ;;  %v5301_v14 = vld [vmem:[%s6869_s13 + $0x8] sm:$0xff]   ;;  %v5302_v16 = vld [vmem:[%s6869_s13] sm:$0xff]   ;;  %s5869_s10 = smov 88   ;;  %s5870_s22 = smov 80  }
 0x11f   : > { %4868 = vmatprep.subr.bf16.mxu1 %v5860_v0  ;;  %4892 = vmatprep.subr.bf16.mxu0 %v5860_v0  ;;  %s5871_s1 = smov 72   ;;  %s4343_s30 = scalar_lea.sflag [#allocation26], %s6228_s4 }
 0x120   : > { %v4663_v27 = vld [vmem:[%s6870_s15] ss:$0 sm:$0xff]  ;;  %s5872_s5 = smov [#allocation25]  }
 0x121   : > { %4865 = vmatmul.mubr.msk.bf16.vlgmr.msra.gmra.mxu1 %vm811_vm1, %v784_v7  ;;  %4881 = vmatmul.mubr.msk.bf16.vlgmr.msra.gmra.mxu0 %vm811_vm1, %v786_v8  ;;  %s5729_s21 = sshll.u32 %s5872_s5, 4  ;;  %s5730_s21 = int_to_ptr.vmem [resolvable:$false] %s5729_s21 }
 0x122   : > { %4869 = vmatpush3.bf16.msra.mxu1 %v5299_v10  ;;  %4893 = vmatpush3.bf16.msra.mxu0 %v5297_v9  ;;  %s5731_s24 = scalar_lea.vmem %s5730_s21, 1024 }
 0x123   : > { %4896 = vmatprep.mubr.msk.bf16.mxu0 %vm5861_vm0, %v5860_v0  ;;  %4894 = vmatprep.subr.bf16.mxu0 %v5860_v0 }
 0x124   : > { %4870 = vmatprep.subr.bf16.mxu1 %v5860_v0  ;;  %4872 = vmatprep.mubr.msk.bf16.mxu1 %vm5861_vm0, %v5860_v0 }
 0x126   : > { %4871 = vmatpush3.bf16.msra.mxu1 %v5300_v13  ;;  %4895 = vmatpush3.bf16.msra.mxu0 %v5298_v11 }
 0x127   : > { %4884 = vmatprep.subr.bf16.mxu1 %v5860_v0  ;;  %4910 = vmatprep.subr.mxu0 %v5860_v0 }
 0x129   : > { %4873 = vmatmul.mubr.msk.bf16.vlgmr.msra.gmra.mxu1 %vm811_vm1, %v784_v7  ;;  %4897 = vmatmul.mubr.msk.bf16.vlgmr.msra.gmra.mxu0 %vm811_vm1, %v1047_v15 }
 0x12a   : > { %4885 = vmatpush3.bf16.msra.mxu1 %v5301_v14  ;;  %4888 = vmatprep.mubr.msk.bf16.mxu1 %vm5861_vm0, %v5860_v0 }
 0x12b   : > { %4886 = vmatprep.subr.bf16.mxu1 %v5860_v0  ;;  %4912 = vmatprep.mubr.msk.f32.mxu0 %vm5861_vm0, %v5860_v0 }
 0x12e   : > { %4887 = vmatpush3.bf16.msra.mxu1 %v5302_v16 }
 0x12f   : > { %4900 = vmatprep.subr.mxu1 %v5860_v0 }
 0x131   : > { %4889 = vmatmul.mubr.msk.bf16.vlgmr.msra.gmra.mxu1 %vm811_vm1, %v786_v8 }
 0x132   : > { %4902 = vmatprep.mubr.msk.f32.mxu1 %vm5861_vm0, %v5860_v0 }
 0x1e1   : > { %v849_v18 = vpop.f32.mrf.mxu1  ;;  %v6311_v20 = vpop.f32.mrf.mxu0 }
 0x1e2   : > { %v6309_v19 = vadd.f32 %v4647_v17, %v849_v18 }
 0x1e3   : > { %v4866_v21 = vpop.f32.mrf.mxu1  ;;  %v4882_v22 = vpop.f32.mrf.mxu0 }
 0x1e4   : > { %1454 = vrot.lane.b32.xlu1 %v6309_v19, %s5862_s28  ;;  %1280 = vrot.lane.b32.xlu0 %v6309_v19, %s5863_s12 }
 0x1e5   : > { %v852_v23 = vpop.f32.mrf.mxu1  ;;  %4901 = vmatpush3.xpose.msk.msra.mxu1 %vm1114_vm2, %v6309_v19  ;;  %v981_v24 = vpop.f32.mrf.mxu0 }
 0x1e6   : > { %4905 = vmatprep.subr.mxu1 %v5860_v0 }
 0x1e7   : > { %v4867_v25 = vpop.f32.mrf.mxu1  ;;  %v4883_v26 = vpop.f32.mrf.mxu0 }
 0x1e9   : > { %v912_v29 = vpop.f32.mrf.mxu1  ;;  %v1108_v30 = vpop.f32.mrf.mxu0 }
 0x1ea   : > { %v1109_v31 = vadd.f32 %v4663_v27, %v1108_v30  ;;  %v6323_v32 = vadd.f32 %v4651_v28, %v912_v29 }
 0x1eb   : > { %v4874_v33 = vpop.f32.mrf.mxu1  ;;  %v4898_v34 = vpop.f32.mrf.mxu0 }
 0x1ec   : > { %1452 = vrot.lane.b32.xlu1 %v1109_v31, %s5862_s28  ;;  %1278 = vrot.lane.b32.xlu0 %v1109_v31, %s5863_s12 }
 0x1ed   : > { %v915_v35 = vpop.f32.mrf.mxu1  ;;  %4903 = vmatmul.mubr.msk.f32.vlgmr.msra.gmra.mxu1 %vm1114_vm2, %v1109_v31  ;;  %v1111_v36 = vpop.f32.mrf.mxu0 }
 0x1ee   : > { %4906 = vmatpush3.msra.mxu1 %v6323_v32  ;;  %4907 = vmatprep.mubr.msk.f32.mxu1 %vm5861_vm0, %v5860_v0 }
 0x1ef   : > { %v4875_v37 = vpop.f32.mrf.mxu1  ;;  %v4899_v38 = vpop.f32.mrf.mxu0  ;;  %4915 = vmatprep.subr.mxu1 %v5860_v0 }
 0x1f0   : > { %1625 = vrot.lane.b32.xlu1 %v1109_v31, %s5864_s18  ;;  %1627 = vrot.lane.b32.xlu0 %v6309_v19, %s5864_s18 }
 0x1f1   : > { %v6335_v39 = vpop.f32.mrf.mxu1 }
 0x1f3   : > { %v4890_v40 = vpop.f32.mrf.mxu1 }
 0x1f5   : > { %v1044_v41 = vpop.f32.mrf.mxu1 }
 0x1f7   : > { %v4891_v42 = vpop.f32.mrf.mxu1 }
 0x256   : > { %v1281_v43 = vpop.permute.xlu0 %1280  ;;  %v1455_v44 = vpop.permute.xlu1 %1454 }
 0x257   : > { %4911 = vmatpush3.xpose.msk.msra.mxu0 %vm1114_vm2, %v1281_v43 }
 0x258   : > { %4920 = vmatprep.subr.mxu0 %v5860_v0 }
 0x25e   : > { %v1279_v45 = vpop.permute.xlu0 %1278  ;;  %v1453_v46 = vpop.permute.xlu1 %1452 }
 0x25f   : > { %4913 = vmatmul.mubr.msk.f32.vlgmr.msra.gmra.mxu0 %vm1114_vm2, %v1279_v45 }
 0x260   : > { %4921 = vmatpush3.xpose.msk.msra.mxu0 %vm1114_vm2, %v1455_v44  ;;  %4922 = vmatprep.mubr.msk.f32.mxu0 %vm5861_vm0, %v5860_v0 }
 0x261   : > { %4930 = vmatprep.subr.mxu0 %v5860_v0 }
 0x262   : > { %v1628_v47 = vpop.permute.xlu0 %1627  ;;  %v1626_v48 = vpop.permute.xlu1 %1625 }
 0x263   : > { %4923 = vmatmul.mubr.msk.f32.vlgmr.msra.gmra.mxu0 %vm1114_vm2, %v1453_v46 }
 0x264   : > { %4931 = vmatpush3.xpose.msk.msra.mxu0 %vm1114_vm2, %v1628_v47  ;;  %4932 = vmatprep.mubr.msk.f32.mxu0 %vm5861_vm0, %v5860_v0 }
 0x265   : > { %4940 = vmatprep.subr.bf16.mxu0 %v5860_v0 }
 0x267   : > { %4933 = vmatmul.mubr.msk.f32.vlgmr.msra.gmra.mxu0 %vm1114_vm2, %v1626_v48 }
 0x268   : > { %4944 = vmatprep.mubr.msk.bf16.mxu0 %vm5861_vm0, %v5860_v0 }
 0x2ad   : > { %v1187_v49 = vpop.f32.mrf.mxu1 }
 0x2ae   : > { %v1191_v51 = vmul.f32 0.35355338, %v1187_v49  ;;  %v5303_v49 = vld [vmem:[#allocation23 + $0x8] sm:$0xff]  }
 0x2af   : > { %v4904_v52 = vpop.f32.mrf.mxu1  ;;  %4941 = vmatpush3.bf16.msra.mxu0 %v5303_v49 }
 0x2b0   : > { %v1192_v53 = vadd.f32 %v1191_v51, %v6352_v50  ;;  %4942 = vmatprep.subr.bf16.mxu0 %v5860_v0  ;;  %v5304_v51 = vld [vmem:[#allocation23] sm:$0xff]  }
 0x2b2   : > { %v1193_v54 = vsel %vm1114_vm2, %v1192_v53, -inf }
 0x2b3   : > { %1194 = vmax.xlane.f32.xlu0 %v1193_v54  ;;  %4943 = vmatpush3.bf16.msra.mxu0 %v5304_v51  ;;  %v4655_v54 = vld [vmem:[#allocation18] ss:$0 sm:$0xff] }
 0x2b4   : > { %4956 = vmatprep.subr.mxu0 %v5860_v0 }
 0x31f   : > { %v1352_v55 = vpop.f32.mrf.mxu0 }
 0x320   : > { %v1356_v56 = vmul.f32 0.35355338, %v1352_v55 }
 0x321   : > { %v4914_v57 = vpop.f32.mrf.mxu0 }
 0x322   : > { %v1357_v58 = vadd.f32 %v1356_v56, %v6352_v50  ;;  %v6393_v57 = vadd.f32 %v4655_v54, %v6311_v20 }
 0x323   : > { %v1526_v59 = vpop.f32.mrf.mxu0 }
 0x324   : > { %v1530_v60 = vmul.f32 0.35355338, %v1526_v59  ;;  %v1358_v61 = vsel %vm1114_vm2, %v1357_v58, -inf }
 0x325   : > { %1359 = vmax.xlane.f32.xlu1 %v1358_v61  ;;  %v4924_v62 = vpop.f32.mrf.mxu0 }
 0x326   : > { %v1531_v63 = vadd.f32 %v1530_v60, %v6352_v50 }
 0x327   : > { %v1699_v1 = vpop.f32.mrf.mxu0 }
 0x328   : > { %v1703_v2 = vmul.f32 0.35355338, %v1699_v1  ;;  %v1532_v3 = vsel %vm1114_vm2, %v1531_v63, -inf }
 0x329   : > { %1533 = vmax.xlane.f32.xlu0 %v1532_v3  ;;  %v4934_v4 = vpop.f32.mrf.mxu0 }
 0x32a   : > { %v1704_v5 = vadd.f32 %v1703_v2, %v6352_v50  ;;  %v5306_v2 = vld [vmem:[#allocation21 + $0x10] sm:$0xff]   ;;  %v4682_v4 = vld [vmem:[%s6871_s23] ss:$0 sm:$0xff] }
 0x32c   : > { %v1705_v6 = vsel %vm1114_vm2, %v1704_v5, -inf }
 0x32d   : > { %1706 = vmax.xlane.f32.xlu0 %v1705_v6 }
 0x336   : > { %1370 = vrot.lane.b32.xlu1 %v6323_v32, %s5863_s12 }
 0x33c   : > { %v1195_v7 = vpop.xlane.xlu0 %1194 }
 0x33d   : > { %v1196_v8 = vsub.f32 %v1192_v53, %v1195_v7  ;;  %v4659_v7 = vld [vmem:[#allocation20] ss:$0 sm:$0xff] }
 0x33f   : > { %v1197_v9 = vmul.f32 1.442695, %v1196_v8 }
 0x341   : > { %5317 = vpow2.f32 %v1197_v9 }
 0x34e   : > { %v5318_v10 = vpop.eup %5317 }
 0x34f   : > { %v1199_v11 = vsel %vm1114_vm2, %v5318_v10, 0.0 }
 0x35a   : > { %1200 = vadd.xlane.f32.xlu1 %v1199_v11  ;;  %v6422_v11 = vadd.f32 %v4659_v7, %v6335_v39 }
 0x3ae   : > { %v1360_v13 = vpop.xlane.xlu1 %1359 }
 0x3af   : > { %v1361_v14 = vsub.f32 %v1357_v58, %v1360_v13  ;;  %v5305_v58 = vld [vmem:[#allocation21 + $0x18] sm:$0xff]  }
 0x3b1   : > { %v1362_v15 = vmul.f32 1.442695, %v1361_v14 }
 0x3b2   : > { %v1534_v16 = vpop.xlane.xlu0 %1533  ;;  %v1371_v30 = vpop.permute.xlu1 %1370 }
 0x3b3   : > { %5319 = vpow2.f32 %v1362_v15  ;;  %v1535_v17 = vsub.f32 %v1531_v63, %v1534_v16 }
 0x3b5   : > { %v1536_v18 = vmul.f32 1.442695, %v1535_v17 }
 0x3b6   : > { %v1707_v21 = vpop.xlane.xlu0 %1706 }
 0x3b7   : > { %5321 = vpow2.f32 %v1536_v18  ;;  %v1708_v22 = vsub.f32 %v1704_v5, %v1707_v21 }
 0x3b9   : > { %v1709_v23 = vmul.f32 1.442695, %v1708_v22 }
 0x3bb   : > { %5323 = vpow2.f32 %v1709_v23 }
 0x3c0   : > { %v5320_v24 = vpop.eup %5319 }
 0x3c1   : > { %v1364_v25 = vsel %vm1114_vm2, %v5320_v24, 0.0 }
 0x3c2   : > { %1365 = vadd.xlane.f32.xlu0 %v1364_v25 }
 0x3c4   : > { %v5322_v26 = vpop.eup %5321 }
 0x3c5   : > { %v1538_v27 = vsel %vm1114_vm2, %v5322_v26, 0.0 }
 0x3c6   : > { %1539 = vadd.xlane.f32.xlu1 %v1538_v27 }
 0x3c8   : > { %v5324_v28 = vpop.eup %5323 }
 0x3c9   : > { %v1711_v29 = vsel %vm1114_vm2, %v5324_v28, 0.0 }
 0x3ca   : > { %1712 = vadd.xlane.f32.xlu0 %v1711_v29 }
 0x3d7   : > { %1716 = vrot.lane.b32.xlu1 %v6323_v32, %s5864_s18 }
 0x3e0   : > { %1543 = vrot.lane.b32.xlu0 %v6323_v32, %s5862_s28 }
 0x3e3   : > { %v1201_v31 = vpop.xlane.xlu1 %1200 }
 0x3e4   : > { %5325 = vrcp.f32 %v1201_v31 }
 0x3f1   : > { %v5326_v33 = vpop.eup %5325 }
 0x3f2   : > { %v1203_v34 = vmul.f32 %v5326_v33, %v5318_v10 }
 0x3f4   : > { %4908 = vmatmul.mubr.msk.f32.vlgmr.msra.gmra.mxu1 %vm1114_vm2, %v1203_v34 }
 0x3f5   : > { %4916 = vmatpush3.msra.mxu1 %v1371_v30  ;;  %4917 = vmatprep.mubr.msk.f32.mxu1 %vm5861_vm0, %v5860_v0 }
 0x3f6   : > { %4925 = vmatprep.subr.mxu1 %v5860_v0 }
 0x44b   : > { %v1366_v35 = vpop.xlane.xlu0 %1365 }
 0x44c   : > { %5327 = vrcp.f32 %v1366_v35 }
 0x44f   : > { %v1540_v36 = vpop.xlane.xlu1 %1539 }
 0x450   : > { %5329 = vrcp.f32 %v1540_v36 }
 0x453   : > { %v1713_v37 = vpop.xlane.xlu0 %1712  ;;  %v1717_v44 = vpop.permute.xlu1 %1716 }
 0x454   : > { %5331 = vrcp.f32 %v1713_v37 }
 0x457   : > { %v1544_v41 = vpop.permute.xlu0 %1543 }
 0x459   : > { %v5328_v38 = vpop.eup %5327 }
 0x45a   : > { %v1368_v40 = vmul.f32 %v5328_v38, %v5320_v24 }
 0x45c   : > { %4918 = vmatmul.mubr.msk.f32.vlgmr.msra.gmra.mxu1 %vm1114_vm2, %v1368_v40 }
 0x45d   : > { %v5330_v42 = vpop.eup %5329  ;;  %4926 = vmatpush3.msra.mxu1 %v1544_v41  ;;  %4927 = vmatprep.mubr.msk.f32.mxu1 %vm5861_vm0, %v5860_v0 }
 0x45e   : > { %4935 = vmatprep.subr.mxu1 %v5860_v0  ;;  %v1542_v43 = vmul.f32 %v5330_v42, %v5322_v26 }
 0x460   : > { %4928 = vmatmul.mubr.msk.f32.vlgmr.msra.gmra.mxu1 %vm1114_vm2, %v1542_v43 }
 0x461   : > { %v5332_v45 = vpop.eup %5331  ;;  %4936 = vmatpush3.msra.mxu1 %v1717_v44  ;;  %4937 = vmatprep.mubr.msk.f32.mxu1 %vm5861_vm0, %v5860_v0 }
 0x462   : > { %v1715_v46 = vmul.f32 %v5332_v45, %v5324_v28  ;;  %4948 = vmatprep.subr.bf16.mxu1 %v5860_v0 }
 0x464   : > { %4938 = vmatmul.mubr.msk.f32.vlgmr.msra.gmra.mxu1 %vm1114_vm2, %v1715_v46 }
 0x465   : > { %4952 = vmatprep.mubr.msk.bf16.mxu1 %vm5861_vm0, %v5860_v0  ;;  %4949 = vmatpush3.bf16.msra.mxu1 %v5305_v58 }
 0x466   : > { %4950 = vmatprep.subr.bf16.mxu1 %v5860_v0 }
 0x469   : > { %4951 = vmatpush3.bf16.msra.mxu1 %v5306_v2 }
 0x46a   : > { %4961 = vmatprep.subr.mxu1 %v5860_v0 }
 0x4b4   : > { %v1273_v47 = vpop.f32.mrf.mxu1 }
 0x4b5   : > { %1277 = vst.msk [vmem:[#allocation2] sm:$0xff] %vm1114_vm2, %v1273_v47 }
 0x4b6   : > { %v4909_v48 = vpop.f32.mrf.mxu1 }
 0x51c   : > { %v1442_v52 = vpop.f32.mrf.mxu1 }
 0x51d   : > { %1447 = vrot.lane.b32.xlu1 %v1442_v52, %s5865_s19 }
 0x51e   : > { %v4919_v53 = vpop.f32.mrf.mxu1 }
 0x520   : > { %v1615_v55 = vpop.f32.mrf.mxu1 }
 0x521   : > { %1620 = vrot.lane.b32.xlu0 %v1615_v55, %s5866_s3 }
 0x522   : > { %v4929_v56 = vpop.f32.mrf.mxu1 }
 0x524   : > { %v1788_v59 = vpop.f32.mrf.mxu1 }
 0x525   : > { %2101 = vrot.lane.b32.xlu0 %v6393_v57, %s5863_s12  ;;  %1793 = vrot.lane.b32.xlu1 %v1788_v59, %s5867_s27 }
 0x526   : > { %v4939_v60 = vpop.f32.mrf.mxu1 }
 0x529   : > { %2273 = vrot.lane.b32.xlu0 %v6393_v57, %s5862_s28 }
 0x52d   : > { %2444 = vrot.lane.b32.xlu0 %v6393_v57, %s5864_s18 }
 0x58f   : > { %v1448_v20 = vpop.permute.xlu1 %1447 }
 0x590   : > { %1451 = vst.msk [vmem:[#allocation2] sm:$0xff] %vm1450_vm3, %v1448_v20 }
 0x593   : > { %v1621_v61 = vpop.permute.xlu0 %1620 }
 0x594   : > { %1624 = vst.msk [vmem:[#allocation2] sm:$0xff] %vm1623_vm4, %v1621_v61 }
 0x597   : > { %v1794_v62 = vpop.permute.xlu1 %1793  ;;  %v2102_v17 = vpop.permute.xlu0 %2101 }
 0x598   : > { %1797 = vst.msk [vmem:[#allocation2] sm:$0xff] %vm1796_vm5, %v1794_v62 }
 0x59b   : > { %v2274_v21 = vpop.permute.xlu0 %2273 }
 0x59f   : > { %v1798_v63 = vld [vmem:[#allocation2] sm:$0xff]  ;;  %v2445_v24 = vpop.permute.xlu0 %2444 }
 0x5a0   : > { %v1799_v1 = vpack.c.bf16 %v1798_v63, %v1798_v63 }
 0x5a2   : > { %4945 = vmatmul.mubr.msk.bf16.vlgmr.msra.gmra.mxu0 %vm811_vm1, %v1799_v1 }
 0x5a3   : > { %4957 = vmatpush3.xpose.msk.msra.mxu0 %vm1114_vm2, %v6393_v57  ;;  %4958 = vmatprep.mubr.msk.f32.mxu0 %vm5861_vm0, %v5860_v0 }
 0x5a4   : > { %4966 = vmatprep.subr.mxu0 %v5860_v0 }
 0x662   : > { %v1853_v3 = vpop.f32.mrf.mxu0 }
 0x663   : > { %v1859_v5 = vadd.f32 %v1853_v3, %v6279_v12  ;;  %v4684_v12 = vld [vmem:[%s6870_s15 + $0x1] ss:$0 sm:$0xff] }
 0x664   : > { %v4946_v6 = vpop.f32.mrf.mxu0 }
 0x665   : > { %v6417_v8 = vadd.f32 %v4682_v4, %v1859_v5 }
 0x666   : > { %v1856_v9 = vpop.f32.mrf.mxu0 }
 0x667   : > { %v1868_v10 = vpack.c.bf16 %v6417_v8, %v6417_v8 }
 0x668   : > { %v4947_v13 = vpop.f32.mrf.mxu0 }
 0x669   : > { %4953 = vmatmul.mubr.msk.bf16.vlgmr.msra.gmra.mxu1 %vm811_vm1, %v1868_v10 }
 0x66a   : > { %4962 = vmatpush3.msra.mxu1 %v6422_v11  ;;  %4963 = vmatprep.mubr.msk.f32.mxu1 %vm5861_vm0, %v5860_v0 }
 0x66b   : > { %4971 = vmatprep.subr.mxu1 %v5860_v0 }
 0x729   : > { %v1931_v14 = vpop.f32.mrf.mxu1 }
 0x72a   : > { %v1932_v15 = vadd.f32 %v4684_v12, %v1931_v14 }
 0x72b   : > { %v4954_v16 = vpop.f32.mrf.mxu1 }
 0x72c   : > { %2099 = vrot.lane.b32.xlu1 %v1932_v15, %s5863_s12  ;;  %4959 = vmatmul.mubr.msk.f32.vlgmr.msra.gmra.mxu0 %vm1114_vm2, %v1932_v15 }
 0x72d   : > { %4967 = vmatpush3.xpose.msk.msra.mxu0 %vm1114_vm2, %v2102_v17  ;;  %v1934_v39 = vpop.f32.mrf.mxu1  ;;  %4968 = vmatprep.mubr.msk.f32.mxu0 %vm5861_vm0, %v5860_v0 }
 0x72e   : > { %4976 = vmatprep.subr.mxu0 %v5860_v0 }
 0x72f   : > { %v4955_v18 = vpop.f32.mrf.mxu1 }
 0x730   : > { %2271 = vrot.lane.b32.xlu1 %v1932_v15, %s5862_s28 }
 0x734   : > { %2442 = vrot.lane.b32.xlu1 %v1932_v15, %s5864_s18 }
 0x79e   : > { %v2100_v22 = vpop.permute.xlu1 %2099 }
 0x79f   : > { %4969 = vmatmul.mubr.msk.f32.vlgmr.msra.gmra.mxu0 %vm1114_vm2, %v2100_v22  ;;  %v5307_v22 = vld [vmem:[#allocation23 + $0x18] sm:$0xff]  }
 0x7a0   : > { %4977 = vmatpush3.xpose.msk.msra.mxu0 %vm1114_vm2, %v2274_v21  ;;  %4978 = vmatprep.mubr.msk.f32.mxu0 %vm5861_vm0, %v5860_v0 }
 0x7a1   : > { %4986 = vmatprep.subr.mxu0 %v5860_v0 }
 0x7a2   : > { %v2272_v23 = vpop.permute.xlu1 %2271 }
 0x7a3   : > { %4979 = vmatmul.mubr.msk.f32.vlgmr.msra.gmra.mxu0 %vm1114_vm2, %v2272_v23  ;;  %v5308_v23 = vld [vmem:[#allocation23 + $0x10] sm:$0xff]  }
 0x7a4   : > { %4987 = vmatpush3.xpose.msk.msra.mxu0 %vm1114_vm2, %v2445_v24  ;;  %4988 = vmatprep.mubr.msk.f32.mxu0 %vm5861_vm0, %v5860_v0 }
 0x7a5   : > { %4996 = vmatprep.subr.bf16.mxu0 %v5860_v0 }
 0x7a6   : > { %v2443_v25 = vpop.permute.xlu1 %2442 }
 0x7a7   : > { %4989 = vmatmul.mubr.msk.f32.vlgmr.msra.gmra.mxu0 %vm1114_vm2, %v2443_v25 }
 0x7a8   : > { %5000 = vmatprep.mubr.msk.bf16.mxu0 %vm5861_vm0, %v5860_v0  ;;  %4997 = vmatpush3.bf16.msra.mxu0 %v5307_v22 }
 0x7a9   : > { %4998 = vmatprep.subr.bf16.mxu0 %v5860_v0 }
 0x7ac   : > { %4999 = vmatpush3.bf16.msra.mxu0 %v5308_v23 }
 0x7ad   : > { %5012 = vmatprep.subr.mxu0 %v5860_v0 }
 0x7ec   : > { %v2009_v26 = vpop.f32.mrf.mxu0 }
 0x7ed   : > { %v2013_v27 = vmul.f32 0.35355338, %v2009_v26 }
 0x7ee   : > { %v4960_v28 = vpop.f32.mrf.mxu0 }
 0x7ef   : > { %v2014_v29 = vsel %vm1114_vm2, %v2013_v27, -inf }
 0x7f0   : > { %2015 = vmax.xlane.f32.xlu0 %v2014_v29 }
 0x85f   : > { %v2173_v30 = vpop.f32.mrf.mxu0 }
 0x860   : > { %v2177_v31 = vmul.f32 0.35355338, %v2173_v30 }
 0x861   : > { %v4970_v33 = vpop.f32.mrf.mxu0 }
 0x862   : > { %v2178_v34 = vsel %vm1114_vm2, %v2177_v31, -inf }
 0x863   : > { %2179 = vmax.xlane.f32.xlu1 %v2178_v34  ;;  %v2345_v35 = vpop.f32.mrf.mxu0 }
 0x864   : > { %v2349_v36 = vmul.f32 0.35355338, %v2345_v35 }
 0x865   : > { %v4980_v37 = vpop.f32.mrf.mxu0 }
 0x866   : > { %v2350_v38 = vsel %vm1114_vm2, %v2349_v36, -inf  ;;  %v5310_v37 = vld [vmem:[#allocation21 + $0x20] sm:$0xff]  }
 0x867   : > { %2351 = vmax.xlane.f32.xlu0 %v2350_v38  ;;  %v2516_v40 = vpop.f32.mrf.mxu0 }
 0x868   : > { %v2520_v41 = vmul.f32 0.35355338, %v2516_v40  ;;  %v4704_v40 = vld [vmem:[%s6871_s23 + $0x1] ss:$0 sm:$0xff] }
 0x869   : > { %v4990_v42 = vpop.f32.mrf.mxu0 }
 0x86a   : > { %v2521_v43 = vsel %vm1114_vm2, %v2520_v41, -inf }
 0x86b   : > { %2522 = vmax.xlane.f32.xlu0 %v2521_v43 }
 0x874   : > { %2190 = vrot.lane.b32.xlu1 %v6422_v11, %s5863_s12 }
 0x879   : > { %v2016_v44 = vpop.xlane.xlu0 %2015 }
 0x87a   : > { %v2017_v45 = vsub.f32 %v2013_v27, %v2016_v44 }
 0x87c   : > { %v2018_v46 = vmul.f32 1.442695, %v2017_v45 }
 0x87e   : > { %5333 = vpow2.f32 %v2018_v46 }
 0x88b   : > { %v5334_v47 = vpop.eup %5333 }
 0x88c   : > { %v2020_v48 = vsel %vm1114_vm2, %v5334_v47, 0.0 }
 0x898   : > { %2021 = vadd.xlane.f32.xlu1 %v2020_v48 }
 0x8ec   : > { %v2180_v49 = vpop.xlane.xlu1 %2179 }
 0x8ed   : > { %v2181_v51 = vsub.f32 %v2177_v31, %v2180_v49 }
 0x8ef   : > { %v2182_v52 = vmul.f32 1.442695, %v2181_v51 }
 0x8f0   : > { %v2352_v53 = vpop.xlane.xlu0 %2351  ;;  %v2191_v2 = vpop.permute.xlu1 %2190 }
 0x8f1   : > { %5335 = vpow2.f32 %v2182_v52  ;;  %v2353_v54 = vsub.f32 %v2349_v36, %v2352_v53 }
 0x8f3   : > { %v2354_v55 = vmul.f32 1.442695, %v2353_v54 }
 0x8f4   : > { %v2523_v56 = vpop.xlane.xlu0 %2522 }
 0x8f5   : > { %5337 = vpow2.f32 %v2354_v55  ;;  %v2524_v58 = vsub.f32 %v2520_v41, %v2523_v56 }
 0x8f7   : > { %v2525_v59 = vmul.f32 1.442695, %v2524_v58 }
 0x8f9   : > { %5339 = vpow2.f32 %v2525_v59 }
 0x8fe   : > { %v5336_v60 = vpop.eup %5335 }
 0x8ff   : > { %v2184_v20 = vsel %vm1114_vm2, %v5336_v60, 0.0 }
 0x900   : > { %2185 = vadd.xlane.f32.xlu0 %v2184_v20 }
 0x902   : > { %v5338_v61 = vpop.eup %5337 }
 0x903   : > { %v2356_v62 = vsel %vm1114_vm2, %v5338_v61, 0.0 }
 0x904   : > { %2357 = vadd.xlane.f32.xlu1 %v2356_v62 }
 0x906   : > { %v5340_v63 = vpop.eup %5339 }
 0x907   : > { %v2527_v1 = vsel %vm1114_vm2, %v5340_v63, 0.0 }
 0x908   : > { %2528 = vadd.xlane.f32.xlu0 %v2527_v1 }
 0x915   : > { %2532 = vrot.lane.b32.xlu1 %v6422_v11, %s5864_s18 }
 0x91e   : > { %2361 = vrot.lane.b32.xlu0 %v6422_v11, %s5862_s28 }
 0x921   : > { %v2022_v3 = vpop.xlane.xlu1 %2021 }
 0x922   : > { %5341 = vrcp.f32 %v2022_v3 }
 0x92f   : > { %v5342_v4 = vpop.eup %5341 }
 0x930   : > { %v2024_v5 = vmul.f32 %v5342_v4, %v5334_v47  ;;  %v4706_v47 = vld [vmem:[%s6870_s15 + $0x2] ss:$0 sm:$0xff] }
 0x932   : > { %4964 = vmatmul.mubr.msk.f32.vlgmr.msra.gmra.mxu1 %vm1114_vm2, %v2024_v5 }
 0x933   : > { %4972 = vmatpush3.msra.mxu1 %v2191_v2  ;;  %4973 = vmatprep.mubr.msk.f32.mxu1 %vm5861_vm0, %v5860_v0 }
 0x934   : > { %4981 = vmatprep.subr.mxu1 %v5860_v0 }
 0x989   : > { %v2186_v6 = vpop.xlane.xlu0 %2185 }
 0x98a   : > { %5343 = vrcp.f32 %v2186_v6 }
 0x98d   : > { %v2358_v7 = vpop.xlane.xlu1 %2357 }
 0x98e   : > { %5345 = vrcp.f32 %v2358_v7 }
 0x991   : > { %v2529_v9 = vpop.xlane.xlu0 %2528  ;;  %v2533_v16 = vpop.permute.xlu1 %2532 }
 0x992   : > { %5347 = vrcp.f32 %v2529_v9 }
 0x995   : > { %v2362_v12 = vpop.permute.xlu0 %2361 }
 0x997   : > { %v5344_v10 = vpop.eup %5343 }
 0x998   : > { %v2188_v13 = vmul.f32 %v5344_v10, %v5336_v60 }
 0x99a   : > { %4974 = vmatmul.mubr.msk.f32.vlgmr.msra.gmra.mxu1 %vm1114_vm2, %v2188_v13 }
 0x99b   : > { %v5346_v14 = vpop.eup %5345  ;;  %4982 = vmatpush3.msra.mxu1 %v2362_v12  ;;  %4983 = vmatprep.mubr.msk.f32.mxu1 %vm5861_vm0, %v5860_v0 }
 0x99c   : > { %4991 = vmatprep.subr.mxu1 %v5860_v0  ;;  %v2360_v15 = vmul.f32 %v5346_v14, %v5338_v61 }
 0x99e   : > { %4984 = vmatmul.mubr.msk.f32.vlgmr.msra.gmra.mxu1 %vm1114_vm2, %v2360_v15 }
 0x99f   : > { %v5348_v17 = vpop.eup %5347  ;;  %4992 = vmatpush3.msra.mxu1 %v2533_v16  ;;  %4993 = vmatprep.mubr.msk.f32.mxu1 %vm5861_vm0, %v5860_v0 }
 0x9a0   : > { %v2531_v39 = vmul.f32 %v5348_v17, %v5340_v63  ;;  %5004 = vmatprep.subr.bf16.mxu1 %v5860_v0 }
 0x9a2   : > { %4994 = vmatmul.mubr.msk.f32.vlgmr.msra.gmra.mxu1 %vm1114_vm2, %v2531_v39 }
 0x9a3   : > { %5008 = vmatprep.mubr.msk.bf16.mxu1 %vm5861_vm0, %v5860_v0 }
 0x9f2   : > { %v2094_v18 = vpop.f32.mrf.mxu1 }
 0x9f3   : > { %2098 = vst.msk [vmem:[#allocation2] sm:$0xff] %vm1114_vm2, %v2094_v18 }
 0x9f4   : > { %v4965_v21 = vpop.f32.mrf.mxu1 }
 0xa5a   : > { %v2262_v24 = vpop.f32.mrf.mxu1 }
 0xa5b   : > { %2267 = vrot.lane.b32.xlu1 %v2262_v24, %s5865_s19 }
 0xa5c   : > { %v4975_v25 = vpop.f32.mrf.mxu1 }
 0xa5e   : > { %v2433_v26 = vpop.f32.mrf.mxu1 }
 0xa5f   : > { %2438 = vrot.lane.b32.xlu0 %v2433_v26, %s5866_s3 }
 0xa60   : > { %v4985_v27 = vpop.f32.mrf.mxu1 }
 0xa62   : > { %v2604_v28 = vpop.f32.mrf.mxu1 }
 0xa63   : > { %2754 = vrot.lane.b32.xlu0 %v6309_v19, %s5868_s29  ;;  %2609 = vrot.lane.b32.xlu1 %v2604_v28, %s5867_s27 }
 0xa64   : > { %v4995_v29 = vpop.f32.mrf.mxu1 }
 0xa67   : > { %2923 = vrot.lane.b32.xlu1 %v6309_v19, %s5869_s10 }
 0xa6b   : > { %3095 = vrot.lane.b32.xlu1 %v6309_v19, %s5870_s22 }
 0xa6f   : > { %3267 = vrot.lane.b32.xlu1 %v6309_v19, %s5871_s1  ;;  %v5309_v19 = vld [vmem:[#allocation21 + $0x28] sm:$0xff]  }
 0xa70   : > { %5005 = vmatpush3.bf16.msra.mxu1 %v5309_v19 }
 0xa71   : > { %5006 = vmatprep.subr.bf16.mxu1 %v5860_v0 }
 0xa74   : > { %5007 = vmatpush3.bf16.msra.mxu1 %v5310_v37 }
 0xa75   : > { %5017 = vmatprep.subr.mxu1 %v5860_v0 }
 0xacd   : > { %v2268_v30 = vpop.permute.xlu1 %2267 }
 0xace   : > { %2270 = vst.msk [vmem:[#allocation2] sm:$0xff] %vm1450_vm3, %v2268_v30 }
 0xad1   : > { %v2439_v31 = vpop.permute.xlu0 %2438 }
 0xad2   : > { %2441 = vst.msk [vmem:[#allocation2] sm:$0xff] %vm1623_vm4, %v2439_v31 }
 0xad5   : > { %v2610_v33 = vpop.permute.xlu1 %2609  ;;  %v2755_v36 = vpop.permute.xlu0 %2754 }
 0xad6   : > { %2612 = vst.msk [vmem:[#allocation2] sm:$0xff] %vm1796_vm5, %v2610_v33 }
 0xad9   : > { %v2924_v51 = vpop.permute.xlu1 %2923 }
 0xadd   : > { %v2613_v34 = vld [vmem:[#allocation2] sm:$0xff]  ;;  %v3096_v54 = vpop.permute.xlu1 %3095 }
 0xade   : > { %v2614_v35 = vpack.c.bf16 %v2613_v34, %v2613_v34 }
 0xae0   : > { %5001 = vmatmul.mubr.msk.bf16.vlgmr.msra.gmra.mxu0 %vm811_vm1, %v2614_v35 }
 0xae1   : > { %5013 = vmatpush3.xpose.msk.msra.mxu0 %vm1114_vm2, %v2755_v36  ;;  %5014 = vmatprep.mubr.msk.f32.mxu0 %vm5861_vm0, %v5860_v0  ;;  %v3268_v58 = vpop.permute.xlu1 %3267 }
 0xae2   : > { %5022 = vmatprep.subr.mxu0 %v5860_v0 }
 0xba0   : > { %v2669_v38 = vpop.f32.mrf.mxu0 }
 0xba1   : > { %v2675_v41 = vadd.f32 %v2669_v38, %v6417_v8 }
 0xba2   : > { %v5002_v42 = vpop.f32.mrf.mxu0 }
 0xba3   : > { %v6510_v43 = vadd.f32 %v4704_v40, %v2675_v41 }
 0xba4   : > { %v2672_v44 = vpop.f32.mrf.mxu0 }
 0xba5   : > { %v2685_v45 = vpack.c.bf16 %v6510_v43, %v6510_v43 }
 0xba6   : > { %v5003_v46 = vpop.f32.mrf.mxu0 }
 0xba7   : > { %5009 = vmatmul.mubr.msk.bf16.vlgmr.msra.gmra.mxu1 %vm811_vm1, %v2685_v45 }
 0xba8   : > { %5019 = vmatprep.mubr.msk.f32.mxu1 %vm5861_vm0, %v5860_v0 }
 0xc67   : > { %v2748_v48 = vpop.f32.mrf.mxu1 }
 0xc68   : > { %v2749_v49 = vadd.f32 %v4706_v47, %v2748_v48 }
 0xc69   : > { %v5010_v8 = vpop.f32.mrf.mxu1 }
 0xc6a   : > { %2921 = vrot.lane.b32.xlu0 %v2749_v49, %s5863_s12  ;;  %5015 = vmatmul.mubr.msk.f32.vlgmr.msra.gmra.mxu0 %vm1114_vm2, %v2749_v49 }
 0xc6b   : > { %5023 = vmatpush3.xpose.msk.msra.mxu0 %vm1114_vm2, %v2924_v51  ;;  %v2751_v52 = vpop.f32.mrf.mxu1  ;;  %5024 = vmatprep.mubr.msk.f32.mxu0 %vm5861_vm0, %v5860_v0 }
 0xc6c   : > { %5032 = vmatprep.subr.mxu0 %v5860_v0 }
 0xc6d   : > { %v5011_v53 = vpop.f32.mrf.mxu1 }
 0xc6e   : > { %3093 = vrot.lane.b32.xlu0 %v2749_v49, %s5862_s28 }
 0xc72   : > { %3265 = vrot.lane.b32.xlu0 %v2749_v49, %s5864_s18 }
 0xcdc   : > { %v2922_v55 = vpop.permute.xlu0 %2921 }
 0xcdd   : > { %5025 = vmatmul.mubr.msk.f32.vlgmr.msra.gmra.mxu0 %vm1114_vm2, %v2922_v55 }
 0xcde   : > { %5033 = vmatpush3.xpose.msk.msra.mxu0 %vm1114_vm2, %v3096_v54  ;;  %5034 = vmatprep.mubr.msk.f32.mxu0 %vm5861_vm0, %v5860_v0 }
 0xcdf   : > { %5042 = vmatprep.subr.mxu0 %v5860_v0 }
 0xce0   : > { %v3094_v56 = vpop.permute.xlu0 %3093 }
 0xce1   : > { %5035 = vmatmul.mubr.msk.f32.vlgmr.msra.gmra.mxu0 %vm1114_vm2, %v3094_v56 }
 0xce2   : > { %5043 = vmatpush3.xpose.msk.msra.mxu0 %vm1114_vm2, %v3268_v58  ;;  %5044 = vmatprep.mubr.msk.f32.mxu0 %vm5861_vm0, %v5860_v0  ;;  %v5311_v58 = vld [vmem:[#allocation23 + $0x28] sm:$0xff]  }
 0xce3   : > { %5052 = vmatprep.subr.bf16.mxu0 %v5860_v0 }
 0xce4   : > { %v3266_v59 = vpop.permute.xlu0 %3265 }
 0xce5   : > { %5045 = vmatmul.mubr.msk.f32.vlgmr.msra.gmra.mxu0 %vm1114_vm2, %v3266_v59  ;;  %v5312_v59 = vld [vmem:[#allocation23 + $0x20] sm:$0xff]  }
 0xce6   : > { %5056 = vmatprep.mubr.msk.bf16.mxu0 %vm5861_vm0, %v5860_v0  ;;  %5053 = vmatpush3.bf16.msra.mxu0 %v5311_v58 }
 0xce7   : > { %5054 = vmatprep.subr.bf16.mxu0 %v5860_v0 }
 0xcea   : > { %5055 = vmatpush3.bf16.msra.mxu0 %v5312_v59 }
 0xceb   : > { %5068 = vmatprep.subr.mxu0 %v5860_v0 }
 0xd2a   : > { %v2827_v60 = vpop.f32.mrf.mxu0 }
 0xd2b   : > { %v2831_v20 = vmul.f32 0.35355338, %v2827_v60 }
 0xd2c   : > { %v5016_v61 = vpop.f32.mrf.mxu0 }
 0xd2d   : > { %v2832_v62 = vadd.f32 %v2831_v20, %v6352_v50 }
 0xd2f   : > { %v2833_v63 = vsel %vm1114_vm2, %v2832_v62, -inf }
 0xd30   : > { %2834 = vmax.xlane.f32.xlu1 %v2833_v63 }
 0xd9d   : > { %v2995_v1 = vpop.f32.mrf.mxu0 }
 0xd9e   : > { %v2999_v2 = vmul.f32 0.35355338, %v2995_v1 }
 0xd9f   : > { %v5026_v3 = vpop.f32.mrf.mxu0 }
 0xda0   : > { %v3000_v4 = vadd.f32 %v2999_v2, %v6352_v50 }
 0xda1   : > { %v3167_v5 = vpop.f32.mrf.mxu0 }
 0xda2   : > { %v3171_v6 = vmul.f32 0.35355338, %v3167_v5  ;;  %v3001_v7 = vsel %vm1114_vm2, %v3000_v4, -inf }
 0xda3   : > { %3002 = vmax.xlane.f32.xlu0 %v3001_v7  ;;  %v5036_v9 = vpop.f32.mrf.mxu0 }
 0xda4   : > { %v3172_v10 = vadd.f32 %v3171_v6, %v6352_v50  ;;  %v5314_v9 = vld [vmem:[#allocation21 + $0x30] sm:$0xff]  }
 0xda5   : > { %v3339_v13 = vpop.f32.mrf.mxu0 }
 0xda6   : > { %v3343_v12 = vmul.f32 0.35355338, %v3339_v13  ;;  %v3173_v14 = vsel %vm1114_vm2, %v3172_v10, -inf  ;;  %v4726_v13 = vld [vmem:[%s6871_s23 + $0x2] ss:$0 sm:$0xff] }
 0xda7   : > { %3174 = vmax.xlane.f32.xlu0 %v3173_v14  ;;  %v5046_v15 = vpop.f32.mrf.mxu0 }
 0xda8   : > { %v3344_v16 = vadd.f32 %v3343_v12, %v6352_v50 }
 0xdaa   : > { %v3345_v17 = vsel %vm1114_vm2, %v3344_v16, -inf }
 0xdab   : > { %3346 = vmax.xlane.f32.xlu1 %v3345_v17 }
 0xdb9   : > { %v2835_v39 = vpop.xlane.xlu1 %2834 }
 0xdba   : > { %v2836_v18 = vsub.f32 %v2832_v62, %v2835_v39 }
 0xdbc   : > { %v2837_v21 = vmul.f32 1.442695, %v2836_v18  ;;  %3012 = vrot.lane.b32.xlu1 %v6323_v32, %s5869_s10  ;;  %v4728_v18 = vld [vmem:[%s6870_s15 + $0x3] ss:$0 sm:$0xff] }
 0xdbe   : > { %5349 = vpow2.f32 %v2837_v21 }
 0xdcb   : > { %v5350_v22 = vpop.eup %5349 }
 0xdcc   : > { %v2839_v23 = vsel %vm1114_vm2, %v5350_v22, 0.0 }
 0xdcd   : > { %2840 = vadd.xlane.f32.xlu0 %v2839_v23 }
 0xde3   : > { %2844 = vrot.lane.b32.xlu0 %v6323_v32, %s5868_s29 }
 0xe2c   : > { %v3003_v24 = vpop.xlane.xlu0 %3002 }
 0xe2d   : > { %v3004_v25 = vsub.f32 %v3000_v4, %v3003_v24 }
 0xe2f   : > { %v3005_v50 = vmul.f32 1.442695, %v3004_v25 }
 0xe30   : > { %v3175_v26 = vpop.xlane.xlu0 %3174 }
 0xe31   : > { %5351 = vpow2.f32 %v3005_v50  ;;  %v3176_v27 = vsub.f32 %v3172_v10, %v3175_v26 }
 0xe33   : > { %v3177_v28 = vmul.f32 1.442695, %v3176_v27 }
 0xe34   : > { %v3347_v29 = vpop.xlane.xlu1 %3346 }
 0xe35   : > { %5353 = vpow2.f32 %v3177_v28  ;;  %v3348_v30 = vsub.f32 %v3344_v16, %v3347_v29 }
 0xe37   : > { %v3349_v31 = vmul.f32 1.442695, %v3348_v30 }
 0xe38   : > { %v3013_v44 = vpop.permute.xlu1 %3012 }
 0xe39   : > { %5355 = vpow2.f32 %v3349_v31 }
 0xe3e   : > { %v5352_v33 = vpop.eup %5351 }
 0xe3f   : > { %v3007_v34 = vsel %vm1114_vm2, %v5352_v33, 0.0 }
 0xe40   : > { %3008 = vadd.xlane.f32.xlu1 %v3007_v34 }
 0xe42   : > { %v5354_v35 = vpop.eup %5353 }
 0xe43   : > { %v3179_v36 = vsel %vm1114_vm2, %v5354_v35, 0.0 }
 0xe44   : > { %3180 = vadd.xlane.f32.xlu0 %v3179_v36 }
 0xe46   : > { %v5356_v19 = vpop.eup %5355 }
 0xe47   : > { %v3351_v37 = vsel %vm1114_vm2, %v5356_v19, 0.0 }
 0xe48   : > { %3352 = vadd.xlane.f32.xlu1 %v3351_v37 }
 0xe56   : > { %v2841_v38 = vpop.xlane.xlu0 %2840 }
 0xe57   : > { %5357 = vrcp.f32 %v2841_v38 }
 0xe59   : > { %3184 = vrot.lane.b32.xlu1 %v6323_v32, %s5870_s22 }
 0xe5a   : > { %3356 = vrot.lane.b32.xlu0 %v6323_v32, %s5871_s1  ;;  %v2845_v40 = vpop.permute.xlu0 %2844 }
 0xe5b   : > { %5018 = vmatpush3.msra.mxu1 %v2845_v40 }
 0xe5c   : > { %5027 = vmatprep.subr.mxu1 %v5860_v0 }
 0xe64   : > { %v5358_v41 = vpop.eup %5357 }
 0xe65   : > { %v2843_v42 = vmul.f32 %v5358_v41, %v5350_v22 }
 0xe67   : > { %5020 = vmatmul.mubr.msk.f32.vlgmr.msra.gmra.mxu1 %vm1114_vm2, %v2843_v42 }
 0xe68   : > { %5028 = vmatpush3.msra.mxu1 %v3013_v44  ;;  %5029 = vmatprep.mubr.msk.f32.mxu1 %vm5861_vm0, %v5860_v0 }
 0xe69   : > { %5037 = vmatprep.subr.mxu1 %v5860_v0 }
 0xec9   : > { %v3009_v45 = vpop.xlane.xlu1 %3008 }
 0xeca   : > { %5359 = vrcp.f32 %v3009_v45 }
 0xecd   : > { %v3181_v46 = vpop.xlane.xlu0 %3180 }
 0xece   : > { %5361 = vrcp.f32 %v3181_v46 }
 0xed1   : > { %v3353_v32 = vpop.xlane.xlu1 %3352  ;;  %v3357_v52 = vpop.permute.xlu0 %3356 }
 0xed2   : > { %5363 = vrcp.f32 %v3353_v32 }
 0xed5   : > { %v3185_v49 = vpop.permute.xlu1 %3184 }
 0xed7   : > { %v5360_v47 = vpop.eup %5359 }
 0xed8   : > { %v3011_v48 = vmul.f32 %v5360_v47, %v5352_v33 }
 0xeda   : > { %5030 = vmatmul.mubr.msk.f32.vlgmr.msra.gmra.mxu1 %vm1114_vm2, %v3011_v48 }
 0xedb   : > { %v5362_v8 = vpop.eup %5361  ;;  %5038 = vmatpush3.msra.mxu1 %v3185_v49  ;;  %5039 = vmatprep.mubr.msk.f32.mxu1 %vm5861_vm0, %v5860_v0 }
 0xedc   : > { %5047 = vmatprep.subr.mxu1 %v5860_v0  ;;  %v3183_v51 = vmul.f32 %v5362_v8, %v5354_v35 }
 0xede   : > { %5040 = vmatmul.mubr.msk.f32.vlgmr.msra.gmra.mxu1 %vm1114_vm2, %v3183_v51 }
 0xedf   : > { %v5364_v53 = vpop.eup %5363  ;;  %5048 = vmatpush3.msra.mxu1 %v3357_v52  ;;  %5049 = vmatprep.mubr.msk.f32.mxu1 %vm5861_vm0, %v5860_v0 }
 0xee0   : > { %v3355_v54 = vmul.f32 %v5364_v53, %v5356_v19  ;;  %5060 = vmatprep.subr.bf16.mxu1 %v5860_v0 }
 0xee2   : > { %5050 = vmatmul.mubr.msk.f32.vlgmr.msra.gmra.mxu1 %vm1114_vm2, %v3355_v54 }
 0xee3   : > { %5064 = vmatprep.mubr.msk.bf16.mxu1 %vm5861_vm0, %v5860_v0 }
 0xf27   : > { %v2916_v55 = vpop.f32.mrf.mxu1 }
 0xf28   : > { %2920 = vst.msk [vmem:[#allocation2] sm:$0xff] %vm1114_vm2, %v2916_v55 }
 0xf29   : > { %v5021_v56 = vpop.f32.mrf.mxu1 }
 0xf9a   : > { %v3084_v60 = vpop.f32.mrf.mxu1 }
 0xf9b   : > { %3089 = vrot.lane.b32.xlu1 %v3084_v60, %s5865_s19 }
 0xf9c   : > { %v5031_v20 = vpop.f32.mrf.mxu1 }
 0xf9e   : > { %v3256_v61 = vpop.f32.mrf.mxu1 }
 0xf9f   : > { %3261 = vrot.lane.b32.xlu0 %v3256_v61, %s5866_s3 }
 0xfa0   : > { %v5041_v62 = vpop.f32.mrf.mxu1 }
 0xfa2   : > { %v3428_v63 = vpop.f32.mrf.mxu1 }
 0xfa3   : > { %3578 = vrot.lane.b32.xlu0 %v6393_v57, %s5868_s29  ;;  %3433 = vrot.lane.b32.xlu1 %v3428_v63, %s5867_s27 }
 0xfa4   : > { %v5051_v1 = vpop.f32.mrf.mxu1 }
 0xfa7   : > { %3747 = vrot.lane.b32.xlu1 %v6393_v57, %s5869_s10 }
 0xfab   : > { %3920 = vrot.lane.b32.xlu1 %v6393_v57, %s5870_s22 }
 0xfaf   : > { %4093 = vrot.lane.b32.xlu1 %v6393_v57, %s5871_s1  ;;  %v5313_v57 = vld [vmem:[#allocation21 + $0x38] sm:$0xff]  }
 0xfb0   : > { %5061 = vmatpush3.bf16.msra.mxu1 %v5313_v57 }
 0xfb1   : > { %5062 = vmatprep.subr.bf16.mxu1 %v5860_v0 }
 0xfb4   : > { %5063 = vmatpush3.bf16.msra.mxu1 %v5314_v9 }
 0xfb5   : > { %5073 = vmatprep.subr.mxu1 %v5860_v0 }
0x100d   : > { %v3090_v2 = vpop.permute.xlu1 %3089 }
0x100e   : > { %3092 = vst.msk [vmem:[#allocation2] sm:$0xff] %vm1450_vm3, %v3090_v2 }
0x1011   : > { %v3262_v3 = vpop.permute.xlu0 %3261 }
0x1012   : > { %3264 = vst.msk [vmem:[#allocation2] sm:$0xff] %vm1623_vm4, %v3262_v3 }
0x1015   : > { %v3434_v4 = vpop.permute.xlu1 %3433  ;;  %v3579_v7 = vpop.permute.xlu0 %3578 }
0x1016   : > { %3436 = vst.msk [vmem:[#allocation2] sm:$0xff] %vm1796_vm5, %v3434_v4 }
0x1019   : > { %v3748_v23 = vpop.permute.xlu1 %3747 }
0x101d   : > { %v3437_v5 = vld [vmem:[#allocation2] sm:$0xff]  ;;  %v3921_v50 = vpop.permute.xlu1 %3920 }
0x101e   : > { %v3438_v6 = vpack.c.bf16 %v3437_v5, %v3437_v5 }
0x1020   : > { %5057 = vmatmul.mubr.msk.bf16.vlgmr.msra.gmra.mxu0 %vm811_vm1, %v3438_v6 }
0x1021   : > { %5069 = vmatpush3.xpose.msk.msra.mxu0 %vm1114_vm2, %v3579_v7  ;;  %5070 = vmatprep.mubr.msk.f32.mxu0 %vm5861_vm0, %v5860_v0  ;;  %v4094_v28 = vpop.permute.xlu1 %4093 }
0x1022   : > { %5078 = vmatprep.subr.mxu0 %v5860_v0 }
0x10e0   : > { %v3493_v10 = vpop.f32.mrf.mxu0 }
0x10e1   : > { %v3499_v12 = vadd.f32 %v3493_v10, %v6510_v43 }
0x10e2   : > { %v5058_v14 = vpop.f32.mrf.mxu0 }
0x10e3   : > { %v6605_v15 = vadd.f32 %v4726_v13, %v3499_v12 }
0x10e4   : > { %v3496_v16 = vpop.f32.mrf.mxu0 }
0x10e5   : > { %v3509_v17 = vpack.c.bf16 %v6605_v15, %v6605_v15 }
0x10e6   : > { %v5059_v39 = vpop.f32.mrf.mxu0 }
0x10e7   : > { %5065 = vmatmul.mubr.msk.bf16.vlgmr.msra.gmra.mxu1 %vm811_vm1, %v3509_v17 }
0x10e8   : > { %5075 = vmatprep.mubr.msk.f32.mxu1 %vm5861_vm0, %v5860_v0 }
0x11a7   : > { %v3572_v21 = vpop.f32.mrf.mxu1 }
0x11a8   : > { %v3573_v22 = vadd.f32 %v4728_v18, %v3572_v21 }
0x11a9   : > { %v5066_v43 = vpop.f32.mrf.mxu1 }
0x11aa   : > { %3745 = vrot.lane.b32.xlu0 %v3573_v22, %s5863_s12  ;;  %5071 = vmatmul.mubr.msk.f32.vlgmr.msra.gmra.mxu0 %vm1114_vm2, %v3573_v22 }
0x11ab   : > { %5079 = vmatpush3.xpose.msk.msra.mxu0 %vm1114_vm2, %v3748_v23  ;;  %v3575_v24 = vpop.f32.mrf.mxu1  ;;  %5080 = vmatprep.mubr.msk.f32.mxu0 %vm5861_vm0, %v5860_v0  ;;  %v5315_v23 = vld [vmem:[#allocation23 + $0x38] sm:$0xff]  }
0x11ac   : > { %5088 = vmatprep.subr.mxu0 %v5860_v0  ;;  %v5316_v24 = vld [vmem:[#allocation23 + $0x30] sm:$0xff]  }
0x11ad   : > { %v5067_v25 = vpop.f32.mrf.mxu1 }
0x11ae   : > { %3918 = vrot.lane.b32.xlu0 %v3573_v22, %s5862_s28  ;;  %s4646_s28 = sshll.u32 %s6228_s4, 5 }
0x11af   : > { %s6654_s12 = scalar_lea.vmem [#allocation25], %s4646_s28 }
0x11b2   : > { %4091 = vrot.lane.b32.xlu0 %v3573_v22, %s5864_s18  ;;  %s6872_s18 = sld [smem:[#allocation40_spill]] }
0x11b8   : > { %p6875_p3 = scmp.ne.s32.totalorder %s6872_s18, 0 }
0x121c   : > { %v3746_v26 = vpop.permute.xlu0 %3745 }
0x121d   : > { %5081 = vmatmul.mubr.msk.f32.vlgmr.msra.gmra.mxu0 %vm1114_vm2, %v3746_v26 }
0x121e   : > { %5089 = vmatpush3.xpose.msk.msra.mxu0 %vm1114_vm2, %v3921_v50  ;;  %5090 = vmatprep.mubr.msk.f32.mxu0 %vm5861_vm0, %v5860_v0 }
0x121f   : > { %5098 = vmatprep.subr.mxu0 %v5860_v0 }
0x1220   : > { %v3919_v27 = vpop.permute.xlu0 %3918 }
0x1221   : > { %5091 = vmatmul.mubr.msk.f32.vlgmr.msra.gmra.mxu0 %vm1114_vm2, %v3919_v27 }
0x1222   : > { %5099 = vmatpush3.xpose.msk.msra.mxu0 %vm1114_vm2, %v4094_v28  ;;  %5100 = vmatprep.mubr.msk.f32.mxu0 %vm5861_vm0, %v5860_v0 }
0x1223   : > { %5108 = vmatprep.subr.bf16.mxu0 %v5860_v0 }
0x1224   : > { %v4092_v29 = vpop.permute.xlu0 %4091 }
0x1225   : > { %5101 = vmatmul.mubr.msk.f32.vlgmr.msra.gmra.mxu0 %vm1114_vm2, %v4092_v29 }
0x1226   : > { %5112 = vmatprep.mubr.msk.bf16.mxu0 %vm5861_vm0, %v5860_v0  ;;  %5109 = vmatpush3.bf16.msra.mxu0 %v5315_v23 }
0x1227   : > { %5110 = vmatprep.subr.bf16.mxu0 %v5860_v0 }
0x122a   : > { %5111 = vmatpush3.bf16.msra.mxu0 %v5316_v24 }
0x126a   : > { %v3651_v30 = vpop.f32.mrf.mxu0 }
0x126b   : > { %v3655_v31 = vmul.f32 0.35355338, %v3651_v30 }
0x126c   : > { %v5072_v33 = vpop.f32.mrf.mxu0 }
0x126d   : > { %v3656_v34 = vsel %vm1114_vm2, %v3655_v31, -inf }
0x126e   : > { %3657 = vmax.xlane.f32.xlu1 %v3656_v34 }
0x12dd   : > { %v3819_v35 = vpop.f32.mrf.mxu0 }
0x12de   : > { %v3823_v36 = vmul.f32 0.35355338, %v3819_v35 }
0x12df   : > { %v5082_v19 = vpop.f32.mrf.mxu0 }
0x12e0   : > { %v3824_v37 = vsel %vm1114_vm2, %v3823_v36, -inf }
0x12e1   : > { %3825 = vmax.xlane.f32.xlu0 %v3824_v37  ;;  %v3992_v38 = vpop.f32.mrf.mxu0 }
0x12e2   : > { %v3996_v40 = vmul.f32 0.35355338, %v3992_v38 }
0x12e3   : > { %v5092_v41 = vpop.f32.mrf.mxu0 }
0x12e4   : > { %v3997_v42 = vsel %vm1114_vm2, %v3996_v40, -inf }
0x12e5   : > { %3998 = vmax.xlane.f32.xlu0 %v3997_v42  ;;  %v4165_v44 = vpop.f32.mrf.mxu0 }
0x12e6   : > { %v4169_v45 = vmul.f32 0.35355338, %v4165_v44 }
0x12e7   : > { %v5102_v46 = vpop.f32.mrf.mxu0 }
0x12e8   : > { %v4170_v32 = vsel %vm1114_vm2, %v4169_v45, -inf }
0x12e9   : > { %4171 = vmax.xlane.f32.xlu1 %v4170_v32 }
0x12f7   : > { %v3658_v47 = vpop.xlane.xlu1 %3657 }
0x12f8   : > { %v3659_v48 = vsub.f32 %v3655_v31, %v3658_v47 }
0x12fa   : > { %v3660_v49 = vmul.f32 1.442695, %v3659_v48  ;;  %3837 = vrot.lane.b32.xlu1 %v6422_v11, %s5869_s10 }
0x12fc   : > { %5365 = vpow2.f32 %v3660_v49 }
0x1309   : > { %v5366_v8 = vpop.eup %5365 }
0x130a   : > { %v3662_v51 = vsel %vm1114_vm2, %v5366_v8, 0.0 }
0x130b   : > { %3663 = vadd.xlane.f32.xlu0 %v3662_v51 }
0x1321   : > { %3668 = vrot.lane.b32.xlu0 %v6422_v11, %s5868_s29  ;;  %s4369_s29 = sshll.u32 %s6654_s12, 4  ;;  %s6692_s29 = int_to_ptr.vmem [resolvable:$true] %s4369_s29 }
0x1322   : > { %s5725_s16 = scalar_lea.vmem %s6692_s29, 512  ;;  %p5732_p8 = scmp.lt.s32.totalorder %s6692_s29, %s5730_s21 }
0x1323   : > { %p5726_p7 = scmp.ne.s32.totalorder %s6692_s29, %s5725_s16  ;;  %p5733_p5 = scmp.lt.s32.totalorder %s5731_s24, %s5725_s16 }
0x1325   : > { %p5727_p0 = pnand %p5726_p7, %p6875_p3  ;;  %p5734_p10 = por %p5733_p5, %p5732_p8 }
0x1327   : > { %p5728_p9 = pneg %p5727_p0 }
0x1329   : > { %p5735_p4 = pnand %p5734_p10, %p5728_p9 }
0x136a   : > { %v3826_v52 = vpop.xlane.xlu0 %3825 }
0x136b   : > { %v3827_v53 = vsub.f32 %v3823_v36, %v3826_v52 }
0x136d   : > { %v3828_v54 = vmul.f32 1.442695, %v3827_v53 }
0x136e   : > { %v3999_v55 = vpop.xlane.xlu0 %3998 }
0x136f   : > { %5367 = vpow2.f32 %v3828_v54  ;;  %v4000_v56 = vsub.f32 %v3996_v40, %v3999_v55 }
0x1371   : > { %v4001_v58 = vmul.f32 1.442695, %v4000_v56 }
0x1372   : > { %v4172_v59 = vpop.xlane.xlu1 %4171 }
0x1373   : > { %5369 = vpow2.f32 %v4001_v58  ;;  %v4173_v60 = vsub.f32 %v4169_v45, %v4172_v59 }
0x1375   : > { %v4174_v20 = vmul.f32 1.442695, %v4173_v60 }
0x1376   : > { %v3838_v57 = vpop.permute.xlu1 %3837 }
0x1377   : > { %5371 = vpow2.f32 %v4174_v20 }
0x137c   : > { %v5368_v61 = vpop.eup %5367 }
0x137d   : > { %v3830_v62 = vsel %vm1114_vm2, %v5368_v61, 0.0 }
0x137e   : > { %3831 = vadd.xlane.f32.xlu1 %v3830_v62 }
0x1380   : > { %v5370_v63 = vpop.eup %5369 }
0x1381   : > { %v4003_v1 = vsel %vm1114_vm2, %v5370_v63, 0.0 }
0x1382   : > { %4004 = vadd.xlane.f32.xlu0 %v4003_v1 }
0x1384   : > { %v5372_v2 = vpop.eup %5371 }
0x1385   : > { %v4176_v3 = vsel %vm1114_vm2, %v5372_v2, 0.0 }
0x1386   : > { %4177 = vadd.xlane.f32.xlu1 %v4176_v3 }
0x1394   : > { %v3664_v4 = vpop.xlane.xlu0 %3663 }
0x1395   : > { %5373 = vrcp.f32 %v3664_v4 }
0x1397   : > { %4010 = vrot.lane.b32.xlu1 %v6422_v11, %s5870_s22 }
0x1398   : > { %4183 = vrot.lane.b32.xlu0 %v6422_v11, %s5871_s1  ;;  %v3669_v5 = vpop.permute.xlu0 %3668 }
0x1399   : > { %5074 = vmatpush3.msra.mxu1 %v3669_v5 }
0x139a   : > { %5083 = vmatprep.subr.mxu1 %v5860_v0 }
0x13a2   : > { %v5374_v6 = vpop.eup %5373 }
0x13a3   : > { %v3666_v7 = vmul.f32 %v5374_v6, %v5366_v8 }
0x13a5   : > { %3667 = vst.msk [vmem:[%s6654_s12] sm:$0xff] %vm1114_vm2, %v3666_v7  ;;  %5076 = vmatmul.mubr.msk.f32.vlgmr.msra.gmra.mxu1 %vm1114_vm2, %v3666_v7 }
0x13a6   : > { %5084 = vmatpush3.msra.mxu1 %v3838_v57  ;;  %5085 = vmatprep.mubr.msk.f32.mxu1 %vm5861_vm0, %v5860_v0 }
0x13a7   : > { %5093 = vmatprep.subr.mxu1 %v5860_v0 }
0x1407   : > { %v3832_v11 = vpop.xlane.xlu1 %3831 }
0x1408   : > { %5375 = vrcp.f32 %v3832_v11 }
0x140b   : > { %v4005_v9 = vpop.xlane.xlu0 %4004 }
0x140c   : > { %5377 = vrcp.f32 %v4005_v9 }
0x140f   : > { %v4178_v10 = vpop.xlane.xlu1 %4177  ;;  %v4184_v39 = vpop.permute.xlu0 %4183 }
0x1410   : > { %5379 = vrcp.f32 %v4178_v10 }
0x1413   : > { %v4011_v14 = vpop.permute.xlu1 %4010 }
0x1415   : > { %v5376_v13 = vpop.eup %5375 }
0x1416   : > { %v3834_v12 = vmul.f32 %v5376_v13, %v5368_v61 }
0x1418   : > { %4737 = vst.msk [vmem:[%s6654_s12 + $0x8] sm:$0xff] %vm1114_vm2, %v3834_v12  ;;  %5086 = vmatmul.mubr.msk.f32.vlgmr.msra.gmra.mxu1 %vm1114_vm2, %v3834_v12 }
0x1419   : > { %v5378_v16 = vpop.eup %5377  ;;  %5094 = vmatpush3.msra.mxu1 %v4011_v14  ;;  %5095 = vmatprep.mubr.msk.f32.mxu1 %vm5861_vm0, %v5860_v0 }
0x141a   : > { %5103 = vmatprep.subr.mxu1 %v5860_v0  ;;  %v4007_v17 = vmul.f32 %v5378_v16, %v5370_v63 }
0x141c   : > { %4741 = vst.msk [vmem:[%s6654_s12 + $0x10] sm:$0xff] %vm1114_vm2, %v4007_v17  ;;  %5096 = vmatmul.mubr.msk.f32.vlgmr.msra.gmra.mxu1 %vm1114_vm2, %v4007_v17 }
0x141d   : > { %v5380_v18 = vpop.eup %5379  ;;  %5104 = vmatpush3.msra.mxu1 %v4184_v39  ;;  %5105 = vmatprep.mubr.msk.f32.mxu1 %vm5861_vm0, %v5860_v0 }
0x141e   : > { %v4180_v21 = vmul.f32 %v5380_v18, %v5372_v2 }
0x1420   : > { %4745 = vst.msk [vmem:[%s6654_s12 + $0x18] sm:$0xff] %vm1114_vm2, %v4180_v21  ;;  %5106 = vmatmul.mubr.msk.f32.vlgmr.msra.gmra.mxu1 %vm1114_vm2, %v4180_v21 }
0x1465   : > { %v3740_v22 = vpop.f32.mrf.mxu1 }
0x1466   : > { %3744 = vst.msk [vmem:[#allocation2] sm:$0xff] %vm1114_vm2, %v3740_v22 }
0x1467   : > { %v5077_v43 = vpop.f32.mrf.mxu1 }
0x14d8   : > { %v3909_v25 = vpop.f32.mrf.mxu1 }
0x14d9   : > { %3914 = vrot.lane.b32.xlu1 %v3909_v25, %s5865_s19 }
0x14da   : > { %v5087_v50 = vpop.f32.mrf.mxu1 }
0x14dc   : > { %v4082_v26 = vpop.f32.mrf.mxu1 }
0x14dd   : > { %4087 = vrot.lane.b32.xlu0 %v4082_v26, %s5866_s3  ;;  %s4759_s3 = sshll.u32 %s5986_s0, 9 }
0x14de   : > { %v5097_v27 = vpop.f32.mrf.mxu1 }
0x14e0   : > { %v4255_v28 = vpop.f32.mrf.mxu1 }
0x14e1   : > { %4260 = vrot.lane.b32.xlu1 %v4255_v28, %s5867_s27  ;;  %s6873_s27 = sld [smem:[#allocation54_spill]] }
0x14e2   : > { %v5107_v29 = vpop.f32.mrf.mxu1 }
0x14e7   : > { %s6874_s1 = smov %s6873_s27  ;;  %s6690_s9 = scalar_lea.hbm %s6873_s27, %s4759_s3 }
0x154b   : > { %v3915_v30 = vpop.permute.xlu1 %3914 }
0x154c   : > { %3917 = vst.msk [vmem:[#allocation2] sm:$0xff] %vm1450_vm3, %v3915_v30 }
0x154f   : > { %v4088_v0 = vpop.permute.xlu0 %4087 }
0x1550   : > { %4090 = vst.msk [vmem:[#allocation2] sm:$0xff] %vm1623_vm4, %v4088_v0 }
0x1553   : > { %v4261_v31 = vpop.permute.xlu1 %4260 }
0x1554   : > { %4263 = vst.msk [vmem:[#allocation2] sm:$0xff] %vm1796_vm5, %v4261_v31 }
0x155b   : > { %v4264_v33 = vld [vmem:[#allocation2] sm:$0xff] }
0x155c   : > { %v4265_v34 = vpack.c.bf16 %v4264_v33, %v4264_v33 }
0x155e   : > { %5113 = vmatmul.mubr.msk.bf16.vlgmr.msra.gmra.mxu0 %vm811_vm1, %v4265_v34 }
0x155f   : > { %5738 = shalt.err (!%p5735_p4)
}
0x1560   : > { %s5739_s28 = scalar_lea.hbm %s6690_s9, 512  ;;  %s5743_s10 = scalar_lea.hbm %s6874_s1, 1024 }
0x1561   : > { %p5740_p11 = scmp.ne.s32.totalorder %s6690_s9, %s5739_s28  ;;  %p5744_p1 = scmp.lt.s32.totalorder %s6690_s9, %s6874_s1 }
0x1562   : > { %p5745_p2 = scmp.lt.s32.totalorder %s5743_s10, %s5739_s28 }
0x1563   : > { %p5741_p12 = pnand %p5740_p11, %p6875_p3 }
0x1564   : > { %p5746_p6 = por %p5745_p2, %p5744_p1 }
0x1565   : > { %p5742_p13 = pneg %p5741_p12 }
0x1567   : > { %p5747_p7 = pnand %p5746_p6, %p5742_p13 }
0x1569   : > { %5750 = shalt.err (!%p5747_p7)
}
0x156a   : > { %s5873_s16 = smov 128   ;;  %v4751_v36 = vld [vmem:[%s6871_s23 + $0x3] ss:$0 sm:$0xff]  ;;  %s4754_s24 = sshll.u32 %s5986_s0, 7 }
0x156b   : > { %5163 = dma.vmem_to_hbm [thread:$0]  (%p6875_p3), %s6692_s29, 512, %s6690_s9, %s4343_s30, %s5873_s16, %s5873_s16, %s5865_s19  }
0x156c   : > { %s773_s28 = scalar_lea.vmem [#allocation24], %s6231_s20  ;;  %s6876_s22 = sld [smem:[#allocation53_spill]] }
0x156d   : > { %s4356_s12 = sshll.u32 %s773_s28, 4  ;;  %s4338_s0 = scalar_lea.sflag [#allocation5], %s6228_s4  ;;  %s6729_s12 = int_to_ptr.vmem [resolvable:$true] %s4356_s12 }
0x156e   : > { %s5751_s20 = scalar_lea.vmem %s6729_s12, 128  ;;  %s5874_s19 = smov [#allocation24]  }
0x156f   : > { %p5752_p0 = scmp.ne.s32.totalorder %s6729_s12, %s5751_s20  ;;  %s5755_s29 = sshll.u32 %s5874_s19, 4  ;;  %s5756_s29 = int_to_ptr.vmem [resolvable:$false] %s5755_s29 }
0x1570   : > { %s5757_s9 = scalar_lea.vmem %s5756_s29, 256  ;;  %p5758_p5 = scmp.lt.s32.totalorder %s6729_s12, %s5756_s29 }
0x1571   : > { %p5753_p9 = pnand %p5752_p0, %p6875_p3  ;;  %p5759_p10 = scmp.lt.s32.totalorder %s5757_s9, %s5751_s20 }
0x1572   : > { %s6727_s27 = scalar_lea.hbm %s6876_s22, %s4754_s24 }
0x1573   : > { %p5754_p8 = pneg %p5753_p9  ;;  %p5760_p4 = por %p5759_p10, %p5758_p5 }
0x1575   : > { %p5761_p11 = pnand %p5760_p4, %p5754_p8 }
0x161e   : > { %v4320_v35 = vpop.f32.mrf.mxu0 }
0x161f   : > { %v4326_v19 = vadd.f32 %v4320_v35, %v6605_v15 }
0x1620   : > { %v5114_v37 = vpop.f32.mrf.mxu0 }
0x1621   : > { %v4335_v38 = vadd.f32 %v4751_v36, %v4326_v19 }
0x1622   : > { %v4323_v40 = vpop.f32.mrf.mxu0 }
0x1623   : > { %4336 = vst.msk [vmem:[%s773_s28] sm:$0xff] %vm811_vm1, %v4335_v38 }
0x1624   : > { %v5115_v41 = vpop.f32.mrf.mxu0 }
0x1625   : > { %5764 = shalt.err (!%p5761_p11)
}
0x1626   : > { %s5765_s30 = scalar_lea.hbm %s6727_s27, 128  ;;  %s5769_s5 = scalar_lea.hbm %s6876_s22, 256 }
0x1627   : > { %p5766_p12 = scmp.ne.s32.totalorder %s6727_s27, %s5765_s30  ;;  %p5770_p2 = scmp.lt.s32.totalorder %s6727_s27, %s6876_s22 }
0x1628   : > { %p5771_p6 = scmp.lt.s32.totalorder %s5769_s5, %s5765_s30 }
0x1629   : > { %p5767_p13 = pnand %p5766_p12, %p6875_p3 }
0x162a   : > { %p5772_p7 = por %p5771_p6, %p5770_p2 }
0x162b   : > { %p5768_p1 = pneg %p5767_p13 }
0x162d   : > { %p5773_p0 = pnand %p5772_p7, %p5768_p1 }
0x162f   : > { %5776 = shalt.err (!%p5773_p0)
}
0x1630   : > { %5162 = dma.vmem_to_hbm [thread:$0]  (%p6875_p3), %s6729_s12, 128, %s6727_s27, %s4338_s0  }
0x1631 PF: > { %s6877_s28 = sld [smem:[#allocation36_spill]] }
0x1632   : > { %s6878_s3 = sld [smem:[#allocation41_spill]] }
0x1633   : > { %s6879_s10 = sld [smem:[#allocation37_spill]] }
0x1637   : > { %s4384_s20 = sand.u32 1, %s6877_s28  }
0x1638   : > { %p6880_p9 = scmp.ne.s32.totalorder %s6878_s3, 0  ;;  %s4385_s19 = scalar_lea.sflag [#allocation5], %s4384_s20 }
0x1639   : > { %p6881_p8 = scmp.ge.s32.totalorder %s6879_s10, 2 }
0x163b   : > { %p5208_p5 = pnand %p6881_p8, %p6880_p9 }
0x163d   : > { %p5209_p10 = pneg %p5208_p5 }
0x163f   : > { %5822 = dma.done.wait (%p5209_p10), %s4385_s19, 128  }
0x1640   : > { %5824 = vsyncadd (%p5209_p10), %s4385_s19, 4294967168  ;;  %s4394_s29 = scalar_lea.sflag [#allocation26], %s4384_s20 }
0x1641   : > { %5826 = dma.done.wait (%p5209_p10), %s4394_s29, 512  }
0x1642   : > { %5828 = vsyncadd (%p5209_p10), %s4394_s29, 4294966784  ;;  %s6882_s27 = sld [smem:[#allocation38_spill]]  ;;  %s6884_s24 = smov %s5835_s25 }
0x1643   : > { %s6883_s18 = sld [smem:[#allocation39_spill]]  ;;  %s6885_s25 = smov %s5839_s26 }
0x1648   : > { %p42_p3 = scmp.ge.s32.totalorder %s6882_s27, 4  }
0x1649   : > { %s6886_s26 = smov %s6883_s18 }
0x164a   :  { %44 = sbr.rel (!%p42_p3) target bundleno = 28 (0x1c), region = 225 }
0x164f   :  { %4399 = vsyncpa [#allocation4], 1 }
0x1650   :  { %4401 = vsyncpa [#allocation4 + $0x1], 1 }
0x1651   :  { %4402 = vsyncpa [#allocation7], 1 }
0x1652   :  { %4404 = vsyncpa [#allocation7 + $0x1], 1 }
0x1653   :  { %4405 = vsyncpa [#allocation10], 1 }
0x1654   :  { %4406 = vsyncpa [#allocation13], 1 }
0x1655   :  { %4407 = vsyncpa [#allocation16], 1 }
0x1656   :  { %4408 = vsyncpa [#allocation19], 1 }
0x1657   :  { %4409 = vsyncpa [#allocation22], 1 }
0x1658   :  { %4410 = vsyncpa [#allocation5], 1 }
0x1659   :  { %4412 = vsyncpa [#allocation5 + $0x1], 1 }
0x165a   :  { %4413 = vsyncpa [#allocation26], 1 }
0x165b   :  { %4415 = vsyncpa [#allocation26 + $0x1], 1 }

// kernel: tpu_custom_call.1
= control target key start
LH: loop header
LB: loop body
LE: loop exit
PB: predicated region body
PF: predicated region fallthrough
CT: control target
= control target key end

     0   :  { %s6771_s0 = inlined_call_operand.hbm [shape: f32[2,8,32], index: 0, kind: input, shape index: {}]   ;;  %s6772_s1 = inlined_call_operand.hbm [shape: f32[2,8,32], index: 1, kind: input, shape index: {}]   ;;  %s6773_s2 = inlined_call_operand.hbm [shape: f32[2,8,32], index: 2, kind: input, shape index: {}]   ;;  %s6774_s3 = inlined_call_operand.hbm [shape: f32[8,8], index: 3, kind: input, shape index: {}]   ;;  %s6775_s4 = inlined_call_operand.hbm [shape: bf16[32,64], index: 4, kind: input, shape index: {}]   ;;  %s6776_s5 = inlined_call_operand.hbm [shape: f32[1,64], index: 5, kind: input, shape index: {}]   ;;  %s6777_s6 = inlined_call_operand.hbm [shape: bf16[32,64], index: 6, kind: input, shape index: {}]   ;;  %s6778_s7 = inlined_call_operand.hbm [shape: f32[1,64], index: 7, kind: input, shape index: {}]   ;;  %s6779_s8 = inlined_call_operand.hbm [shape: bf16[32,64], index: 8, kind: input, shape index: {}]   ;;  %s6780_s9 = inlined_call_operand.hbm [shape: f32[1,64], index: 9, kind: input, shape index: {}]   ;;  %s6781_s10 = inlined_call_operand.vmem [shape: bf16[32,64], index: 10, kind: input, shape index: {}]   ;;  %s6782_s11 = inlined_call_operand.hbm [shape: f32[1,64], index: 11, kind: input, shape index: {}]   ;;  %s6783_s12 = inlined_call_operand.hbm [shape: bf16[4,32,32], index: 12, kind: input, shape index: {}]   ;;  %s6784_s13 = inlined_call_operand.vmem [shape: f32[4,1,32], index: 13, kind: input, shape index: {}]   ;;  %s6785_s14 = inlined_call_operand.hbm [shape: bf16[4,32,32], index: 14, kind: input, shape index: {}]   ;;  %s6786_s15 = inlined_call_operand.vmem [shape: f32[4,1,32], index: 15, kind: input, shape index: {}]   ;;  %s6787_s16 = inlined_call_operand.hbm [shape: f32[2,8,32], index: 16, kind: output, shape index: {0}]   ;;  %s6788_s17 = inlined_call_operand.hbm [shape: f32[2,4,8,8], index: 17, kind: output, shape index: {1}]  }
   0x1   :  { %6816 = sst [smem:[#allocation42_spill]] %s6771_s0 }
   0x2   :  { %6817 = sst [smem:[#allocation43_spill]] %s6772_s1 }
   0x3   :  { %6818 = sst [smem:[#allocation44_spill]] %s6774_s3 }
   0x4   :  { %6819 = sst [smem:[#allocation45_spill]] %s6775_s4 }
   0x5   :  { %6820 = sst [smem:[#allocation46_spill]] %s6776_s5 }
   0x6   :  { %6821 = sst [smem:[#allocation47_spill]] %s6778_s7 }
   0x7   :  { %6822 = sst [smem:[#allocation48_spill]] %s6780_s9 }
   0x8   :  { %6823 = sst [smem:[#allocation49_spill]] %s6781_s10 }
   0x9   :  { %6824 = sst [smem:[#allocation50_spill]] %s6783_s12 }
   0xa   :  { %6825 = sst [smem:[#allocation51_spill]] %s6784_s13 }
   0xb   :  { %6826 = sst [smem:[#allocation52_spill]] %s6786_s15 }
   0xc   :  { %6827 = sst [smem:[#allocation53_spill]] %s6787_s16 }
   0xd   :  { %6828 = sst [smem:[#allocation54_spill]] %s6788_s17 }
   0xe   :  { %23 = vsyncpa [#allocation4], 0 }
   0xf   :  { %25 = vsyncpa [#allocation4 + $0x1], 0 }
  0x10   :  { %26 = vsyncpa [#allocation7], 0 }
  0x11   :  { %28 = vsyncpa [#allocation7 + $0x1], 0 }
  0x12   :  { %29 = vsyncpa [#allocation10], 0 }
  0x13   :  { %30 = vsyncpa [#allocation13], 0 }
  0x14   :  { %31 = vsyncpa [#allocation16], 0 }
  0x15   :  { %32 = vsyncpa [#allocation19], 0 }
  0x16   :  { %33 = vsyncpa [#allocation22], 0 }
  0x17   :  { %34 = vsyncpa [#allocation5], 0 }
  0x18   :  { %36 = vsyncpa [#allocation5 + $0x1], 0 }
  0x19   :  { %37 = vsyncpa [#allocation26], 0 }
  0x1a   :  { %39 = vsyncpa [#allocation26 + $0x1], 0  ;;  %s5965_s24 = smov 0   ;;  %s5967_s25 = smov 0  }
  0x1b   :  { %s5969_s26 = smov 0   ;;  %s5971_s27 = smov 0  }
  0x1c LB: > { %6829 = sst [smem:[#allocation36_spill]] %s5831_s24  ;;  %s5845_s28 = smov [#allocation9]   ;;  %s5843_s27 = sphi %s5971_s27, %s6882_s27   ;;  %s5839_s26 = sphi %s5969_s26, %s6886_s26   ;;  %s5835_s25 = sphi %s5967_s25, %s6885_s25   ;;  %s5831_s24 = sphi %s5965_s24, %s6884_s24  }
  0x1d   : > { %6830 = sst [smem:[#allocation37_spill]] %s5843_s27  ;;  %s466_s29 = sshll.u32 %s5845_s28, 4  ;;  %s467_s29 = int_to_ptr.vmem [resolvable:$true] %s466_s29 }
  0x1e   : > { %s5986_s0 = sadd.s32 4294967295, %s5843_s27   ;;  %p4613_p0 = scmp.ge.s32.totalorder %s5843_s27, 1 }
  0x1f   : > { %p6793_p1 = scmp.eq.s32.totalorder %s5986_s0, 0  ;;  %p453_p2 = scmp.lt.s32.totalorder %s5843_s27, 3 }
  0x20   : > { %s5846_s18 = smov [#allocation12]   ;;  %s5847_s1 = smov [#allocation15]  }
  0x21   : > { %p5991_p3 = pnand %p4613_p0, %p453_p2  ;;  %s490_s19 = sshll.u32 %s5846_s18, 4  ;;  %s491_s19 = int_to_ptr.vmem [resolvable:$true] %s490_s19 }
  0x22   : > { %s514_s20 = sshll.u32 %s5847_s1, 4  ;;  %s5848_s22 = smov [#allocation18]   ;;  %s6004_s20 = int_to_ptr.vmem [resolvable:$true] %s514_s20 }
  0x23   : > { %s6831_s30 = scalar_select %p5991_p3, 1, 0 }
  0x24   : > { %p5166_p5 = pneg %p5991_p3  ;;  %s6006_s23 = sshll.u32 %s5848_s22, 4  ;;  %s539_s23 = int_to_ptr.vmem [resolvable:$true] %s6006_s23 }
  0x25   : > { %s5392_s18 = scalar_lea.vmem %s467_s29, 128  ;;  %p5400_p11 = scmp.lt.s32.totalorder %s467_s29, %s467_s29 }
  0x26   : > { %p6000_p6 = pnand %p5166_p5, %p6793_p1  ;;  %p5393_p8 = scmp.ne.s32.totalorder %s467_s29, %s5392_s18 }
  0x27   : > { %p5401_p12 = scmp.lt.s32.totalorder %s5392_s18, %s5392_s18 }
  0x28   : > { %s6832_s21 = scalar_select %p6000_p6, 1, 0 }
  0x29   : > { %p6010_p7 = pneg %p6000_p6  ;;  %p5402_p13 = por %p5401_p12, %p5400_p11 }
  0x2b   : > { %s6833_s28 = scalar_select %p6010_p7, 1, 0 }
  0x2c   : > { %p5395_p9 = pnand %p5393_p8, %p6010_p7 }
  0x2e   : > { %p5396_p10 = pneg %p5395_p9 }
  0x30   : > { %p5403_p0 = pnand %p5402_p13, %p5396_p10 }
  0x32   : > { %5406 = shalt.err (!%p5403_p0)
}
  0x33   : > { %s6834_s3 = sld [smem:[#allocation44_spill]]  ;;  %s5418_s16 = scalar_lea.vmem %s491_s19, 16 }
  0x34   : > { %p5419_p2 = scmp.ne.s32.totalorder %s491_s19, %s5418_s16  ;;  %s5425_s17 = scalar_lea.vmem %s491_s19, 32 }
  0x35   : > { %p5426_p8 = scmp.lt.s32.totalorder %s491_s19, %s491_s19  ;;  %p5427_p9 = scmp.lt.s32.totalorder %s5425_s17, %s5418_s16 }
  0x36   : > { %p5421_p5 = pnand %p5419_p2, %p6010_p7 }
  0x37   : > { %p5428_p1 = por %p5427_p9, %p5426_p8 }
  0x38   : > { %p5422_p4 = pneg %p5421_p5 }
  0x39   : > { %5169 = dma.hbm_to_vmem [thread:$0]  (!%p6000_p6), %s6834_s3, 128, %s467_s29, [#allocation10]  }
  0x3a   : > { %p5429_p3 = pnand %p5428_p1, %p5422_p4 }
  0x3c   : > { %5432 = shalt.err (!%p5429_p3)
}
  0x3d   : > { %s6835_s5 = sld [smem:[#allocation46_spill]]  ;;  %s5444_s29 = scalar_lea.vmem %s6004_s20, 16 }
  0x3e   : > { %p5445_p10 = scmp.ne.s32.totalorder %s6004_s20, %s5444_s29  ;;  %s5451_s16 = scalar_lea.vmem %s6004_s20, 32 }
  0x3f   : > { %p5452_p1 = scmp.lt.s32.totalorder %s6004_s20, %s6004_s20  ;;  %p5453_p3 = scmp.lt.s32.totalorder %s5451_s16, %s5444_s29 }
  0x40   : > { %p5447_p11 = pnand %p5445_p10, %p6010_p7 }
  0x41   : > { %p5454_p4 = por %p5453_p3, %p5452_p1 }
  0x42   : > { %p5448_p12 = pneg %p5447_p11 }
  0x43   : > { %5175 = dma.hbm_to_vmem [thread:$0]  (!%p6000_p6), %s6835_s5, 16, %s491_s19, [#allocation13]  }
  0x44   : > { %p5455_p13 = pnand %p5454_p4, %p5448_p12 }
  0x46   : > { %5458 = shalt.err (!%p5455_p13)
}
  0x47   : > { %s6836_s7 = sld [smem:[#allocation47_spill]]  ;;  %s5470_s19 = scalar_lea.vmem %s539_s23, 16 }
  0x48   : > { %p5471_p0 = scmp.ne.s32.totalorder %s539_s23, %s5470_s19  ;;  %s5477_s1 = scalar_lea.vmem %s539_s23, 32 }
  0x49   : > { %p5478_p8 = scmp.lt.s32.totalorder %s539_s23, %s539_s23  ;;  %p5479_p9 = scmp.lt.s32.totalorder %s5477_s1, %s5470_s19 }
  0x4a   : > { %p5473_p2 = pnand %p5471_p0, %p6010_p7 }
  0x4b   : > { %p5480_p10 = por %p5479_p9, %p5478_p8 }
  0x4c   : > { %p5474_p5 = pneg %p5473_p2 }
  0x4d   : > { %5181 = dma.hbm_to_vmem [thread:$0]  (!%p6000_p6), %s6836_s7, 16, %s6004_s20, [#allocation16]  }
  0x4e   : > { %p5481_p11 = pnand %p5480_p10, %p5474_p5 }
  0x50   : > { %5484 = shalt.err (!%p5481_p11)
}
  0x51   : > { %s6837_s9 = sld [smem:[#allocation48_spill]]  ;;  %s5849_s20 = smov [#allocation21]  }
  0x52   : > { %s562_s29 = sshll.u32 %s5849_s20, 4  ;;  %s563_s29 = int_to_ptr.vmem [resolvable:$true] %s562_s29 }
  0x53   : > { %s5496_s16 = scalar_lea.vmem %s563_s29, 1024  ;;  %p5504_p4 = scmp.lt.s32.totalorder %s563_s29, %s563_s29 }
  0x54   : > { %p5497_p12 = scmp.ne.s32.totalorder %s563_s29, %s5496_s16  ;;  %p5505_p13 = scmp.lt.s32.totalorder %s5496_s16, %s5496_s16 }
  0x56   : > { %p5499_p1 = pnand %p5497_p12, %p6010_p7  ;;  %p5506_p0 = por %p5505_p13, %p5504_p4 }
  0x57   : > { %5187 = dma.hbm_to_vmem [thread:$0]  (!%p6000_p6), %s6837_s9, 16, %s539_s23, [#allocation19]  }
  0x58   : > { %p5500_p3 = pneg %p5499_p1 }
  0x5a   : > { %p5507_p2 = pnand %p5506_p0, %p5500_p3 }
  0x5c   : > { %5510 = shalt.err (!%p5507_p2)
}
  0x5d   : > { %s6796_s15 = smov 64   ;;  %s6798_s23 = smov 4  }
  0x5e   : > { %s6838_s12 = sld [smem:[#allocation50_spill]]  ;;  %s4612_s1 = sadd.s32 4294967294, %s5843_s27  }
  0x5f   : > { %s6061_s22 = sadd.s32 1, %s5843_s27   ;;  %s52_s18 = sadd.s32 1, %s5839_s26 }
  0x60   : > { %6839 = sst [smem:[#allocation38_spill]] %s6061_s22  ;;  %s49_s20 = ssub.s32 %s5843_s27, %s6061_s22 }
  0x61   : > { %p59_p5 = scmp.ne.s32.totalorder %s5839_s26, %s5835_s25  ;;  %p50_p8 = scmp.eq.s32.totalorder %s49_s20, 0 }
  0x62   : > { %p60_p9 = scmp.eq.s32.totalorder %s5843_s27, 0  ;;  %p65_p10 = scmp.ne.s32.totalorder %s5835_s25, %s5831_s24 }
  0x63   : > { %p414_p11 = scmp.eq.s32.totalorder %s5986_s0, 1  ;;  %p6841_p1 = scmp.eq.s32.totalorder %s5986_s0, 0 }
  0x64   : > { %5193 = dma.hbm_to_vmem [thread:$0]  (!%p6000_p6), %s6838_s12, 1024, %s563_s29, [#allocation22], %s6796_s15, %s6796_s15, %s6798_s23  }
  0x65   : > { %s6073_s16 = scalar_select %p50_p8, %s5839_s26, %s52_s18  }
  0x66   : > { %p61_p12 = por %p60_p9, %p59_p5  ;;  %p6077_p3 = por %p6841_p1, %p65_p10 }
  0x67   : > { %6840 = sst [smem:[#allocation39_spill]] %s6073_s16  ;;  %p6081_p4 = por %p414_p11, %p59_p5 }
  0x68   : > { %s6842_s29 = scalar_select %p6077_p3, 1, 0 }
  0x69   : > { %s6843_s17 = scalar_select %p6081_p4, 1, 0 }
  0x6a   : > { %p420_p13 = scmp.eq.s32.totalorder %s4612_s1, 1  ;;  %p5224_p0 = scmp.lt.s32.totalorder %s5843_s27, 2 }
  0x6b   : > { %6844 = sst [smem:[#allocation40_spill]] %s6843_s17  ;;  %s6800_s19 = sand.u32 1, %s5839_s26  }
  0x6c   : > { %p6087_p2 = por %p420_p13, %p65_p10  ;;  %s6093_s18 = sshll.u32 %s6800_s19, 3 }
  0x6d   : > { %s6096_s15 = sshll.u32 %s5843_s27, 7  ;;  %p6098_p8 = pnand %p5224_p0, %p61_p12 }
  0x6e   : > { %s6845_s20 = scalar_select %p6087_p2, 1, 0 }
  0x6f   : > { %s613_s3 = sand.u32 1, %s5843_s27   ;;  %s6848_s7 = sld [smem:[#allocation43_spill]] }
  0x70   : > { %6846 = sst [smem:[#allocation41_spill]] %s6845_s20  ;;  %s617_s19 = scalar_lea.vmem [#allocation6], %s6093_s18 }
  0x71   : > { %s624_s12 = sshll.u32 %s617_s19, 4  ;;  %s6110_s16 = scalar_lea.sflag [#allocation7], %s613_s3  ;;  %s625_s12 = int_to_ptr.vmem [resolvable:$true] %s624_s12 }
  0x72   : > { %p6116_p9 = pneg %p6098_p8 }
  0x75   : > { %s6107_s9 = scalar_lea.hbm %s6848_s7, %s6096_s15  ;;  %s5516_s27 = scalar_lea.hbm %s6848_s7, 256 }
  0x76   : > { %s5511_s22 = scalar_lea.hbm %s6107_s9, 128  ;;  %p5517_p12 = scmp.lt.s32.totalorder %s6107_s9, %s6848_s7 }
  0x77   : > { %p5512_p5 = scmp.ne.s32.totalorder %s6107_s9, %s5511_s22  ;;  %p5518_p1 = scmp.lt.s32.totalorder %s5516_s27, %s5511_s22 }
  0x79   : > { %p5514_p10 = pnand %p6116_p9, %p5512_p5  ;;  %p5519_p13 = por %p5518_p1, %p5517_p12 }
  0x7b   : > { %p5515_p11 = pneg %p5514_p10 }
  0x7d   : > { %p5520_p0 = pnand %p5519_p13, %p5515_p11 }
  0x7f   : > { %5523 = shalt.err (!%p5520_p0)
}
  0x80   : > { %s5524_s3 = scalar_lea.vmem %s625_s12, 128  ;;  %s5852_s17 = smov [#allocation6]  }
  0x81   : > { %p5525_p2 = scmp.ne.s32.totalorder %s625_s12, %s5524_s3  ;;  %s5529_s13 = sshll.u32 %s5852_s17, 4  ;;  %s5530_s13 = int_to_ptr.vmem [resolvable:$false] %s5529_s13 }
  0x82   : > { %s5531_s10 = scalar_lea.vmem %s5530_s13, 256  ;;  %p5532_p5 = scmp.lt.s32.totalorder %s625_s12, %s5530_s13 }
  0x83   : > { %p5527_p4 = pnand %p5525_p2, %p6116_p9  ;;  %p5533_p10 = scmp.lt.s32.totalorder %s5531_s10, %s5524_s3 }
  0x85   : > { %p5528_p3 = pneg %p5527_p4  ;;  %p5534_p6 = por %p5533_p10, %p5532_p5 }
  0x87   : > { %p5535_p7 = pnand %p5534_p6, %p5528_p3 }
  0x89   : > { %5538 = shalt.err (!%p5535_p7)
}
  0x8a   : > { %5203 = dma.hbm_to_vmem [thread:$0]  (!%p6098_p8), %s6107_s9, 128, %s625_s12, %s6110_s16  }
  0x8b   : > { %s5853_s24 = smov [#allocation11]   ;;  %s5854_s22 = smov [#allocation14]  }
  0x8c   : > { %s476_s27 = sshll.u32 %s5853_s24, 4  ;;  %s500_s5 = sshll.u32 %s5854_s22, 4  ;;  %s477_s27 = int_to_ptr.vmem [resolvable:$true] %s476_s27  ;;  %s501_s5 = int_to_ptr.vmem [resolvable:$true] %s500_s5 }
  0x8d   : > { %s5550_s1 = scalar_lea.vmem %s477_s27, 256  ;;  %p6850_p2 = scmp.ne.s32.totalorder %s6833_s28, 0 }
  0x8e   : > { %p5551_p4 = scmp.ne.s32.totalorder %s477_s27, %s5550_s1  ;;  %p5558_p1 = scmp.lt.s32.totalorder %s477_s27, %s477_s27 }
  0x8f   : > { %p5559_p13 = scmp.lt.s32.totalorder %s5550_s1, %s5550_s1 }
  0x90   : > { %p5553_p11 = pnand %p5551_p4, %p6850_p2 }
  0x91   : > { %p5560_p6 = por %p5559_p13, %p5558_p1 }
  0x92   : > { %p5554_p12 = pneg %p5553_p11 }
  0x94   : > { %p5561_p7 = pnand %p5560_p6, %p5554_p12 }
  0x96   : > { %5564 = shalt.err (!%p5561_p7)
}
  0x97   : > { %p6851_p3 = scmp.ne.s32.totalorder %s6832_s21, 0  ;;  %s6852_s10 = smov 4  }
  0x98   : > { %s6853_s13 = smov 64   ;;  %s6854_s4 = sld [smem:[#allocation45_spill]] }
  0x99   : > { %s5576_s17 = scalar_lea.vmem %s501_s5, 256  ;;  %p5584_p4 = scmp.lt.s32.totalorder %s501_s5, %s501_s5 }
  0x9a   : > { %p5577_p0 = scmp.ne.s32.totalorder %s501_s5, %s5576_s17  ;;  %p5585_p11 = scmp.lt.s32.totalorder %s5576_s17, %s5576_s17 }
  0x9c   : > { %p5579_p5 = pnand %p5577_p0, %p6850_p2  ;;  %p5586_p12 = por %p5585_p11, %p5584_p4 }
  0x9e   : > { %5172 = dma.hbm_to_vmem [thread:$0]  (!%p6851_p3), %s6854_s4, 256, %s477_s27, [#allocation10], %s6853_s13, %s6853_s13, %s6852_s10  }
  0x9f   : > { %p5580_p10 = pneg %p5579_p5 }
  0xa1   : > { %p5587_p1 = pnand %p5586_p12, %p5580_p10 }
  0xa3   : > { %5590 = shalt.err (!%p5587_p1)
}
  0xa4   : > { %5178 = dma.hbm_to_vmem [thread:$0]  (!%p6851_p3), %s6777_s6, 256, %s501_s5, [#allocation13], %s6853_s13, %s6853_s13, %s6852_s10  }
  0xa5   : > { %s5855_s24 = smov [#allocation17]   ;;  %s5856_s22 = smov [#allocation20]  }
  0xa6   : > { %s524_s27 = sshll.u32 %s5855_s24, 4  ;;  %s552_s1 = sshll.u32 %s5856_s22, 4  ;;  %s525_s27 = int_to_ptr.vmem [resolvable:$true] %s524_s27  ;;  %s553_s1 = int_to_ptr.vmem [resolvable:$true] %s552_s1 }
  0xa7   : > { %s5602_s9 = scalar_lea.vmem %s525_s27, 256  ;;  %p5610_p0 = scmp.lt.s32.totalorder %s525_s27, %s525_s27 }
  0xa8   : > { %p5603_p13 = scmp.ne.s32.totalorder %s525_s27, %s5602_s9  ;;  %p5611_p5 = scmp.lt.s32.totalorder %s5602_s9, %s5602_s9 }
  0xaa   : > { %p5605_p6 = pnand %p5603_p13, %p6850_p2  ;;  %p5612_p10 = por %p5611_p5, %p5610_p0 }
  0xac   : > { %p5606_p7 = pneg %p5605_p6 }
  0xae   : > { %p5613_p4 = pnand %p5612_p10, %p5606_p7 }
  0xb0   : > { %5616 = shalt.err (!%p5613_p4)
}
  0xb1   : > { %5184 = dma.hbm_to_vmem [thread:$0]  (!%p6851_p3), %s6779_s8, 256, %s525_s27, [#allocation16], %s6853_s13, %s6853_s13, %s6852_s10  }
  0xb2   : > { %s5628_s17 = scalar_lea.vmem %s553_s1, 16  ;;  %s5635_s19 = scalar_lea.vmem %s553_s1, 32 }
  0xb3   : > { %p5629_p11 = scmp.ne.s32.totalorder %s553_s1, %s5628_s17  ;;  %p5636_p13 = scmp.lt.s32.totalorder %s553_s1, %s553_s1 }
  0xb4   : > { %p5637_p6 = scmp.lt.s32.totalorder %s5635_s19, %s5628_s17 }
  0xb5   : > { %p5631_p12 = pnand %p5629_p11, %p6850_p2 }
  0xb6   : > { %p5638_p7 = por %p5637_p6, %p5636_p13 }
  0xb7   : > { %p5632_p1 = pneg %p5631_p12 }
  0xb9   : > { %p5639_p0 = pnand %p5638_p7, %p5632_p1 }
  0xbb   : > { %5642 = shalt.err (!%p5639_p0)
}
  0xbc   : > { %5190 = dma.hbm_to_vmem [thread:$0]  (!%p6851_p3), %s6782_s11, 16, %s553_s1, [#allocation19]  }
  0xbd   : > { %s5857_s27 = smov [#allocation23]  }
  0xbe   : > { %s578_s22 = sshll.u32 %s5857_s27, 4  ;;  %s579_s22 = int_to_ptr.vmem [resolvable:$true] %s578_s22 }
  0xbf   : > { %s5654_s9 = scalar_lea.vmem %s579_s22, 1024  ;;  %p5662_p11 = scmp.lt.s32.totalorder %s579_s22, %s579_s22 }
  0xc0   : > { %p5655_p5 = scmp.ne.s32.totalorder %s579_s22, %s5654_s9  ;;  %p5663_p12 = scmp.lt.s32.totalorder %s5654_s9, %s5654_s9 }
  0xc2   : > { %p5657_p10 = pnand %p5655_p5, %p6850_p2  ;;  %p5664_p13 = por %p5663_p12, %p5662_p11 }
  0xc4   : > { %p5658_p4 = pneg %p5657_p10 }
  0xc6   : > { %p5665_p1 = pnand %p5664_p13, %p5658_p4 }
  0xc8   : > { %5668 = shalt.err (!%p5665_p1)
}
  0xc9   : > { %5196 = dma.hbm_to_vmem [thread:$0]  (!%p6851_p3), %s6785_s14, 1024, %s579_s22, [#allocation22], %s6853_s13, %s6853_s13, %s6852_s10  }
  0xca   : > { %s6855_s17 = sld [smem:[#allocation42_spill]]  ;;  %s599_s21 = scalar_lea.vmem [#allocation3], %s6093_s18 }
  0xcb   : > { %s606_s3 = sshll.u32 %s599_s21, 4  ;;  %s6856_s24 = sand.u32 1, %s5839_s26   ;;  %s607_s3 = int_to_ptr.vmem [resolvable:$true] %s606_s3 }
  0xcc   : > { %s596_s27 = scalar_lea.sflag [#allocation4], %s6856_s24 }
  0xd0   : > { %s6186_s19 = scalar_lea.hbm %s6855_s17, %s6096_s15  ;;  %s5674_s13 = scalar_lea.hbm %s6855_s17, 256 }
  0xd1   : > { %s5669_s9 = scalar_lea.hbm %s6186_s19, 128  ;;  %p5675_p3 = scmp.lt.s32.totalorder %s6186_s19, %s6855_s17 }
  0xd2   : > { %p5670_p2 = scmp.ne.s32.totalorder %s6186_s19, %s5669_s9  ;;  %p5676_p0 = scmp.lt.s32.totalorder %s5674_s13, %s5669_s9 }
  0xd4   : > { %p5672_p6 = pnand %p5670_p2, %p6116_p9  ;;  %p5677_p5 = por %p5676_p0, %p5675_p3 }
  0xd6   : > { %p5673_p7 = pneg %p5672_p6 }
  0xd8   : > { %p5678_p10 = pnand %p5677_p5, %p5673_p7 }
  0xda   : > { %5681 = shalt.err (!%p5678_p10)
}
  0xdb   : > { %s5682_s28 = scalar_lea.vmem %s607_s3, 128  ;;  %s5858_s12 = smov [#allocation3]  }
  0xdc   : > { %p5683_p4 = scmp.ne.s32.totalorder %s607_s3, %s5682_s28  ;;  %s5687_s21 = sshll.u32 %s5858_s12, 4  ;;  %s5688_s21 = int_to_ptr.vmem [resolvable:$false] %s5687_s21 }
  0xdd   : > { %s5689_s24 = scalar_lea.vmem %s5688_s21, 256  ;;  %p5690_p13 = scmp.lt.s32.totalorder %s607_s3, %s5688_s21 }
  0xde   : > { %p5685_p11 = pnand %p5683_p4, %p6116_p9  ;;  %p5691_p1 = scmp.lt.s32.totalorder %s5689_s24, %s5682_s28 }
  0xe0   : > { %p5686_p12 = pneg %p5685_p11  ;;  %p5692_p2 = por %p5691_p1, %p5690_p13 }
  0xe2   : > { %p5693_p6 = pnand %p5692_p2, %p5686_p12 }
  0xe4   : > { %5696 = shalt.err (!%p5693_p6)
}
  0xe5   : > { %5200 = dma.hbm_to_vmem [thread:$0]  (!%p6098_p8), %s6186_s19, 128, %s607_s3, %s596_s27  }
  0xe6   : > { %s640_s10 = scalar_lea.hbm %s6773_s2, %s6096_s15  ;;  %s635_s13 = scalar_lea.vmem [#allocation8], %s6093_s18 }
  0xe7   : > { %s642_s22 = sshll.u32 %s635_s13, 4  ;;  %s5697_s1 = scalar_lea.hbm %s640_s10, 128  ;;  %s643_s22 = int_to_ptr.vmem [resolvable:$true] %s642_s22 }
  0xe8   : > { %p5698_p7 = scmp.ne.s32.totalorder %s640_s10, %s5697_s1  ;;  %s5702_s21 = scalar_lea.hbm %s6773_s2, 256 }
  0xe9   : > { %p5703_p5 = scmp.lt.s32.totalorder %s640_s10, %s6773_s2  ;;  %p5704_p10 = scmp.lt.s32.totalorder %s5702_s21, %s5697_s1 }
  0xea   : > { %p5700_p3 = pnand %p5698_p7, %p6116_p9 }
  0xeb   : > { %p5705_p4 = por %p5704_p10, %p5703_p5 }
  0xec   : > { %p5701_p0 = pneg %p5700_p3 }
  0xee   : > { %p5706_p11 = pnand %p5705_p4, %p5701_p0 }
  0xf0   : > { %5709 = shalt.err (!%p5706_p11)
}
  0xf1   : > { %s5710_s15 = scalar_lea.vmem %s643_s22, 128  ;;  %s5859_s18 = smov [#allocation8]  }
  0xf2   : > { %p5711_p12 = scmp.ne.s32.totalorder %s643_s22, %s5710_s15  ;;  %s5715_s19 = sshll.u32 %s5859_s18, 4  ;;  %s5716_s19 = int_to_ptr.vmem [resolvable:$false] %s5715_s19 }
  0xf3   : > { %s5717_s3 = scalar_lea.vmem %s5716_s19, 256  ;;  %p5718_p2 = scmp.lt.s32.totalorder %s643_s22, %s5716_s19 }
  0xf4   : > { %p5713_p13 = pnand %p5711_p12, %p6116_p9  ;;  %p5719_p6 = scmp.lt.s32.totalorder %s5717_s3, %s5710_s15 }
  0xf6   : > { %p5714_p1 = pneg %p5713_p13  ;;  %p5720_p7 = por %p5719_p6, %p5718_p2 }
  0xf8   : > { %p5721_p3 = pnand %p5720_p7, %p5714_p1 }
  0xfa   : > { %5724 = shalt.err (!%p5721_p3)
}
  0xfb   : > { %5206 = dma.hbm_to_vmem [thread:$0]  (!%p6098_p8), %s640_s10, 128, %s643_s22, %s6110_s16  }
  0xfc   : > { %p6857_p0 = scmp.ne.s32.totalorder %s6831_s30, 0 }
  0xfd   : > { %s6228_s4 = sand.u32 (!%p6857_p0), 1, %s5835_s25   ;;  %p6858_p9 = scmp.ne.s32.totalorder (!%p6857_p0), %s6842_s29, 0 }
  0xfe   : > { %651 = sbr.rel (%p6857_p0) target bundleno = 5681 (0x1631), region = 84  ;;  %s6231_s20 = sshll.u32 (!%p6857_p0), %s6228_s4, 3 }
  0xff   : > { %s654_s27 = scalar_lea.sflag (!%p6857_p0), [#allocation4], %s6228_s4  ;;  %s657_s9 = scalar_lea.vmem (!%p6857_p0), [#allocation3], %s6231_s20 }
 0x103   : > { %5794 = dma.done.wait (%p6858_p9), %s654_s27, 128  }
 0x104   : > { %5796 = vsyncadd (%p6858_p9), %s654_s27, 4294967168  ;;  %s662_s30 = sand.u32 1, %s5986_s0   ;;  %s666_s16 = scalar_lea.vmem [#allocation6], %s6231_s20 }
 0x105   : > { %s663_s23 = scalar_lea.sflag [#allocation7], %s662_s30 }
 0x106   : > { %5798 = dma.done.wait (%p6858_p9), %s663_s23, 256  }
 0x107   : > { %5800 = vsyncadd (%p6858_p9), %s663_s23, 4294967040  ;;  %s675_s5 = scalar_lea.vmem [#allocation8], %s6231_s20  ;;  %p6859_p8 = scmp.eq.s32.totalorder %s5986_s0, 0 }
 0x109   : > { %5802 = dma.done.wait (%p6859_p8), [#allocation10], 384   ;;  %p6860_p5 = pmov %p6859_p8 }
 0x10b   : > { %5804 = vsyncadd (%p6860_p5), [#allocation10], 4294966912  ;;  %p6861_p10 = pmov %p6860_p5 }
 0x10c   : > { %p6862_p4 = pmov %p6860_p5 }
 0x10d   : > { %5806 = dma.done.wait (%p6861_p10), [#allocation13], 272  }
 0x10e   : > { %5808 = vsyncadd (%p6862_p4), [#allocation13], 4294967024  ;;  %p6863_p11 = pmov %p6862_p4 }
 0x10f   : > { %p6864_p12 = pmov %p6862_p4 }
 0x110   : > { %5810 = dma.done.wait (%p6863_p11), [#allocation16], 272  }
 0x111   : > { %5812 = vsyncadd (%p6864_p12), [#allocation16], 4294967024  ;;  %p6865_p13 = pmov %p6862_p4 }
 0x112   : > { %p6866_p1 = pmov %p6862_p4 }
 0x113   : > { %5814 = dma.done.wait (%p6865_p13), [#allocation19], 32  }
 0x114   : > { %5816 = vsyncadd (%p6866_p1), [#allocation19], 4294967264  ;;  %p6867_p2 = pmov %p6866_p1 }
 0x115   : > { %p6868_p6 = pmov %p6866_p1 }
 0x116   : > { %5818 = dma.done.wait (%p6867_p2), [#allocation22], 2048  }
 0x117   : > { %5820 = vsyncadd (%p6868_p6), [#allocation22], 4294965248  ;;  %v5860_v0 = vmov 0.0   ;;  %vm5861_vm0 = vmmov 0   ;;  %v5293_v1 = vld [vmem:[#allocation11 + $0x8] sm:$0xff]   ;;  %v5295_v3 = vld [vmem:[#allocation11] sm:$0xff]  }
 0x118   : > { %4860 = vmatprep.subr.bf16.mxu1 %v5860_v0  ;;  %4876 = vmatprep.subr.bf16.mxu0 %v5860_v0  ;;  %v5294_v2 = vld [vmem:[#allocation17 + $0x8] sm:$0xff]   ;;  %v5296_v4 = vld [vmem:[#allocation17] sm:$0xff]   ;;  %vm811_vm1 = vcmask 261120   ;;  %v5299_v10 = vld [vmem:[#allocation14 + $0x8] sm:$0xff]   ;;  %s6869_s13 = sld [smem:[#allocation49_spill]]  ;;  %vm1114_vm2 = vcmask 64512  }
 0x119   : > { %4864 = vmatprep.mubr.msk.bf16.mxu1 %vm5861_vm0, %v5860_v0  ;;  %4880 = vmatprep.mubr.msk.bf16.mxu0 %vm5861_vm0, %v5860_v0  ;;  %v783_v5 = vld [vmem:[%s666_s16] sm:$0xff]  ;;  %v785_v6 = vld [vmem:[%s675_s5] sm:$0xff]  ;;  %s5862_s28 = smov 112   ;;  %s5863_s12 = smov 120   ;;  %vm1450_vm3 = vcmask 130112   ;;  %vm1623_vm4 = vcmask 195712  }
 0x11a   : > { %4861 = vmatpush3.bf16.msra.mxu1 %v5293_v1  ;;  %4877 = vmatpush3.bf16.msra.mxu0 %v5294_v2  ;;  %v784_v7 = vpack.c.bf16 %v783_v5, %v783_v5  ;;  %v786_v8 = vpack.c.bf16 %v785_v6, %v785_v6  ;;  %v5297_v9 = vld [vmem:[#allocation21 + $0x8] sm:$0xff]   ;;  %v5298_v11 = vld [vmem:[#allocation21] sm:$0xff]   ;;  %v6279_v12 = vld [vmem:[%s657_s9] sm:$0xff]  ;;  %s6870_s15 = sld [smem:[#allocation51_spill]]  ;;  %s5864_s18 = smov 104   ;;  %vm1796_vm5 = vcmask 261312  }
 0x11b   : > { %4862 = vmatprep.subr.bf16.mxu1 %v5860_v0  ;;  %4878 = vmatprep.subr.bf16.mxu0 %v5860_v0  ;;  %v5300_v13 = vld [vmem:[#allocation14] sm:$0xff]   ;;  %v1047_v15 = vpack.c.bf16 %v6279_v12, %v6279_v12  ;;  %v4647_v17 = vld [vmem:[#allocation12] ss:$0 sm:$0xff]  ;;  %v4651_v28 = vld [vmem:[#allocation15] ss:$0 sm:$0xff]  ;;  %s5865_s19 = smov 8  }
 0x11c   : > { %v6352_v50 = vld [vmem:[#allocation9] sm:$0xff]  ;;  %s5866_s3 = smov 16   ;;  %s5867_s27 = smov 24  }
 0x11d   : > { %s6871_s23 = sld [smem:[#allocation52_spill]]  ;;  %s5868_s29 = smov 96  }
 0x11e   : > { %4863 = vmatpush3.bf16.msra.mxu1 %v5295_v3  ;;  %4879 = vmatpush3.bf16.msra.mxu0 %v5296_v4  ;;  %v5301_v14 = vld [vmem:[%s6869_s13 + $0x8] sm:$0xff]   ;;  %v5302_v16 = vld [vmem:[%s6869_s13] sm:$0xff]   ;;  %s5869_s10 = smov 88   ;;  %s5870_s22 = smov 80  }
 0x11f   : > { %4868 = vmatprep.subr.bf16.mxu1 %v5860_v0  ;;  %4892 = vmatprep.subr.bf16.mxu0 %v5860_v0  ;;  %s5871_s1 = smov 72   ;;  %s4343_s30 = scalar_lea.sflag [#allocation26], %s6228_s4 }
 0x120   : > { %v4663_v27 = vld [vmem:[%s6870_s15] ss:$0 sm:$0xff]  ;;  %s5872_s5 = smov [#allocation25]  }
 0x121   : > { %4865 = vmatmul.mubr.msk.bf16.vlgmr.msra.gmra.mxu1 %vm811_vm1, %v784_v7  ;;  %4881 = vmatmul.mubr.msk.bf16.vlgmr.msra.gmra.mxu0 %vm811_vm1, %v786_v8  ;;  %s5729_s21 = sshll.u32 %s5872_s5, 4  ;;  %s5730_s21 = int_to_ptr.vmem [resolvable:$false] %s5729_s21 }
 0x122   : > { %4869 = vmatpush3.bf16.msra.mxu1 %v5299_v10  ;;  %4893 = vmatpush3.bf16.msra.mxu0 %v5297_v9  ;;  %s5731_s24 = scalar_lea.vmem %s5730_s21, 1024 }
 0x123   : > { %4896 = vmatprep.mubr.msk.bf16.mxu0 %vm5861_vm0, %v5860_v0  ;;  %4894 = vmatprep.subr.bf16.mxu0 %v5860_v0 }
 0x124   : > { %4870 = vmatprep.subr.bf16.mxu1 %v5860_v0  ;;  %4872 = vmatprep.mubr.msk.bf16.mxu1 %vm5861_vm0, %v5860_v0 }
 0x126   : > { %4871 = vmatpush3.bf16.msra.mxu1 %v5300_v13  ;;  %4895 = vmatpush3.bf16.msra.mxu0 %v5298_v11 }
 0x127   : > { %4884 = vmatprep.subr.bf16.mxu1 %v5860_v0  ;;  %4910 = vmatprep.subr.mxu0 %v5860_v0 }
 0x129   : > { %4873 = vmatmul.mubr.msk.bf16.vlgmr.msra.gmra.mxu1 %vm811_vm1, %v784_v7  ;;  %4897 = vmatmul.mubr.msk.bf16.vlgmr.msra.gmra.mxu0 %vm811_vm1, %v1047_v15 }
 0x12a   : > { %4885 = vmatpush3.bf16.msra.mxu1 %v5301_v14  ;;  %4888 = vmatprep.mubr.msk.bf16.mxu1 %vm5861_vm0, %v5860_v0 }
 0x12b   : > { %4886 = vmatprep.subr.bf16.mxu1 %v5860_v0  ;;  %4912 = vmatprep.mubr.msk.f32.mxu0 %vm5861_vm0, %v5860_v0 }
 0x12e   : > { %4887 = vmatpush3.bf16.msra.mxu1 %v5302_v16 }
 0x12f   : > { %4900 = vmatprep.subr.mxu1 %v5860_v0 }
 0x131   : > { %4889 = vmatmul.mubr.msk.bf16.vlgmr.msra.gmra.mxu1 %vm811_vm1, %v786_v8 }
 0x132   : > { %4902 = vmatprep.mubr.msk.f32.mxu1 %vm5861_vm0, %v5860_v0 }
 0x1e1   : > { %v849_v18 = vpop.f32.mrf.mxu1  ;;  %v6311_v20 = vpop.f32.mrf.mxu0 }
 0x1e2   : > { %v6309_v19 = vadd.f32 %v4647_v17, %v849_v18 }
 0x1e3   : > { %v4866_v21 = vpop.f32.mrf.mxu1  ;;  %v4882_v22 = vpop.f32.mrf.mxu0 }
 0x1e4   : > { %1454 = vrot.lane.b32.xlu1 %v6309_v19, %s5862_s28  ;;  %1280 = vrot.lane.b32.xlu0 %v6309_v19, %s5863_s12 }
 0x1e5   : > { %v852_v23 = vpop.f32.mrf.mxu1  ;;  %4901 = vmatpush3.xpose.msk.msra.mxu1 %vm1114_vm2, %v6309_v19  ;;  %v981_v24 = vpop.f32.mrf.mxu0 }
 0x1e6   : > { %4905 = vmatprep.subr.mxu1 %v5860_v0 }
 0x1e7   : > { %v4867_v25 = vpop.f32.mrf.mxu1  ;;  %v4883_v26 = vpop.f32.mrf.mxu0 }
 0x1e9   : > { %v912_v29 = vpop.f32.mrf.mxu1  ;;  %v1108_v30 = vpop.f32.mrf.mxu0 }
 0x1ea   : > { %v1109_v31 = vadd.f32 %v4663_v27, %v1108_v30  ;;  %v6323_v32 = vadd.f32 %v4651_v28, %v912_v29 }
 0x1eb   : > { %v4874_v33 = vpop.f32.mrf.mxu1  ;;  %v4898_v34 = vpop.f32.mrf.mxu0 }
 0x1ec   : > { %1452 = vrot.lane.b32.xlu1 %v1109_v31, %s5862_s28  ;;  %1278 = vrot.lane.b32.xlu0 %v1109_v31, %s5863_s12 }
 0x1ed   : > { %v915_v35 = vpop.f32.mrf.mxu1  ;;  %4903 = vmatmul.mubr.msk.f32.vlgmr.msra.gmra.mxu1 %vm1114_vm2, %v1109_v31  ;;  %v1111_v36 = vpop.f32.mrf.mxu0 }
 0x1ee   : > { %4906 = vmatpush3.msra.mxu1 %v6323_v32  ;;  %4907 = vmatprep.mubr.msk.f32.mxu1 %vm5861_vm0, %v5860_v0 }
 0x1ef   : > { %v4875_v37 = vpop.f32.mrf.mxu1  ;;  %v4899_v38 = vpop.f32.mrf.mxu0  ;;  %4915 = vmatprep.subr.mxu1 %v5860_v0 }
 0x1f0   : > { %1625 = vrot.lane.b32.xlu1 %v1109_v31, %s5864_s18  ;;  %1627 = vrot.lane.b32.xlu0 %v6309_v19, %s5864_s18 }
 0x1f1   : > { %v6335_v39 = vpop.f32.mrf.mxu1 }
 0x1f3   : > { %v4890_v40 = vpop.f32.mrf.mxu1 }
 0x1f5   : > { %v1044_v41 = vpop.f32.mrf.mxu1 }
 0x1f7   : > { %v4891_v42 = vpop.f32.mrf.mxu1 }
 0x256   : > { %v1281_v43 = vpop.permute.xlu0 %1280  ;;  %v1455_v44 = vpop.permute.xlu1 %1454 }
 0x257   : > { %4911 = vmatpush3.xpose.msk.msra.mxu0 %vm1114_vm2, %v1281_v43 }
 0x258   : > { %4920 = vmatprep.subr.mxu0 %v5860_v0 }
 0x25e   : > { %v1279_v45 = vpop.permute.xlu0 %1278  ;;  %v1453_v46 = vpop.permute.xlu1 %1452 }
 0x25f   : > { %4913 = vmatmul.mubr.msk.f32.vlgmr.msra.gmra.mxu0 %vm1114_vm2, %v1279_v45 }
 0x260   : > { %4921 = vmatpush3.xpose.msk.msra.mxu0 %vm1114_vm2, %v1455_v44  ;;  %4922 = vmatprep.mubr.msk.f32.mxu0 %vm5861_vm0, %v5860_v0 }
 0x261   : > { %4930 = vmatprep.subr.mxu0 %v5860_v0 }
 0x262   : > { %v1628_v47 = vpop.permute.xlu0 %1627  ;;  %v1626_v48 = vpop.permute.xlu1 %1625 }
 0x263   : > { %4923 = vmatmul.mubr.msk.f32.vlgmr.msra.gmra.mxu0 %vm1114_vm2, %v1453_v46 }
 0x264   : > { %4931 = vmatpush3.xpose.msk.msra.mxu0 %vm1114_vm2, %v1628_v47  ;;  %4932 = vmatprep.mubr.msk.f32.mxu0 %vm5861_vm0, %v5860_v0 }
 0x265   : > { %4940 = vmatprep.subr.bf16.mxu0 %v5860_v0 }
 0x267   : > { %4933 = vmatmul.mubr.msk.f32.vlgmr.msra.gmra.mxu0 %vm1114_vm2, %v1626_v48 }
 0x268   : > { %4944 = vmatprep.mubr.msk.bf16.mxu0 %vm5861_vm0, %v5860_v0 }
 0x2ad   : > { %v1187_v49 = vpop.f32.mrf.mxu1 }
 0x2ae   : > { %v1191_v51 = vmul.f32 0.35355338, %v1187_v49  ;;  %v5303_v49 = vld [vmem:[#allocation23 + $0x8] sm:$0xff]  }
 0x2af   : > { %v4904_v52 = vpop.f32.mrf.mxu1  ;;  %4941 = vmatpush3.bf16.msra.mxu0 %v5303_v49 }
 0x2b0   : > { %v1192_v53 = vadd.f32 %v1191_v51, %v6352_v50  ;;  %4942 = vmatprep.subr.bf16.mxu0 %v5860_v0  ;;  %v5304_v51 = vld [vmem:[#allocation23] sm:$0xff]  }
 0x2b2   : > { %v1193_v54 = vsel %vm1114_vm2, %v1192_v53, -inf }
 0x2b3   : > { %1194 = vmax.xlane.f32.xlu0 %v1193_v54  ;;  %4943 = vmatpush3.bf16.msra.mxu0 %v5304_v51  ;;  %v4655_v54 = vld [vmem:[#allocation18] ss:$0 sm:$0xff] }
 0x2b4   : > { %4956 = vmatprep.subr.mxu0 %v5860_v0 }
 0x31f   : > { %v1352_v55 = vpop.f32.mrf.mxu0 }
 0x320   : > { %v1356_v56 = vmul.f32 0.35355338, %v1352_v55 }
 0x321   : > { %v4914_v57 = vpop.f32.mrf.mxu0 }
 0x322   : > { %v1357_v58 = vadd.f32 %v1356_v56, %v6352_v50  ;;  %v6393_v57 = vadd.f32 %v4655_v54, %v6311_v20 }
 0x323   : > { %v1526_v59 = vpop.f32.mrf.mxu0 }
 0x324   : > { %v1530_v60 = vmul.f32 0.35355338, %v1526_v59  ;;  %v1358_v61 = vsel %vm1114_vm2, %v1357_v58, -inf }
 0x325   : > { %1359 = vmax.xlane.f32.xlu1 %v1358_v61  ;;  %v4924_v62 = vpop.f32.mrf.mxu0 }
 0x326   : > { %v1531_v63 = vadd.f32 %v1530_v60, %v6352_v50 }
 0x327   : > { %v1699_v1 = vpop.f32.mrf.mxu0 }
 0x328   : > { %v1703_v2 = vmul.f32 0.35355338, %v1699_v1  ;;  %v1532_v3 = vsel %vm1114_vm2, %v1531_v63, -inf }
 0x329   : > { %1533 = vmax.xlane.f32.xlu0 %v1532_v3  ;;  %v4934_v4 = vpop.f32.mrf.mxu0 }
 0x32a   : > { %v1704_v5 = vadd.f32 %v1703_v2, %v6352_v50  ;;  %v5306_v2 = vld [vmem:[#allocation21 + $0x10] sm:$0xff]   ;;  %v4682_v4 = vld [vmem:[%s6871_s23] ss:$0 sm:$0xff] }
 0x32c   : > { %v1705_v6 = vsel %vm1114_vm2, %v1704_v5, -inf }
 0x32d   : > { %1706 = vmax.xlane.f32.xlu0 %v1705_v6 }
 0x336   : > { %1370 = vrot.lane.b32.xlu1 %v6323_v32, %s5863_s12 }
 0x33c   : > { %v1195_v7 = vpop.xlane.xlu0 %1194 }
 0x33d   : > { %v1196_v8 = vsub.f32 %v1192_v53, %v1195_v7  ;;  %v4659_v7 = vld [vmem:[#allocation20] ss:$0 sm:$0xff] }
 0x33f   : > { %v1197_v9 = vmul.f32 1.442695, %v1196_v8 }
 0x341   : > { %5317 = vpow2.f32 %v1197_v9 }
 0x34e   : > { %v5318_v10 = vpop.eup %5317 }
 0x34f   : > { %v1199_v11 = vsel %vm1114_vm2, %v5318_v10, 0.0 }
 0x35a   : > { %1200 = vadd.xlane.f32.xlu1 %v1199_v11  ;;  %v6422_v11 = vadd.f32 %v4659_v7, %v6335_v39 }
 0x3ae   : > { %v1360_v13 = vpop.xlane.xlu1 %1359 }
 0x3af   : > { %v1361_v14 = vsub.f32 %v1357_v58, %v1360_v13  ;;  %v5305_v58 = vld [vmem:[#allocation21 + $0x18] sm:$0xff]  }
 0x3b1   : > { %v1362_v15 = vmul.f32 1.442695, %v1361_v14 }
 0x3b2   : > { %v1534_v16 = vpop.xlane.xlu0 %1533  ;;  %v1371_v30 = vpop.permute.xlu1 %1370 }
 0x3b3   : > { %5319 = vpow2.f32 %v1362_v15  ;;  %v1535_v17 = vsub.f32 %v1531_v63, %v1534_v16 }
 0x3b5   : > { %v1536_v18 = vmul.f32 1.442695, %v1535_v17 }
 0x3b6   : > { %v1707_v21 = vpop.xlane.xlu0 %1706 }
 0x3b7   : > { %5321 = vpow2.f32 %v1536_v18  ;;  %v1708_v22 = vsub.f32 %v1704_v5, %v1707_v21 }
 0x3b9   : > { %v1709_v23 = vmul.f32 1.442695, %v1708_v22 }
 0x3bb   : > { %5323 = vpow2.f32 %v1709_v23 }
 0x3c0   : > { %v5320_v24 = vpop.eup %5319 }
 0x3c1   : > { %v1364_v25 = vsel %vm1114_vm2, %v5320_v24, 0.0 }
 0x3c2   : > { %1365 = vadd.xlane.f32.xlu0 %v1364_v25 }
 0x3c4   : > { %v5322_v26 = vpop.eup %5321 }
 0x3c5   : > { %v1538_v27 = vsel %vm1114_vm2, %v5322_v26, 0.0 }
 0x3c6   : > { %1539 = vadd.xlane.f32.xlu1 %v1538_v27 }
 0x3c8   : > { %v5324_v28 = vpop.eup %5323 }
 0x3c9   : > { %v1711_v29 = vsel %vm1114_vm2, %v5324_v28, 0.0 }
 0x3ca   : > { %1712 = vadd.xlane.f32.xlu0 %v1711_v29 }
 0x3d7   : > { %1716 = vrot.lane.b32.xlu1 %v6323_v32, %s5864_s18 }
 0x3e0   : > { %1543 = vrot.lane.b32.xlu0 %v6323_v32, %s5862_s28 }
 0x3e3   : > { %v1201_v31 = vpop.xlane.xlu1 %1200 }
 0x3e4   : > { %5325 = vrcp.f32 %v1201_v31 }
 0x3f1   : > { %v5326_v33 = vpop.eup %5325 }
 0x3f2   : > { %v1203_v34 = vmul.f32 %v5326_v33, %v5318_v10 }
 0x3f4   : > { %4908 = vmatmul.mubr.msk.f32.vlgmr.msra.gmra.mxu1 %vm1114_vm2, %v1203_v34 }
 0x3f5   : > { %4916 = vmatpush3.msra.mxu1 %v1371_v30  ;;  %4917 = vmatprep.mubr.msk.f32.mxu1 %vm5861_vm0, %v5860_v0 }
 0x3f6   : > { %4925 = vmatprep.subr.mxu1 %v5860_v0 }
 0x44b   : > { %v1366_v35 = vpop.xlane.xlu0 %1365 }
 0x44c   : > { %5327 = vrcp.f32 %v1366_v35 }
 0x44f   : > { %v1540_v36 = vpop.xlane.xlu1 %1539 }
 0x450   : > { %5329 = vrcp.f32 %v1540_v36 }
 0x453   : > { %v1713_v37 = vpop.xlane.xlu0 %1712  ;;  %v1717_v44 = vpop.permute.xlu1 %1716 }
 0x454   : > { %5331 = vrcp.f32 %v1713_v37 }
 0x457   : > { %v1544_v41 = vpop.permute.xlu0 %1543 }
 0x459   : > { %v5328_v38 = vpop.eup %5327 }
 0x45a   : > { %v1368_v40 = vmul.f32 %v5328_v38, %v5320_v24 }
 0x45c   : > { %4918 = vmatmul.mubr.msk.f32.vlgmr.msra.gmra.mxu1 %vm1114_vm2, %v1368_v40 }
 0x45d   : > { %v5330_v42 = vpop.eup %5329  ;;  %4926 = vmatpush3.msra.mxu1 %v1544_v41  ;;  %4927 = vmatprep.mubr.msk.f32.mxu1 %vm5861_vm0, %v5860_v0 }
 0x45e   : > { %4935 = vmatprep.subr.mxu1 %v5860_v0  ;;  %v1542_v43 = vmul.f32 %v5330_v42, %v5322_v26 }
 0x460   : > { %4928 = vmatmul.mubr.msk.f32.vlgmr.msra.gmra.mxu1 %vm1114_vm2, %v1542_v43 }
 0x461   : > { %v5332_v45 = vpop.eup %5331  ;;  %4936 = vmatpush3.msra.mxu1 %v1717_v44  ;;  %4937 = vmatprep.mubr.msk.f32.mxu1 %vm5861_vm0, %v5860_v0 }
 0x462   : > { %v1715_v46 = vmul.f32 %v5332_v45, %v5324_v28  ;;  %4948 = vmatprep.subr.bf16.mxu1 %v5860_v0 }
 0x464   : > { %4938 = vmatmul.mubr.msk.f32.vlgmr.msra.gmra.mxu1 %vm1114_vm2, %v1715_v46 }
 0x465   : > { %4952 = vmatprep.mubr.msk.bf16.mxu1 %vm5861_vm0, %v5860_v0  ;;  %4949 = vmatpush3.bf16.msra.mxu1 %v5305_v58 }
 0x466   : > { %4950 = vmatprep.subr.bf16.mxu1 %v5860_v0 }
 0x469   : > { %4951 = vmatpush3.bf16.msra.mxu1 %v5306_v2 }
 0x46a   : > { %4961 = vmatprep.subr.mxu1 %v5860_v0 }
 0x4b4   : > { %v1273_v47 = vpop.f32.mrf.mxu1 }
 0x4b5   : > { %1277 = vst.msk [vmem:[#allocation2] sm:$0xff] %vm1114_vm2, %v1273_v47 }
 0x4b6   : > { %v4909_v48 = vpop.f32.mrf.mxu1 }
 0x51c   : > { %v1442_v52 = vpop.f32.mrf.mxu1 }
 0x51d   : > { %1447 = vrot.lane.b32.xlu1 %v1442_v52, %s5865_s19 }
 0x51e   : > { %v4919_v53 = vpop.f32.mrf.mxu1 }
 0x520   : > { %v1615_v55 = vpop.f32.mrf.mxu1 }
 0x521   : > { %1620 = vrot.lane.b32.xlu0 %v1615_v55, %s5866_s3 }
 0x522   : > { %v4929_v56 = vpop.f32.mrf.mxu1 }
 0x524   : > { %v1788_v59 = vpop.f32.mrf.mxu1 }
 0x525   : > { %2101 = vrot.lane.b32.xlu0 %v6393_v57, %s5863_s12  ;;  %1793 = vrot.lane.b32.xlu1 %v1788_v59, %s5867_s27 }
 0x526   : > { %v4939_v60 = vpop.f32.mrf.mxu1 }
 0x529   : > { %2273 = vrot.lane.b32.xlu0 %v6393_v57, %s5862_s28 }
 0x52d   : > { %2444 = vrot.lane.b32.xlu0 %v6393_v57, %s5864_s18 }
 0x58f   : > { %v1448_v20 = vpop.permute.xlu1 %1447 }
 0x590   : > { %1451 = vst.msk [vmem:[#allocation2] sm:$0xff] %vm1450_vm3, %v1448_v20 }
 0x593   : > { %v1621_v61 = vpop.permute.xlu0 %1620 }
 0x594   : > { %1624 = vst.msk [vmem:[#allocation2] sm:$0xff] %vm1623_vm4, %v1621_v61 }
 0x597   : > { %v1794_v62 = vpop.permute.xlu1 %1793  ;;  %v2102_v17 = vpop.permute.xlu0 %2101 }
 0x598   : > { %1797 = vst.msk [vmem:[#allocation2] sm:$0xff] %vm1796_vm5, %v1794_v62 }
 0x59b   : > { %v2274_v21 = vpop.permute.xlu0 %2273 }
 0x59f   : > { %v1798_v63 = vld [vmem:[#allocation2] sm:$0xff]  ;;  %v2445_v24 = vpop.permute.xlu0 %2444 }
 0x5a0   : > { %v1799_v1 = vpack.c.bf16 %v1798_v63, %v1798_v63 }
 0x5a2   : > { %4945 = vmatmul.mubr.msk.bf16.vlgmr.msra.gmra.mxu0 %vm811_vm1, %v1799_v1 }
 0x5a3   : > { %4957 = vmatpush3.xpose.msk.msra.mxu0 %vm1114_vm2, %v6393_v57  ;;  %4958 = vmatprep.mubr.msk.f32.mxu0 %vm5861_vm0, %v5860_v0 }
 0x5a4   : > { %4966 = vmatprep.subr.mxu0 %v5860_v0 }
 0x662   : > { %v1853_v3 = vpop.f32.mrf.mxu0 }
 0x663   : > { %v1859_v5 = vadd.f32 %v1853_v3, %v6279_v12  ;;  %v4684_v12 = vld [vmem:[%s6870_s15 + $0x1] ss:$0 sm:$0xff] }
 0x664   : > { %v4946_v6 = vpop.f32.mrf.mxu0 }
 0x665   : > { %v6417_v8 = vadd.f32 %v4682_v4, %v1859_v5 }
 0x666   : > { %v1856_v9 = vpop.f32.mrf.mxu0 }
 0x667   : > { %v1868_v10 = vpack.c.bf16 %v6417_v8, %v6417_v8 }
 0x668   : > { %v4947_v13 = vpop.f32.mrf.mxu0 }
 0x669   : > { %4953 = vmatmul.mubr.msk.bf16.vlgmr.msra.gmra.mxu1 %vm811_vm1, %v1868_v10 }
 0x66a   : > { %4962 = vmatpush3.msra.mxu1 %v6422_v11  ;;  %4963 = vmatprep.mubr.msk.f32.mxu1 %vm5861_vm0, %v5860_v0 }
 0x66b   : > { %4971 = vmatprep.subr.mxu1 %v5860_v0 }
 0x729   : > { %v1931_v14 = vpop.f32.mrf.mxu1 }
 0x72a   : > { %v1932_v15 = vadd.f32 %v4684_v12, %v1931_v14 }
 0x72b   : > { %v4954_v16 = vpop.f32.mrf.mxu1 }
 0x72c   : > { %2099 = vrot.lane.b32.xlu1 %v1932_v15, %s5863_s12  ;;  %4959 = vmatmul.mubr.msk.f32.vlgmr.msra.gmra.mxu0 %vm1114_vm2, %v1932_v15 }
 0x72d   : > { %4967 = vmatpush3.xpose.msk.msra.mxu0 %vm1114_vm2, %v2102_v17  ;;  %v1934_v39 = vpop.f32.mrf.mxu1  ;;  %4968 = vmatprep.mubr.msk.f32.mxu0 %vm5861_vm0, %v5860_v0 }
 0x72e   : > { %4976 = vmatprep.subr.mxu0 %v5860_v0 }
 0x72f   : > { %v4955_v18 = vpop.f32.mrf.mxu1 }
 0x730   : > { %2271 = vrot.lane.b32.xlu1 %v1932_v15, %s5862_s28 }
 0x734   : > { %2442 = vrot.lane.b32.xlu1 %v1932_v15, %s5864_s18 }
 0x79e   : > { %v2100_v22 = vpop.permute.xlu1 %2099 }
 0x79f   : > { %4969 = vmatmul.mubr.msk.f32.vlgmr.msra.gmra.mxu0 %vm1114_vm2, %v2100_v22  ;;  %v5307_v22 = vld [vmem:[#allocation23 + $0x18] sm:$0xff]  }
 0x7a0   : > { %4977 = vmatpush3.xpose.msk.msra.mxu0 %vm1114_vm2, %v2274_v21  ;;  %4978 = vmatprep.mubr.msk.f32.mxu0 %vm5861_vm0, %v5860_v0 }
 0x7a1   : > { %4986 = vmatprep.subr.mxu0 %v5860_v0 }
 0x7a2   : > { %v2272_v23 = vpop.permute.xlu1 %2271 }
 0x7a3   : > { %4979 = vmatmul.mubr.msk.f32.vlgmr.msra.gmra.mxu0 %vm1114_vm2, %v2272_v23  ;;  %v5308_v23 = vld [vmem:[#allocation23 + $0x10] sm:$0xff]  }
 0x7a4   : > { %4987 = vmatpush3.xpose.msk.msra.mxu0 %vm1114_vm2, %v2445_v24  ;;  %4988 = vmatprep.mubr.msk.f32.mxu0 %vm5861_vm0, %v5860_v0 }
 0x7a5   : > { %4996 = vmatprep.subr.bf16.mxu0 %v5860_v0 }
 0x7a6   : > { %v2443_v25 = vpop.permute.xlu1 %2442 }
 0x7a7   : > { %4989 = vmatmul.mubr.msk.f32.vlgmr.msra.gmra.mxu0 %vm1114_vm2, %v2443_v25 }
 0x7a8   : > { %5000 = vmatprep.mubr.msk.bf16.mxu0 %vm5861_vm0, %v5860_v0  ;;  %4997 = vmatpush3.bf16.msra.mxu0 %v5307_v22 }
 0x7a9   : > { %4998 = vmatprep.subr.bf16.mxu0 %v5860_v0 }
 0x7ac   : > { %4999 = vmatpush3.bf16.msra.mxu0 %v5308_v23 }
 0x7ad   : > { %5012 = vmatprep.subr.mxu0 %v5860_v0 }
 0x7ec   : > { %v2009_v26 = vpop.f32.mrf.mxu0 }
 0x7ed   : > { %v2013_v27 = vmul.f32 0.35355338, %v2009_v26 }
 0x7ee   : > { %v4960_v28 = vpop.f32.mrf.mxu0 }
 0x7ef   : > { %v2014_v29 = vsel %vm1114_vm2, %v2013_v27, -inf }
 0x7f0   : > { %2015 = vmax.xlane.f32.xlu0 %v2014_v29 }
 0x85f   : > { %v2173_v30 = vpop.f32.mrf.mxu0 }
 0x860   : > { %v2177_v31 = vmul.f32 0.35355338, %v2173_v30 }
 0x861   : > { %v4970_v33 = vpop.f32.mrf.mxu0 }
 0x862   : > { %v2178_v34 = vsel %vm1114_vm2, %v2177_v31, -inf }
 0x863   : > { %2179 = vmax.xlane.f32.xlu1 %v2178_v34  ;;  %v2345_v35 = vpop.f32.mrf.mxu0 }
 0x864   : > { %v2349_v36 = vmul.f32 0.35355338, %v2345_v35 }
 0x865   : > { %v4980_v37 = vpop.f32.mrf.mxu0 }
 0x866   : > { %v2350_v38 = vsel %vm1114_vm2, %v2349_v36, -inf  ;;  %v5310_v37 = vld [vmem:[#allocation21 + $0x20] sm:$0xff]  }
 0x867   : > { %2351 = vmax.xlane.f32.xlu0 %v2350_v38  ;;  %v2516_v40 = vpop.f32.mrf.mxu0 }
 0x868   : > { %v2520_v41 = vmul.f32 0.35355338, %v2516_v40  ;;  %v4704_v40 = vld [vmem:[%s6871_s23 + $0x1] ss:$0 sm:$0xff] }
 0x869   : > { %v4990_v42 = vpop.f32.mrf.mxu0 }
 0x86a   : > { %v2521_v43 = vsel %vm1114_vm2, %v2520_v41, -inf }
 0x86b   : > { %2522 = vmax.xlane.f32.xlu0 %v2521_v43 }
 0x874   : > { %2190 = vrot.lane.b32.xlu1 %v6422_v11, %s5863_s12 }
 0x879   : > { %v2016_v44 = vpop.xlane.xlu0 %2015 }
 0x87a   : > { %v2017_v45 = vsub.f32 %v2013_v27, %v2016_v44 }
 0x87c   : > { %v2018_v46 = vmul.f32 1.442695, %v2017_v45 }
 0x87e   : > { %5333 = vpow2.f32 %v2018_v46 }
 0x88b   : > { %v5334_v47 = vpop.eup %5333 }
 0x88c   : > { %v2020_v48 = vsel %vm1114_vm2, %v5334_v47, 0.0 }
 0x898   : > { %2021 = vadd.xlane.f32.xlu1 %v2020_v48 }
 0x8ec   : > { %v2180_v49 = vpop.xlane.xlu1 %2179 }
 0x8ed   : > { %v2181_v51 = vsub.f32 %v2177_v31, %v2180_v49 }
 0x8ef   : > { %v2182_v52 = vmul.f32 1.442695, %v2181_v51 }
 0x8f0   : > { %v2352_v53 = vpop.xlane.xlu0 %2351  ;;  %v2191_v2 = vpop.permute.xlu1 %2190 }
 0x8f1   : > { %5335 = vpow2.f32 %v2182_v52  ;;  %v2353_v54 = vsub.f32 %v2349_v36, %v2352_v53 }
 0x8f3   : > { %v2354_v55 = vmul.f32 1.442695, %v2353_v54 }
 0x8f4   : > { %v2523_v56 = vpop.xlane.xlu0 %2522 }
 0x8f5   : > { %5337 = vpow2.f32 %v2354_v55  ;;  %v2524_v58 = vsub.f32 %v2520_v41, %v2523_v56 }
 0x8f7   : > { %v2525_v59 = vmul.f32 1.442695, %v2524_v58 }
 0x8f9   : > { %5339 = vpow2.f32 %v2525_v59 }
 0x8fe   : > { %v5336_v60 = vpop.eup %5335 }
 0x8ff   : > { %v2184_v20 = vsel %vm1114_vm2, %v5336_v60, 0.0 }
 0x900   : > { %2185 = vadd.xlane.f32.xlu0 %v2184_v20 }
 0x902   : > { %v5338_v61 = vpop.eup %5337 }
 0x903   : > { %v2356_v62 = vsel %vm1114_vm2, %v5338_v61, 0.0 }
 0x904   : > { %2357 = vadd.xlane.f32.xlu1 %v2356_v62 }
 0x906   : > { %v5340_v63 = vpop.eup %5339 }
 0x907   : > { %v2527_v1 = vsel %vm1114_vm2, %v5340_v63, 0.0 }
 0x908   : > { %2528 = vadd.xlane.f32.xlu0 %v2527_v1 }
 0x915   : > { %2532 = vrot.lane.b32.xlu1 %v6422_v11, %s5864_s18 }
 0x91e   : > { %2361 = vrot.lane.b32.xlu0 %v6422_v11, %s5862_s28 }
 0x921   : > { %v2022_v3 = vpop.xlane.xlu1 %2021 }
 0x922   : > { %5341 = vrcp.f32 %v2022_v3 }
 0x92f   : > { %v5342_v4 = vpop.eup %5341 }
 0x930   : > { %v2024_v5 = vmul.f32 %v5342_v4, %v5334_v47  ;;  %v4706_v47 = vld [vmem:[%s6870_s15 + $0x2] ss:$0 sm:$0xff] }
 0x932   : > { %4964 = vmatmul.mubr.msk.f32.vlgmr.msra.gmra.mxu1 %vm1114_vm2, %v2024_v5 }
 0x933   : > { %4972 = vmatpush3.msra.mxu1 %v2191_v2  ;;  %4973 = vmatprep.mubr.msk.f32.mxu1 %vm5861_vm0, %v5860_v0 }
 0x934   : > { %4981 = vmatprep.subr.mxu1 %v5860_v0 }
 0x989   : > { %v2186_v6 = vpop.xlane.xlu0 %2185 }
 0x98a   : > { %5343 = vrcp.f32 %v2186_v6 }
 0x98d   : > { %v2358_v7 = vpop.xlane.xlu1 %2357 }
 0x98e   : > { %5345 = vrcp.f32 %v2358_v7 }
 0x991   : > { %v2529_v9 = vpop.xlane.xlu0 %2528  ;;  %v2533_v16 = vpop.permute.xlu1 %2532 }
 0x992   : > { %5347 = vrcp.f32 %v2529_v9 }
 0x995   : > { %v2362_v12 = vpop.permute.xlu0 %2361 }
 0x997   : > { %v5344_v10 = vpop.eup %5343 }
 0x998   : > { %v2188_v13 = vmul.f32 %v5344_v10, %v5336_v60 }
 0x99a   : > { %4974 = vmatmul.mubr.msk.f32.vlgmr.msra.gmra.mxu1 %vm1114_vm2, %v2188_v13 }
 0x99b   : > { %v5346_v14 = vpop.eup %5345  ;;  %4982 = vmatpush3.msra.mxu1 %v2362_v12  ;;  %4983 = vmatprep.mubr.msk.f32.mxu1 %vm5861_vm0, %v5860_v0 }
 0x99c   : > { %4991 = vmatprep.subr.mxu1 %v5860_v0  ;;  %v2360_v15 = vmul.f32 %v5346_v14, %v5338_v61 }
 0x99e   : > { %4984 = vmatmul.mubr.msk.f32.vlgmr.msra.gmra.mxu1 %vm1114_vm2, %v2360_v15 }
 0x99f   : > { %v5348_v17 = vpop.eup %5347  ;;  %4992 = vmatpush3.msra.mxu1 %v2533_v16  ;;  %4993 = vmatprep.mubr.msk.f32.mxu1 %vm5861_vm0, %v5860_v0 }
 0x9a0   : > { %v2531_v39 = vmul.f32 %v5348_v17, %v5340_v63  ;;  %5004 = vmatprep.subr.bf16.mxu1 %v5860_v0 }
 0x9a2   : > { %4994 = vmatmul.mubr.msk.f32.vlgmr.msra.gmra.mxu1 %vm1114_vm2, %v2531_v39 }
 0x9a3   : > { %5008 = vmatprep.mubr.msk.bf16.mxu1 %vm5861_vm0, %v5860_v0 }
 0x9f2   : > { %v2094_v18 = vpop.f32.mrf.mxu1 }
 0x9f3   : > { %2098 = vst.msk [vmem:[#allocation2] sm:$0xff] %vm1114_vm2, %v2094_v18 }
 0x9f4   : > { %v4965_v21 = vpop.f32.mrf.mxu1 }
 0xa5a   : > { %v2262_v24 = vpop.f32.mrf.mxu1 }
 0xa5b   : > { %2267 = vrot.lane.b32.xlu1 %v2262_v24, %s5865_s19 }
 0xa5c   : > { %v4975_v25 = vpop.f32.mrf.mxu1 }
 0xa5e   : > { %v2433_v26 = vpop.f32.mrf.mxu1 }
 0xa5f   : > { %2438 = vrot.lane.b32.xlu0 %v2433_v26, %s5866_s3 }
 0xa60   : > { %v4985_v27 = vpop.f32.mrf.mxu1 }
 0xa62   : > { %v2604_v28 = vpop.f32.mrf.mxu1 }
 0xa63   : > { %2754 = vrot.lane.b32.xlu0 %v6309_v19, %s5868_s29  ;;  %2609 = vrot.lane.b32.xlu1 %v2604_v28, %s5867_s27 }
 0xa64   : > { %v4995_v29 = vpop.f32.mrf.mxu1 }
 0xa67   : > { %2923 = vrot.lane.b32.xlu1 %v6309_v19, %s5869_s10 }
 0xa6b   : > { %3095 = vrot.lane.b32.xlu1 %v6309_v19, %s5870_s22 }
 0xa6f   : > { %3267 = vrot.lane.b32.xlu1 %v6309_v19, %s5871_s1  ;;  %v5309_v19 = vld [vmem:[#allocation21 + $0x28] sm:$0xff]  }
 0xa70   : > { %5005 = vmatpush3.bf16.msra.mxu1 %v5309_v19 }
 0xa71   : > { %5006 = vmatprep.subr.bf16.mxu1 %v5860_v0 }
 0xa74   : > { %5007 = vmatpush3.bf16.msra.mxu1 %v5310_v37 }
 0xa75   : > { %5017 = vmatprep.subr.mxu1 %v5860_v0 }
 0xacd   : > { %v2268_v30 = vpop.permute.xlu1 %2267 }
 0xace   : > { %2270 = vst.msk [vmem:[#allocation2] sm:$0xff] %vm1450_vm3, %v2268_v30 }
 0xad1   : > { %v2439_v31 = vpop.permute.xlu0 %2438 }
 0xad2   : > { %2441 = vst.msk [vmem:[#allocation2] sm:$0xff] %vm1623_vm4, %v2439_v31 }
 0xad5   : > { %v2610_v33 = vpop.permute.xlu1 %2609  ;;  %v2755_v36 = vpop.permute.xlu0 %2754 }
 0xad6   : > { %2612 = vst.msk [vmem:[#allocation2] sm:$0xff] %vm1796_vm5, %v2610_v33 }
 0xad9   : > { %v2924_v51 = vpop.permute.xlu1 %2923 }
 0xadd   : > { %v2613_v34 = vld [vmem:[#allocation2] sm:$0xff]  ;;  %v3096_v54 = vpop.permute.xlu1 %3095 }
 0xade   : > { %v2614_v35 = vpack.c.bf16 %v2613_v34, %v2613_v34 }
 0xae0   : > { %5001 = vmatmul.mubr.msk.bf16.vlgmr.msra.gmra.mxu0 %vm811_vm1, %v2614_v35 }
 0xae1   : > { %5013 = vmatpush3.xpose.msk.msra.mxu0 %vm1114_vm2, %v2755_v36  ;;  %5014 = vmatprep.mubr.msk.f32.mxu0 %vm5861_vm0, %v5860_v0  ;;  %v3268_v58 = vpop.permute.xlu1 %3267 }
 0xae2   : > { %5022 = vmatprep.subr.mxu0 %v5860_v0 }
 0xba0   : > { %v2669_v38 = vpop.f32.mrf.mxu0 }
 0xba1   : > { %v2675_v41 = vadd.f32 %v2669_v38, %v6417_v8 }
 0xba2   : > { %v5002_v42 = vpop.f32.mrf.mxu0 }
 0xba3   : > { %v6510_v43 = vadd.f32 %v4704_v40, %v2675_v41 }
 0xba4   : > { %v2672_v44 = vpop.f32.mrf.mxu0 }
 0xba5   : > { %v2685_v45 = vpack.c.bf16 %v6510_v43, %v6510_v43 }
 0xba6   : > { %v5003_v46 = vpop.f32.mrf.mxu0 }
 0xba7   : > { %5009 = vmatmul.mubr.msk.bf16.vlgmr.msra.gmra.mxu1 %vm811_vm1, %v2685_v45 }
 0xba8   : > { %5019 = vmatprep.mubr.msk.f32.mxu1 %vm5861_vm0, %v5860_v0 }
 0xc67   : > { %v2748_v48 = vpop.f32.mrf.mxu1 }
 0xc68   : > { %v2749_v49 = vadd.f32 %v4706_v47, %v2748_v48 }
 0xc69   : > { %v5010_v8 = vpop.f32.mrf.mxu1 }
 0xc6a   : > { %2921 = vrot.lane.b32.xlu0 %v2749_v49, %s5863_s12  ;;  %5015 = vmatmul.mubr.msk.f32.vlgmr.msra.gmra.mxu0 %vm1114_vm2, %v2749_v49 }
 0xc6b   : > { %5023 = vmatpush3.xpose.msk.msra.mxu0 %vm1114_vm2, %v2924_v51  ;;  %v2751_v52 = vpop.f32.mrf.mxu1  ;;  %5024 = vmatprep.mubr.msk.f32.mxu0 %vm5861_vm0, %v5860_v0 }
 0xc6c   : > { %5032 = vmatprep.subr.mxu0 %v5860_v0 }
 0xc6d   : > { %v5011_v53 = vpop.f32.mrf.mxu1 }
 0xc6e   : > { %3093 = vrot.lane.b32.xlu0 %v2749_v49, %s5862_s28 }
 0xc72   : > { %3265 = vrot.lane.b32.xlu0 %v2749_v49, %s5864_s18 }
 0xcdc   : > { %v2922_v55 = vpop.permute.xlu0 %2921 }
 0xcdd   : > { %5025 = vmatmul.mubr.msk.f32.vlgmr.msra.gmra.mxu0 %vm1114_vm2, %v2922_v55 }
 0xcde   : > { %5033 = vmatpush3.xpose.msk.msra.mxu0 %vm1114_vm2, %v3096_v54  ;;  %5034 = vmatprep.mubr.msk.f32.mxu0 %vm5861_vm0, %v5860_v0 }
 0xcdf   : > { %5042 = vmatprep.subr.mxu0 %v5860_v0 }
 0xce0   : > { %v3094_v56 = vpop.permute.xlu0 %3093 }
 0xce1   : > { %5035 = vmatmul.mubr.msk.f32.vlgmr.msra.gmra.mxu0 %vm1114_vm2, %v3094_v56 }
 0xce2   : > { %5043 = vmatpush3.xpose.msk.msra.mxu0 %vm1114_vm2, %v3268_v58  ;;  %5044 = vmatprep.mubr.msk.f32.mxu0 %vm5861_vm0, %v5860_v0  ;;  %v5311_v58 = vld [vmem:[#allocation23 + $0x28] sm:$0xff]  }
 0xce3   : > { %5052 = vmatprep.subr.bf16.mxu0 %v5860_v0 }
 0xce4   : > { %v3266_v59 = vpop.permute.xlu0 %3265 }
 0xce5   : > { %5045 = vmatmul.mubr.msk.f32.vlgmr.msra.gmra.mxu0 %vm1114_vm2, %v3266_v59  ;;  %v5312_v59 = vld [vmem:[#allocation23 + $0x20] sm:$0xff]  }
 0xce6   : > { %5056 = vmatprep.mubr.msk.bf16.mxu0 %vm5861_vm0, %v5860_v0  ;;  %5053 = vmatpush3.bf16.msra.mxu0 %v5311_v58 }
 0xce7   : > { %5054 = vmatprep.subr.bf16.mxu0 %v5860_v0 }
 0xcea   : > { %5055 = vmatpush3.bf16.msra.mxu0 %v5312_v59 }
 0xceb   : > { %5068 = vmatprep.subr.mxu0 %v5860_v0 }
 0xd2a   : > { %v2827_v60 = vpop.f32.mrf.mxu0 }
 0xd2b   : > { %v2831_v20 = vmul.f32 0.35355338, %v2827_v60 }
 0xd2c   : > { %v5016_v61 = vpop.f32.mrf.mxu0 }
 0xd2d   : > { %v2832_v62 = vadd.f32 %v2831_v20, %v6352_v50 }
 0xd2f   : > { %v2833_v63 = vsel %vm1114_vm2, %v2832_v62, -inf }
 0xd30   : > { %2834 = vmax.xlane.f32.xlu1 %v2833_v63 }
 0xd9d   : > { %v2995_v1 = vpop.f32.mrf.mxu0 }
 0xd9e   : > { %v2999_v2 = vmul.f32 0.35355338, %v2995_v1 }
 0xd9f   : > { %v5026_v3 = vpop.f32.mrf.mxu0 }
 0xda0   : > { %v3000_v4 = vadd.f32 %v2999_v2, %v6352_v50 }
 0xda1   : > { %v3167_v5 = vpop.f32.mrf.mxu0 }
 0xda2   : > { %v3171_v6 = vmul.f32 0.35355338, %v3167_v5  ;;  %v3001_v7 = vsel %vm1114_vm2, %v3000_v4, -inf }
 0xda3   : > { %3002 = vmax.xlane.f32.xlu0 %v3001_v7  ;;  %v5036_v9 = vpop.f32.mrf.mxu0 }
 0xda4   : > { %v3172_v10 = vadd.f32 %v3171_v6, %v6352_v50  ;;  %v5314_v9 = vld [vmem:[#allocation21 + $0x30] sm:$0xff]  }
 0xda5   : > { %v3339_v13 = vpop.f32.mrf.mxu0 }
 0xda6   : > { %v3343_v12 = vmul.f32 0.35355338, %v3339_v13  ;;  %v3173_v14 = vsel %vm1114_vm2, %v3172_v10, -inf  ;;  %v4726_v13 = vld [vmem:[%s6871_s23 + $0x2] ss:$0 sm:$0xff] }
 0xda7   : > { %3174 = vmax.xlane.f32.xlu0 %v3173_v14  ;;  %v5046_v15 = vpop.f32.mrf.mxu0 }
 0xda8   : > { %v3344_v16 = vadd.f32 %v3343_v12, %v6352_v50 }
 0xdaa   : > { %v3345_v17 = vsel %vm1114_vm2, %v3344_v16, -inf }
 0xdab   : > { %3346 = vmax.xlane.f32.xlu1 %v3345_v17 }
 0xdb9   : > { %v2835_v39 = vpop.xlane.xlu1 %2834 }
 0xdba   : > { %v2836_v18 = vsub.f32 %v2832_v62, %v2835_v39 }
 0xdbc   : > { %v2837_v21 = vmul.f32 1.442695, %v2836_v18  ;;  %3012 = vrot.lane.b32.xlu1 %v6323_v32, %s5869_s10  ;;  %v4728_v18 = vld [vmem:[%s6870_s15 + $0x3] ss:$0 sm:$0xff] }
 0xdbe   : > { %5349 = vpow2.f32 %v2837_v21 }
 0xdcb   : > { %v5350_v22 = vpop.eup %5349 }
 0xdcc   : > { %v2839_v23 = vsel %vm1114_vm2, %v5350_v22, 0.0 }
 0xdcd   : > { %2840 = vadd.xlane.f32.xlu0 %v2839_v23 }
 0xde3   : > { %2844 = vrot.lane.b32.xlu0 %v6323_v32, %s5868_s29 }
 0xe2c   : > { %v3003_v24 = vpop.xlane.xlu0 %3002 }
 0xe2d   : > { %v3004_v25 = vsub.f32 %v3000_v4, %v3003_v24 }
 0xe2f   : > { %v3005_v50 = vmul.f32 1.442695, %v3004_v25 }
 0xe30   : > { %v3175_v26 = vpop.xlane.xlu0 %3174 }
 0xe31   : > { %5351 = vpow2.f32 %v3005_v50  ;;  %v3176_v27 = vsub.f32 %v3172_v10, %v3175_v26 }
 0xe33   : > { %v3177_v28 = vmul.f32 1.442695, %v3176_v27 }
 0xe34   : > { %v3347_v29 = vpop.xlane.xlu1 %3346 }
 0xe35   : > { %5353 = vpow2.f32 %v3177_v28  ;;  %v3348_v30 = vsub.f32 %v3344_v16, %v3347_v29 }
 0xe37   : > { %v3349_v31 = vmul.f32 1.442695, %v3348_v30 }
 0xe38   : > { %v3013_v44 = vpop.permute.xlu1 %3012 }
 0xe39   : > { %5355 = vpow2.f32 %v3349_v31 }
 0xe3e   : > { %v5352_v33 = vpop.eup %5351 }
 0xe3f   : > { %v3007_v34 = vsel %vm1114_vm2, %v5352_v33, 0.0 }
 0xe40   : > { %3008 = vadd.xlane.f32.xlu1 %v3007_v34 }
 0xe42   : > { %v5354_v35 = vpop.eup %5353 }
 0xe43   : > { %v3179_v36 = vsel %vm1114_vm2, %v5354_v35, 0.0 }
 0xe44   : > { %3180 = vadd.xlane.f32.xlu0 %v3179_v36 }
 0xe46   : > { %v5356_v19 = vpop.eup %5355 }
 0xe47   : > { %v3351_v37 = vsel %vm1114_vm2, %v5356_v19, 0.0 }
 0xe48   : > { %3352 = vadd.xlane.f32.xlu1 %v3351_v37 }
 0xe56   : > { %v2841_v38 = vpop.xlane.xlu0 %2840 }
 0xe57   : > { %5357 = vrcp.f32 %v2841_v38 }
 0xe59   : > { %3184 = vrot.lane.b32.xlu1 %v6323_v32, %s5870_s22 }
 0xe5a   : > { %3356 = vrot.lane.b32.xlu0 %v6323_v32, %s5871_s1  ;;  %v2845_v40 = vpop.permute.xlu0 %2844 }
 0xe5b   : > { %5018 = vmatpush3.msra.mxu1 %v2845_v40 }
 0xe5c   : > { %5027 = vmatprep.subr.mxu1 %v5860_v0 }
 0xe64   : > { %v5358_v41 = vpop.eup %5357 }
 0xe65   : > { %v2843_v42 = vmul.f32 %v5358_v41, %v5350_v22 }
 0xe67   : > { %5020 = vmatmul.mubr.msk.f32.vlgmr.msra.gmra.mxu1 %vm1114_vm2, %v2843_v42 }
 0xe68   : > { %5028 = vmatpush3.msra.mxu1 %v3013_v44  ;;  %5029 = vmatprep.mubr.msk.f32.mxu1 %vm5861_vm0, %v5860_v0 }
 0xe69   : > { %5037 = vmatprep.subr.mxu1 %v5860_v0 }
 0xec9   : > { %v3009_v45 = vpop.xlane.xlu1 %3008 }
 0xeca   : > { %5359 = vrcp.f32 %v3009_v45 }
 0xecd   : > { %v3181_v46 = vpop.xlane.xlu0 %3180 }
 0xece   : > { %5361 = vrcp.f32 %v3181_v46 }
 0xed1   : > { %v3353_v32 = vpop.xlane.xlu1 %3352  ;;  %v3357_v52 = vpop.permute.xlu0 %3356 }
 0xed2   : > { %5363 = vrcp.f32 %v3353_v32 }
 0xed5   : > { %v3185_v49 = vpop.permute.xlu1 %3184 }
 0xed7   : > { %v5360_v47 = vpop.eup %5359 }
 0xed8   : > { %v3011_v48 = vmul.f32 %v5360_v47, %v5352_v33 }
 0xeda   : > { %5030 = vmatmul.mubr.msk.f32.vlgmr.msra.gmra.mxu1 %vm1114_vm2, %v3011_v48 }
 0xedb   : > { %v5362_v8 = vpop.eup %5361  ;;  %5038 = vmatpush3.msra.mxu1 %v3185_v49  ;;  %5039 = vmatprep.mubr.msk.f32.mxu1 %vm5861_vm0, %v5860_v0 }
 0xedc   : > { %5047 = vmatprep.subr.mxu1 %v5860_v0  ;;  %v3183_v51 = vmul.f32 %v5362_v8, %v5354_v35 }
 0xede   : > { %5040 = vmatmul.mubr.msk.f32.vlgmr.msra.gmra.mxu1 %vm1114_vm2, %v3183_v51 }
 0xedf   : > { %v5364_v53 = vpop.eup %5363  ;;  %5048 = vmatpush3.msra.mxu1 %v3357_v52  ;;  %5049 = vmatprep.mubr.msk.f32.mxu1 %vm5861_vm0, %v5860_v0 }
 0xee0   : > { %v3355_v54 = vmul.f32 %v5364_v53, %v5356_v19  ;;  %5060 = vmatprep.subr.bf16.mxu1 %v5860_v0 }
 0xee2   : > { %5050 = vmatmul.mubr.msk.f32.vlgmr.msra.gmra.mxu1 %vm1114_vm2, %v3355_v54 }
 0xee3   : > { %5064 = vmatprep.mubr.msk.bf16.mxu1 %vm5861_vm0, %v5860_v0 }
 0xf27   : > { %v2916_v55 = vpop.f32.mrf.mxu1 }
 0xf28   : > { %2920 = vst.msk [vmem:[#allocation2] sm:$0xff] %vm1114_vm2, %v2916_v55 }
 0xf29   : > { %v5021_v56 = vpop.f32.mrf.mxu1 }
 0xf9a   : > { %v3084_v60 = vpop.f32.mrf.mxu1 }
 0xf9b   : > { %3089 = vrot.lane.b32.xlu1 %v3084_v60, %s5865_s19 }
 0xf9c   : > { %v5031_v20 = vpop.f32.mrf.mxu1 }
 0xf9e   : > { %v3256_v61 = vpop.f32.mrf.mxu1 }
 0xf9f   : > { %3261 = vrot.lane.b32.xlu0 %v3256_v61, %s5866_s3 }
 0xfa0   : > { %v5041_v62 = vpop.f32.mrf.mxu1 }
 0xfa2   : > { %v3428_v63 = vpop.f32.mrf.mxu1 }
 0xfa3   : > { %3578 = vrot.lane.b32.xlu0 %v6393_v57, %s5868_s29  ;;  %3433 = vrot.lane.b32.xlu1 %v3428_v63, %s5867_s27 }
 0xfa4   : > { %v5051_v1 = vpop.f32.mrf.mxu1 }
 0xfa7   : > { %3747 = vrot.lane.b32.xlu1 %v6393_v57, %s5869_s10 }
 0xfab   : > { %3920 = vrot.lane.b32.xlu1 %v6393_v57, %s5870_s22 }
 0xfaf   : > { %4093 = vrot.lane.b32.xlu1 %v6393_v57, %s5871_s1  ;;  %v5313_v57 = vld [vmem:[#allocation21 + $0x38] sm:$0xff]  }
 0xfb0   : > { %5061 = vmatpush3.bf16.msra.mxu1 %v5313_v57 }
 0xfb1   : > { %5062 = vmatprep.subr.bf16.mxu1 %v5860_v0 }
 0xfb4   : > { %5063 = vmatpush3.bf16.msra.mxu1 %v5314_v9 }
 0xfb5   : > { %5073 = vmatprep.subr.mxu1 %v5860_v0 }
0x100d   : > { %v3090_v2 = vpop.permute.xlu1 %3089 }
0x100e   : > { %3092 = vst.msk [vmem:[#allocation2] sm:$0xff] %vm1450_vm3, %v3090_v2 }
0x1011   : > { %v3262_v3 = vpop.permute.xlu0 %3261 }
0x1012   : > { %3264 = vst.msk [vmem:[#allocation2] sm:$0xff] %vm1623_vm4, %v3262_v3 }
0x1015   : > { %v3434_v4 = vpop.permute.xlu1 %3433  ;;  %v3579_v7 = vpop.permute.xlu0 %3578 }
0x1016   : > { %3436 = vst.msk [vmem:[#allocation2] sm:$0xff] %vm1796_vm5, %v3434_v4 }
0x1019   : > { %v3748_v23 = vpop.permute.xlu1 %3747 }
0x101d   : > { %v3437_v5 = vld [vmem:[#allocation2] sm:$0xff]  ;;  %v3921_v50 = vpop.permute.xlu1 %3920 }
0x101e   : > { %v3438_v6 = vpack.c.bf16 %v3437_v5, %v3437_v5 }
0x1020   : > { %5057 = vmatmul.mubr.msk.bf16.vlgmr.msra.gmra.mxu0 %vm811_vm1, %v3438_v6 }
0x1021   : > { %5069 = vmatpush3.xpose.msk.msra.mxu0 %vm1114_vm2, %v3579_v7  ;;  %5070 = vmatprep.mubr.msk.f32.mxu0 %vm5861_vm0, %v5860_v0  ;;  %v4094_v28 = vpop.permute.xlu1 %4093 }
0x1022   : > { %5078 = vmatprep.subr.mxu0 %v5860_v0 }
0x10e0   : > { %v3493_v10 = vpop.f32.mrf.mxu0 }
0x10e1   : > { %v3499_v12 = vadd.f32 %v3493_v10, %v6510_v43 }
0x10e2   : > { %v5058_v14 = vpop.f32.mrf.mxu0 }
0x10e3   : > { %v6605_v15 = vadd.f32 %v4726_v13, %v3499_v12 }
0x10e4   : > { %v3496_v16 = vpop.f32.mrf.mxu0 }
0x10e5   : > { %v3509_v17 = vpack.c.bf16 %v6605_v15, %v6605_v15 }
0x10e6   : > { %v5059_v39 = vpop.f32.mrf.mxu0 }
0x10e7   : > { %5065 = vmatmul.mubr.msk.bf16.vlgmr.msra.gmra.mxu1 %vm811_vm1, %v3509_v17 }
0x10e8   : > { %5075 = vmatprep.mubr.msk.f32.mxu1 %vm5861_vm0, %v5860_v0 }
0x11a7   : > { %v3572_v21 = vpop.f32.mrf.mxu1 }
0x11a8   : > { %v3573_v22 = vadd.f32 %v4728_v18, %v3572_v21 }
0x11a9   : > { %v5066_v43 = vpop.f32.mrf.mxu1 }
0x11aa   : > { %3745 = vrot.lane.b32.xlu0 %v3573_v22, %s5863_s12  ;;  %5071 = vmatmul.mubr.msk.f32.vlgmr.msra.gmra.mxu0 %vm1114_vm2, %v3573_v22 }
0x11ab   : > { %5079 = vmatpush3.xpose.msk.msra.mxu0 %vm1114_vm2, %v3748_v23  ;;  %v3575_v24 = vpop.f32.mrf.mxu1  ;;  %5080 = vmatprep.mubr.msk.f32.mxu0 %vm5861_vm0, %v5860_v0  ;;  %v5315_v23 = vld [vmem:[#allocation23 + $0x38] sm:$0xff]  }
0x11ac   : > { %5088 = vmatprep.subr.mxu0 %v5860_v0  ;;  %v5316_v24 = vld [vmem:[#allocation23 + $0x30] sm:$0xff]  }
0x11ad   : > { %v5067_v25 = vpop.f32.mrf.mxu1 }
0x11ae   : > { %3918 = vrot.lane.b32.xlu0 %v3573_v22, %s5862_s28  ;;  %s4646_s28 = sshll.u32 %s6228_s4, 5 }
0x11af   : > { %s6654_s12 = scalar_lea.vmem [#allocation25], %s4646_s28 }
0x11b2   : > { %4091 = vrot.lane.b32.xlu0 %v3573_v22, %s5864_s18  ;;  %s6872_s18 = sld [smem:[#allocation40_spill]] }
0x11b8   : > { %p6875_p3 = scmp.ne.s32.totalorder %s6872_s18, 0 }
0x121c   : > { %v3746_v26 = vpop.permute.xlu0 %3745 }
0x121d   : > { %5081 = vmatmul.mubr.msk.f32.vlgmr.msra.gmra.mxu0 %vm1114_vm2, %v3746_v26 }
0x121e   : > { %5089 = vmatpush3.xpose.msk.msra.mxu0 %vm1114_vm2, %v3921_v50  ;;  %5090 = vmatprep.mubr.msk.f32.mxu0 %vm5861_vm0, %v5860_v0 }
0x121f   : > { %5098 = vmatprep.subr.mxu0 %v5860_v0 }
0x1220   : > { %v3919_v27 = vpop.permute.xlu0 %3918 }
0x1221   : > { %5091 = vmatmul.mubr.msk.f32.vlgmr.msra.gmra.mxu0 %vm1114_vm2, %v3919_v27 }
0x1222   : > { %5099 = vmatpush3.xpose.msk.msra.mxu0 %vm1114_vm2, %v4094_v28  ;;  %5100 = vmatprep.mubr.msk.f32.mxu0 %vm5861_vm0, %v5860_v0 }
0x1223   : > { %5108 = vmatprep.subr.bf16.mxu0 %v5860_v0 }
0x1224   : > { %v4092_v29 = vpop.permute.xlu0 %4091 }
0x1225   : > { %5101 = vmatmul.mubr.msk.f32.vlgmr.msra.gmra.mxu0 %vm1114_vm2, %v4092_v29 }
0x1226   : > { %5112 = vmatprep.mubr.msk.bf16.mxu0 %vm5861_vm0, %v5860_v0  ;;  %5109 = vmatpush3.bf16.msra.mxu0 %v5315_v23 }
0x1227   : > { %5110 = vmatprep.subr.bf16.mxu0 %v5860_v0 }
0x122a   : > { %5111 = vmatpush3.bf16.msra.mxu0 %v5316_v24 }
0x126a   : > { %v3651_v30 = vpop.f32.mrf.mxu0 }
0x126b   : > { %v3655_v31 = vmul.f32 0.35355338, %v3651_v30 }
0x126c   : > { %v5072_v33 = vpop.f32.mrf.mxu0 }
0x126d   : > { %v3656_v34 = vsel %vm1114_vm2, %v3655_v31, -inf }
0x126e   : > { %3657 = vmax.xlane.f32.xlu1 %v3656_v34 }
0x12dd   : > { %v3819_v35 = vpop.f32.mrf.mxu0 }
0x12de   : > { %v3823_v36 = vmul.f32 0.35355338, %v3819_v35 }
0x12df   : > { %v5082_v19 = vpop.f32.mrf.mxu0 }
0x12e0   : > { %v3824_v37 = vsel %vm1114_vm2, %v3823_v36, -inf }
0x12e1   : > { %3825 = vmax.xlane.f32.xlu0 %v3824_v37  ;;  %v3992_v38 = vpop.f32.mrf.mxu0 }
0x12e2   : > { %v3996_v40 = vmul.f32 0.35355338, %v3992_v38 }
0x12e3   : > { %v5092_v41 = vpop.f32.mrf.mxu0 }
0x12e4   : > { %v3997_v42 = vsel %vm1114_vm2, %v3996_v40, -inf }
0x12e5   : > { %3998 = vmax.xlane.f32.xlu0 %v3997_v42  ;;  %v4165_v44 = vpop.f32.mrf.mxu0 }
0x12e6   : > { %v4169_v45 = vmul.f32 0.35355338, %v4165_v44 }
0x12e7   : > { %v5102_v46 = vpop.f32.mrf.mxu0 }
0x12e8   : > { %v4170_v32 = vsel %vm1114_vm2, %v4169_v45, -inf }
0x12e9   : > { %4171 = vmax.xlane.f32.xlu1 %v4170_v32 }
0x12f7   : > { %v3658_v47 = vpop.xlane.xlu1 %3657 }
0x12f8   : > { %v3659_v48 = vsub.f32 %v3655_v31, %v3658_v47 }
0x12fa   : > { %v3660_v49 = vmul.f32 1.442695, %v3659_v48  ;;  %3837 = vrot.lane.b32.xlu1 %v6422_v11, %s5869_s10 }
0x12fc   : > { %5365 = vpow2.f32 %v3660_v49 }
0x1309   : > { %v5366_v8 = vpop.eup %5365 }
0x130a   : > { %v3662_v51 = vsel %vm1114_vm2, %v5366_v8, 0.0 }
0x130b   : > { %3663 = vadd.xlane.f32.xlu0 %v3662_v51 }
0x1321   : > { %3668 = vrot.lane.b32.xlu0 %v6422_v11, %s5868_s29  ;;  %s4369_s29 = sshll.u32 %s6654_s12, 4  ;;  %s6692_s29 = int_to_ptr.vmem [resolvable:$true] %s4369_s29 }
0x1322   : > { %s5725_s16 = scalar_lea.vmem %s6692_s29, 512  ;;  %p5732_p8 = scmp.lt.s32.totalorder %s6692_s29, %s5730_s21 }
0x1323   : > { %p5726_p7 = scmp.ne.s32.totalorder %s6692_s29, %s5725_s16  ;;  %p5733_p5 = scmp.lt.s32.totalorder %s5731_s24, %s5725_s16 }
0x1325   : > { %p5727_p0 = pnand %p5726_p7, %p6875_p3  ;;  %p5734_p10 = por %p5733_p5, %p5732_p8 }
0x1327   : > { %p5728_p9 = pneg %p5727_p0 }
0x1329   : > { %p5735_p4 = pnand %p5734_p10, %p5728_p9 }
0x136a   : > { %v3826_v52 = vpop.xlane.xlu0 %3825 }
0x136b   : > { %v3827_v53 = vsub.f32 %v3823_v36, %v3826_v52 }
0x136d   : > { %v3828_v54 = vmul.f32 1.442695, %v3827_v53 }
0x136e   : > { %v3999_v55 = vpop.xlane.xlu0 %3998 }
0x136f   : > { %5367 = vpow2.f32 %v3828_v54  ;;  %v4000_v56 = vsub.f32 %v3996_v40, %v3999_v55 }
0x1371   : > { %v4001_v58 = vmul.f32 1.442695, %v4000_v56 }
0x1372   : > { %v4172_v59 = vpop.xlane.xlu1 %4171 }
0x1373   : > { %5369 = vpow2.f32 %v4001_v58  ;;  %v4173_v60 = vsub.f32 %v4169_v45, %v4172_v59 }
0x1375   : > { %v4174_v20 = vmul.f32 1.442695, %v4173_v60 }
0x1376   : > { %v3838_v57 = vpop.permute.xlu1 %3837 }
0x1377   : > { %5371 = vpow2.f32 %v4174_v20 }
0x137c   : > { %v5368_v61 = vpop.eup %5367 }
0x137d   : > { %v3830_v62 = vsel %vm1114_vm2, %v5368_v61, 0.0 }
0x137e   : > { %3831 = vadd.xlane.f32.xlu1 %v3830_v62 }
0x1380   : > { %v5370_v63 = vpop.eup %5369 }
0x1381   : > { %v4003_v1 = vsel %vm1114_vm2, %v5370_v63, 0.0 }
0x1382   : > { %4004 = vadd.xlane.f32.xlu0 %v4003_v1 }
0x1384   : > { %v5372_v2 = vpop.eup %5371 }
0x1385   : > { %v4176_v3 = vsel %vm1114_vm2, %v5372_v2, 0.0 }
0x1386   : > { %4177 = vadd.xlane.f32.xlu1 %v4176_v3 }
0x1394   : > { %v3664_v4 = vpop.xlane.xlu0 %3663 }
0x1395   : > { %5373 = vrcp.f32 %v3664_v4 }
0x1397   : > { %4010 = vrot.lane.b32.xlu1 %v6422_v11, %s5870_s22 }
0x1398   : > { %4183 = vrot.lane.b32.xlu0 %v6422_v11, %s5871_s1  ;;  %v3669_v5 = vpop.permute.xlu0 %3668 }
0x1399   : > { %5074 = vmatpush3.msra.mxu1 %v3669_v5 }
0x139a   : > { %5083 = vmatprep.subr.mxu1 %v5860_v0 }
0x13a2   : > { %v5374_v6 = vpop.eup %5373 }
0x13a3   : > { %v3666_v7 = vmul.f32 %v5374_v6, %v5366_v8 }
0x13a5   : > { %3667 = vst.msk [vmem:[%s6654_s12] sm:$0xff] %vm1114_vm2, %v3666_v7  ;;  %5076 = vmatmul.mubr.msk.f32.vlgmr.msra.gmra.mxu1 %vm1114_vm2, %v3666_v7 }
0x13a6   : > { %5084 = vmatpush3.msra.mxu1 %v3838_v57  ;;  %5085 = vmatprep.mubr.msk.f32.mxu1 %vm5861_vm0, %v5860_v0 }
0x13a7   : > { %5093 = vmatprep.subr.mxu1 %v5860_v0 }
0x1407   : > { %v3832_v11 = vpop.xlane.xlu1 %3831 }
0x1408   : > { %5375 = vrcp.f32 %v3832_v11 }
0x140b   : > { %v4005_v9 = vpop.xlane.xlu0 %4004 }
0x140c   : > { %5377 = vrcp.f32 %v4005_v9 }
0x140f   : > { %v4178_v10 = vpop.xlane.xlu1 %4177  ;;  %v4184_v39 = vpop.permute.xlu0 %4183 }
0x1410   : > { %5379 = vrcp.f32 %v4178_v10 }
0x1413   : > { %v4011_v14 = vpop.permute.xlu1 %4010 }
0x1415   : > { %v5376_v13 = vpop.eup %5375 }
0x1416   : > { %v3834_v12 = vmul.f32 %v5376_v13, %v5368_v61 }
0x1418   : > { %4737 = vst.msk [vmem:[%s6654_s12 + $0x8] sm:$0xff] %vm1114_vm2, %v3834_v12  ;;  %5086 = vmatmul.mubr.msk.f32.vlgmr.msra.gmra.mxu1 %vm1114_vm2, %v3834_v12 }
0x1419   : > { %v5378_v16 = vpop.eup %5377  ;;  %5094 = vmatpush3.msra.mxu1 %v4011_v14  ;;  %5095 = vmatprep.mubr.msk.f32.mxu1 %vm5861_vm0, %v5860_v0 }
0x141a   : > { %5103 = vmatprep.subr.mxu1 %v5860_v0  ;;  %v4007_v17 = vmul.f32 %v5378_v16, %v5370_v63 }
0x141c   : > { %4741 = vst.msk [vmem:[%s6654_s12 + $0x10] sm:$0xff] %vm1114_vm2, %v4007_v17  ;;  %5096 = vmatmul.mubr.msk.f32.vlgmr.msra.gmra.mxu1 %vm1114_vm2, %v4007_v17 }
0x141d   : > { %v5380_v18 = vpop.eup %5379  ;;  %5104 = vmatpush3.msra.mxu1 %v4184_v39  ;;  %5105 = vmatprep.mubr.msk.f32.mxu1 %vm5861_vm0, %v5860_v0 }
0x141e   : > { %v4180_v21 = vmul.f32 %v5380_v18, %v5372_v2 }
0x1420   : > { %4745 = vst.msk [vmem:[%s6654_s12 + $0x18] sm:$0xff] %vm1114_vm2, %v4180_v21  ;;  %5106 = vmatmul.mubr.msk.f32.vlgmr.msra.gmra.mxu1 %vm1114_vm2, %v4180_v21 }
0x1465   : > { %v3740_v22 = vpop.f32.mrf.mxu1 }
0x1466   : > { %3744 = vst.msk [vmem:[#allocation2] sm:$0xff] %vm1114_vm2, %v3740_v22 }
0x1467   : > { %v5077_v43 = vpop.f32.mrf.mxu1 }
0x14d8   : > { %v3909_v25 = vpop.f32.mrf.mxu1 }
0x14d9   : > { %3914 = vrot.lane.b32.xlu1 %v3909_v25, %s5865_s19 }
0x14da   : > { %v5087_v50 = vpop.f32.mrf.mxu1 }
0x14dc   : > { %v4082_v26 = vpop.f32.mrf.mxu1 }
0x14dd   : > { %4087 = vrot.lane.b32.xlu0 %v4082_v26, %s5866_s3  ;;  %s4759_s3 = sshll.u32 %s5986_s0, 9 }
0x14de   : > { %v5097_v27 = vpop.f32.mrf.mxu1 }
0x14e0   : > { %v4255_v28 = vpop.f32.mrf.mxu1 }
0x14e1   : > { %4260 = vrot.lane.b32.xlu1 %v4255_v28, %s5867_s27  ;;  %s6873_s27 = sld [smem:[#allocation54_spill]] }
0x14e2   : > { %v5107_v29 = vpop.f32.mrf.mxu1 }
0x14e7   : > { %s6874_s1 = smov %s6873_s27  ;;  %s6690_s9 = scalar_lea.hbm %s6873_s27, %s4759_s3 }
0x154b   : > { %v3915_v30 = vpop.permute.xlu1 %3914 }
0x154c   : > { %3917 = vst.msk [vmem:[#allocation2] sm:$0xff] %vm1450_vm3, %v3915_v30 }
0x154f   : > { %v4088_v0 = vpop.permute.xlu0 %4087 }
0x1550   : > { %4090 = vst.msk [vmem:[#allocation2] sm:$0xff] %vm1623_vm4, %v4088_v0 }
0x1553   : > { %v4261_v31 = vpop.permute.xlu1 %4260 }
0x1554   : > { %4263 = vst.msk [vmem:[#allocation2] sm:$0xff] %vm1796_vm5, %v4261_v31 }
0x155b   : > { %v4264_v33 = vld [vmem:[#allocation2] sm:$0xff] }
0x155c   : > { %v4265_v34 = vpack.c.bf16 %v4264_v33, %v4264_v33 }
0x155e   : > { %5113 = vmatmul.mubr.msk.bf16.vlgmr.msra.gmra.mxu0 %vm811_vm1, %v4265_v34 }
0x155f   : > { %5738 = shalt.err (!%p5735_p4)
}
0x1560   : > { %s5739_s28 = scalar_lea.hbm %s6690_s9, 512  ;;  %s5743_s10 = scalar_lea.hbm %s6874_s1, 1024 }
0x1561   : > { %p5740_p11 = scmp.ne.s32.totalorder %s6690_s9, %s5739_s28  ;;  %p5744_p1 = scmp.lt.s32.totalorder %s6690_s9, %s6874_s1 }
0x1562   : > { %p5745_p2 = scmp.lt.s32.totalorder %s5743_s10, %s5739_s28 }
0x1563   : > { %p5741_p12 = pnand %p5740_p11, %p6875_p3 }
0x1564   : > { %p5746_p6 = por %p5745_p2, %p5744_p1 }
0x1565   : > { %p5742_p13 = pneg %p5741_p12 }
0x1567   : > { %p5747_p7 = pnand %p5746_p6, %p5742_p13 }
0x1569   : > { %5750 = shalt.err (!%p5747_p7)
}
0x156a   : > { %s5873_s16 = smov 128   ;;  %v4751_v36 = vld [vmem:[%s6871_s23 + $0x3] ss:$0 sm:$0xff]  ;;  %s4754_s24 = sshll.u32 %s5986_s0, 7 }
0x156b   : > { %5163 = dma.vmem_to_hbm [thread:$0]  (%p6875_p3), %s6692_s29, 512, %s6690_s9, %s4343_s30, %s5873_s16, %s5873_s16, %s5865_s19  }
0x156c   : > { %s773_s28 = scalar_lea.vmem [#allocation24], %s6231_s20  ;;  %s6876_s22 = sld [smem:[#allocation53_spill]] }
0x156d   : > { %s4356_s12 = sshll.u32 %s773_s28, 4  ;;  %s4338_s0 = scalar_lea.sflag [#allocation5], %s6228_s4  ;;  %s6729_s12 = int_to_ptr.vmem [resolvable:$true] %s4356_s12 }
0x156e   : > { %s5751_s20 = scalar_lea.vmem %s6729_s12, 128  ;;  %s5874_s19 = smov [#allocation24]  }
0x156f   : > { %p5752_p0 = scmp.ne.s32.totalorder %s6729_s12, %s5751_s20  ;;  %s5755_s29 = sshll.u32 %s5874_s19, 4  ;;  %s5756_s29 = int_to_ptr.vmem [resolvable:$false] %s5755_s29 }
0x1570   : > { %s5757_s9 = scalar_lea.vmem %s5756_s29, 256  ;;  %p5758_p5 = scmp.lt.s32.totalorder %s6729_s12, %s5756_s29 }
0x1571   : > { %p5753_p9 = pnand %p5752_p0, %p6875_p3  ;;  %p5759_p10 = scmp.lt.s32.totalorder %s5757_s9, %s5751_s20 }
0x1572   : > { %s6727_s27 = scalar_lea.hbm %s6876_s22, %s4754_s24 }
0x1573   : > { %p5754_p8 = pneg %p5753_p9  ;;  %p5760_p4 = por %p5759_p10, %p5758_p5 }
0x1575   : > { %p5761_p11 = pnand %p5760_p4, %p5754_p8 }
0x161e   : > { %v4320_v35 = vpop.f32.mrf.mxu0 }
0x161f   : > { %v4326_v19 = vadd.f32 %v4320_v35, %v6605_v15 }
0x1620   : > { %v5114_v37 = vpop.f32.mrf.mxu0 }
0x1621   : > { %v4335_v38 = vadd.f32 %v4751_v36, %v4326_v19 }
0x1622   : > { %v4323_v40 = vpop.f32.mrf.mxu0 }
0x1623   : > { %4336 = vst.msk [vmem:[%s773_s28] sm:$0xff] %vm811_vm1, %v4335_v38 }
0x1624   : > { %v5115_v41 = vpop.f32.mrf.mxu0 }
0x1625   : > { %5764 = shalt.err (!%p5761_p11)
}
0x1626   : > { %s5765_s30 = scalar_lea.hbm %s6727_s27, 128  ;;  %s5769_s5 = scalar_lea.hbm %s6876_s22, 256 }
0x1627   : > { %p5766_p12 = scmp.ne.s32.totalorder %s6727_s27, %s5765_s30  ;;  %p5770_p2 = scmp.lt.s32.totalorder %s6727_s27, %s6876_s22 }
0x1628   : > { %p5771_p6 = scmp.lt.s32.totalorder %s5769_s5, %s5765_s30 }
0x1629   : > { %p5767_p13 = pnand %p5766_p12, %p6875_p3 }
0x162a   : > { %p5772_p7 = por %p5771_p6, %p5770_p2 }
0x162b   : > { %p5768_p1 = pneg %p5767_p13 }
0x162d   : > { %p5773_p0 = pnand %p5772_p7, %p5768_p1 }
0x162f   : > { %5776 = shalt.err (!%p5773_p0)
}
0x1630   : > { %5162 = dma.vmem_to_hbm [thread:$0]  (%p6875_p3), %s6729_s12, 128, %s6727_s27, %s4338_s0  }
0x1631 PF: > { %s6877_s28 = sld [smem:[#allocation36_spill]] }
0x1632   : > { %s6878_s3 = sld [smem:[#allocation41_spill]] }
0x1633   : > { %s6879_s10 = sld [smem:[#allocation37_spill]] }
0x1637   : > { %s4384_s20 = sand.u32 1, %s6877_s28  }
0x1638   : > { %p6880_p9 = scmp.ne.s32.totalorder %s6878_s3, 0  ;;  %s4385_s19 = scalar_lea.sflag [#allocation5], %s4384_s20 }
0x1639   : > { %p6881_p8 = scmp.ge.s32.totalorder %s6879_s10, 2 }
0x163b   : > { %p5208_p5 = pnand %p6881_p8, %p6880_p9 }
0x163d   : > { %p5209_p10 = pneg %p5208_p5 }
0x163f   : > { %5822 = dma.done.wait (%p5209_p10), %s4385_s19, 128  }
0x1640   : > { %5824 = vsyncadd (%p5209_p10), %s4385_s19, 4294967168  ;;  %s4394_s29 = scalar_lea.sflag [#allocation26], %s4384_s20 }
0x1641   : > { %5826 = dma.done.wait (%p5209_p10), %s4394_s29, 512  }
0x1642   : > { %5828 = vsyncadd (%p5209_p10), %s4394_s29, 4294966784  ;;  %s6882_s27 = sld [smem:[#allocation38_spill]]  ;;  %s6884_s24 = smov %s5835_s25 }
0x1643   : > { %s6883_s18 = sld [smem:[#allocation39_spill]]  ;;  %s6885_s25 = smov %s5839_s26 }
0x1648   : > { %p42_p3 = scmp.ge.s32.totalorder %s6882_s27, 4  }
0x1649   : > { %s6886_s26 = smov %s6883_s18 }
0x164a   :  { %44 = sbr.rel (!%p42_p3) target bundleno = 28 (0x1c), region = 225 }
0x164f   :  { %4399 = vsyncpa [#allocation4], 1 }
0x1650   :  { %4401 = vsyncpa [#allocation4 + $0x1], 1 }
0x1651   :  { %4402 = vsyncpa [#allocation7], 1 }
0x1652   :  { %4404 = vsyncpa [#allocation7 + $0x1], 1 }
0x1653   :  { %4405 = vsyncpa [#allocation10], 1 }
0x1654   :  { %4406 = vsyncpa [#allocation13], 1 }
0x1655   :  { %4407 = vsyncpa [#allocation16], 1 }
0x1656   :  { %4408 = vsyncpa [#allocation19], 1 }
0x1657   :  { %4409 = vsyncpa [#allocation22], 1 }
0x1658   :  { %4410 = vsyncpa [#allocation5], 1 }
0x1659   :  { %4412 = vsyncpa [#allocation5 + $0x1], 1 }
0x165a   :  { %4413 = vsyncpa [#allocation26], 1 }
0x165b   :  { %4415 = vsyncpa [#allocation26 + $0x1], 1 }

</bundles_post_ra>
